<compile_context>
chip_gen: v7x
topology: tpu7x:2x2x1
jax: 0.10.0
libtpu: 0.0.40
codegen_flags: <defaults>
</compile_context>

<pallas_src>
import functools

import jax
import jax.numpy as jnp
import numpy as np
from jax import lax
from jax.experimental import pallas as pl
from jax.experimental.pallas import tpu as pltpu

EPS = 1e-3


def _round_up(x, m):
    return (x + m - 1) // m * m


def fused_kernel(inv_n, step2, off1, off2,
                 x_ref, mask_ref,
                 g1_ref, b1_ref, w1_ref,
                 g2_ref, b2_ref, w2_ref,
                 g3_ref, b3_ref,
                 o_ref, apad_ref, bpad_ref):
    L, C1 = x_ref.shape
    C2 = o_ref.shape[1]
    mask = mask_ref[...]                      # (L,1): 1.0 at the 144 real pixels

    def bn_relu(y, g_ref, b_ref):
        # Train-mode BatchNorm (batch stats, biased variance) + affine + ReLU.
        # Stats ignore the width-padding columns via the mask; inv_n = 1/(H*W).
        ym = y * mask
        mean = jnp.sum(ym, axis=0, keepdims=True) * inv_n
        ex2 = jnp.sum(ym * ym, axis=0, keepdims=True) * inv_n
        var = ex2 - mean * mean
        scale = g_ref[...] * lax.rsqrt(var + EPS)
        shift = b_ref[...] - mean * scale
        return jnp.maximum(y * scale + shift, 0.0)

    def conv_taps(src, pad_ref, w_ref, step, off, n_out):
        # 1-D conv along one spatial axis as K shifted flat matmuls.
        # `pad_ref` holds `src` at row offset `off` surrounded by zero guard
        # rows, so a tap shift of d spatial steps is the static ref slice
        # pad_ref[off + d*step : off + d*step + L].  The guard rows (and the
        # zeroed width-padding columns inside `src`) supply the conv's zero
        # padding exactly.
        k = w_ref.shape[0]
        half = k // 2
        pad_ref[...] = jnp.zeros_like(pad_ref)          # zero guards
        pad_ref[off:off + L, :] = src                   # aligned center store
        acc = jnp.zeros((L, n_out), jnp.float32)
        for t in range(k):                              # static tap loop
            start = off + (t - half) * step             # static python int
            tap = pad_ref[start:start + L, :].astype(jnp.bfloat16)
            acc = acc + jnp.dot(tap, w_ref[t],
                                preferred_element_type=jnp.float32)
        return acc

    # ---- BatchNorm2d(160) + ReLU; re-zero padding columns afterwards --------
    a = bn_relu(x_ref[...], g1_ref, b1_ref) * mask                  # (L, C1)
    # ---- Conv2d 160->160, kernel (1,7), pad (0,3), no bias ------------------
    acc1 = conv_taps(a, apad_ref, w1_ref, 1, off1, C1)              # (L, C1)
    # ---- BatchNorm2d(160) + ReLU ---------------------------------------------
    b = bn_relu(acc1, g2_ref, b2_ref)
    # ---- Conv2d 160->192, kernel (7,1), pad (3,0), no bias -------------------
    acc2 = conv_taps(b, bpad_ref, w2_ref, step2, off2, C2)          # (L, C2)
    # ---- BatchNorm2d(192) + ReLU ---------------------------------------------
    o_ref[...] = bn_relu(acc2, g3_ref, b3_ref)


def module_forward(x_nchw, params):
    """x_nchw: (1, 160, H, W) float32 -> (1, 192, H, W) float32."""
    N, C1, H, W = x_nchw.shape
    assert N == 1, "kernel assumes batch size 1 (as in the reference module)"
    PAD = 3
    Wp = W + 2 * PAD              # padded width == flat row stride of a height step
    L = H * Wp
    w1, w2 = params["w1"], params["w2"]   # (160,160,1,7), (192,160,7,1)
    C2 = w2.shape[0]
    KW, KH = w1.shape[3], w2.shape[2]
    assert KW == 2 * PAD + 1 and KH == 2 * PAD + 1

    # channels-last, width zero-padding materialized, flat spatial (XLA glue)
    x_hwc = jnp.transpose(x_nchw[0], (1, 2, 0))                    # (H, W, C1)
    x_pad = jnp.pad(x_hwc, ((0, 0), (PAD, PAD), (0, 0)))           # (H, Wp, C1)
    x_flat = x_pad.reshape(L, C1)

    # validity mask over the flat rows (1.0 at real pixels, 0.0 at pad columns)
    col = jnp.arange(Wp, dtype=jnp.int32)
    colmask = ((col >= PAD) & (col < PAD + W)).astype(jnp.float32)
    mask = jnp.broadcast_to(colmask[None, :], (H, Wp)).reshape(L, 1)

    # conv weights -> (tap, Cin, Cout), bf16 operands for the MXU
    w1k = jnp.transpose(w1[:, :, 0, :], (2, 1, 0)).astype(jnp.bfloat16)  # (7,C1,C1)
    w2k = jnp.transpose(w2[:, :, :, 0], (2, 1, 0)).astype(jnp.bfloat16)  # (7,C1,C2)

    g1 = params["g1"].reshape(1, C1); b1 = params["b1"].reshape(1, C1)
    g2 = params["g2"].reshape(1, C1); b2 = params["b2"].reshape(1, C1)
    g3 = params["g3"].reshape(1, C2); b3 = params["b3"].reshape(1, C2)

    off1 = 8                            # aligned store offset, guard >= PAD rows
    off2 = _round_up(PAD * Wp, 8)       # aligned, guard >= PAD*Wp rows (height conv)

    flops = 2 * H * W * C1 * (C1 * KW + C2 * KH)
    bytes_accessed = int(x_flat.size * 4 + mask.size * 4 + w1k.size * 2
                         + w2k.size * 2 + (4 * C1 + 2 * C2) * 4 + L * C2 * 4)

    vmem = pl.BlockSpec(memory_space=pltpu.MemorySpace.VMEM)
    out_flat = pl.pallas_call(
        functools.partial(fused_kernel, 1.0 / (H * W), Wp, off1, off2),
        out_shape=jax.ShapeDtypeStruct((L, C2), jnp.float32),
        in_specs=[vmem] * 10,
        out_specs=vmem,
        scratch_shapes=[pltpu.VMEM((off1 + L + off1, C1), jnp.float32),
                        pltpu.VMEM((off2 + L + off2, C1), jnp.float32)],
        compiler_params=pltpu.CompilerParams(vmem_limit_bytes=32 * 1024 * 1024),
        cost_estimate=pl.CostEstimate(flops=flops,
                                      transcendentals=2 * C1 + C2,
                                      bytes_accessed=bytes_accessed),
    )(x_flat, mask, g1, b1, w1k, g2, b2, w2k, g3, b3)

    out = out_flat.reshape(H, Wp, C2)[:, PAD:PAD + W, :]           # drop pad columns
    return jnp.transpose(out, (2, 0, 1))[None]


def reference_forward(x, params, matmul_dtype=jnp.float32):
    """Pure-JAX reference (train-mode BN semantics), NCHW.

    matmul_dtype=bfloat16 mimics the kernel's MXU precision (bf16 operands,
    f32 accumulation); float32 gives the full-precision reference.
    """
    def bn_relu(y, g, b):
        m = jnp.mean(y, axis=(0, 2, 3), keepdims=True)
        v = jnp.mean((y - m) ** 2, axis=(0, 2, 3), keepdims=True)
        yhat = (y - m) * lax.rsqrt(v + EPS)
        return jnp.maximum(yhat * g.reshape(1, -1, 1, 1) + b.reshape(1, -1, 1, 1), 0.0)

    prec = lax.Precision.HIGHEST if matmul_dtype == jnp.float32 else None

    def conv(y, w, pad):
        return lax.conv_general_dilated(
            y.astype(matmul_dtype), w.astype(matmul_dtype), (1, 1), pad,
            dimension_numbers=("NCHW", "OIHW", "NCHW"),
            preferred_element_type=jnp.float32, precision=prec)

    y = bn_relu(x, params["g1"], params["b1"])
    y = conv(y, params["w1"], ((0, 0), (3, 3)))
    y = bn_relu(y, params["g2"], params["b2"])
    y = conv(y, params["w2"], ((3, 3), (0, 0)))
    y = bn_relu(y, params["g3"], params["b3"])
    return y


if __name__ == "__main__":
    key = jax.random.PRNGKey(0)
    ks = jax.random.split(key, 9)

    # Shapes implied by the module: x (1,160,12,12), conv weights per __init__.
    x = jax.random.normal(ks[0], (1, 160, 12, 12), jnp.float32)
    params = {
        "w1": jax.random.normal(ks[1], (160, 160, 1, 7), jnp.float32) * 0.05,
        "w2": jax.random.normal(ks[2], (192, 160, 7, 1), jnp.float32) * 0.05,
        "g1": 1.0 + 0.1 * jax.random.normal(ks[3], (160,), jnp.float32),
        "b1": 0.1 * jax.random.normal(ks[4], (160,), jnp.float32),
        "g2": 1.0 + 0.1 * jax.random.normal(ks[5], (160,), jnp.float32),
        "b2": 0.1 * jax.random.normal(ks[6], (160,), jnp.float32),
        "g3": 1.0 + 0.1 * jax.random.normal(ks[7], (192,), jnp.float32),
        "b3": 0.1 * jax.random.normal(ks[8], (192,), jnp.float32),
    }

    fwd = jax.jit(module_forward)
    out = jax.block_until_ready(fwd(x, params))
    assert out.shape == (1, 192, 12, 12), out.shape

    # 1) Tight check against a reference matching the kernel's MXU precision
    #    (bf16 operands, f32 accumulation) -- validates the conv/BN logic.
    ref_bf16 = jax.block_until_ready(reference_forward(x, params, jnp.bfloat16))
    np.testing.assert_allclose(np.asarray(out), np.asarray(ref_bf16),
                               rtol=5e-3, atol=5e-3)

    # 2) Loose sanity check against the full-f32 reference (bounds bf16-MXU
    #    rounding noise; BN after each conv renormalizes it).
    ref_f32 = jax.block_until_ready(reference_forward(x, params, jnp.float32))
    np.testing.assert_allclose(np.asarray(out), np.asarray(ref_f32),
                               rtol=5e-2, atol=5e-2)

    print("KERNEL_OK")
</pallas_src>

<mosaic_0001>
module attributes {stable_mosaic.version = 11 : i64} {
  func.func @fused_kernel(%arg0: memref<216x160xf32, #tpu.memory_space<vmem>>, %arg1: memref<216x1xf32, #tpu.memory_space<vmem>>, %arg2: memref<1x160xf32, #tpu.memory_space<vmem>>, %arg3: memref<1x160xf32, #tpu.memory_space<vmem>>, %arg4: memref<7x160x160xbf16, #tpu.memory_space<vmem>>, %arg5: memref<1x160xf32, #tpu.memory_space<vmem>>, %arg6: memref<1x160xf32, #tpu.memory_space<vmem>>, %arg7: memref<7x160x192xbf16, #tpu.memory_space<vmem>>, %arg8: memref<1x192xf32, #tpu.memory_space<vmem>>, %arg9: memref<1x192xf32, #tpu.memory_space<vmem>>, %arg10: memref<216x192xf32, #tpu.memory_space<vmem>>, %arg11: memref<232x160xf32, #tpu.memory_space<vmem>>, %arg12: memref<328x160xf32, #tpu.memory_space<vmem>>) attributes {dimension_semantics = [], scalar_prefetch = 0 : i64, scratch_operands = 2 : i64, tpu.core_type = #tpu.core_type<tc>} {
    %c0 = arith.constant 0 : index
    %c0_0 = arith.constant 0 : index
    %0 = vector.load %arg1[%c0, %c0_0] : memref<216x1xf32, #tpu.memory_space<vmem>>, vector<216x1xf32>
    %c0_1 = arith.constant 0 : index
    %c0_2 = arith.constant 0 : index
    %1 = vector.load %arg0[%c0_1, %c0_2] : memref<216x160xf32, #tpu.memory_space<vmem>>, vector<216x160xf32>
    %2 = vector.broadcast %0 : vector<216x1xf32> to vector<216x160xf32>
    %3 = arith.mulf %1, %2 : vector<216x160xf32>
    %cst = arith.constant dense<0.000000e+00> : vector<160xf32>
    %4 = vector.multi_reduction <add>, %3, %cst [0] : vector<216x160xf32> to vector<160xf32>
    %5 = vector.shape_cast %4 : vector<160xf32> to vector<1x160xf32>
    %cst_3 = arith.constant 0.0069444445 : f32
    %6 = vector.broadcast %cst_3 : f32 to vector<1x160xf32>
    %7 = arith.mulf %5, %6 : vector<1x160xf32>
    %8 = arith.mulf %3, %3 : vector<216x160xf32>
    %cst_4 = arith.constant dense<0.000000e+00> : vector<160xf32>
    %9 = vector.multi_reduction <add>, %8, %cst_4 [0] : vector<216x160xf32> to vector<160xf32>
    %10 = vector.shape_cast %9 : vector<160xf32> to vector<1x160xf32>
    %cst_5 = arith.constant 0.0069444445 : f32
    %11 = vector.broadcast %cst_5 : f32 to vector<1x160xf32>
    %12 = arith.mulf %10, %11 : vector<1x160xf32>
    %13 = arith.mulf %7, %7 : vector<1x160xf32>
    %14 = arith.subf %12, %13 : vector<1x160xf32>
    %c0_6 = arith.constant 0 : index
    %c0_7 = arith.constant 0 : index
    %15 = vector.load %arg2[%c0_6, %c0_7] : memref<1x160xf32, #tpu.memory_space<vmem>>, vector<1x160xf32>
    %cst_8 = arith.constant 1.000000e-03 : f32
    %16 = vector.broadcast %cst_8 : f32 to vector<1x160xf32>
    %17 = arith.addf %14, %16 : vector<1x160xf32>
    %18 = math.rsqrt %17 : vector<1x160xf32>
    %19 = arith.mulf %15, %18 : vector<1x160xf32>
    %c0_9 = arith.constant 0 : index
    %c0_10 = arith.constant 0 : index
    %20 = vector.load %arg3[%c0_9, %c0_10] : memref<1x160xf32, #tpu.memory_space<vmem>>, vector<1x160xf32>
    %21 = arith.mulf %7, %19 : vector<1x160xf32>
    %22 = arith.subf %20, %21 : vector<1x160xf32>
    %23 = vector.broadcast %19 : vector<1x160xf32> to vector<216x160xf32>
    %24 = arith.mulf %1, %23 : vector<216x160xf32>
    %25 = vector.broadcast %22 : vector<1x160xf32> to vector<216x160xf32>
    %26 = arith.addf %24, %25 : vector<216x160xf32>
    %cst_11 = arith.constant 0.000000e+00 : f32
    %27 = vector.broadcast %cst_11 : f32 to vector<216x160xf32>
    %28 = arith.maximumf %26, %27 : vector<216x160xf32>
    %29 = vector.broadcast %0 : vector<216x1xf32> to vector<216x160xf32>
    %30 = arith.mulf %28, %29 : vector<216x160xf32>
    %cst_12 = arith.constant 0.000000e+00 : f32
    %31 = vector.broadcast %cst_12 : f32 to vector<232x160xf32>
    %c0_13 = arith.constant 0 : index
    %c0_14 = arith.constant 0 : index
    %32 = vector.load %arg11[%c0_13, %c0_14] : memref<232x160xf32, #tpu.memory_space<vmem>>, vector<232x160xf32>
    tpu.vector_store %arg11[%c0_13, %c0_14], %31 {strides = array<i32>} : memref<232x160xf32, #tpu.memory_space<vmem>>, vector<232x160xf32>,
    %c8 = arith.constant 8 : index
    %c0_15 = arith.constant 0 : index
    %33 = vector.load %arg11[%c8, %c0_15] : memref<232x160xf32, #tpu.memory_space<vmem>>, vector<216x160xf32>
    tpu.vector_store %arg11[%c8, %c0_15], %30 {strides = array<i32>} : memref<232x160xf32, #tpu.memory_space<vmem>>, vector<216x160xf32>,
    %cst_16 = arith.constant 0.000000e+00 : f32
    %34 = vector.broadcast %cst_16 : f32 to vector<216x160xf32>
    %c5 = arith.constant 5 : index
    %c0_17 = arith.constant 0 : index
    %35 = vector.load %arg11[%c5, %c0_17] : memref<232x160xf32, #tpu.memory_space<vmem>>, vector<216x160xf32>
    %36 = arith.truncf %35 : vector<216x160xf32> to vector<216x160xbf16>
    %c0_18 = arith.constant 0 : index
    %c0_19 = arith.constant 0 : index
    %c0_20 = arith.constant 0 : index
    %37 = vector.load %arg4[%c0_18, %c0_19, %c0_20] : memref<7x160x160xbf16, #tpu.memory_space<vmem>>, vector<1x160x160xbf16>
    %38 = vector.shape_cast %37 : vector<1x160x160xbf16> to vector<160x160xbf16>
    %cst_21 = arith.constant dense<0.000000e+00> : vector<216x160xf32>
    %39 = tpu.matmul %36, %38, %cst_21 {dimension_numbers = #tpu.dot_dimension_numbers<[1], [0], [0], [1], [0, 0, 1, 1], [], []>} : vector<216x160xbf16>, vector<160x160xbf16>, vector<216x160xf32> -> vector<216x160xf32>
    %40 = arith.addf %34, %39 : vector<216x160xf32>
    %c6 = arith.constant 6 : index
    %c0_22 = arith.constant 0 : index
    %41 = vector.load %arg11[%c6, %c0_22] : memref<232x160xf32, #tpu.memory_space<vmem>>, vector<216x160xf32>
    %42 = arith.truncf %41 : vector<216x160xf32> to vector<216x160xbf16>
    %c1 = arith.constant 1 : index
    %c0_23 = arith.constant 0 : index
    %c0_24 = arith.constant 0 : index
    %43 = vector.load %arg4[%c1, %c0_23, %c0_24] : memref<7x160x160xbf16, #tpu.memory_space<vmem>>, vector<1x160x160xbf16>
    %44 = vector.shape_cast %43 : vector<1x160x160xbf16> to vector<160x160xbf16>
    %cst_25 = arith.constant dense<0.000000e+00> : vector<216x160xf32>
    %45 = tpu.matmul %42, %44, %cst_25 {dimension_numbers = #tpu.dot_dimension_numbers<[1], [0], [0], [1], [0, 0, 1, 1], [], []>} : vector<216x160xbf16>, vector<160x160xbf16>, vector<216x160xf32> -> vector<216x160xf32>
    %46 = arith.addf %40, %45 : vector<216x160xf32>
    %c7 = arith.constant 7 : index
    %c0_26 = arith.constant 0 : index
    %47 = vector.load %arg11[%c7, %c0_26] : memref<232x160xf32, #tpu.memory_space<vmem>>, vector<216x160xf32>
    %48 = arith.truncf %47 : vector<216x160xf32> to vector<216x160xbf16>
    %c2 = arith.constant 2 : index
    %c0_27 = arith.constant 0 : index
    %c0_28 = arith.constant 0 : index
    %49 = vector.load %arg4[%c2, %c0_27, %c0_28] : memref<7x160x160xbf16, #tpu.memory_space<vmem>>, vector<1x160x160xbf16>
    %50 = vector.shape_cast %49 : vector<1x160x160xbf16> to vector<160x160xbf16>
    %cst_29 = arith.constant dense<0.000000e+00> : vector<216x160xf32>
    %51 = tpu.matmul %48, %50, %cst_29 {dimension_numbers = #tpu.dot_dimension_numbers<[1], [0], [0], [1], [0, 0, 1, 1], [], []>} : vector<216x160xbf16>, vector<160x160xbf16>, vector<216x160xf32> -> vector<216x160xf32>
    %52 = arith.addf %46, %51 : vector<216x160xf32>
    %c8_30 = arith.constant 8 : index
    %c0_31 = arith.constant 0 : index
    %53 = vector.load %arg11[%c8_30, %c0_31] : memref<232x160xf32, #tpu.memory_space<vmem>>, vector<216x160xf32>
    %54 = arith.truncf %53 : vector<216x160xf32> to vector<216x160xbf16>
    %c3 = arith.constant 3 : index
    %c0_32 = arith.constant 0 : index
    %c0_33 = arith.constant 0 : index
    %55 = vector.load %arg4[%c3, %c0_32, %c0_33] : memref<7x160x160xbf16, #tpu.memory_space<vmem>>, vector<1x160x160xbf16>
    %56 = vector.shape_cast %55 : vector<1x160x160xbf16> to vector<160x160xbf16>
    %cst_34 = arith.constant dense<0.000000e+00> : vector<216x160xf32>
    %57 = tpu.matmul %54, %56, %cst_34 {dimension_numbers = #tpu.dot_dimension_numbers<[1], [0], [0], [1], [0, 0, 1, 1], [], []>} : vector<216x160xbf16>, vector<160x160xbf16>, vector<216x160xf32> -> vector<216x160xf32>
    %58 = arith.addf %52, %57 : vector<216x160xf32>
    %c9 = arith.constant 9 : index
    %c0_35 = arith.constant 0 : index
    %59 = vector.load %arg11[%c9, %c0_35] : memref<232x160xf32, #tpu.memory_space<vmem>>, vector<216x160xf32>
    %60 = arith.truncf %59 : vector<216x160xf32> to vector<216x160xbf16>
    %c4 = arith.constant 4 : index
    %c0_36 = arith.constant 0 : index
    %c0_37 = arith.constant 0 : index
    %61 = vector.load %arg4[%c4, %c0_36, %c0_37] : memref<7x160x160xbf16, #tpu.memory_space<vmem>>, vector<1x160x160xbf16>
    %62 = vector.shape_cast %61 : vector<1x160x160xbf16> to vector<160x160xbf16>
    %cst_38 = arith.constant dense<0.000000e+00> : vector<216x160xf32>
    %63 = tpu.matmul %60, %62, %cst_38 {dimension_numbers = #tpu.dot_dimension_numbers<[1], [0], [0], [1], [0, 0, 1, 1], [], []>} : vector<216x160xbf16>, vector<160x160xbf16>, vector<216x160xf32> -> vector<216x160xf32>
    %64 = arith.addf %58, %63 : vector<216x160xf32>
    %c10 = arith.constant 10 : index
    %c0_39 = arith.constant 0 : index
    %65 = vector.load %arg11[%c10, %c0_39] : memref<232x160xf32, #tpu.memory_space<vmem>>, vector<216x160xf32>
    %66 = arith.truncf %65 : vector<216x160xf32> to vector<216x160xbf16>
    %c5_40 = arith.constant 5 : index
    %c0_41 = arith.constant 0 : index
    %c0_42 = arith.constant 0 : index
    %67 = vector.load %arg4[%c5_40, %c0_41, %c0_42] : memref<7x160x160xbf16, #tpu.memory_space<vmem>>, vector<1x160x160xbf16>
    %68 = vector.shape_cast %67 : vector<1x160x160xbf16> to vector<160x160xbf16>
    %cst_43 = arith.constant dense<0.000000e+00> : vector<216x160xf32>
    %69 = tpu.matmul %66, %68, %cst_43 {dimension_numbers = #tpu.dot_dimension_numbers<[1], [0], [0], [1], [0, 0, 1, 1], [], []>} : vector<216x160xbf16>, vector<160x160xbf16>, vector<216x160xf32> -> vector<216x160xf32>
    %70 = arith.addf %64, %69 : vector<216x160xf32>
    %c11 = arith.constant 11 : index
    %c0_44 = arith.constant 0 : index
    %71 = vector.load %arg11[%c11, %c0_44] : memref<232x160xf32, #tpu.memory_space<vmem>>, vector<216x160xf32>
    %72 = arith.truncf %71 : vector<216x160xf32> to vector<216x160xbf16>
    %c6_45 = arith.constant 6 : index
    %c0_46 = arith.constant 0 : index
    %c0_47 = arith.constant 0 : index
    %73 = vector.load %arg4[%c6_45, %c0_46, %c0_47] : memref<7x160x160xbf16, #tpu.memory_space<vmem>>, vector<1x160x160xbf16>
    %74 = vector.shape_cast %73 : vector<1x160x160xbf16> to vector<160x160xbf16>
    %cst_48 = arith.constant dense<0.000000e+00> : vector<216x160xf32>
    %75 = tpu.matmul %72, %74, %cst_48 {dimension_numbers = #tpu.dot_dimension_numbers<[1], [0], [0], [1], [0, 0, 1, 1], [], []>} : vector<216x160xbf16>, vector<160x160xbf16>, vector<216x160xf32> -> vector<216x160xf32>
    %76 = arith.addf %70, %75 : vector<216x160xf32>
    %77 = vector.broadcast %0 : vector<216x1xf32> to vector<216x160xf32>
    %78 = arith.mulf %76, %77 : vector<216x160xf32>
    %cst_49 = arith.constant dense<0.000000e+00> : vector<160xf32>
    %79 = vector.multi_reduction <add>, %78, %cst_49 [0] : vector<216x160xf32> to vector<160xf32>
    %80 = vector.shape_cast %79 : vector<160xf32> to vector<1x160xf32>
    %cst_50 = arith.constant 0.0069444445 : f32
    %81 = vector.broadcast %cst_50 : f32 to vector<1x160xf32>
    %82 = arith.mulf %80, %81 : vector<1x160xf32>
    %83 = arith.mulf %78, %78 : vector<216x160xf32>
    %cst_51 = arith.constant dense<0.000000e+00> : vector<160xf32>
    %84 = vector.multi_reduction <add>, %83, %cst_51 [0] : vector<216x160xf32> to vector<160xf32>
    %85 = vector.shape_cast %84 : vector<160xf32> to vector<1x160xf32>
    %cst_52 = arith.constant 0.0069444445 : f32
    %86 = vector.broadcast %cst_52 : f32 to vector<1x160xf32>
    %87 = arith.mulf %85, %86 : vector<1x160xf32>
    %88 = arith.mulf %82, %82 : vector<1x160xf32>
    %89 = arith.subf %87, %88 : vector<1x160xf32>
    %c0_53 = arith.constant 0 : index
    %c0_54 = arith.constant 0 : index
    %90 = vector.load %arg5[%c0_53, %c0_54] : memref<1x160xf32, #tpu.memory_space<vmem>>, vector<1x160xf32>
    %cst_55 = arith.constant 1.000000e-03 : f32
    %91 = vector.broadcast %cst_55 : f32 to vector<1x160xf32>
    %92 = arith.addf %89, %91 : vector<1x160xf32>
    %93 = math.rsqrt %92 : vector<1x160xf32>
    %94 = arith.mulf %90, %93 : vector<1x160xf32>
    %c0_56 = arith.constant 0 : index
    %c0_57 = arith.constant 0 : index
    %95 = vector.load %arg6[%c0_56, %c0_57] : memref<1x160xf32, #tpu.memory_space<vmem>>, vector<1x160xf32>
    %96 = arith.mulf %82, %94 : vector<1x160xf32>
    %97 = arith.subf %95, %96 : vector<1x160xf32>
    %98 = vector.broadcast %94 : vector<1x160xf32> to vector<216x160xf32>
    %99 = arith.mulf %76, %98 : vector<216x160xf32>
    %100 = vector.broadcast %97 : vector<1x160xf32> to vector<216x160xf32>
    %101 = arith.addf %99, %100 : vector<216x160xf32>
    %cst_58 = arith.constant 0.000000e+00 : f32
    %102 = vector.broadcast %cst_58 : f32 to vector<216x160xf32>
    %103 = arith.maximumf %101, %102 : vector<216x160xf32>
    %cst_59 = arith.constant 0.000000e+00 : f32
    %104 = vector.broadcast %cst_59 : f32 to vector<328x160xf32>
    %c0_60 = arith.constant 0 : index
    %c0_61 = arith.constant 0 : index
    %105 = vector.load %arg12[%c0_60, %c0_61] : memref<328x160xf32, #tpu.memory_space<vmem>>, vector<328x160xf32>
    tpu.vector_store %arg12[%c0_60, %c0_61], %104 {strides = array<i32>} : memref<328x160xf32, #tpu.memory_space<vmem>>, vector<328x160xf32>,
    %c56 = arith.constant 56 : index
    %c0_62 = arith.constant 0 : index
    %106 = vector.load %arg12[%c56, %c0_62] : memref<328x160xf32, #tpu.memory_space<vmem>>, vector<216x160xf32>
    tpu.vector_store %arg12[%c56, %c0_62], %103 {strides = array<i32>} : memref<328x160xf32, #tpu.memory_space<vmem>>, vector<216x160xf32>,
    %cst_63 = arith.constant 0.000000e+00 : f32
    %107 = vector.broadcast %cst_63 : f32 to vector<216x192xf32>
    %c2_64 = arith.constant 2 : index
    %c0_65 = arith.constant 0 : index
    %108 = vector.load %arg12[%c2_64, %c0_65] : memref<328x160xf32, #tpu.memory_space<vmem>>, vector<216x160xf32>
    %109 = arith.truncf %108 : vector<216x160xf32> to vector<216x160xbf16>
    %c0_66 = arith.constant 0 : index
    %c0_67 = arith.constant 0 : index
    %c0_68 = arith.constant 0 : index
    %110 = vector.load %arg7[%c0_66, %c0_67, %c0_68] : memref<7x160x192xbf16, #tpu.memory_space<vmem>>, vector<1x160x192xbf16>
    %111 = vector.shape_cast %110 : vector<1x160x192xbf16> to vector<160x192xbf16>
    %cst_69 = arith.constant dense<0.000000e+00> : vector<216x192xf32>
    %112 = tpu.matmul %109, %111, %cst_69 {dimension_numbers = #tpu.dot_dimension_numbers<[1], [0], [0], [1], [0, 0, 1, 1], [], []>} : vector<216x160xbf16>, vector<160x192xbf16>, vector<216x192xf32> -> vector<216x192xf32>
    %113 = arith.addf %107, %112 : vector<216x192xf32>
    %c20 = arith.constant 20 : index
    %c0_70 = arith.constant 0 : index
    %114 = vector.load %arg12[%c20, %c0_70] : memref<328x160xf32, #tpu.memory_space<vmem>>, vector<216x160xf32>
    %115 = arith.truncf %114 : vector<216x160xf32> to vector<216x160xbf16>
    %c1_71 = arith.constant 1 : index
    %c0_72 = arith.constant 0 : index
    %c0_73 = arith.constant 0 : index
    %116 = vector.load %arg7[%c1_71, %c0_72, %c0_73] : memref<7x160x192xbf16, #tpu.memory_space<vmem>>, vector<1x160x192xbf16>
    %117 = vector.shape_cast %116 : vector<1x160x192xbf16> to vector<160x192xbf16>
    %cst_74 = arith.constant dense<0.000000e+00> : vector<216x192xf32>
    %118 = tpu.matmul %115, %117, %cst_74 {dimension_numbers = #tpu.dot_dimension_numbers<[1], [0], [0], [1], [0, 0, 1, 1], [], []>} : vector<216x160xbf16>, vector<160x192xbf16>, vector<216x192xf32> -> vector<216x192xf32>
    %119 = arith.addf %113, %118 : vector<216x192xf32>
    %c38 = arith.constant 38 : index
    %c0_75 = arith.constant 0 : index
    %120 = vector.load %arg12[%c38, %c0_75] : memref<328x160xf32, #tpu.memory_space<vmem>>, vector<216x160xf32>
    %121 = arith.truncf %120 : vector<216x160xf32> to vector<216x160xbf16>
    %c2_76 = arith.constant 2 : index
    %c0_77 = arith.constant 0 : index
    %c0_78 = arith.constant 0 : index
    %122 = vector.load %arg7[%c2_76, %c0_77, %c0_78] : memref<7x160x192xbf16, #tpu.memory_space<vmem>>, vector<1x160x192xbf16>
    %123 = vector.shape_cast %122 : vector<1x160x192xbf16> to vector<160x192xbf16>
    %cst_79 = arith.constant dense<0.000000e+00> : vector<216x192xf32>
    %124 = tpu.matmul %121, %123, %cst_79 {dimension_numbers = #tpu.dot_dimension_numbers<[1], [0], [0], [1], [0, 0, 1, 1], [], []>} : vector<216x160xbf16>, vector<160x192xbf16>, vector<216x192xf32> -> vector<216x192xf32>
    %125 = arith.addf %119, %124 : vector<216x192xf32>
    %c56_80 = arith.constant 56 : index
    %c0_81 = arith.constant 0 : index
    %126 = vector.load %arg12[%c56_80, %c0_81] : memref<328x160xf32, #tpu.memory_space<vmem>>, vector<216x160xf32>
    %127 = arith.truncf %126 : vector<216x160xf32> to vector<216x160xbf16>
    %c3_82 = arith.constant 3 : index
    %c0_83 = arith.constant 0 : index
    %c0_84 = arith.constant 0 : index
    %128 = vector.load %arg7[%c3_82, %c0_83, %c0_84] : memref<7x160x192xbf16, #tpu.memory_space<vmem>>, vector<1x160x192xbf16>
    %129 = vector.shape_cast %128 : vector<1x160x192xbf16> to vector<160x192xbf16>
    %cst_85 = arith.constant dense<0.000000e+00> : vector<216x192xf32>
    %130 = tpu.matmul %127, %129, %cst_85 {dimension_numbers = #tpu.dot_dimension_numbers<[1], [0], [0], [1], [0, 0, 1, 1], [], []>} : vector<216x160xbf16>, vector<160x192xbf16>, vector<216x192xf32> -> vector<216x192xf32>
    %131 = arith.addf %125, %130 : vector<216x192xf32>
    %c74 = arith.constant 74 : index
    %c0_86 = arith.constant 0 : index
    %132 = vector.load %arg12[%c74, %c0_86] : memref<328x160xf32, #tpu.memory_space<vmem>>, vector<216x160xf32>
    %133 = arith.truncf %132 : vector<216x160xf32> to vector<216x160xbf16>
    %c4_87 = arith.constant 4 : index
    %c0_88 = arith.constant 0 : index
    %c0_89 = arith.constant 0 : index
    %134 = vector.load %arg7[%c4_87, %c0_88, %c0_89] : memref<7x160x192xbf16, #tpu.memory_space<vmem>>, vector<1x160x192xbf16>
    %135 = vector.shape_cast %134 : vector<1x160x192xbf16> to vector<160x192xbf16>
    %cst_90 = arith.constant dense<0.000000e+00> : vector<216x192xf32>
    %136 = tpu.matmul %133, %135, %cst_90 {dimension_numbers = #tpu.dot_dimension_numbers<[1], [0], [0], [1], [0, 0, 1, 1], [], []>} : vector<216x160xbf16>, vector<160x192xbf16>, vector<216x192xf32> -> vector<216x192xf32>
    %137 = arith.addf %131, %136 : vector<216x192xf32>
    %c92 = arith.constant 92 : index
    %c0_91 = arith.constant 0 : index
    %138 = vector.load %arg12[%c92, %c0_91] : memref<328x160xf32, #tpu.memory_space<vmem>>, vector<216x160xf32>
    %139 = arith.truncf %138 : vector<216x160xf32> to vector<216x160xbf16>
    %c5_92 = arith.constant 5 : index
    %c0_93 = arith.constant 0 : index
    %c0_94 = arith.constant 0 : index
    %140 = vector.load %arg7[%c5_92, %c0_93, %c0_94] : memref<7x160x192xbf16, #tpu.memory_space<vmem>>, vector<1x160x192xbf16>
    %141 = vector.shape_cast %140 : vector<1x160x192xbf16> to vector<160x192xbf16>
    %cst_95 = arith.constant dense<0.000000e+00> : vector<216x192xf32>
    %142 = tpu.matmul %139, %141, %cst_95 {dimension_numbers = #tpu.dot_dimension_numbers<[1], [0], [0], [1], [0, 0, 1, 1], [], []>} : vector<216x160xbf16>, vector<160x192xbf16>, vector<216x192xf32> -> vector<216x192xf32>
    %143 = arith.addf %137, %142 : vector<216x192xf32>
    %c110 = arith.constant 110 : index
    %c0_96 = arith.constant 0 : index
    %144 = vector.load %arg12[%c110, %c0_96] : memref<328x160xf32, #tpu.memory_space<vmem>>, vector<216x160xf32>
    %145 = arith.truncf %144 : vector<216x160xf32> to vector<216x160xbf16>
    %c6_97 = arith.constant 6 : index
    %c0_98 = arith.constant 0 : index
    %c0_99 = arith.constant 0 : index
    %146 = vector.load %arg7[%c6_97, %c0_98, %c0_99] : memref<7x160x192xbf16, #tpu.memory_space<vmem>>, vector<1x160x192xbf16>
    %147 = vector.shape_cast %146 : vector<1x160x192xbf16> to vector<160x192xbf16>
    %cst_100 = arith.constant dense<0.000000e+00> : vector<216x192xf32>
    %148 = tpu.matmul %145, %147, %cst_100 {dimension_numbers = #tpu.dot_dimension_numbers<[1], [0], [0], [1], [0, 0, 1, 1], [], []>} : vector<216x160xbf16>, vector<160x192xbf16>, vector<216x192xf32> -> vector<216x192xf32>
    %149 = arith.addf %143, %148 : vector<216x192xf32>
    %150 = vector.broadcast %0 : vector<216x1xf32> to vector<216x192xf32>
    %151 = arith.mulf %149, %150 : vector<216x192xf32>
    %cst_101 = arith.constant dense<0.000000e+00> : vector<192xf32>
    %152 = vector.multi_reduction <add>, %151, %cst_101 [0] : vector<216x192xf32> to vector<192xf32>
    %153 = vector.shape_cast %152 : vector<192xf32> to vector<1x192xf32>
    %cst_102 = arith.constant 0.0069444445 : f32
    %154 = vector.broadcast %cst_102 : f32 to vector<1x192xf32>
    %155 = arith.mulf %153, %154 : vector<1x192xf32>
    %156 = arith.mulf %151, %151 : vector<216x192xf32>
    %cst_103 = arith.constant dense<0.000000e+00> : vector<192xf32>
    %157 = vector.multi_reduction <add>, %156, %cst_103 [0] : vector<216x192xf32> to vector<192xf32>
    %158 = vector.shape_cast %157 : vector<192xf32> to vector<1x192xf32>
    %cst_104 = arith.constant 0.0069444445 : f32
    %159 = vector.broadcast %cst_104 : f32 to vector<1x192xf32>
    %160 = arith.mulf %158, %159 : vector<1x192xf32>
    %161 = arith.mulf %155, %155 : vector<1x192xf32>
    %162 = arith.subf %160, %161 : vector<1x192xf32>
    %c0_105 = arith.constant 0 : index
    %c0_106 = arith.constant 0 : index
    %163 = vector.load %arg8[%c0_105, %c0_106] : memref<1x192xf32, #tpu.memory_space<vmem>>, vector<1x192xf32>
    %cst_107 = arith.constant 1.000000e-03 : f32
    %164 = vector.broadcast %cst_107 : f32 to vector<1x192xf32>
    %165 = arith.addf %162, %164 : vector<1x192xf32>
    %166 = math.rsqrt %165 : vector<1x192xf32>
    %167 = arith.mulf %163, %166 : vector<1x192xf32>
    %c0_108 = arith.constant 0 : index
    %c0_109 = arith.constant 0 : index
    %168 = vector.load %arg9[%c0_108, %c0_109] : memref<1x192xf32, #tpu.memory_space<vmem>>, vector<1x192xf32>
    %169 = arith.mulf %155, %167 : vector<1x192xf32>
    %170 = arith.subf %168, %169 : vector<1x192xf32>
    %171 = vector.broadcast %167 : vector<1x192xf32> to vector<216x192xf32>
    %172 = arith.mulf %149, %171 : vector<216x192xf32>
    %173 = vector.broadcast %170 : vector<1x192xf32> to vector<216x192xf32>
    %174 = arith.addf %172, %173 : vector<216x192xf32>
    %cst_110 = arith.constant 0.000000e+00 : f32
    %175 = vector.broadcast %cst_110 : f32 to vector<216x192xf32>
    %176 = arith.maximumf %174, %175 : vector<216x192xf32>
    %c0_111 = arith.constant 0 : index
    %c0_112 = arith.constant 0 : index
    %177 = vector.load %arg10[%c0_111, %c0_112] : memref<216x192xf32, #tpu.memory_space<vmem>>, vector<216x192xf32>
    tpu.vector_store %arg10[%c0_111, %c0_112], %176 {strides = array<i32>} : memref<216x192xf32, #tpu.memory_space<vmem>>, vector<216x192xf32>,
    return
  }
}

</mosaic_0001>

<bundles_post_ra>
// kernel: module_forward.1
= control target key start
LH: loop header
LB: loop body
LE: loop exit
PB: predicated region body
PF: predicated region fallthrough
CT: control target
= control target key end

     0   :  { %v11584_v0 = vmov 0   ;;  %vm338_vm0 = vcmask 261120   ;;  %v11585_v28 = vmov 0.0   ;;  %vm1108_vm1 = vcmask 1044480   ;;  %s16978_s1 = inlined_call_operand.vmem [shape: f32[216,1], index: 1, kind: input, shape index: {}]   ;;  %s16979_s4 = inlined_call_operand.vmem [shape: bf16[7,160,160], index: 4, kind: input, shape index: {}]   ;;  %s16980_s0 = inlined_call_operand.vmem [shape: f32[216,160], index: 0, kind: input, shape index: {}]   ;;  %s16981_s2 = inlined_call_operand.vmem [shape: f32[1,160], index: 2, kind: input, shape index: {}]   ;;  %s16982_s3 = inlined_call_operand.vmem [shape: f32[1,160], index: 3, kind: input, shape index: {}]   ;;  %s16983_s7 = inlined_call_operand.vmem [shape: bf16[7,160,192], index: 7, kind: input, shape index: {}]   ;;  %s16984_s5 = inlined_call_operand.vmem [shape: f32[1,160], index: 5, kind: input, shape index: {}]   ;;  %s16985_s6 = inlined_call_operand.vmem [shape: f32[1,160], index: 6, kind: input, shape index: {}]   ;;  %s16986_s8 = inlined_call_operand.vmem [shape: f32[1,192], index: 8, kind: input, shape index: {}]   ;;  %s16987_s9 = inlined_call_operand.vmem [shape: f32[1,192], index: 9, kind: input, shape index: {}]   ;;  %s16988_s10 = inlined_call_operand.vmem [shape: f32[216,192], index: 10, kind: output, shape index: {}]  }
   0x1   :  { %11091 = vset.pattern.permute.xlu1 %v11584_v0  ;;  %11090 = vset.pattern.permute.xlu0 %v11584_v0  ;;  %v38_v1 = vld [vmem:[%s16978_s1 + $0x10] sm:$0xff]  ;;  %v36_v2 = vld [vmem:[%s16978_s1] sm:$0xff]  ;;  %v39_v3 = vld [vmem:[%s16978_s1 + $0x18] sm:$0xff]  ;;  %890 = vst.msk [vmem:[#allocation2 + $0x1b8] sm:$0xff] %vm338_vm0, %v11585_v28  ;;  %vm1490_vm2 = vsmask.f32 5376 }
   0x2   :  { %129 = vperm.xlu1 %11091, %v38_v1   ;;  %119 = vperm.xlu0 %11090, %v36_v2   ;;  %v37_v4 = vld [vmem:[%s16978_s1 + $0x8] sm:$0xff]  ;;  %v40_v6 = vld [vmem:[%s16978_s1 + $0x20] sm:$0xff]  ;;  %v43_v7 = vld [vmem:[%s16978_s1 + $0x38] sm:$0xff]  ;;  %835 = vst [vmem:[#allocation2] sm:$0xff] %v11585_v28  ;;  %vm2097_vm3 = vsmask.f32 4352 }
   0x3   :  { %v41_v5 = vld [vmem:[%s16978_s1 + $0x28] sm:$0xff]  ;;  %v42_v8 = vld [vmem:[%s16978_s1 + $0x30] sm:$0xff]  ;;  %v44_v10 = vld [vmem:[%s16978_s1 + $0x40] sm:$0xff]  ;;  %836 = vst.msk [vmem:[#allocation2 + $0x8] sm:$0xff] %vm338_vm0, %v11585_v28  ;;  %vm3132_vm4 = vsmask.f32 7424 }
   0x4   :  { %v45_v9 = vld [vmem:[%s16978_s1 + $0x48] sm:$0xff]  ;;  %v47_v11 = vld [vmem:[%s16978_s1 + $0x58] sm:$0xff]  ;;  %v46_v12 = vld [vmem:[%s16978_s1 + $0x50] sm:$0xff]  ;;  %838 = vst.msk [vmem:[#allocation2 + $0x18] sm:$0xff] %vm338_vm0, %v11585_v28  ;;  %vm3793_vm5 = vcmask 1046528   ;;  %vm5601_vm7 = vcmask 1045504  }
   0x5   :  { %v49_v13 = vld [vmem:[%s16978_s1 + $0x68] sm:$0xff]  ;;  %v48_v14 = vld [vmem:[%s16978_s1 + $0x60] sm:$0xff]  ;;  %v51_v15 = vld [vmem:[%s16978_s1 + $0x78] sm:$0xff]  ;;  %840 = vst.msk [vmem:[#allocation2 + $0x28] sm:$0xff] %vm338_vm0, %v11585_v28  ;;  %vm4258_vm6 = vsmask.f32 6400 }
   0x6   :  { %134 = vperm.xlu1 %11091, %v39_v3   ;;  %124 = vperm.xlu0 %11090, %v37_v4   ;;  %v50_v16 = vld [vmem:[%s16978_s1 + $0x70] sm:$0xff]  ;;  %v53_v17 = vld [vmem:[%s16978_s1 + $0x88] sm:$0xff]  ;;  %v52_v18 = vld [vmem:[%s16978_s1 + $0x80] sm:$0xff]  ;;  %842 = vst.msk [vmem:[#allocation2 + $0x38] sm:$0xff] %vm338_vm0, %v11585_v28  ;;  %vm9198_vm8 = vcmask 523264  }
   0x7   :  { %v55_v19 = vld [vmem:[%s16978_s1 + $0x98] sm:$0xff]  ;;  %v54_v20 = vld [vmem:[%s16978_s1 + $0x90] sm:$0xff]  ;;  %v57_v21 = vld [vmem:[%s16978_s1 + $0xa8] sm:$0xff]  ;;  %844 = vst.msk [vmem:[#allocation2 + $0x48] sm:$0xff] %vm338_vm0, %v11585_v28 }
   0x8   :  { %v56_v22 = vld [vmem:[%s16978_s1 + $0xa0] sm:$0xff]  ;;  %v59_v23 = vld [vmem:[%s16978_s1 + $0xb8] sm:$0xff]  ;;  %v58_v24 = vld [vmem:[%s16978_s1 + $0xb0] sm:$0xff]  ;;  %846 = vst.msk [vmem:[#allocation2 + $0x58] sm:$0xff] %vm338_vm0, %v11585_v28 }
   0x9   :  { %v61_v25 = vld [vmem:[%s16978_s1 + $0xc8] sm:$0xff]  ;;  %v60_v26 = vld [vmem:[%s16978_s1 + $0xc0] sm:$0xff]  ;;  %v62_v27 = vld [vmem:[%s16978_s1 + $0xd0] sm:$0xff]  ;;  %848 = vst.msk [vmem:[#allocation2 + $0x68] sm:$0xff] %vm338_vm0, %v11585_v28 }
   0xa   :  { %144 = vperm.xlu1 %11091, %v41_v5   ;;  %139 = vperm.xlu0 %11090, %v40_v6   ;;  %850 = vst.msk [vmem:[#allocation2 + $0x78] sm:$0xff] %vm338_vm0, %v11585_v28  ;;  %852 = vst.msk [vmem:[#allocation2 + $0x88] sm:$0xff] %vm338_vm0, %v11585_v28  ;;  %v11092_v29 = vld [vmem:[%s16979_s4 + $0xa4] ss:$8 sps:$4 sm:$0xff]   ;;  %v11094_v30 = vld [vmem:[%s16979_s4 + $0xa0] ss:$8 sps:$4 sm:$0xff]  }
   0xb   :  { %854 = vst.msk [vmem:[#allocation2 + $0x98] sm:$0xff] %vm338_vm0, %v11585_v28  ;;  %856 = vst.msk [vmem:[#allocation2 + $0xa8] sm:$0xff] %vm338_vm0, %v11585_v28  ;;  %1319 = vmatprep.subr.bf16.mxu0 %v11092_v29  ;;  %v11095_v31 = vld [vmem:[%s16979_s4 + $0xb4] ss:$8 sps:$4 sm:$0xff]   ;;  %v11097_v32 = vld [vmem:[%s16979_s4 + $0xb0] ss:$8 sps:$4 sm:$0xff]  }
   0xc   :  { %858 = vst.msk [vmem:[#allocation2 + $0xb8] sm:$0xff] %vm338_vm0, %v11585_v28  ;;  %860 = vst.msk [vmem:[#allocation2 + $0xc8] sm:$0xff] %vm338_vm0, %v11585_v28  ;;  %1320 = vmatpush1.bf16.msra.mxu0 %v11094_v30  ;;  %v11098_v33 = vld [vmem:[%s16979_s4 + $0xc4] ss:$8 sps:$4 sm:$0xff]   ;;  %v11100_v34 = vld [vmem:[%s16979_s4 + $0xc0] ss:$8 sps:$4 sm:$0xff]  }
   0xd   :  { %862 = vst.msk [vmem:[#allocation2 + $0xd8] sm:$0xff] %vm338_vm0, %v11585_v28  ;;  %864 = vst.msk [vmem:[#allocation2 + $0xe8] sm:$0xff] %vm338_vm0, %v11585_v28  ;;  %1321 = vmatprep.subr.bf16.mxu0 %v11095_v31  ;;  %v11101_v35 = vld [vmem:[%s16979_s4 + $0xd4] ss:$8 sps:$4 sm:$0xff]   ;;  %v11103_v36 = vld [vmem:[%s16979_s4 + $0xd0] ss:$8 sps:$4 sm:$0xff]  }
   0xe   :  { %154 = vperm.xlu1 %11091, %v43_v7   ;;  %149 = vperm.xlu0 %11090, %v42_v8   ;;  %866 = vst.msk [vmem:[#allocation2 + $0xf8] sm:$0xff] %vm338_vm0, %v11585_v28  ;;  %868 = vst.msk [vmem:[#allocation2 + $0x108] sm:$0xff] %vm338_vm0, %v11585_v28  ;;  %v11104_v37 = vld [vmem:[%s16979_s4 + $0xe4] ss:$8 sps:$4 sm:$0xff]   ;;  %v11106_v38 = vld [vmem:[%s16979_s4 + $0xe0] ss:$8 sps:$4 sm:$0xff]  }
   0xf   :  { %870 = vst.msk [vmem:[#allocation2 + $0x118] sm:$0xff] %vm338_vm0, %v11585_v28  ;;  %872 = vst.msk [vmem:[#allocation2 + $0x128] sm:$0xff] %vm338_vm0, %v11585_v28  ;;  %v68_v39 = vld [vmem:[%s16980_s0 + $0x28] sm:$0xff]  ;;  %v11107_v41 = vld [vmem:[%s16979_s4 + $0xf4] ss:$8 sps:$4 sm:$0xff]  }
  0x10   :  { %874 = vst.msk [vmem:[#allocation2 + $0x138] sm:$0xff] %vm338_vm0, %v11585_v28  ;;  %876 = vst.msk [vmem:[#allocation2 + $0x148] sm:$0xff] %vm338_vm0, %v11585_v28  ;;  %1322 = vmatpush1.bf16.msra.mxu0 %v11097_v32  ;;  %v64_v40 = vld [vmem:[%s16980_s0 + $0x8] sm:$0xff]  ;;  %v67_v42 = vld [vmem:[%s16980_s0 + $0x20] sm:$0xff] }
  0x11   :  { %878 = vst.msk [vmem:[#allocation2 + $0x158] sm:$0xff] %vm338_vm0, %v11585_v28  ;;  %880 = vst.msk [vmem:[#allocation2 + $0x168] sm:$0xff] %vm338_vm0, %v11585_v28  ;;  %1323 = vmatprep.subr.bf16.mxu0 %v11098_v33  ;;  %v11109_v43 = vld [vmem:[%s16979_s4 + $0xf0] ss:$8 sps:$4 sm:$0xff]   ;;  %v63_v44 = vld [vmem:[%s16980_s0] sm:$0xff] }
  0x12   :  { %164 = vperm.xlu1 %11091, %v45_v9   ;;  %159 = vperm.xlu0 %11090, %v44_v10   ;;  %882 = vst.msk [vmem:[#allocation2 + $0x178] sm:$0xff] %vm338_vm0, %v11585_v28  ;;  %884 = vst.msk [vmem:[#allocation2 + $0x188] sm:$0xff] %vm338_vm0, %v11585_v28  ;;  %v11926_v47 = vld [vmem:[%s16980_s0 + $0x38] sm:$0xff]  ;;  %v11931_v48 = vld [vmem:[%s16980_s0 + $0x10] sm:$0xff] }
  0x13   :  { %886 = vst.msk [vmem:[#allocation2 + $0x198] sm:$0xff] %vm338_vm0, %v11585_v28  ;;  %888 = vst.msk [vmem:[#allocation2 + $0x1a8] sm:$0xff] %vm338_vm0, %v11585_v28  ;;  %v11110_v49 = vld [vmem:[%s16979_s4 + $0x104] ss:$8 sps:$4 sm:$0xff]   ;;  %v11941_v52 = vld [vmem:[%s16980_s0 + $0x18] sm:$0xff] }
  0x14   :  { %891 = vst [vmem:[#allocation2 + $0x1c0] sm:$0xff] %v11585_v28  ;;  %892 = vst.msk [vmem:[#allocation2 + $0x1c8] sm:$0xff] %vm338_vm0, %v11585_v28  ;;  %1324 = vmatpush1.bf16.msra.mxu0 %v11100_v34  ;;  %v11112_v53 = vld [vmem:[%s16979_s4 + $0x100] ss:$8 sps:$4 sm:$0xff]   ;;  %v11950_v55 = vld [vmem:[%s16980_s0 + $0x30] sm:$0xff] }
  0x15   :  { %5298 = vst [vmem:[#allocation3] sm:$0xff] %v11585_v28  ;;  %5299 = vst.msk [vmem:[#allocation3 + $0x8] sm:$0xff] %vm338_vm0, %v11585_v28  ;;  %1325 = vmatprep.subr.bf16.mxu0 %v11101_v35  ;;  %v11113_v60 = vld [vmem:[%s16979_s4 + $0x114] ss:$8 sps:$4 sm:$0xff]   ;;  %v11115_v61 = vld [vmem:[%s16979_s4 + $0x110] ss:$8 sps:$4 sm:$0xff]  }
  0x16   :  { %174 = vperm.xlu1 %11091, %v47_v11   ;;  %169 = vperm.xlu0 %11090, %v46_v12   ;;  %5301 = vst.msk [vmem:[#allocation3 + $0x18] sm:$0xff] %vm338_vm0, %v11585_v28  ;;  %5302 = vst [vmem:[#allocation3 + $0x20] sm:$0xff] %v11585_v28  ;;  %v11116_v62 = vld [vmem:[%s16979_s4 + $0x124] ss:$8 sps:$4 sm:$0xff]   ;;  %v11974_v3 = vld [vmem:[%s16980_s0 + $0x58] sm:$0xff] }
  0x17   :  { %5303 = vst.msk [vmem:[#allocation3 + $0x28] sm:$0xff] %vm338_vm0, %v11585_v28  ;;  %5305 = vst.msk [vmem:[#allocation3 + $0x38] sm:$0xff] %vm338_vm0, %v11585_v28  ;;  %v11979_v4 = vld [vmem:[%s16980_s0 + $0x40] sm:$0xff]  ;;  %v11987_v8 = vld [vmem:[%s16980_s0 + $0x50] sm:$0xff] }
  0x18   :  { %5306 = vst [vmem:[#allocation3 + $0x40] sm:$0xff] %v11585_v28  ;;  %5307 = vst.msk [vmem:[#allocation3 + $0x48] sm:$0xff] %vm338_vm0, %v11585_v28  ;;  %1326 = vmatpush1.bf16.msra.mxu0 %v11103_v36  ;;  %v11992_v9 = vld [vmem:[%s16980_s0 + $0x48] sm:$0xff]  ;;  %v11119_v11 = vld [vmem:[%s16979_s4 + $0x134] ss:$8 sps:$4 sm:$0xff]  }
  0x19   :  { %5309 = vst.msk [vmem:[#allocation3 + $0x58] sm:$0xff] %vm338_vm0, %v11585_v28  ;;  %5311 = vst.msk [vmem:[#allocation3 + $0x68] sm:$0xff] %vm338_vm0, %v11585_v28  ;;  %1327 = vmatprep.subr.bf16.mxu0 %v11104_v37  ;;  %v11118_v10 = vld [vmem:[%s16979_s4 + $0x120] ss:$8 sps:$4 sm:$0xff]   ;;  %v12021_v31 = vld [vmem:[%s16980_s0 + $0x78] sm:$0xff] }
  0x1a   :  { %184 = vperm.xlu1 %11091, %v49_v13   ;;  %179 = vperm.xlu0 %11090, %v48_v14   ;;  %5313 = vst.msk [vmem:[#allocation3 + $0x78] sm:$0xff] %vm338_vm0, %v11585_v28  ;;  %5315 = vst.msk [vmem:[#allocation3 + $0x88] sm:$0xff] %vm338_vm0, %v11585_v28  ;;  %v12030_v36 = vld [vmem:[%s16980_s0 + $0x60] sm:$0xff] }
  0x1b   :  { %5317 = vst.msk [vmem:[#allocation3 + $0x98] sm:$0xff] %vm338_vm0, %v11585_v28  ;;  %5319 = vst.msk [vmem:[#allocation3 + $0xa8] sm:$0xff] %vm338_vm0, %v11585_v28 }
  0x1c   :  { %5321 = vst.msk [vmem:[#allocation3 + $0xb8] sm:$0xff] %vm338_vm0, %v11585_v28  ;;  %5323 = vst.msk [vmem:[#allocation3 + $0xc8] sm:$0xff] %vm338_vm0, %v11585_v28  ;;  %1328 = vmatpush1.bf16.msra.mxu0 %v11106_v38 }
  0x1d   :  { %5325 = vst.msk [vmem:[#allocation3 + $0xd8] sm:$0xff] %vm338_vm0, %v11585_v28  ;;  %5327 = vst.msk [vmem:[#allocation3 + $0xe8] sm:$0xff] %vm338_vm0, %v11585_v28  ;;  %1329 = vmatprep.subr.bf16.mxu0 %v11107_v41 }
  0x1e   :  { %194 = vperm.xlu1 %11091, %v51_v15   ;;  %189 = vperm.xlu0 %11090, %v50_v16   ;;  %5329 = vst.msk [vmem:[#allocation3 + $0xf8] sm:$0xff] %vm338_vm0, %v11585_v28  ;;  %5331 = vst.msk [vmem:[#allocation3 + $0x108] sm:$0xff] %vm338_vm0, %v11585_v28 }
  0x1f   :  { %5333 = vst.msk [vmem:[#allocation3 + $0x118] sm:$0xff] %vm338_vm0, %v11585_v28  ;;  %5335 = vst.msk [vmem:[#allocation3 + $0x128] sm:$0xff] %vm338_vm0, %v11585_v28 }
  0x20   :  { %5337 = vst.msk [vmem:[#allocation3 + $0x138] sm:$0xff] %vm338_vm0, %v11585_v28  ;;  %5339 = vst.msk [vmem:[#allocation3 + $0x148] sm:$0xff] %vm338_vm0, %v11585_v28  ;;  %1330 = vmatpush1.bf16.msra.mxu0 %v11109_v43 }
  0x21   :  { %5341 = vst.msk [vmem:[#allocation3 + $0x158] sm:$0xff] %vm338_vm0, %v11585_v28  ;;  %5343 = vst.msk [vmem:[#allocation3 + $0x168] sm:$0xff] %vm338_vm0, %v11585_v28  ;;  %1331 = vmatprep.subr.bf16.mxu0 %v11110_v49 }
  0x22   :  { %204 = vperm.xlu1 %11091, %v53_v17   ;;  %199 = vperm.xlu0 %11090, %v52_v18   ;;  %5345 = vst.msk [vmem:[#allocation3 + $0x178] sm:$0xff] %vm338_vm0, %v11585_v28  ;;  %5347 = vst.msk [vmem:[#allocation3 + $0x188] sm:$0xff] %vm338_vm0, %v11585_v28 }
  0x23   :  { %5349 = vst.msk [vmem:[#allocation3 + $0x198] sm:$0xff] %vm338_vm0, %v11585_v28  ;;  %5351 = vst.msk [vmem:[#allocation3 + $0x1a8] sm:$0xff] %vm338_vm0, %v11585_v28 }
  0x24   :  { %5353 = vst.msk [vmem:[#allocation3 + $0x1b8] sm:$0xff] %vm338_vm0, %v11585_v28  ;;  %5355 = vst.msk [vmem:[#allocation3 + $0x1c8] sm:$0xff] %vm338_vm0, %v11585_v28  ;;  %1332 = vmatpush1.bf16.msra.mxu0 %v11112_v53 }
  0x25   :  { %5357 = vst.msk [vmem:[#allocation3 + $0x1d8] sm:$0xff] %vm338_vm0, %v11585_v28  ;;  %5359 = vst.msk [vmem:[#allocation3 + $0x1e8] sm:$0xff] %vm338_vm0, %v11585_v28  ;;  %1333 = vmatprep.subr.bf16.mxu0 %v11113_v60 }
  0x26   :  { %214 = vperm.xlu1 %11091, %v55_v19   ;;  %209 = vperm.xlu0 %11090, %v54_v20   ;;  %5361 = vst.msk [vmem:[#allocation3 + $0x1f8] sm:$0xff] %vm338_vm0, %v11585_v28  ;;  %5363 = vst.msk [vmem:[#allocation3 + $0x208] sm:$0xff] %vm338_vm0, %v11585_v28 }
  0x27   :  { %5365 = vst.msk [vmem:[#allocation3 + $0x218] sm:$0xff] %vm338_vm0, %v11585_v28  ;;  %5367 = vst.msk [vmem:[#allocation3 + $0x228] sm:$0xff] %vm338_vm0, %v11585_v28 }
  0x28   :  { %5369 = vst.msk [vmem:[#allocation3 + $0x238] sm:$0xff] %vm338_vm0, %v11585_v28  ;;  %5370 = vst [vmem:[#allocation3 + $0x240] sm:$0xff] %v11585_v28  ;;  %1334 = vmatpush1.bf16.msra.mxu0 %v11115_v61 }
  0x29   :  { %5371 = vst.msk [vmem:[#allocation3 + $0x248] sm:$0xff] %vm338_vm0, %v11585_v28  ;;  %5373 = vst.msk [vmem:[#allocation3 + $0x258] sm:$0xff] %vm338_vm0, %v11585_v28  ;;  %1335 = vmatprep.subr.bf16.mxu0 %v11116_v62 }
  0x2a   :  { %224 = vperm.xlu1 %11091, %v57_v21   ;;  %219 = vperm.xlu0 %11090, %v56_v22   ;;  %5374 = vst [vmem:[#allocation3 + $0x260] sm:$0xff] %v11585_v28  ;;  %5375 = vst.msk [vmem:[#allocation3 + $0x268] sm:$0xff] %vm338_vm0, %v11585_v28 }
  0x2b   :  { %5377 = vst.msk [vmem:[#allocation3 + $0x278] sm:$0xff] %vm338_vm0, %v11585_v28  ;;  %5378 = vst [vmem:[#allocation3 + $0x280] sm:$0xff] %v11585_v28 }
  0x2c   :  { %5379 = vst.msk [vmem:[#allocation3 + $0x288] sm:$0xff] %vm338_vm0, %v11585_v28  ;;  %1336 = vmatpush1.bf16.msra.mxu0 %v11118_v10 }
  0x2d   :  { %1337 = vmatprep.subr.bf16.mxu0 %v11119_v11 }
  0x2e   :  { %234 = vperm.xlu1 %11091, %v59_v23   ;;  %229 = vperm.xlu0 %11090, %v58_v24  }
  0x32   :  { %244 = vperm.xlu1 %11091, %v61_v25   ;;  %239 = vperm.xlu0 %11090, %v60_v26   ;;  %v11121_v26 = vld [vmem:[%s16979_s4 + $0x130] ss:$8 sps:$4 sm:$0xff]  }
  0x33   :  { %1338 = vmatpush1.bf16.msra.mxu0 %v11121_v26 }
  0x36   :  { %249 = vperm.xlu0 %11090, %v62_v27  }
  0x81   :  { %v11919_v45 = vpop.permute.xlu1 %129  ;;  %v11921_v46 = vpop.permute.xlu0 %119 }
  0x82   :  { %17231 = vst [vmem:[#allocation4_spill] sm:$0xff] %v11919_v45  ;;  %17232 = vst [vmem:[#allocation5_spill] sm:$0xff] %v11921_v46  ;;  %v257_v50 = vmul.f32 %v11919_v45, %v68_v39  ;;  %v253_v51 = vmul.f32 %v11921_v46, %v64_v40  ;;  %v256_v54 = vmul.f32 %v11919_v45, %v67_v42  ;;  %v12038_v42 = vld [vmem:[%s16980_s0 + $0x70] sm:$0xff] }
  0x83   :  { %v252_v57 = vmul.f32 %v11921_v46, %v63_v44  ;;  %v12045_v44 = vld [vmem:[%s16980_s0 + $0x68] sm:$0xff] }
  0x84   :  { %v405_v56 = vmul.f32 %v257_v50, %v257_v50  ;;  %v342_v63 = vsel %vm338_vm0, %v257_v50, 0.0  ;;  %v401_v0 = vmul.f32 %v253_v51, %v253_v51  ;;  %v404_v5 = vmul.f32 %v256_v54, %v256_v54 }
  0x85   :  { %v11953_v58 = vpop.permute.xlu1 %134  ;;  %v11955_v59 = vpop.permute.xlu0 %124  ;;  %v339_v6 = vsel %vm338_vm0, %v253_v51, 0.0  ;;  %v400_v13 = vmul.f32 %v252_v57, %v252_v57 }
  0x86   :  { %17233 = vst [vmem:[#allocation6_spill] sm:$0xff] %v11953_v58  ;;  %17234 = vst [vmem:[#allocation7_spill] sm:$0xff] %v11955_v59  ;;  %v259_v1 = vmul.f32 %v11953_v58, %v11926_v47  ;;  %v254_v2 = vmul.f32 %v11955_v59, %v11931_v48  ;;  %v255_v7 = vmul.f32 %v11955_v59, %v11941_v52  ;;  %v489_v12 = vsel %vm338_vm0, %v405_v56, 0.0 }
  0x87   :  { %v258_v14 = vmul.f32 %v11953_v58, %v11950_v55  ;;  %v486_v22 = vsel %vm338_vm0, %v401_v0, 0.0 }
  0x88   :  { %v306_v15 = vadd.f32 %v254_v2, %v252_v57  ;;  %v407_v16 = vmul.f32 %v259_v1, %v259_v1  ;;  %v340_v17 = vsel %vm338_vm0, %v255_v7, 0.0  ;;  %v402_v18 = vmul.f32 %v254_v2, %v254_v2 }
  0x89   :  { %v403_v19 = vmul.f32 %v255_v7, %v255_v7  ;;  %v12004_v20 = vpop.permute.xlu1 %144  ;;  %v12006_v21 = vpop.permute.xlu0 %139  ;;  %v344_v23 = vsel %vm338_vm0, %v259_v1, 0.0  ;;  %v341_v25 = vadd.f32 %v340_v17, %v339_v6  ;;  %v406_v37 = vmul.f32 %v258_v14, %v258_v14  ;;  %v12053_v1 = vld [vmem:[%s16980_s0 + $0x98] sm:$0xff]  ;;  %v12076_v17 = vld [vmem:[%s16980_s0 + $0x90] sm:$0xff] }
  0x8a   :  { %17235 = vst [vmem:[#allocation8_spill] sm:$0xff] %v12004_v20  ;;  %17236 = vst [vmem:[#allocation9_spill] sm:$0xff] %v12006_v21  ;;  %v307_v24 = vadd.f32 %v306_v15, %v256_v54  ;;  %v454_v27 = vadd.f32 %v402_v18, %v400_v13  ;;  %v263_v29 = vmul.f32 %v12004_v20, %v11974_v3  ;;  %v491_v38 = vsel %vm338_vm0, %v407_v16, 0.0 }
  0x8b   :  { %v487_v28 = vsel %vm338_vm0, %v403_v19, 0.0  ;;  %v260_v30 = vmul.f32 %v12006_v21, %v11979_v4  ;;  %v343_v32 = vadd.f32 %v342_v63, %v341_v25  ;;  %v262_v34 = vmul.f32 %v12004_v20, %v11987_v8  ;;  %v11124_v25 = vld [vmem:[%s16979_s4 + $0x4] ss:$8 sps:$4 sm:$0xff]  }
  0x8c   :  { %v488_v33 = vadd.f32 %v487_v28, %v486_v22  ;;  %v261_v35 = vmul.f32 %v12006_v21, %v11992_v9  ;;  %v455_v39 = vadd.f32 %v454_v27, %v404_v5  ;;  %v308_v40 = vadd.f32 %v307_v24, %v258_v14  ;;  %v12082_v24 = vld [vmem:[%s16980_s0 + $0x88] sm:$0xff]  ;;  %1897 = vmatprep.subr.bf16.mxu0 %v11124_v25 }
  0x8d   :  { %v12033_v41 = vpop.permute.xlu1 %154  ;;  %v12040_v43 = vpop.permute.xlu0 %149  ;;  %v411_v50 = vmul.f32 %v263_v29, %v263_v29  ;;  %v345_v51 = vadd.f32 %v344_v23, %v343_v32  ;;  %v408_v56 = vmul.f32 %v260_v30, %v260_v30  ;;  %v410_v61 = vmul.f32 %v262_v34, %v262_v34 }
  0x8e   :  { %17237 = vst [vmem:[#allocation10_spill] sm:$0xff] %v12033_v41  ;;  %17238 = vst [vmem:[#allocation11_spill] sm:$0xff] %v12040_v43  ;;  %v490_v49 = vadd.f32 %v489_v12, %v488_v33  ;;  %v346_v53 = vsel %vm338_vm0, %v261_v35, 0.0  ;;  %v309_v54 = vadd.f32 %v308_v40, %v260_v30  ;;  %v409_v57 = vmul.f32 %v261_v35, %v261_v35  ;;  %v12067_v12 = vld [vmem:[%s16980_s0 + $0x80] sm:$0xff] }
  0x8f   :  { %v456_v60 = vadd.f32 %v455_v39, %v406_v37  ;;  %v347_v62 = vadd.f32 %v346_v53, %v345_v51  ;;  %v267_v0 = vmul.f32 %v12033_v41, %v12021_v31  ;;  %v264_v6 = vmul.f32 %v12040_v43, %v12030_v36  ;;  %v12095_v37 = vld [vmem:[%s16980_s0 + $0xb8] sm:$0xff]  ;;  %v12107_v51 = vld [vmem:[%s16980_s0 + $0xa0] sm:$0xff]  ;;  %v12112_v53 = vld [vmem:[%s16980_s0 + $0xa8] sm:$0xff] }
  0x90   :  { %v492_v63 = vadd.f32 %v491_v38, %v490_v49  ;;  %v493_v5 = vsel %vm338_vm0, %v409_v57, 0.0  ;;  %v265_v7 = vmul.f32 %v12040_v43, %v12045_v44  ;;  %v348_v13 = vsel %vm338_vm0, %v263_v29, 0.0 }
  0x91   :  { %v457_v2 = vadd.f32 %v456_v60, %v408_v56  ;;  %v12060_v10 = vpop.permute.xlu1 %164  ;;  %v12062_v11 = vpop.permute.xlu0 %159  ;;  %v495_v14 = vsel %vm338_vm0, %v411_v50, 0.0  ;;  %v266_v16 = vmul.f32 %v12033_v41, %v12038_v42  ;;  %v415_v18 = vmul.f32 %v267_v0, %v267_v0 }
  0x92   :  { %17239 = vst [vmem:[#allocation12_spill] sm:$0xff] %v12060_v10  ;;  %17240 = vst [vmem:[#allocation13_spill] sm:$0xff] %v12062_v11  ;;  %v494_v15 = vadd.f32 %v493_v5, %v492_v63  ;;  %v310_v19 = vadd.f32 %v309_v54, %v262_v34  ;;  %v349_v22 = vadd.f32 %v348_v13, %v347_v62  ;;  %v350_v23 = vsel %vm338_vm0, %v265_v7, 0.0 }
  0x93   :  { %v412_v26 = vmul.f32 %v264_v6, %v264_v6  ;;  %v413_v27 = vmul.f32 %v265_v7, %v265_v7  ;;  %v458_v28 = vadd.f32 %v457_v2, %v410_v61  ;;  %v352_v30 = vsel %vm338_vm0, %v267_v0, 0.0  ;;  %v12120_v61 = vld [vmem:[%s16980_s0 + $0xb0] sm:$0xff] }
  0x94   :  { %v496_v29 = vadd.f32 %v495_v14, %v494_v15  ;;  %v311_v32 = vadd.f32 %v310_v19, %v264_v6  ;;  %v351_v33 = vadd.f32 %v350_v23, %v349_v22  ;;  %v271_v34 = vmul.f32 %v12060_v10, %v12053_v1 }
  0x95   :  { %v12090_v35 = vpop.permute.xlu1 %174  ;;  %v12097_v38 = vpop.permute.xlu0 %169  ;;  %v459_v39 = vadd.f32 %v458_v28, %v412_v26  ;;  %v497_v40 = vsel %vm338_vm0, %v413_v27, 0.0  ;;  %v268_v49 = vmul.f32 %v12062_v11, %v12067_v12  ;;  %v269_v50 = vmul.f32 %v12062_v11, %v12082_v24 }
  0x96   :  { %17241 = vst [vmem:[#allocation14_spill] sm:$0xff] %v12090_v35  ;;  %17242 = vst [vmem:[#allocation15_spill] sm:$0xff] %v12097_v38  ;;  %v414_v54 = vmul.f32 %v266_v16, %v266_v16  ;;  %v499_v56 = vsel %vm338_vm0, %v415_v18, 0.0  ;;  %v498_v57 = vadd.f32 %v497_v40, %v496_v29  ;;  %v270_v60 = vmul.f32 %v12060_v10, %v12076_v17 }
  0x97   :  { %v419_v62 = vmul.f32 %v271_v34, %v271_v34  ;;  %v312_v63 = vadd.f32 %v311_v32, %v266_v16  ;;  %v353_v0 = vadd.f32 %v352_v30, %v351_v33  ;;  %v354_v2 = vsel %vm338_vm0, %v269_v50, 0.0  ;;  %v12133_v16 = vld [vmem:[%s16980_s0 + $0xd8] sm:$0xff] }
  0x98   :  { %v416_v5 = vmul.f32 %v268_v49, %v268_v49  ;;  %v417_v6 = vmul.f32 %v269_v50, %v269_v50  ;;  %v460_v7 = vadd.f32 %v459_v39, %v414_v54  ;;  %v500_v13 = vadd.f32 %v499_v56, %v498_v57  ;;  %v12152_v54 = vld [vmem:[%s16980_s0 + $0xc0] sm:$0xff]  ;;  %v12157_v56 = vld [vmem:[%s16980_s0 + $0xc8] sm:$0xff] }
  0x99   :  { %v12123_v14 = vpop.permute.xlu1 %184  ;;  %v12125_v15 = vpop.permute.xlu0 %179  ;;  %v356_v18 = vsel %vm338_vm0, %v271_v34, 0.0  ;;  %v313_v19 = vadd.f32 %v312_v63, %v268_v49  ;;  %v355_v22 = vadd.f32 %v354_v2, %v353_v0  ;;  %v275_v23 = vmul.f32 %v12090_v35, %v12095_v37  ;;  %v12146_v34 = vld [vmem:[%s16980_s0 + $0xd0] sm:$0xff] }
  0x9a   :  { %17243 = vst [vmem:[#allocation16_spill] sm:$0xff] %v12123_v14  ;;  %17244 = vst [vmem:[#allocation17_spill] sm:$0xff] %v12125_v15  ;;  %v461_v25 = vadd.f32 %v460_v7, %v416_v5  ;;  %v501_v26 = vsel %vm338_vm0, %v417_v6, 0.0  ;;  %v272_v27 = vmul.f32 %v12097_v38, %v12107_v51  ;;  %v273_v28 = vmul.f32 %v12097_v38, %v12112_v53 }
  0x9b   :  { %v418_v29 = vmul.f32 %v270_v60, %v270_v60  ;;  %v503_v30 = vsel %vm338_vm0, %v419_v62, 0.0  ;;  %v502_v32 = vadd.f32 %v501_v26, %v500_v13  ;;  %v274_v33 = vmul.f32 %v12090_v35, %v12120_v61 }
  0x9c   :  { %v423_v39 = vmul.f32 %v275_v23, %v275_v23  ;;  %v314_v40 = vadd.f32 %v313_v19, %v270_v60  ;;  %v357_v49 = vadd.f32 %v356_v18, %v355_v22  ;;  %v358_v50 = vsel %vm338_vm0, %v273_v28, 0.0 }
  0x9d   :  { %v12159_v57 = vpop.permute.xlu1 %194  ;;  %v12161_v62 = vpop.permute.xlu0 %189  ;;  %v420_v63 = vmul.f32 %v272_v27, %v272_v27  ;;  %v421_v0 = vmul.f32 %v273_v28, %v273_v28  ;;  %v462_v60 = vadd.f32 %v461_v25, %v418_v29  ;;  %v504_v2 = vadd.f32 %v503_v30, %v502_v32 }
  0x9e   :  { %17245 = vst [vmem:[#allocation18_spill] sm:$0xff] %v12159_v57  ;;  %17246 = vst [vmem:[#allocation19_spill] sm:$0xff] %v12161_v62  ;;  %v360_v5 = vsel %vm338_vm0, %v275_v23, 0.0  ;;  %v315_v6 = vadd.f32 %v314_v40, %v272_v27  ;;  %v359_v7 = vadd.f32 %v358_v50, %v357_v49  ;;  %v279_v13 = vmul.f32 %v12123_v14, %v12133_v16  ;;  %v12177_v27 = vld [vmem:[%s16980_s0 + $0xf8] sm:$0xff]  ;;  %v12190_v50 = vld [vmem:[%s16980_s0 + $0xe8] sm:$0xff] }
  0x9f   :  { %v463_v18 = vadd.f32 %v462_v60, %v420_v63  ;;  %v505_v19 = vsel %vm338_vm0, %v421_v0, 0.0  ;;  %v276_v22 = vmul.f32 %v12125_v15, %v12152_v54  ;;  %v277_v26 = vmul.f32 %v12125_v15, %v12157_v56  ;;  %17247 = vst [vmem:[#allocation20_spill] sm:$0xff] %v12177_v27 }
  0xa0   :  { %v422_v35 = vmul.f32 %v274_v33, %v274_v33  ;;  %v507_v25 = vsel %vm338_vm0, %v423_v39, 0.0  ;;  %v506_v28 = vadd.f32 %v505_v19, %v504_v2  ;;  %v278_v23 = vmul.f32 %v12123_v14, %v12146_v34  ;;  %v12185_v39 = vld [vmem:[%s16980_s0 + $0xe0] sm:$0xff] }
  0xa1   :  { %v12179_v29 = vpop.permute.xlu0 %199  ;;  %v427_v30 = vmul.f32 %v279_v13, %v279_v13  ;;  %v316_v32 = vadd.f32 %v315_v6, %v274_v33  ;;  %v361_v40 = vadd.f32 %v360_v5, %v359_v7  ;;  %v362_v49 = vsel %vm338_vm0, %v277_v26, 0.0  ;;  %17249 = vst [vmem:[#allocation22_spill] sm:$0xff] %v12185_v39  ;;  %v12192_v63 = vpop.permute.xlu1 %204  ;;  %v12197_v33 = vld [vmem:[%s16980_s0 + $0xf0] sm:$0xff] }
  0xa2   :  { %17248 = vst [vmem:[#allocation21_spill] sm:$0xff] %v12179_v29  ;;  %17250 = vst [vmem:[#allocation23_spill] sm:$0xff] %v12192_v63  ;;  %v424_v0 = vmul.f32 %v276_v22, %v276_v22  ;;  %v425_v60 = vmul.f32 %v277_v26, %v277_v26  ;;  %v464_v2 = vadd.f32 %v463_v18, %v422_v35  ;;  %v364_v5 = vsel %vm338_vm0, %v279_v13, 0.0 }
  0xa3   :  { %v508_v19 = vadd.f32 %v507_v25, %v506_v28  ;;  %17251 = vst [vmem:[#allocation24_spill] sm:$0xff] %v12197_v33  ;;  %v317_v6 = vadd.f32 %v316_v32, %v276_v22  ;;  %v363_v7 = vadd.f32 %v362_v49, %v361_v40  ;;  %v283_v14 = vmul.f32 %v12159_v57, %v12177_v27  ;;  %v12213_v22 = vld [vmem:[%s16980_s0 + $0x118] sm:$0xff] }
  0xa4   :  { %v465_v15 = vadd.f32 %v464_v2, %v424_v0  ;;  %v509_v38 = vsel %vm338_vm0, %v425_v60, 0.0  ;;  %v280_v26 = vmul.f32 %v12161_v62, %v12185_v39  ;;  %v281_v35 = vmul.f32 %v12161_v62, %v12190_v50  ;;  %17252 = vst [vmem:[#allocation25_spill] sm:$0xff] %v12213_v22 }
  0xa5   :  { %v426_v18 = vmul.f32 %v278_v23, %v278_v23  ;;  %v511_v25 = vsel %vm338_vm0, %v427_v30, 0.0  ;;  %v510_v28 = vadd.f32 %v509_v38, %v508_v19  ;;  %v282_v13 = vmul.f32 %v12159_v57, %v12197_v33  ;;  %v12215_v32 = vpop.permute.xlu0 %209  ;;  %v12221_v30 = vld [vmem:[%s16980_s0 + $0x100] sm:$0xff]  ;;  %v12226_v38 = vld [vmem:[%s16980_s0 + $0x108] sm:$0xff] }
  0xa6   :  { %17253 = vst [vmem:[#allocation26_spill] sm:$0xff] %v12215_v32  ;;  %v431_v40 = vmul.f32 %v283_v14, %v283_v14  ;;  %v318_v49 = vadd.f32 %v317_v6, %v278_v23  ;;  %v365_v0 = vadd.f32 %v364_v5, %v363_v7  ;;  %v366_v60 = vsel %vm338_vm0, %v281_v35, 0.0  ;;  %17254 = vst [vmem:[#allocation27_spill] sm:$0xff] %v12221_v30  ;;  %v12231_v23 = vld [vmem:[%s16980_s0 + $0x110] sm:$0xff]  ;;  %v12233_v5 = vpop.permute.xlu1 %214 }
  0xa7   :  { %17255 = vst [vmem:[#allocation28_spill] sm:$0xff] %v12226_v38  ;;  %v428_v2 = vmul.f32 %v280_v26, %v280_v26  ;;  %v429_v19 = vmul.f32 %v281_v35, %v281_v35  ;;  %v466_v57 = vadd.f32 %v465_v15, %v426_v18  ;;  %v512_v62 = vadd.f32 %v511_v25, %v510_v28 }
  0xa8   :  { %17256 = vst [vmem:[#allocation29_spill] sm:$0xff] %v12231_v23  ;;  %17257 = vst [vmem:[#allocation30_spill] sm:$0xff] %v12233_v5  ;;  %v368_v6 = vsel %vm338_vm0, %v283_v14, 0.0  ;;  %v319_v7 = vadd.f32 %v318_v49, %v280_v26  ;;  %v367_v33 = vadd.f32 %v366_v60, %v365_v0  ;;  %v287_v10 = vmul.f32 %v12192_v63, %v12213_v22  ;;  %v12249_v26 = vld [vmem:[%s16980_s0 + $0x138] sm:$0xff] }
  0xa9   :  { %v467_v27 = vadd.f32 %v466_v57, %v428_v2  ;;  %v513_v11 = vsel %vm338_vm0, %v429_v19, 0.0  ;;  %v284_v15 = vmul.f32 %v12179_v29, %v12221_v30  ;;  %v285_v35 = vmul.f32 %v12179_v29, %v12226_v38  ;;  %17258 = vst [vmem:[#allocation31_spill] sm:$0xff] %v12249_v26  ;;  %v12255_v2 = vld [vmem:[%s16980_s0 + $0x120] sm:$0xff] }
  0xaa   :  { %v430_v18 = vmul.f32 %v282_v13, %v282_v13  ;;  %v515_v25 = vsel %vm338_vm0, %v431_v40, 0.0  ;;  %v514_v28 = vadd.f32 %v513_v11, %v512_v62  ;;  %v286_v14 = vmul.f32 %v12192_v63, %v12231_v23  ;;  %17259 = vst [vmem:[#allocation32_spill] sm:$0xff] %v12255_v2  ;;  %v12260_v11 = vld [vmem:[%s16980_s0 + $0x128] sm:$0xff]  ;;  %v12262_v62 = vpop.permute.xlu0 %219  ;;  %v12272_v22 = vpop.permute.xlu1 %224 }
  0xab   :  { %v435_v57 = vmul.f32 %v287_v10, %v287_v10  ;;  %v320_v49 = vadd.f32 %v319_v7, %v282_v13  ;;  %v369_v0 = vadd.f32 %v368_v6, %v367_v33  ;;  %v370_v60 = vsel %vm338_vm0, %v285_v35, 0.0  ;;  %17260 = vst [vmem:[#allocation33_spill] sm:$0xff] %v12260_v11  ;;  %17261 = vst [vmem:[#allocation34_spill] sm:$0xff] %v12262_v62  ;;  %v12267_v33 = vld [vmem:[%s16980_s0 + $0x130] sm:$0xff] }
  0xac   :  { %v432_v40 = vmul.f32 %v284_v15, %v284_v15  ;;  %v433_v19 = vmul.f32 %v285_v35, %v285_v35  ;;  %v468_v63 = vadd.f32 %v467_v27, %v430_v18  ;;  %v516_v29 = vadd.f32 %v515_v25, %v514_v28  ;;  %17262 = vst [vmem:[#allocation35_spill] sm:$0xff] %v12267_v33  ;;  %v12285_v28 = vld [vmem:[%s16980_s0 + $0x158] sm:$0xff] }
  0xad   :  { %v372_v13 = vsel %vm338_vm0, %v287_v10, 0.0  ;;  %v321_v6 = vadd.f32 %v320_v49, %v284_v15  ;;  %v371_v7 = vadd.f32 %v370_v60, %v369_v0  ;;  %v291_v23 = vmul.f32 %v12233_v5, %v12249_v26  ;;  %17263 = vst [vmem:[#allocation36_spill] sm:$0xff] %v12272_v22  ;;  %17264 = vst [vmem:[#allocation37_spill] sm:$0xff] %v12285_v28 }
  0xae   :  { %v469_v30 = vadd.f32 %v468_v63, %v432_v40  ;;  %v517_v38 = vsel %vm338_vm0, %v433_v19, 0.0  ;;  %v288_v27 = vmul.f32 %v12215_v32, %v12255_v2  ;;  %v289_v35 = vmul.f32 %v12215_v32, %v12260_v11  ;;  %v12291_v40 = vld [vmem:[%s16980_s0 + $0x140] sm:$0xff] }
  0xaf   :  { %v434_v18 = vmul.f32 %v286_v14, %v286_v14  ;;  %v519_v25 = vsel %vm338_vm0, %v435_v57, 0.0  ;;  %v518_v10 = vadd.f32 %v517_v38, %v516_v29  ;;  %v290_v15 = vmul.f32 %v12233_v5, %v12267_v33  ;;  %17265 = vst [vmem:[#allocation38_spill] sm:$0xff] %v12291_v40  ;;  %v12296_v29 = vld [vmem:[%s16980_s0 + $0x148] sm:$0xff] }
  0xb0   :  { %v439_v63 = vmul.f32 %v291_v23, %v291_v23  ;;  %v322_v49 = vadd.f32 %v321_v6, %v286_v14  ;;  %v373_v0 = vadd.f32 %v372_v13, %v371_v7  ;;  %v374_v60 = vsel %vm338_vm0, %v289_v35, 0.0  ;;  %17266 = vst [vmem:[#allocation39_spill] sm:$0xff] %v12296_v29  ;;  %v12301_v14 = vld [vmem:[%s16980_s0 + $0x150] sm:$0xff]  ;;  %v12303_v13 = vpop.permute.xlu0 %229 }
  0xb1   :  { %v436_v38 = vmul.f32 %v288_v27, %v288_v27  ;;  %v437_v57 = vmul.f32 %v289_v35, %v289_v35  ;;  %v470_v19 = vadd.f32 %v469_v30, %v434_v18  ;;  %v520_v5 = vadd.f32 %v519_v25, %v518_v10  ;;  %17267 = vst [vmem:[#allocation40_spill] sm:$0xff] %v12301_v14  ;;  %v12313_v18 = vpop.permute.xlu1 %234 }
  0xb2   :  { %17268 = vst [vmem:[#allocation41_spill] sm:$0xff] %v12303_v13  ;;  %v376_v6 = vsel %vm338_vm0, %v291_v23, 0.0  ;;  %v323_v7 = vadd.f32 %v322_v49, %v288_v27  ;;  %v375_v33 = vadd.f32 %v374_v60, %v373_v0  ;;  %v295_v32 = vmul.f32 %v12272_v22, %v12285_v28  ;;  %17269 = vst [vmem:[#allocation42_spill] sm:$0xff] %v12313_v18  ;;  %v12321_v49 = vld [vmem:[%s16980_s0 + $0x178] sm:$0xff] }
  0xb3   :  { %v471_v26 = vadd.f32 %v470_v19, %v436_v38  ;;  %v521_v2 = vsel %vm338_vm0, %v437_v57, 0.0  ;;  %v292_v30 = vmul.f32 %v12262_v62, %v12291_v40  ;;  %v293_v35 = vmul.f32 %v12262_v62, %v12296_v29  ;;  %17270 = vst [vmem:[#allocation43_spill] sm:$0xff] %v12321_v49  ;;  %v12327_v19 = vld [vmem:[%s16980_s0 + $0x160] sm:$0xff] }
  0xb4   :  { %v438_v25 = vmul.f32 %v290_v15, %v290_v15  ;;  %v523_v10 = vsel %vm338_vm0, %v439_v63, 0.0  ;;  %v522_v23 = vadd.f32 %v521_v2, %v520_v5  ;;  %v294_v27 = vmul.f32 %v12272_v22, %v12301_v14  ;;  %17271 = vst [vmem:[#allocation44_spill] sm:$0xff] %v12327_v19  ;;  %v12332_v5 = vld [vmem:[%s16980_s0 + $0x168] sm:$0xff]  ;;  %v12342_v28 = vpop.permute.xlu0 %239 }
  0xb5   :  { %v443_v0 = vmul.f32 %v295_v32, %v295_v32  ;;  %v324_v60 = vadd.f32 %v323_v7, %v290_v15  ;;  %v377_v38 = vadd.f32 %v376_v6, %v375_v33  ;;  %v378_v57 = vsel %vm338_vm0, %v293_v35, 0.0  ;;  %17272 = vst [vmem:[#allocation45_spill] sm:$0xff] %v12332_v5  ;;  %v12337_v33 = vld [vmem:[%s16980_s0 + $0x170] sm:$0xff]  ;;  %17274 = vst [vmem:[#allocation47_spill] sm:$0xff] %v12342_v28 }
  0xb6   :  { %v440_v2 = vmul.f32 %v292_v30, %v292_v30  ;;  %v441_v63 = vmul.f32 %v293_v35, %v293_v35  ;;  %v472_v22 = vadd.f32 %v471_v26, %v438_v25  ;;  %v524_v14 = vadd.f32 %v523_v10, %v522_v23  ;;  %17273 = vst [vmem:[#allocation46_spill] sm:$0xff] %v12337_v33  ;;  %v12352_v23 = vpop.permute.xlu1 %244 }
  0xb7   :  { %v380_v15 = vsel %vm338_vm0, %v295_v32, 0.0  ;;  %v325_v6 = vadd.f32 %v324_v60, %v292_v30  ;;  %v379_v7 = vadd.f32 %v378_v57, %v377_v38  ;;  %v299_v62 = vmul.f32 %v12313_v18, %v12321_v49  ;;  %17275 = vst [vmem:[#allocation48_spill] sm:$0xff] %v12352_v23 }
  0xb8   :  { %v473_v40 = vadd.f32 %v472_v22, %v440_v2  ;;  %v525_v29 = vsel %vm338_vm0, %v441_v63, 0.0  ;;  %v296_v26 = vmul.f32 %v12303_v13, %v12327_v19  ;;  %v297_v35 = vmul.f32 %v12303_v13, %v12332_v5  ;;  %v12357_v22 = vld [vmem:[%s16980_s0 + $0x198] sm:$0xff] }
  0xb9   :  { %v442_v25 = vmul.f32 %v294_v27, %v294_v27  ;;  %v527_v10 = vsel %vm338_vm0, %v443_v0, 0.0  ;;  %v526_v32 = vadd.f32 %v525_v29, %v524_v14  ;;  %v298_v30 = vmul.f32 %v12313_v18, %v12337_v33  ;;  %17276 = vst [vmem:[#allocation49_spill] sm:$0xff] %v12357_v22  ;;  %v12363_v0 = vld [vmem:[%s16980_s0 + $0x180] sm:$0xff]  ;;  %v12368_v29 = vld [vmem:[%s16980_s0 + $0x188] sm:$0xff] }
  0xba   :  { %v447_v60 = vmul.f32 %v299_v62, %v299_v62  ;;  %v326_v38 = vadd.f32 %v325_v6, %v294_v27  ;;  %v381_v57 = vadd.f32 %v380_v15, %v379_v7  ;;  %v382_v2 = vsel %vm338_vm0, %v297_v35, 0.0  ;;  %17277 = vst [vmem:[#allocation50_spill] sm:$0xff] %v12363_v0  ;;  %17278 = vst [vmem:[#allocation51_spill] sm:$0xff] %v12368_v29  ;;  %v12373_v27 = vld [vmem:[%s16980_s0 + $0x190] sm:$0xff] }
  0xbb   :  { %v444_v14 = vmul.f32 %v296_v26, %v296_v26  ;;  %v445_v63 = vmul.f32 %v297_v35, %v297_v35  ;;  %v474_v18 = vadd.f32 %v473_v40, %v442_v25  ;;  %v528_v33 = vadd.f32 %v527_v10, %v526_v32  ;;  %17279 = vst [vmem:[#allocation52_spill] sm:$0xff] %v12373_v27  ;;  %v12382_v35 = vpop.permute.xlu0 %249 }
  0xbc   :  { %v327_v13 = vadd.f32 %v326_v38, %v296_v26  ;;  %v383_v49 = vadd.f32 %v382_v2, %v381_v57  ;;  %v303_v15 = vmul.f32 %v12352_v23, %v12357_v22  ;;  %v300_v19 = vmul.f32 %v12342_v28, %v12363_v0  ;;  %17280 = vst [vmem:[#allocation53_spill] sm:$0xff] %v12382_v35  ;;  %v12387_v26 = vld [vmem:[%s16980_s0 + $0x1a8] sm:$0xff] }
  0xbd   :  { %v475_v6 = vadd.f32 %v474_v18, %v444_v14  ;;  %v529_v7 = vsel %vm338_vm0, %v445_v63, 0.0  ;;  %v301_v40 = vmul.f32 %v12342_v28, %v12368_v29  ;;  %v384_v25 = vsel %vm338_vm0, %v299_v62, 0.0  ;;  %v12393_v18 = vld [vmem:[%s16980_s0 + $0x1a0] sm:$0xff] }
  0xbe   :  { %v446_v10 = vmul.f32 %v298_v30, %v298_v30  ;;  %v530_v32 = vadd.f32 %v529_v7, %v528_v33  ;;  %v531_v38 = vsel %vm338_vm0, %v447_v60, 0.0  ;;  %v302_v57 = vmul.f32 %v12352_v23, %v12373_v27 }
  0xbf   :  { %v451_v2 = vmul.f32 %v303_v15, %v303_v15  ;;  %v449_v14 = vmul.f32 %v301_v40, %v301_v40  ;;  %v386_v63 = vsel %vm338_vm0, %v301_v40, 0.0  ;;  %v305_v28 = vmul.f32 %v12382_v35, %v12387_v26 }
  0xc0   :  { %v328_v62 = vadd.f32 %v327_v13, %v298_v30  ;;  %v385_v22 = vadd.f32 %v384_v25, %v383_v49  ;;  %v448_v33 = vmul.f32 %v300_v19, %v300_v19  ;;  %v304_v7 = vmul.f32 %v12382_v35, %v12393_v18 }
  0xc1   :  { %v476_v0 = vadd.f32 %v475_v6, %v446_v10  ;;  %v532_v29 = vadd.f32 %v531_v38, %v530_v32  ;;  %v533_v60 = vsel %vm338_vm0, %v449_v14, 0.0  ;;  %v453_v23 = vmul.f32 %v305_v28, %v305_v28 }
  0xc2   :  { %v329_v5 = vadd.f32 %v328_v62, %v300_v19  ;;  %v387_v11 = vadd.f32 %v386_v63, %v385_v22  ;;  %v388_v27 = vsel %vm338_vm0, %v303_v15, 0.0  ;;  %v450_v41 = vmul.f32 %v302_v57, %v302_v57 }
  0xc3   :  { %v477_v40 = vadd.f32 %v476_v0, %v448_v33  ;;  %v534_v39 = vadd.f32 %v533_v60, %v532_v29  ;;  %v535_v43 = vsel %vm338_vm0, %v451_v2, 0.0  ;;  %v390_v30 = vsel %vm338_vm0, %v305_v28, 0.0 }
  0xc4   :  { %v330_v13 = vadd.f32 %v329_v5, %v302_v57  ;;  %v389_v49 = vadd.f32 %v388_v27, %v387_v11  ;;  %v452_v25 = vmul.f32 %v304_v7, %v304_v7  ;;  %v537_v19 = vsel %vm338_vm0, %v453_v23, 0.0 }
  0xc5   :  { %v478_v20 = vadd.f32 %v477_v40, %v450_v41  ;;  %v536_v6 = vadd.f32 %v535_v43, %v534_v39 }
  0xc6   :  { %v331_v10 = vadd.f32 %v330_v13, %v304_v7  ;;  %v391_v32 = vadd.f32 %v390_v30, %v389_v49 }
  0xc7   :  { %v479_v22 = vadd.f32 %v478_v20, %v452_v25  ;;  %v538_v38 = vadd.f32 %v537_v19, %v536_v6 }
  0xc8   :  { %v332_v14 = vrot.slane %v331_v10, 4  ;;  %v392_v15 = vrot.slane %v391_v32, 4 }
  0xc9   :  { %v480_v63 = vrot.slane %v479_v22, 4  ;;  %v539_v0 = vrot.slane %v538_v38, 4 }
  0xca   :  { %v333_v29 = vadd.f32 %v332_v14, %v331_v10  ;;  %v393_v62 = vadd.f32 %v392_v15, %v391_v32 }
  0xcb   :  { %v481_v2 = vadd.f32 %v480_v63, %v479_v22  ;;  %v540_v5 = vadd.f32 %v539_v0, %v538_v38  ;;  %v11586_v0 = vmov 1966171168  }
  0xcc   :  { %v334_v11 = vrot.slane %v333_v29, 2  ;;  %v394_v27 = vrot.slane %v393_v62, 2 }
  0xcd   :  { %v482_v28 = vrot.slane %v481_v2, 2  ;;  %v541_v57 = vrot.slane %v540_v5, 2 }
  0xce   :  { %v335_v41 = vadd.f32 %v334_v11, %v333_v29  ;;  %v395_v43 = vadd.f32 %v394_v27, %v393_v62  ;;  %v560_v29 = vunpack.c.l.s4 %v11586_v0  ;;  %v562_v62 = vlaneseq }
  0xcf   :  { %v483_v39 = vadd.f32 %v482_v28, %v481_v2  ;;  %v542_v33 = vadd.f32 %v541_v57, %v540_v5 }
  0xd0   :  { %v336_v7 = vrot.slane %v335_v41, 1  ;;  %v396_v23 = vrot.slane %v395_v43, 1  ;;  %v561_v2 = vunpack.c.0.s8 %v560_v29  ;;  %v563_v5 = vshrl.u32 %v562_v62, 7 }
  0xd1   :  { %v484_v20 = vrot.slane %v483_v39, 1  ;;  %v543_v60 = vrot.slane %v542_v33, 1 }
  0xd2   :  { %v337_v40 = vadd.f32 %v336_v7, %v335_v41  ;;  %v397_v13 = vadd.f32 %v396_v23, %v395_v43  ;;  %v12408_v27 = vsub.s32 %v561_v2, %v563_v5  ;;  %v551_v43 = vld [vmem:[%s16981_s2] sm:$0x3] }
  0xd3   :  { %v485_v49 = vadd.f32 %v484_v20, %v483_v39  ;;  %v544_v30 = vadd.f32 %v543_v60, %v542_v33  ;;  %v12414_v39 = vsub.s32 0, %v563_v5  ;;  %v12416_v33 = vsub.s32 1, %v563_v5 }
  0xd4   :  { %v398_v25 = vmul.f32 0.0069444445, %v337_v40  ;;  %v399_v6 = vmul.f32 0.0069444445, %v397_v13  ;;  %17281 = vst [vmem:[#allocation54_spill] sm:$0xff] %v12408_v27 }
  0xd5   :  { %v545_v10 = vmul.f32 0.0069444445, %v485_v49  ;;  %v546_v32 = vmul.f32 0.0069444445, %v544_v30  ;;  %17282 = vst [vmem:[#allocation55_spill] sm:$0xff] %v12414_v39  ;;  %17283 = vst [vmem:[#allocation56_spill] sm:$0xff] %v12416_v33 }
  0xd6   :  { %v547_v19 = vmul.f32 %v398_v25, %v398_v25  ;;  %v548_v22 = vmul.f32 %v399_v6, %v399_v6 }
  0xd8   :  { %v549_v38 = vsub.f32 %v545_v10, %v547_v19  ;;  %v550_v14 = vsub.f32 %v546_v32, %v548_v22  ;;  %v11524_v19 = vld [vmem:[%s16980_s0 + $0x8] sm:$0xff] }
  0xda   :  { %v552_v15 = vadd.f32 0.001, %v549_v38  ;;  %v553_v63 = vadd.f32 0.001, %v550_v14  ;;  %v11526_v38 = vld [vmem:[%s16980_s0] sm:$0xff] }
  0xdc   :  { %11512 = vrsqrt.f32 %v552_v15 }
  0xdd   :  { %11514 = vrsqrt.f32 %v553_v63 }
  0xe6   :  { %v11513_v11 = vpop.eup %11512 }
  0xe7   :  { %v11515_v28 = vpop.eup %11514 }
  0xe8   :  { %v558_v57 = vcombine.low %v11513_v11, %v11515_v28 }
  0xea   :  { %v565_v41 = vrot.slane %v558_v57, %v12408_v27 }
  0xec   :  { %v572_v7 = vrot.slane %v565_v41, %v12408_v27 }
  0xee   :  { %v574_v23 = vmul.f32 %v572_v7, %v551_v43 }
  0xf0   :  { %v12420_v20 = vrot.slane %v574_v23, %v12414_v39  ;;  %v12423_v60 = vrot.slane %v574_v23, %v12416_v33 }
  0xf2   :  { %v587_v40 = vmul.f32 %v12420_v20, %v398_v25  ;;  %v588_v13 = vmul.f32 %v12423_v60, %v399_v6  ;;  %v660_v30 = vmul.f32 %v12420_v20, %v12393_v18  ;;  %v661_v10 = vmul.f32 %v12423_v60, %v12387_v26  ;;  %v11525_v6 = vld [vmem:[%s16980_s0 + $0x28] sm:$0xff]  ;;  %v575_v26 = vld [vmem:[%s16982_s3] sm:$0x3] }
  0xf3   :  { %v609_v22 = vmul.f32 %v11524_v19, %v12423_v60  ;;  %v611_v25 = vmul.f32 %v12423_v60, %v11941_v52  ;;  %v613_v18 = vmul.f32 %v11525_v6, %v12423_v60  ;;  %v608_v14 = vmul.f32 %v11526_v38, %v12420_v20  ;;  %v11527_v52 = vld [vmem:[%s16980_s0 + $0x20] sm:$0xff] }
  0xf4   :  { %v591_v49 = vcombine.low %v587_v40, %v588_v13  ;;  %v610_v15 = vmul.f32 %v12420_v20, %v11931_v48  ;;  %v612_v63 = vmul.f32 %v11527_v52, %v12420_v20  ;;  %v615_v0 = vmul.f32 %v12423_v60, %v11926_v47 }
  0xf5   :  { %v617_v62 = vmul.f32 %v12423_v60, %v11992_v9  ;;  %v614_v2 = vmul.f32 %v12420_v20, %v11950_v55  ;;  %v616_v48 = vmul.f32 %v12420_v20, %v11979_v4  ;;  %v619_v5 = vmul.f32 %v12423_v60, %v11974_v3 }
  0xf6   :  { %v598_v32 = vrot.slane %v591_v49, %v12408_v27  ;;  %v621_v11 = vmul.f32 %v12423_v60, %v12045_v44  ;;  %v12470_v47 = vmul.f32 %v12420_v20, %v11987_v8  ;;  %v12474_v28 = vmul.f32 %v12420_v20, %v12030_v36 }
  0xf7   :  { %v12478_v55 = vmul.f32 %v12423_v60, %v12021_v31  ;;  %v12482_v4 = vmul.f32 %v12423_v60, %v12082_v24  ;;  %v12486_v3 = vmul.f32 %v12420_v20, %v12038_v42  ;;  %v12490_v8 = vmul.f32 %v12420_v20, %v12067_v12 }
  0xf8   :  { %v605_v29 = vrot.slane %v598_v32, %v12408_v27  ;;  %v12494_v36 = vmul.f32 %v12423_v60, %v12053_v1  ;;  %v12498_v31 = vmul.f32 %v12423_v60, %v12112_v53  ;;  %v12502_v44 = vmul.f32 %v12420_v20, %v12076_v17  ;;  %v17313_v27 = vld [vmem:[#allocation37_spill] sm:$0xff] }
  0xf9   :  { %v12512_v12 = vmul.f32 %v12420_v20, %v12107_v51  ;;  %v12516_v1 = vmul.f32 %v12423_v60, %v12095_v37  ;;  %v12520_v53 = vmul.f32 %v12423_v60, %v12157_v56  ;;  %v12524_v17 = vmul.f32 %v12420_v20, %v12120_v61 }
  0xfa   :  { %v607_v9 = vsub.f32 %v575_v26, %v605_v29  ;;  %v12528_v57 = vmul.f32 %v12420_v20, %v12152_v54  ;;  %v12532_v51 = vmul.f32 %v12423_v60, %v12133_v16  ;;  %v1051_v26 = vld [vmem:[#allocation2] sm:$0xc0] }
  0xfc   :  { %v12505_v24 = vrot.slane %v607_v9, %v12414_v39  ;;  %v12508_v42 = vrot.slane %v607_v9, %v12416_v33 }
  0xfe   :  { %v725_v41 = vadd.f32 %v12505_v24, %v660_v30  ;;  %v726_v37 = vadd.f32 %v12508_v42, %v661_v10  ;;  %v674_v43 = vadd.f32 %v12508_v42, %v609_v22  ;;  %v676_v56 = vadd.f32 %v12508_v42, %v611_v25 }
  0xff   :  { %v678_v7 = vadd.f32 %v12508_v42, %v613_v18  ;;  %v673_v61 = vadd.f32 %v12505_v24, %v608_v14  ;;  %v675_v23 = vadd.f32 %v12505_v24, %v610_v15  ;;  %v677_v54 = vadd.f32 %v12505_v24, %v612_v63 }
 0x100   :  { %v779_v40 = vmax.f32 %v725_v41, 0.0  ;;  %v780_v13 = vmax.f32 %v726_v37, 0.0  ;;  %v728_v16 = vmax.f32 %v674_v43, 0.0  ;;  %v730_v49 = vmax.f32 %v676_v56, 0.0 }
 0x101   :  { %v732_v32 = vmax.f32 %v678_v7, 0.0  ;;  %v727_v30 = vmax.f32 %v673_v61, 0.0  ;;  %v729_v19 = vmax.f32 %v675_v23, 0.0  ;;  %v731_v10 = vmax.f32 %v677_v54, 0.0 }
 0x102   :  { %v833_v22 = vmul.f32 %v779_v40, %v12382_v35  ;;  %v834_v25 = vmul.f32 %v780_v13, %v12382_v35  ;;  %v782_v6 = vmul.f32 %v728_v16, %v11921_v46  ;;  %v784_v18 = vmul.f32 %v730_v49, %v11955_v59  ;;  %v1052_v16 = vld [vmem:[#allocation2 + $0x8] sm:$0xc0]  ;;  %v17284_v49 = vld [vmem:[#allocation8_spill] sm:$0xff] }
 0x103   :  { %v786_v38 = vmul.f32 %v732_v32, %v11919_v45  ;;  %v12548_v14 = vmul.f32 %v727_v30, %v11921_v46  ;;  %v783_v15 = vmul.f32 %v729_v19, %v11955_v59  ;;  %v785_v52 = vmul.f32 %v731_v10, %v11919_v45  ;;  %v17285_v30 = vld [vmem:[#allocation11_spill] sm:$0xff] }
 0x104   :  { %945 = vst [vmem:[#allocation2 + $0x1b0] sm:$0xff] %v833_v22  ;;  %946 = vst.msk [vmem:[#allocation2 + $0x1b8] sm:$0xff] %vm338_vm0, %v834_v25  ;;  %v680_v63 = vadd.f32 %v12508_v42, %v615_v0  ;;  %v682_v29 = vadd.f32 %v12508_v42, %v617_v62  ;;  %v679_v9 = vadd.f32 %v12505_v24, %v614_v2  ;;  %v17286_v22 = vld [vmem:[#allocation22_spill] sm:$0xff] }
 0x105   :  { %894 = vst.msk [vmem:[#allocation2 + $0x18] sm:$0xff] %vm338_vm0, %v782_v6  ;;  %896 = vst.msk [vmem:[#allocation2 + $0x28] sm:$0xff] %vm338_vm0, %v784_v18  ;;  %v681_v41 = vadd.f32 %v12505_v24, %v616_v48  ;;  %v1055_v37 = vpack.c.bf16 %v12548_v14, %v1051_v26  ;;  %v684_v43 = vadd.f32 %v12508_v42, %v619_v5 }
 0x106   :  { %898 = vst.msk [vmem:[#allocation2 + $0x38] sm:$0xff] %vm338_vm0, %v786_v38  ;;  %893 = vst [vmem:[#allocation2 + $0x10] sm:$0xff] %v12548_v14  ;;  %v686_v56 = vadd.f32 %v12508_v42, %v621_v11  ;;  %v12566_v0 = vmul.f32 %v12423_v60, %v12190_v50  ;;  %v734_v62 = vmax.f32 %v680_v63, 0.0  ;;  %v736_v2 = vmax.f32 %v682_v29, 0.0 }
 0x107   :  { %895 = vst [vmem:[#allocation2 + $0x20] sm:$0xff] %v783_v15  ;;  %897 = vst [vmem:[#allocation2 + $0x30] sm:$0xff] %v785_v52  ;;  %v733_v48 = vmax.f32 %v679_v9, 0.0  ;;  %v735_v7 = vmax.f32 %v681_v41, 0.0  ;;  %v12568_v61 = vpack.c.bf16 %v785_v52, %v783_v15  ;;  %v738_v23 = vmax.f32 %v684_v43, 0.0 }
 0x108   :  { %v740_v54 = vmax.f32 %v686_v56, 0.0  ;;  %v12572_v40 = vmul.f32 %v12420_v20, %v12146_v34  ;;  %v788_v5 = vmul.f32 %v734_v62, %v11953_v58  ;;  %v790_v11 = vmul.f32 %v736_v2, %v12006_v21 }
 0x109   :  { %v787_v50 = vmul.f32 %v733_v48, %v11953_v58  ;;  %v789_v13 = vmul.f32 %v735_v7, %v12006_v21  ;;  %v792_v32 = vmul.f32 %v738_v23, %v17284_v49  ;;  %v683_v10 = vadd.f32 %v12505_v24, %v12470_v47  ;;  %v17287_v48 = vld [vmem:[#allocation10_spill] sm:$0xff] }
 0x10a   :  { %v794_v19 = vmul.f32 %v740_v54, %v17285_v30  ;;  %v12584_v34 = vmul.f32 %v12420_v20, %v17286_v22  ;;  %v1109_v25 = vrot.slane %v1055_v37, 3  ;;  %900 = vst.msk [vmem:[#allocation2 + $0x48] sm:$0xff] %vm338_vm0, %v788_v5  ;;  %902 = vst.msk [vmem:[#allocation2 + $0x58] sm:$0xff] %vm338_vm0, %v790_v11  ;;  %v685_v6 = vadd.f32 %v12505_v24, %v12474_v28 }
 0x10b   :  { %899 = vst [vmem:[#allocation2 + $0x40] sm:$0xff] %v787_v50  ;;  %901 = vst [vmem:[#allocation2 + $0x50] sm:$0xff] %v789_v13  ;;  %v688_v18 = vadd.f32 %v12508_v42, %v12478_v55  ;;  %v690_v47 = vadd.f32 %v12508_v42, %v12482_v4  ;;  %v1110_v15 = vrot.slane %v12568_v61, 3  ;;  %v737_v52 = vmax.f32 %v683_v10, 0.0 }
 0x10c   :  { %v12594_v26 = vld [vmem:[#allocation2 + $0x18] sm:$0xff]  ;;  %v952_v38 = vld [vmem:[#allocation2 + $0x28] sm:$0xff]  ;;  %904 = vst.msk [vmem:[#allocation2 + $0x68] sm:$0xff] %vm338_vm0, %v792_v32  ;;  %906 = vst.msk [vmem:[#allocation2 + $0x78] sm:$0xff] %vm338_vm0, %v794_v19  ;;  %v687_v63 = vadd.f32 %v12505_v24, %v12486_v3  ;;  %v689_v28 = vadd.f32 %v12505_v24, %v12490_v8  ;;  %v739_v4 = vmax.f32 %v685_v6, 0.0  ;;  %v692_v41 = vadd.f32 %v12508_v42, %v12494_v36 }
 0x10d   :  { %v954_v55 = vld [vmem:[#allocation2 + $0x38] sm:$0xff]  ;;  %v1056_v29 = vpack.c.bf16 %v12594_v26, %v1052_v16  ;;  %v742_v9 = vmax.f32 %v688_v18, 0.0  ;;  %v12609_v43 = vmul.f32 %v737_v52, %v17284_v49  ;;  %v744_v56 = vmax.f32 %v690_v47, 0.0  ;;  %v17288_v36 = vld [vmem:[#allocation13_spill] sm:$0xff]  ;;  %v17289_v19 = vld [vmem:[#allocation20_spill] sm:$0xff] }
 0x10e   :  { %v12606_v37 = vpack.c.bf16 %v954_v55, %v952_v38  ;;  %v741_v62 = vmax.f32 %v687_v63, 0.0  ;;  %v12611_v3 = vpack.c.bf16 %v789_v13, %v787_v50  ;;  %v12614_v8 = vmul.f32 %v739_v4, %v17285_v30  ;;  %v11122_v50 = vld [vmem:[%s16979_s4] ss:$8 sps:$4 sm:$0xff]  }
 0x10f   :  { %v1112_v2 = vrot.slane %v1056_v29, 3  ;;  %v796_v7 = vmul.f32 %v742_v9, %v17287_v48  ;;  %903 = vst [vmem:[#allocation2 + $0x60] sm:$0xff] %v12609_v43  ;;  %v798_v54 = vmul.f32 %v744_v56, %v17288_v36  ;;  %v743_v5 = vmax.f32 %v689_v28, 0.0  ;;  %v17290_v55 = vld [vmem:[#allocation12_spill] sm:$0xff] }
 0x110   :  { %v1113_v23 = vrot.slane %v12606_v37, 3  ;;  %v12621_v11 = vmul.f32 %v741_v62, %v17287_v48  ;;  %905 = vst [vmem:[#allocation2 + $0x70] sm:$0xff] %v12614_v8  ;;  %v694_v13 = vadd.f32 %v12508_v42, %v12498_v31  ;;  %v746_v16 = vmax.f32 %v692_v41, 0.0  ;;  %v11127_v31 = vld [vmem:[%s16979_s4 + $0x14] ss:$8 sps:$4 sm:$0xff]  }
 0x111   :  { %908 = vst.msk [vmem:[#allocation2 + $0x88] sm:$0xff] %vm338_vm0, %v796_v7  ;;  %v691_v32 = vadd.f32 %v12505_v24, %v12502_v44  ;;  %v12634_v10 = vmul.f32 %v12423_v60, %v17289_v19  ;;  %v1111_v6 = vsel %vm1108_vm1, %v1109_v25, %v1110_v15  ;;  %v956_v18 = vld [vmem:[#allocation2 + $0x48] sm:$0xff]  ;;  %v958_v47 = vld [vmem:[#allocation2 + $0x58] sm:$0xff]  ;;  %910 = vst.msk [vmem:[#allocation2 + $0x98] sm:$0xff] %vm338_vm0, %v798_v54  ;;  %v1115_v9 = vrot.slane %v12611_v3, 3 }
 0x112   :  { %v1114_v22 = vsel %vm1108_vm1, %v1112_v2, %v1113_v23  ;;  %v12645_v44 = vmul.f32 %v743_v5, %v17288_v36  ;;  %907 = vst [vmem:[#allocation2 + $0x80] sm:$0xff] %v12621_v11  ;;  %v693_v38 = vadd.f32 %v12505_v24, %v12512_v12  ;;  %v12651_v52 = vpack.c.bf16 %v958_v47, %v956_v18  ;;  %v11125_v2 = vld [vmem:[%s16979_s4 + $0x10] ss:$8 sps:$4 sm:$0xff]   ;;  %v17292_v5 = vld [vmem:[#allocation28_spill] sm:$0xff] }
 0x113   :  { %9739 = vmatprep.mubr.msk.bf16.mxu0 %vm338_vm0, %v1114_v22  ;;  %v960_v25 = vld [vmem:[#allocation2 + $0x68] sm:$0xff]  ;;  %v962_v63 = vld [vmem:[#allocation2 + $0x78] sm:$0xff]  ;;  %v748_v28 = vmax.f32 %v694_v13, 0.0  ;;  %v800_v29 = vmul.f32 %v746_v16, %v17290_v55  ;;  %v696_v4 = vadd.f32 %v12508_v42, %v12516_v1  ;;  %v745_v12 = vmax.f32 %v691_v32, 0.0  ;;  %v17293_v19 = vld [vmem:[#allocation24_spill] sm:$0xff] }
 0x114   :  { %1352 = vmatmul.mubr.bf16.vlgmr.msra.gmra.mrb[0].mxu0 %v1111_v6  ;;  %v12657_v41 = vpack.c.bf16 %v962_v63, %v960_v25  ;;  %909 = vst [vmem:[#allocation2 + $0x90] sm:$0xff] %v12645_v44  ;;  %v747_v56 = vmax.f32 %v693_v38, 0.0  ;;  %v1117_v62 = vrot.slane %v12651_v52, 3  ;;  %v17291_v7 = vld [vmem:[#allocation15_spill] sm:$0xff]  ;;  %v698_v1 = vadd.f32 %v12508_v42, %v12520_v53 }
 0x115   :  { %1898 = vmatpush1.bf16.msra.mxu0 %v11122_v50  ;;  %v802_v54 = vmul.f32 %v748_v28, %v17291_v7  ;;  %912 = vst.msk [vmem:[#allocation2 + $0xa8] sm:$0xff] %vm338_vm0, %v800_v29  ;;  %v641_v13 = vmul.f32 %v12423_v60, %v17292_v5  ;;  %v11130_v50 = vld [vmem:[%s16979_s4 + $0x24] ss:$8 sps:$4 sm:$0xff]   ;;  %v12674_v16 = vmul.f32 %v745_v12, %v17290_v55  ;;  %v17294_v6 = vld [vmem:[#allocation27_spill] sm:$0xff]  ;;  %v750_v47 = vmax.f32 %v696_v4, 0.0 }
 0x116   :  { %1899 = vmatprep.subr.bf16.mxu0 %v11127_v31  ;;  %v12677_v32 = vmul.f32 %v747_v56, %v17291_v7  ;;  %v12681_v22 = vmul.f32 %v12420_v20, %v17293_v19  ;;  %v12685_v53 = vmul.f32 %v12420_v20, %v17294_v6  ;;  %v1118_v18 = vsel %vm1108_vm1, %v1113_v23, %v1117_v62  ;;  %v17295_v29 = vld [vmem:[#allocation25_spill] sm:$0xff] }
 0x117   :  { %914 = vst.msk [vmem:[#allocation2 + $0xb8] sm:$0xff] %vm338_vm0, %v802_v54  ;;  %v752_v31 = vmax.f32 %v698_v1, 0.0  ;;  %v695_v38 = vadd.f32 %v12505_v24, %v12524_v17  ;;  %9740 = vmatprep.mubr.msk.bf16.mxu0 %vm338_vm0, %v1118_v18  ;;  %v1116_v25 = vsel %vm1108_vm1, %v1110_v15, %v1115_v9  ;;  %v1121_v63 = vrot.slane %v12657_v41, 3  ;;  %911 = vst [vmem:[#allocation2 + $0xa0] sm:$0xff] %v12674_v16  ;;  %v11128_v12 = vld [vmem:[%s16979_s4 + $0x20] ss:$8 sps:$4 sm:$0xff]  }
 0x118   :  { %v964_v28 = vld [vmem:[#allocation2 + $0x88] sm:$0xff]  ;;  %913 = vst [vmem:[#allocation2 + $0xb0] sm:$0xff] %v12677_v32  ;;  %v697_v23 = vadd.f32 %v12505_v24, %v12528_v57  ;;  %v643_v17 = vmul.f32 %v12423_v60, %v17295_v29  ;;  %v966_v4 = vld [vmem:[#allocation2 + $0x98] sm:$0xff]  ;;  %v17296_v15 = vld [vmem:[#allocation14_spill] sm:$0xff]  ;;  %v700_v19 = vadd.f32 %v12508_v42, %v12532_v51  ;;  %v12713_v57 = vpack.c.bf16 %v12614_v8, %v12609_v43 }
 0x119   :  { %1900 = vmatpush1.bf16.msra.mxu0 %v11125_v2  ;;  %v804_v56 = vmul.f32 %v750_v47, %v17296_v15  ;;  %v17297_v54 = vld [vmem:[#allocation17_spill] sm:$0xff]  ;;  %v749_v5 = vmax.f32 %v695_v38, 0.0  ;;  %v12715_v6 = vpack.c.bf16 %v966_v4, %v964_v28  ;;  %v11133_v2 = vld [vmem:[%s16979_s4 + $0x34] ss:$8 sps:$4 sm:$0xff]   ;;  %v702_v47 = vadd.f32 %v12508_v42, %v12566_v0 }
 0x11a   :  { %v806_v1 = vmul.f32 %v752_v31, %v17297_v54  ;;  %1901 = vmatprep.subr.bf16.mxu0 %v11130_v50  ;;  %v751_v18 = vmax.f32 %v697_v23, 0.0  ;;  %v754_v43 = vmax.f32 %v700_v19, 0.0  ;;  %v699_v8 = vadd.f32 %v12505_v24, %v12572_v40  ;;  %v17298_v28 = vld [vmem:[#allocation33_spill] sm:$0xff]  ;;  %v11131_v40 = vld [vmem:[%s16979_s4 + $0x30] ss:$8 sps:$4 sm:$0xff]  }
 0x11b   :  { %916 = vst.msk [vmem:[#allocation2 + $0xc8] sm:$0xff] %vm338_vm0, %v804_v56  ;;  %v12725_v51 = vmul.f32 %v749_v5, %v17296_v15  ;;  %v701_v50 = vadd.f32 %v12505_v24, %v12584_v34  ;;  %v1122_v31 = vsel %vm1108_vm1, %v1117_v62, %v1121_v63  ;;  %v756_v38 = vmax.f32 %v702_v47, 0.0  ;;  %v17299_v34 = vld [vmem:[#allocation16_spill] sm:$0xff] }
 0x11c   :  { %918 = vst.msk [vmem:[#allocation2 + $0xd8] sm:$0xff] %vm338_vm0, %v806_v1  ;;  %1362 = vmatmul.mubr.bf16.gmra.mrb[4].mxu0 %v1116_v25  ;;  %v12735_v0 = vmul.f32 %v751_v18, %v17297_v54  ;;  %v645_v23 = vmul.f32 %v12423_v60, %v17298_v28  ;;  %v808_v25 = vmul.f32 %v754_v43, %v17299_v34  ;;  %v753_v29 = vmax.f32 %v699_v8, 0.0  ;;  %v11136_v19 = vld [vmem:[%s16979_s4 + $0x44] ss:$8 sps:$4 sm:$0xff]  }
 0x11d   :  { %9741 = vmatprep.mubr.msk.bf16.mxu0 %vm338_vm0, %v1122_v31  ;;  %1902 = vmatpush1.bf16.msra.mxu0 %v11128_v12  ;;  %915 = vst [vmem:[#allocation2 + $0xc0] sm:$0xff] %v12725_v51  ;;  %v755_v62 = vmax.f32 %v701_v50, 0.0  ;;  %v704_v4 = vadd.f32 %v12508_v42, %v12634_v10  ;;  %v1119_v56 = vrot.slane %v12713_v57, 3  ;;  %v12750_v1 = vpack.c.bf16 %v12645_v44, %v12621_v11  ;;  %v17300_v12 = vld [vmem:[#allocation19_spill] sm:$0xff]  ;;  %v17301_v31 = vld [vmem:[#allocation29_spill] sm:$0xff] }
 0x11e   :  { %1903 = vmatprep.subr.bf16.mxu0 %v11133_v2  ;;  %917 = vst [vmem:[#allocation2 + $0xd0] sm:$0xff] %v12735_v0  ;;  %v810_v5 = vmul.f32 %v756_v38, %v17300_v12  ;;  %v706_v18 = vadd.f32 %v12508_v42, %v641_v13  ;;  %v17054_v47 = vrot.slane %v12715_v6, 3  ;;  %920 = vst.msk [vmem:[#allocation2 + $0xe8] sm:$0xff] %vm338_vm0, %v808_v25  ;;  %v968_v2 = vld [vmem:[#allocation2 + $0xa8] sm:$0xff]  ;;  %v970_v43 = vld [vmem:[#allocation2 + $0xb8] sm:$0xff]  ;;  %v17340_v7 = vshll.u32 %v12568_v61, 16 }
 0x11f   :  { %v12761_v10 = vmul.f32 %v753_v29, %v17299_v34  ;;  %v12764_v11 = vmul.f32 %v755_v62, %v17300_v12  ;;  %v758_v44 = vmax.f32 %v704_v4, 0.0  ;;  %v703_v50 = vadd.f32 %v12505_v24, %v12681_v22  ;;  %v11134_v25 = vld [vmem:[%s16979_s4 + $0x40] ss:$8 sps:$4 sm:$0xff]   ;;  %v17302_v22 = vld [vmem:[#allocation18_spill] sm:$0xff] }
 0x120   :  { %922 = vst.msk [vmem:[#allocation2 + $0xf8] sm:$0xff] %vm338_vm0, %v810_v5  ;;  %v760_v8 = vmax.f32 %v706_v18, 0.0  ;;  %v705_v13 = vadd.f32 %v12505_v24, %v12685_v53  ;;  %v642_v38 = vmul.f32 %v12420_v20, %v17301_v31  ;;  %v12775_v28 = vpack.c.bf16 %v12677_v32, %v12674_v16  ;;  %v17303_v62 = vld [vmem:[#allocation32_spill] sm:$0xff]  ;;  %v17304_v32 = vld [vmem:[#allocation21_spill] sm:$0xff]  ;;  %v11139_v5 = vld [vmem:[%s16979_s4 + $0x54] ss:$8 sps:$4 sm:$0xff]  }
 0x121   :  { %1904 = vmatpush1.bf16.msra.mxu0 %v11131_v40  ;;  %919 = vst [vmem:[#allocation2 + $0xe0] sm:$0xff] %v12761_v10  ;;  %921 = vst [vmem:[#allocation2 + $0xf0] sm:$0xff] %v12764_v11  ;;  %v812_v29 = vmul.f32 %v758_v44, %v17302_v22  ;;  %v708_v53 = vadd.f32 %v12508_v42, %v643_v17  ;;  %v644_v4 = vmul.f32 %v12420_v20, %v17303_v62 }
 0x122   :  { %v1120_v16 = vsel %vm1108_vm1, %v1115_v9, %v1119_v56  ;;  %1905 = vmatprep.subr.bf16.mxu0 %v11136_v19  ;;  %v814_v40 = vmul.f32 %v760_v8, %v17304_v32  ;;  %v757_v18 = vmax.f32 %v703_v50, 0.0  ;;  %v759_v44 = vmax.f32 %v705_v13, 0.0 }
 0x123   :  { %v1126_v17 = vsel %vm1108_vm1, %v1121_v63, %v17054_v47  ;;  %v1123_v31 = vrot.slane %v12750_v1, 3  ;;  %v12801_v62 = vpack.c.bf16 %v970_v43, %v968_v2  ;;  %924 = vst.msk [vmem:[#allocation2 + $0x108] sm:$0xff] %vm338_vm0, %v812_v29  ;;  %v710_v9 = vadd.f32 %v12508_v42, %v645_v23  ;;  %v972_v43 = vld [vmem:[#allocation2 + $0xc8] sm:$0xff]  ;;  %v974_v13 = vld [vmem:[#allocation2 + $0xd8] sm:$0xff] }
 0x124   :  { %1372 = vmatmul.mubr.bf16.gmra.mrb[8].mxu0 %v1120_v16  ;;  %926 = vst.msk [vmem:[#allocation2 + $0x118] sm:$0xff] %vm338_vm0, %v814_v40  ;;  %v12807_v19 = vmul.f32 %v757_v18, %v17302_v22  ;;  %v12810_v8 = vmul.f32 %v759_v44, %v17304_v32  ;;  %v762_v50 = vmax.f32 %v708_v53, 0.0  ;;  %v707_v63 = vadd.f32 %v12505_v24, %v642_v38  ;;  %v11137_v23 = vld [vmem:[%s16979_s4 + $0x50] ss:$8 sps:$4 sm:$0xff]  }
 0x125   :  { %9742 = vmatprep.mubr.msk.bf16.mxu0 %vm338_vm0, %v1126_v17  ;;  %v1127_v2 = vrot.slane %v12775_v28, 3  ;;  %1906 = vmatpush1.bf16.msra.mxu0 %v11134_v25  ;;  %v764_v29 = vmax.f32 %v710_v9, 0.0  ;;  %v709_v16 = vadd.f32 %v12505_v24, %v644_v4  ;;  %v12821_v40 = vpack.c.bf16 %v12735_v0, %v12725_v51  ;;  %v17305_v38 = vld [vmem:[#allocation23_spill] sm:$0xff]  ;;  %v11142_v17 = vld [vmem:[%s16979_s4 + $0x64] ss:$8 sps:$4 sm:$0xff]   ;;  %v17307_v9 = vld [vmem:[#allocation26_spill] sm:$0xff] }
 0x126   :  { %1907 = vmatprep.subr.bf16.mxu0 %v11139_v5  ;;  %923 = vst [vmem:[#allocation2 + $0x100] sm:$0xff] %v12807_v19  ;;  %925 = vst [vmem:[#allocation2 + $0x110] sm:$0xff] %v12810_v8  ;;  %v816_v53 = vmul.f32 %v762_v50, %v17305_v38  ;;  %v761_v18 = vmax.f32 %v707_v63, 0.0  ;;  %v17306_v25 = vld [vmem:[#allocation31_spill] sm:$0xff]  ;;  %v1129_v4 = vrot.slane %v12801_v62, 3  ;;  %v1124_v50 = vsel %vm1108_vm1, %v1119_v56, %v1123_v31 }
 0x127   :  { %v647_v44 = vmul.f32 %v12423_v60, %v17306_v25  ;;  %v818_v51 = vmul.f32 %v764_v29, %v17307_v9  ;;  %v763_v0 = vmax.f32 %v709_v16, 0.0  ;;  %v17308_v5 = vld [vmem:[#allocation39_spill] sm:$0xff]  ;;  %v12838_v63 = vpack.c.bf16 %v974_v13, %v972_v43  ;;  %v11140_v56 = vld [vmem:[%s16979_s4 + $0x60] ss:$8 sps:$4 sm:$0xff]  }
 0x128   :  { %v649_v47 = vmul.f32 %v12423_v60, %v17308_v5  ;;  %928 = vst.msk [vmem:[#allocation2 + $0x128] sm:$0xff] %vm338_vm0, %v816_v53  ;;  %v12842_v25 = vmul.f32 %v761_v18, %v17305_v38  ;;  %v17309_v43 = vld [vmem:[#allocation35_spill] sm:$0xff]  ;;  %v17310_v53 = vld [vmem:[#allocation38_spill] sm:$0xff]  ;;  %v651_v35 = vmul.f32 %v12423_v60, %v17313_v27  ;;  %v17080_v34 = vshrl.u32 %v12651_v52, 16 }
 0x129   :  { %v712_v33 = vadd.f32 %v12508_v42, %v647_v44  ;;  %1908 = vmatpush1.bf16.msra.mxu0 %v11137_v23  ;;  %930 = vst.msk [vmem:[#allocation2 + $0x138] sm:$0xff] %vm338_vm0, %v818_v51  ;;  %v12847_v29 = vmul.f32 %v763_v0, %v17307_v9  ;;  %v646_v13 = vmul.f32 %v12420_v20, %v17309_v43  ;;  %v976_v51 = vld [vmem:[#allocation2 + $0xe8] sm:$0xff]  ;;  %v978_v0 = vld [vmem:[#allocation2 + $0xf8] sm:$0xff]  ;;  %v17081_v55 = vshll.u32 %v12651_v52, 16 }
 0x12a   :  { %v714_v16 = vadd.f32 %v12508_v42, %v649_v47  ;;  %v648_v18 = vmul.f32 %v12420_v20, %v17310_v53  ;;  %v12858_v44 = vsel %vm1108_vm1, %v1123_v31, %v1127_v2  ;;  %v12863_v47 = vpack.c.bf16 %v12764_v11, %v12761_v10  ;;  %927 = vst [vmem:[#allocation2 + $0x120] sm:$0xff] %v12842_v25  ;;  %v11145_v43 = vld [vmem:[%s16979_s4 + $0x74] ss:$8 sps:$4 sm:$0xff]   ;;  %v17314_v9 = vld [vmem:[#allocation45_spill] sm:$0xff] }
 0x12b   :  { %v766_v5 = vmax.f32 %v712_v33, 0.0  ;;  %1909 = vmatprep.subr.bf16.mxu0 %v11142_v17  ;;  %v17311_v53 = vrot.slane %v12715_v6, 3  ;;  %929 = vst [vmem:[#allocation2 + $0x130] sm:$0xff] %v12847_v29  ;;  %v711_v39 = vadd.f32 %v12505_v24, %v646_v13  ;;  %v17312_v33 = vld [vmem:[#allocation30_spill] sm:$0xff]  ;;  %v653_v38 = vmul.f32 %v12423_v60, %v17314_v9 }
 0x12c   :  { %v768_v23 = vmax.f32 %v714_v16, 0.0  ;;  %v713_v10 = vadd.f32 %v12505_v24, %v648_v18  ;;  %1382 = vmatmul.mubr.bf16.gmra.mrb[12].mxu0 %v1124_v50  ;;  %v17315_v16 = vld [vmem:[#allocation34_spill] sm:$0xff]  ;;  %v716_v9 = vadd.f32 %v12508_v42, %v651_v35  ;;  %v17092_v48 = vshrl.u32 %v12713_v57, 16 }
 0x12d   :  { %v1130_v31 = vsel %vm1108_vm1, %v17311_v53, %v1129_v4  ;;  %v820_v17 = vmul.f32 %v766_v5, %v17312_v33  ;;  %v12882_v53 = vpack.c.bf16 %v978_v0, %v976_v51  ;;  %1910 = vmatpush1.bf16.msra.mxu0 %v11140_v56  ;;  %v765_v13 = vmax.f32 %v711_v39, 0.0  ;;  %v11143_v50 = vld [vmem:[%s16979_s4 + $0x70] ss:$8 sps:$4 sm:$0xff]   ;;  %v11148_v56 = vld [vmem:[%s16979_s4 + $0x84] ss:$8 sps:$4 sm:$0xff]  }
 0x12e   :  { %9743 = vmatprep.mubr.msk.bf16.mxu0 %vm338_vm0, %v1130_v31  ;;  %v822_v32 = vmul.f32 %v768_v23, %v17315_v16  ;;  %v767_v18 = vmax.f32 %v713_v10, 0.0  ;;  %v17316_v5 = vrot.slane %v12821_v40, 3  ;;  %v718_v51 = vadd.f32 %v12508_v42, %v653_v38  ;;  %1911 = vmatprep.subr.bf16.mxu0 %v11145_v43  ;;  %v17317_v23 = vld [vmem:[#allocation40_spill] sm:$0xff]  ;;  %v980_v38 = vld [vmem:[#allocation2 + $0x108] sm:$0xff]  ;;  %v982_v43 = vld [vmem:[#allocation2 + $0x118] sm:$0xff] }
 0x12f   :  { %932 = vst.msk [vmem:[#allocation2 + $0x148] sm:$0xff] %vm338_vm0, %v820_v17  ;;  %v650_v39 = vmul.f32 %v12420_v20, %v17317_v23  ;;  %v17318_v10 = vld [vmem:[#allocation44_spill] sm:$0xff]  ;;  %v12909_v17 = vpack.c.bf16 %v12810_v8, %v12807_v19  ;;  %v17319_v0 = vrot.slane %v12838_v63, 3  ;;  %v984_v8 = vld [vmem:[#allocation2 + $0x128] sm:$0xff]  ;;  %v17097_v49 = vshrl.u32 %v12750_v1, 16 }
 0x130   :  { %v12891_v27 = vsel %vm1108_vm1, %v1127_v2, %v17316_v5  ;;  %934 = vst.msk [vmem:[#allocation2 + $0x158] sm:$0xff] %vm338_vm0, %v822_v32  ;;  %v819_v2 = vmul.f32 %v765_v13, %v17312_v33  ;;  %v821_v31 = vmul.f32 %v767_v18, %v17315_v16  ;;  %v652_v35 = vmul.f32 %v12420_v20, %v17318_v10  ;;  %v17320_v10 = vld [vmem:[#allocation43_spill] sm:$0xff]  ;;  %v11146_v19 = vld [vmem:[%s16979_s4 + $0x80] ss:$8 sps:$4 sm:$0xff]  }
 0x131   :  { %v770_v5 = vmax.f32 %v716_v9, 0.0  ;;  %v772_v23 = vmax.f32 %v718_v51, 0.0  ;;  %v715_v11 = vadd.f32 %v12505_v24, %v650_v39  ;;  %v1134_v32 = vsel %vm1108_vm1, %v1129_v4, %v17319_v0  ;;  %1912 = vmatpush1.bf16.msra.mxu0 %v11143_v50  ;;  %v986_v9 = vld [vmem:[#allocation2 + $0x138] sm:$0xff]  ;;  %v17321_v51 = vld [vmem:[#allocation36_spill] sm:$0xff]  ;;  %v17322_v33 = vld [vmem:[#allocation41_spill] sm:$0xff] }
 0x132   :  { %931 = vst [vmem:[#allocation2 + $0x140] sm:$0xff] %v819_v2  ;;  %933 = vst [vmem:[#allocation2 + $0x150] sm:$0xff] %v821_v31  ;;  %v717_v18 = vadd.f32 %v12505_v24, %v652_v35  ;;  %v655_v16 = vmul.f32 %v12423_v60, %v17320_v10  ;;  %v17323_v13 = vld [vmem:[#allocation51_spill] sm:$0xff]  ;;  %1913 = vmatprep.subr.bf16.mxu0 %v11148_v56  ;;  %v12929_v35 = vpack.c.bf16 %v982_v43, %v980_v38  ;;  %v17325_v43 = vld [vmem:[#allocation50_spill] sm:$0xff] }
 0x133   :  { %v824_v39 = vmul.f32 %v770_v5, %v17321_v51  ;;  %v826_v4 = vmul.f32 %v772_v23, %v17322_v33  ;;  %v769_v0 = vmax.f32 %v715_v11, 0.0  ;;  %v657_v22 = vmul.f32 %v12423_v60, %v17323_v13  ;;  %v11151_v50 = vld [vmem:[%s16979_s4 + $0x94] ss:$8 sps:$4 sm:$0xff]  }
 0x134   :  { %v12933_v10 = vpack.c.bf16 %v12847_v29, %v12842_v25  ;;  %v771_v12 = vmax.f32 %v717_v18, 0.0  ;;  %v720_v5 = vadd.f32 %v12508_v42, %v655_v16  ;;  %1392 = vmatmul.mubr.bf16.gmra.mrb[16].mxu0 %v12858_v44  ;;  %v17324_v23 = vld [vmem:[#allocation46_spill] sm:$0xff]  ;;  %v656_v25 = vmul.f32 %v12420_v20, %v17325_v43  ;;  %v17329_v43 = vld [vmem:[#allocation47_spill] sm:$0xff] }
 0x135   :  { %936 = vst.msk [vmem:[#allocation2 + $0x168] sm:$0xff] %vm338_vm0, %v824_v39  ;;  %938 = vst.msk [vmem:[#allocation2 + $0x178] sm:$0xff] %vm338_vm0, %v826_v4  ;;  %v823_v11 = vmul.f32 %v769_v0, %v17321_v51  ;;  %v722_v56 = vadd.f32 %v12508_v42, %v657_v22  ;;  %v654_v38 = vmul.f32 %v12420_v20, %v17324_v23  ;;  %9744 = vmatprep.mubr.msk.bf16.mxu0 %vm338_vm0, %v1134_v32  ;;  %v11149_v22 = vld [vmem:[%s16979_s4 + $0x90] ss:$8 sps:$4 sm:$0xff]   ;;  %v17328_v23 = vld [vmem:[#allocation52_spill] sm:$0xff] }
 0x136   :  { %v12946_v29 = vpack.c.bf16 %v986_v9, %v984_v8  ;;  %v988_v16 = vld [vmem:[#allocation2 + $0x148] sm:$0xff]  ;;  %v12948_v44 = vpack.c.bf16 %v821_v31, %v819_v2  ;;  %v825_v13 = vmul.f32 %v771_v12, %v17322_v33  ;;  %v774_v18 = vmax.f32 %v720_v5, 0.0  ;;  %1914 = vmatpush1.bf16.msra.mxu0 %v11146_v19  ;;  %v17327_v5 = vld [vmem:[#allocation42_spill] sm:$0xff] }
 0x137   :  { %v990_v39 = vld [vmem:[#allocation2 + $0x158] sm:$0xff]  ;;  %935 = vst [vmem:[#allocation2 + $0x160] sm:$0xff] %v823_v11  ;;  %v776_v4 = vmax.f32 %v722_v56, 0.0  ;;  %v719_v0 = vadd.f32 %v12505_v24, %v654_v38  ;;  %v721_v32 = vadd.f32 %v12505_v24, %v656_v25  ;;  %v17326_v8 = vld [vmem:[#allocation49_spill] sm:$0xff]  ;;  %1915 = vmatprep.subr.bf16.mxu0 %v11151_v50  ;;  %v658_v38 = vmul.f32 %v12420_v20, %v17328_v23 }
 0x138   :  { %v659_v9 = vmul.f32 %v12423_v60, %v17326_v8  ;;  %v948_v2 = vld [vmem:[#allocation2 + $0x8] sm:$0xe0]  ;;  %v12961_v31 = vpack.c.bf16 %v990_v39, %v988_v16  ;;  %937 = vst [vmem:[#allocation2 + $0x170] sm:$0xff] %v825_v13  ;;  %v12963_v19 = vpack.c.bf16 %v825_v13, %v823_v11  ;;  %v828_v56 = vmul.f32 %v774_v18, %v17327_v5 }
 0x139   :  { %v11154_v12 = vld [vmem:[%s16979_s4 + $0x144] ss:$8 sps:$4 sm:$0xff]   ;;  %v830_v25 = vmul.f32 %v776_v4, %v17329_v43  ;;  %v773_v33 = vmax.f32 %v719_v0, 0.0  ;;  %v775_v60 = vmax.f32 %v721_v32, 0.0  ;;  %v17330_v8 = vrot.slane %v12882_v53, 3 }
 0x13a   :  { %v724_v50 = vadd.f32 %v12508_v42, %v659_v9  ;;  %v17331_v51 = vrot.slane %v12838_v63, 3  ;;  %v1139_v11 = vrot.slane %v12909_v17, 3  ;;  %940 = vst.msk [vmem:[#allocation2 + $0x188] sm:$0xff] %vm338_vm0, %v828_v56  ;;  %v723_v13 = vadd.f32 %v12505_v24, %v658_v38  ;;  %1916 = vmatpush1.bf16.msra.mxu0 %v11149_v22 }
 0x13b   :  { %v1004_v20 = vpack.c.bf16 %v12594_v26, %v948_v2  ;;  %v1143_v18 = vrot.slane %v12933_v10, 3  ;;  %942 = vst.msk [vmem:[#allocation2 + $0x198] sm:$0xff] %vm338_vm0, %v830_v25  ;;  %v827_v42 = vmul.f32 %v773_v33, %v17327_v5  ;;  %v829_v39 = vmul.f32 %v775_v60, %v17329_v43  ;;  %2384 = vmatprep.subr.bf16.mxu0 %v11154_v12  ;;  %v17332_v33 = vld [vmem:[#allocation48_spill] sm:$0xff] }
 0x13c   :  { %v1138_v16 = vsel %vm1108_vm1, %v17331_v51, %v17330_v8  ;;  %v778_v4 = vmax.f32 %v724_v50, 0.0  ;;  %v1141_v51 = vrot.slane %v12929_v35, 3  ;;  %v1145_v0 = vrot.slane %v12946_v29, 3  ;;  %v992_v24 = vld [vmem:[#allocation2 + $0x168] sm:$0xff]  ;;  %v994_v22 = vld [vmem:[#allocation2 + $0x178] sm:$0xff]  ;;  %1402 = vmatmul.mubr.bf16.gmra.mrb[20].mxu0 %v12891_v27 }
 0x13d   :  { %v1147_v32 = vrot.slane %v12948_v44, 3  ;;  %v777_v9 = vmax.f32 %v723_v13, 0.0  ;;  %v1149_v26 = vrot.slane %v12961_v31, 3  ;;  %v1151_v2 = vrot.slane %v12963_v19, 3  ;;  %939 = vst [vmem:[#allocation2 + $0x180] sm:$0xff] %v827_v42  ;;  %941 = vst [vmem:[#allocation2 + $0x190] sm:$0xff] %v829_v39  ;;  %9745 = vmatprep.mubr.msk.bf16.mxu0 %vm338_vm0, %v1138_v16 }
 0x13e   :  { %v832_v56 = vmul.f32 %v778_v4, %v17332_v33  ;;  %v12992_v23 = vpack.c.bf16 %v994_v22, %v992_v24  ;;  %v1509_v25 = vshrl.u32 %v1004_v20, 16  ;;  %v17333_v60 = vrot.slane %v12863_v47, 3 }
 0x13f   :  { %v12995_v38 = vmul.f32 %v777_v9, %v17332_v33  ;;  %v17334_v50 = vrot.slane %v12821_v40, 3  ;;  %v13008_v16 = vpack.c.bf16 %v829_v39, %v827_v42  ;;  %v1512_v24 = vshll.u32 %v1004_v20, 16 }
 0x140   :  { %v17335_v13 = vmov %v17333_v60  ;;  %944 = vst.msk [vmem:[#allocation2 + $0x1a8] sm:$0xff] %vm338_vm0, %v832_v56  ;;  %v17336_v22 = vrot.slane %v12882_v53, 3  ;;  %v13015_v27 = vsel %vm1108_vm1, %v1139_v11, %v1143_v18  ;;  %v13022_v42 = vsel %vm1108_vm1, %v1145_v0, %v1149_v26 }
 0x141   :  { %v1136_v8 = vsel %vm1108_vm1, %v17334_v50, %v17333_v60  ;;  %v13006_v4 = vsel %vm1108_vm1, %v17335_v13, %v1139_v11  ;;  %943 = vst [vmem:[#allocation2 + $0x1a0] sm:$0xff] %v12995_v38  ;;  %v1146_v13 = vsel %vm1108_vm1, %v1141_v51, %v1145_v0  ;;  %v13025_v20 = vsel %vm1108_vm1, %v1143_v18, %v1147_v32  ;;  %v996_v56 = vld [vmem:[#allocation2 + $0x188] sm:$0xff]  ;;  %v13030_v11 = vld [vmem:[#allocation2 + $0x1b0] sm:$0x3f] }
 0x142   :  { %v1142_v9 = vsel %vm1108_vm1, %v17336_v22, %v1141_v51  ;;  %v13028_v39 = vsel %vm1108_vm1, %v1147_v32, %v1151_v2  ;;  %v947_v22 = vld [vmem:[#allocation2] sm:$0xe0]  ;;  %v1153_v60 = vrot.slane %v12992_v23, 3  ;;  %v998_v12 = vld [vmem:[#allocation2 + $0x198] sm:$0xff]  ;;  %v13033_v50 = vrot.slane %v1509_v25, 2 }
 0x143   :  { %v17337_v51 = vshrl.u32 %v12606_v37, 16  ;;  %v17338_v33 = vshll.u32 %v12606_v37, 16  ;;  %v13039_v43 = vpack.c.bf16 %v998_v12, %v996_v56  ;;  %v17083_v32 = vrot.slane %v13008_v16, 3 }
 0x144   :  { %v13042_v5 = vrot.slane %v1512_v24, 3  ;;  %v13046_v54 = vpack.c.bf16 %v12548_v14, %v947_v22  ;;  %v17339_v25 = vshrl.u32 %v12568_v61, 16  ;;  %1412 = vmatmul.mubr.bf16.gmra.mrb[24].mxu0 %v1136_v8  ;;  %v1537_v24 = vrot.slane %v17080_v34, 2 }
 0x145   :  { %v1519_v0 = vrot.slane %v17337_v51, 2  ;;  %v1522_v18 = vrot.slane %v17338_v33, 3  ;;  %v1505_v51 = vrot.slane %v17340_v7, 3  ;;  %v17084_v14 = vshrl.u32 %v12611_v3, 16  ;;  %9746 = vmatprep.mubr.msk.bf16.mxu0 %vm338_vm0, %v1142_v9 }
 0x146   :  { %v1502_v15 = vrot.slane %v17339_v25, 2  ;;  %v1540_v7 = vrot.slane %v17081_v55, 3  ;;  %v17088_v22 = vshll.u32 %v12611_v3, 16  ;;  %v17086_v8 = vshrl.u32 %v12657_v41, 16  ;;  %v13079_v55 = vld [vmem:[#allocation2 + $0x1b8] sm:$0x3f] }
 0x147   :  { %v13060_v56 = vor.u32 %v1522_v18, %v1519_v0  ;;  %v13067_v25 = vsel %vm1108_vm1, %v1149_v26, %v1153_v60  ;;  %v13072_v34 = vsel %vm1108_vm1, %v1151_v2, %v17083_v32  ;;  %v1528_v9 = vrot.slane %v17084_v14, 2  ;;  %v13077_v18 = vld [vmem:[#allocation2 + $0x1a8] sm:$0xff] }
 0x148   :  { %v17087_v0 = vshll.u32 %v12657_v41, 16  ;;  %v13081_v12 = vor.u32 %v1505_v51, %v1502_v15  ;;  %v1541_v33 = vor.u32 %v1540_v7, %v1537_v24  ;;  %v1531_v26 = vrot.slane %v17088_v22, 3 }
 0x149   :  { %v1555_v36 = vrot.slane %v17086_v8, 2  ;;  %v17341_v2 = vrot.slane %v13039_v43, 3  ;;  %v17091_v15 = vshll.u32 %v12713_v57, 16  ;;  %v17093_v7 = vshrl.u32 %v12715_v6, 16 }
 0x14a   :  { %v1558_v14 = vrot.slane %v17087_v0, 3  ;;  %v13098_v51 = vsel %vm1490_vm2, %v13060_v56, %v1541_v33  ;;  %v1532_v24 = vor.u32 %v1531_v26, %v1528_v9  ;;  %v17094_v8 = vshll.u32 %v12715_v6, 16 }
 0x14b   :  { %v13090_v32 = vsel %vm1108_vm1, %v1153_v60, %v17341_v2  ;;  %v1546_v0 = vrot.slane %v17092_v48, 2  ;;  %v1549_v22 = vrot.slane %v17091_v15, 3  ;;  %v1573_v9 = vrot.slane %v17093_v7, 2 }
 0x14c   :  { %v1559_v2 = vor.u32 %v1558_v14, %v1555_v36  ;;  %v13110_v30 = vsel %vm1490_vm2, %v13081_v12, %v1532_v24  ;;  %v1576_v26 = vrot.slane %v17094_v8, 3  ;;  %1422 = vmatmul.mubr.bf16.gmra.mrb[28].mxu0 %v13006_v4  ;;  %v17098_v15 = vshll.u32 %v12750_v1, 16 }
 0x14d   :  { %v1550_v14 = vor.u32 %v1549_v22, %v1546_v0  ;;  %v17101_v48 = vshrl.u32 %v12801_v62, 16  ;;  %9747 = vmatprep.mubr.msk.bf16.mxu0 %vm338_vm0, %v1146_v13  ;;  %v1564_v7 = vrot.slane %v17097_v49, 2  ;;  %v17106_v8 = vshll.u32 %v12801_v62, 16 }
 0x14e   :  { %v13119_v36 = vsel %vm1490_vm2, %v1541_v33, %v1559_v2  ;;  %v1577_v60 = vor.u32 %v1576_v26, %v1573_v9  ;;  %v17107_v21 = vshrl.u32 %v12775_v28, 16  ;;  %v1567_v33 = vrot.slane %v17098_v15, 3 }
 0x14f   :  { %v13129_v4 = vsel %vm1490_vm2, %v1532_v24, %v1550_v14  ;;  %v1591_v22 = vrot.slane %v17101_v48, 2  ;;  %v17110_v0 = vshll.u32 %v12775_v28, 16  ;;  %v1594_v9 = vrot.slane %v17106_v8, 3 }
 0x150   :  { %v13137_v13 = vsel %vm1490_vm2, %v1559_v2, %v1577_v60  ;;  %v1582_v26 = vrot.slane %v17107_v21, 2  ;;  %v17111_v24 = vshrl.u32 %v12838_v63, 16  ;;  %v1568_v49 = vor.u32 %v1567_v33, %v1564_v7 }
 0x151   :  { %v1585_v15 = vrot.slane %v17110_v0, 3  ;;  %v17115_v58 = vshll.u32 %v12838_v63, 16  ;;  %v17112_v48 = vshrl.u32 %v12821_v40, 16  ;;  %v1595_v45 = vor.u32 %v1594_v9, %v1591_v22 }
 0x152   :  { %v1609_v2 = vrot.slane %v17111_v24, 2  ;;  %v17113_v59 = vshll.u32 %v12821_v40, 16  ;;  %v17114_v8 = vshrl.u32 %v12882_v53, 16  ;;  %v13153_v21 = vsel %vm1490_vm2, %v1550_v14, %v1568_v49 }
 0x153   :  { %v1586_v46 = vor.u32 %v1585_v15, %v1582_v26  ;;  %v1612_v7 = vrot.slane %v17115_v58, 3  ;;  %v1600_v33 = vrot.slane %v17112_v48, 2  ;;  %v13160_v0 = vsel %vm1490_vm2, %v1577_v60, %v1595_v45 }
 0x154   :  { %v1603_v22 = vrot.slane %v17113_v59, 3  ;;  %v1627_v9 = vrot.slane %v17114_v8, 2  ;;  %v17116_v24 = vshll.u32 %v12882_v53, 16  ;;  %1432 = vmatmul.mubr.bf16.gmra.mrb[32].mxu0 %v13015_v27  ;;  %v17117_v26 = vshrl.u32 %v12863_v47, 16 }
 0x155   :  { %v13169_v15 = vsel %vm1490_vm2, %v1568_v49, %v1586_v46  ;;  %v1613_v14 = vor.u32 %v1612_v7, %v1609_v2  ;;  %v17118_v48 = vshll.u32 %v12863_v47, 16  ;;  %9748 = vmatprep.mubr.msk.bf16.mxu0 %vm338_vm0, %v13022_v42  ;;  %v17119_v8 = vshrl.u32 %v12929_v35, 16 }
 0x156   :  { %17342 = vst [vmem:[#allocation22_spill] sm:$0xff] %v13169_v15  ;;  %v1604_v60 = vor.u32 %v1603_v22, %v1600_v33  ;;  %v1630_v59 = vrot.slane %v17116_v24, 3  ;;  %v17121_v58 = vshll.u32 %v12929_v35, 16  ;;  %v1618_v49 = vrot.slane %v17117_v26, 2 }
 0x157   :  { %v13180_v27 = vsel %vm1490_vm2, %v1595_v45, %v1613_v14  ;;  %v1621_v2 = vrot.slane %v17118_v48, 3  ;;  %v17120_v7 = vshrl.u32 %v12909_v17, 16  ;;  %v1645_v22 = vrot.slane %v17119_v8, 2 }
 0x158   :  { %17343 = vst [vmem:[#allocation20_spill] sm:$0xff] %v13180_v27  ;;  %v13188_v42 = vsel %vm1490_vm2, %v1586_v46, %v1604_v60  ;;  %v1631_v33 = vor.u32 %v1630_v59, %v1627_v9  ;;  %v1648_v24 = vrot.slane %v17121_v58, 3  ;;  %v17122_v26 = vshll.u32 %v12909_v17, 16 }
 0x159   :  { %17344 = vst [vmem:[#allocation28_spill] sm:$0xff] %v13188_v42  ;;  %v1622_v45 = vor.u32 %v1621_v2, %v1618_v49  ;;  %v1636_v27 = vrot.slane %v17120_v7, 2  ;;  %v17123_v48 = vshrl.u32 %v12946_v29, 16  ;;  %v17124_v59 = vshll.u32 %v12946_v29, 16 }
 0x15a   :  { %v13199_v15 = vsel %vm1490_vm2, %v1613_v14, %v1631_v33  ;;  %v1649_v46 = vor.u32 %v1648_v24, %v1645_v22  ;;  %v17125_v9 = vshrl.u32 %v12933_v10, 16  ;;  %v1639_v49 = vrot.slane %v17122_v26, 3 }
 0x15b   :  { %17345 = vst [vmem:[#allocation24_spill] sm:$0xff] %v13199_v15  ;;  %v13204_v8 = vsel %vm1490_vm2, %v1604_v60, %v1622_v45  ;;  %v1663_v2 = vrot.slane %v17123_v48, 2  ;;  %v17126_v7 = vshll.u32 %v12933_v10, 16  ;;  %v1666_v24 = vrot.slane %v17124_v59, 3 }
 0x15c   :  { %17346 = vst [vmem:[#allocation27_spill] sm:$0xff] %v13204_v8  ;;  %v13212_v58 = vsel %vm1490_vm2, %v1631_v33, %v1649_v46  ;;  %v1654_v14 = vrot.slane %v17125_v9, 2  ;;  %v17127_v60 = vshrl.u32 %v12961_v31, 16  ;;  %1442 = vmatmul.mubr.bf16.gmra.mrb[36].mxu0 %v13025_v20  ;;  %v1640_v22 = vor.u32 %v1639_v49, %v1636_v27 }
 0x15d   :  { %17347 = vst [vmem:[#allocation25_spill] sm:$0xff] %v13212_v58  ;;  %v1657_v26 = vrot.slane %v17126_v7, 3  ;;  %v17128_v48 = vshll.u32 %v12961_v31, 16  ;;  %v17129_v8 = vshrl.u32 %v12948_v44, 16  ;;  %9749 = vmatprep.mubr.msk.bf16.mxu0 %vm338_vm0, %v13067_v25  ;;  %v1667_v33 = vor.u32 %v1666_v24, %v1663_v2 }
 0x15e   :  { %v1681_v59 = vrot.slane %v17127_v60, 2  ;;  %v17130_v9 = vshll.u32 %v12948_v44, 16  ;;  %v17131_v58 = vshrl.u32 %v12992_v23, 16  ;;  %v13231_v20 = vsel %vm1490_vm2, %v1622_v45, %v1640_v22 }
 0x15f   :  { %17348 = vst [vmem:[#allocation33_spill] sm:$0xff] %v13231_v20  ;;  %v1658_v27 = vor.u32 %v1657_v26, %v1654_v14  ;;  %v1684_v49 = vrot.slane %v17128_v48, 3  ;;  %v1672_v7 = vrot.slane %v17129_v8, 2  ;;  %v13238_v25 = vsel %vm1490_vm2, %v1649_v46, %v1667_v33  ;;  %v1002_v20 = vld [vmem:[#allocation2 + $0x1b8] sm:$0x1f] }
 0x160   :  { %17349 = vst [vmem:[#allocation29_spill] sm:$0xff] %v13238_v25  ;;  %v1675_v2 = vrot.slane %v17130_v9, 3  ;;  %v1699_v24 = vrot.slane %v17131_v58, 2  ;;  %v17132_v60 = vshll.u32 %v12992_v23, 16  ;;  %v17133_v14 = vshrl.u32 %v12963_v19, 16 }
 0x161   :  { %v13246_v45 = vsel %vm1490_vm2, %v1640_v22, %v1658_v27  ;;  %v1685_v26 = vor.u32 %v1684_v49, %v1681_v59  ;;  %v17134_v48 = vshll.u32 %v12963_v19, 16  ;;  %v17136_v25 = vshrl.u32 %v13039_v43, 16 }
 0x162   :  { %17350 = vst [vmem:[#allocation32_spill] sm:$0xff] %v13246_v45  ;;  %v1676_v8 = vor.u32 %v1675_v2, %v1672_v7  ;;  %v1702_v46 = vrot.slane %v17132_v60, 3  ;;  %v1690_v22 = vrot.slane %v17133_v14, 2  ;;  %v17135_v49 = vshrl.u32 %v13008_v16, 16  ;;  %v1001_v7 = vld [vmem:[#allocation2 + $0x1b0] sm:$0x1f] }
 0x163   :  { %v13255_v58 = vsel %vm1490_vm2, %v1667_v33, %v1685_v26  ;;  %v1693_v59 = vrot.slane %v17134_v48, 3  ;;  %v1717_v9 = vrot.slane %v17136_v25, 2  ;;  %v17353_v45 = vshll.u32 %v13039_v43, 16 }
 0x164   :  { %17351 = vst [vmem:[#allocation31_spill] sm:$0xff] %v13255_v58  ;;  %v13263_v2 = vsel %vm1490_vm2, %v1658_v27, %v1676_v8  ;;  %v1703_v60 = vor.u32 %v1702_v46, %v1699_v24  ;;  %1452 = vmatmul.mubr.bf16.gmra.mrb[40].mxu0 %v13028_v39  ;;  %v1708_v14 = vrot.slane %v17135_v49, 2  ;;  %v17137_v48 = vshll.u32 %v13008_v16, 16 }
 0x165   :  { %17352 = vst [vmem:[#allocation39_spill] sm:$0xff] %v13263_v2  ;;  %v1720_v33 = vrot.slane %v17353_v45, 3  ;;  %v1694_v58 = vor.u32 %v1693_v59, %v1690_v22  ;;  %v1030_v15 = vpack.c.bf16 %v1002_v20, %v13077_v18  ;;  %9750 = vmatprep.mubr.msk.bf16.mxu0 %vm338_vm0, %v13090_v32  ;;  %v1492_v27 = vshrl.u32 %v13046_v54, 16 }
 0x166   :  { %v13278_v24 = vsel %vm1490_vm2, %v1685_v26, %v1703_v60  ;;  %v1029_v45 = vpack.c.bf16 %v1001_v7, %v12995_v38  ;;  %v1711_v22 = vrot.slane %v17137_v48, 3  ;;  %v1495_v20 = vshll.u32 %v13046_v54, 16 }
 0x167   :  { %17354 = vst [vmem:[#allocation35_spill] sm:$0xff] %v13278_v24  ;;  %v1721_v46 = vor.u32 %v1720_v33, %v1717_v9  ;;  %v13282_v39 = vsel %vm1490_vm2, %v1676_v8, %v1694_v58  ;;  %v1733_v59 = vshrl.u32 %v1030_v15, 16  ;;  %v1736_v49 = vshll.u32 %v1030_v15, 16 }
 0x168   :  { %17355 = vst [vmem:[#allocation38_spill] sm:$0xff] %v13282_v39  ;;  %v1724_v25 = vshrl.u32 %v1029_v45, 16  ;;  %v1727_v2 = vshll.u32 %v1029_v45, 16  ;;  %v17357_v9 = vpack.c.bf16 %v13079_v55, %v13077_v18  ;;  %v1712_v7 = vor.u32 %v1711_v22, %v1708_v14 }
 0x169   :  { %v13288_v32 = vsel %vm1490_vm2, %v1703_v60, %v1721_v46  ;;  %v1735_v33 = vrot.slane %v1733_v59, 2  ;;  %v1738_v8 = vrot.slane %v1736_v49, 3  ;;  %v17358_v39 = vpack.c.bf16 %v13030_v11, %v12995_v38 }
 0x16a   :  { %17356 = vst [vmem:[#allocation37_spill] sm:$0xff] %v13288_v32  ;;  %v1161_v26 = vrot.slane %v17357_v9, 3  ;;  %v1726_v15 = vrot.slane %v1724_v25, 2  ;;  %v1729_v24 = vrot.slane %v1727_v2, 3  ;;  %v17359_v54 = vshrl.u32 %v12606_v37, 16 }
 0x16b   :  { %v13296_v48 = vrot.slane %v17358_v39, 3  ;;  %v1494_v32 = vrot.slane %v1492_v27, 2  ;;  %v13301_v45 = vsel %vm1490_vm2, %v1694_v58, %v1712_v7  ;;  %v13303_v42 = vor.u32 %v1738_v8, %v1735_v33 }
 0x16c   :  { %v2118_v60 = vrot.slane %v17359_v54, 3  ;;  %v17360_v55 = vshll.u32 %v12606_v37, 16  ;;  %v1497_v49 = vrot.slane %v1495_v20, 3  ;;  %v13307_v22 = vor.u32 %v1729_v24, %v1726_v15  ;;  %1462 = vmatmul.mubr.bf16.gmra.mrb[44].mxu0 %v13072_v34 }
 0x16d   :  { %v17361_v11 = vshrl.u32 %v12568_v61, 16  ;;  %v17362_v25 = vshll.u32 %v12568_v61, 16  ;;  %v17363_v27 = vrot.slane %v13039_v43, 3  ;;  %v13319_v59 = vsel %vm1490_vm2, %v1721_v46, %v13303_v42 }
 0x16e   :  { %v2119_v14 = vrot.slane %v17360_v55, 4  ;;  %v17364_v24 = vshrl.u32 %v12651_v52, 16  ;;  %v1515_v61 = vor.u32 %v13042_v5, %v13033_v50  ;;  %v13330_v34 = vsel %vm1490_vm2, %v1712_v7, %v13307_v22 }
 0x16f   :  { %v2106_v39 = vrot.slane %v17361_v11, 3  ;;  %v2107_v2 = vrot.slane %v17362_v25, 4  ;;  %v1162_v58 = vsel %vm1108_vm1, %v17363_v27, %v1161_v26  ;;  %v17365_v46 = vshll.u32 %v12651_v52, 16 }
 0x170   :  { %v13321_v37 = vor.u32 %v2119_v14, %v2118_v60  ;;  %v2126_v20 = vrot.slane %v17364_v24, 3  ;;  %9751 = vmatprep.mubr.msk.bf16.mxu0 %vm338_vm0, %v1162_v58  ;;  %v17366_v8 = vshrl.u32 %v12611_v3, 16  ;;  %v17367_v54 = vshll.u32 %v12611_v3, 16 }
 0x171   :  { %v13332_v9 = vor.u32 %v2107_v2, %v2106_v39  ;;  %v2127_v33 = vrot.slane %v17365_v46, 4  ;;  %v17368_v55 = vrot.slane %v13008_v16, 3  ;;  %v1498_v50 = vor.u32 %v1497_v49, %v1494_v32 }
 0x172   :  { %v2122_v15 = vrot.slane %v17366_v8, 3  ;;  %v2123_v60 = vrot.slane %v17367_v54, 4  ;;  %v17369_v7 = vshrl.u32 %v12657_v41, 16  ;;  %v17370_v11 = vshll.u32 %v12657_v41, 16 }
 0x173   :  { %v1160_v5 = vsel %vm1108_vm1, %v17368_v55, %v13296_v48  ;;  %v2128_v52 = vor.u32 %v2127_v33, %v2126_v20  ;;  %v17371_v2 = vshrl.u32 %v12713_v57, 16  ;;  %v17372_v3 = vshll.u32 %v12713_v57, 16 }
 0x174   :  { %v2134_v14 = vrot.slane %v17369_v7, 3  ;;  %v2135_v39 = vrot.slane %v17370_v11, 4  ;;  %v2124_v25 = vor.u32 %v2123_v60, %v2122_v15  ;;  %v1524_v24 = vsel %vm1490_vm2, %v1515_v61, %v13060_v56  ;;  %1472 = vmatmul.mubr.bf16.gmra.mrb[48].mxu0 %v1160_v5 }
 0x175   :  { %v2130_v27 = vrot.slane %v17371_v2, 3  ;;  %v2131_v58 = vrot.slane %v17372_v3, 4  ;;  %v17373_v32 = vshrl.u32 %v12715_v6, 16  ;;  %v17374_v8 = vshll.u32 %v12715_v6, 16  ;;  %9752 = vmatprep.mubr.msk.bf16.mxu0 %vm338_vm0, %v1161_v26 }
 0x176   :  { %v2136_v46 = vor.u32 %v2135_v39, %v2134_v14  ;;  %v13360_v41 = vsel %vm2097_vm3, %v13321_v37, %v2128_v52  ;;  %v13364_v20 = vsel %vm2097_vm3, %v13332_v9, %v2124_v25  ;;  %v17375_v33 = vshrl.u32 %v12750_v1, 16 }
 0x177   :  { %v2142_v49 = vrot.slane %v17373_v32, 3  ;;  %v2143_v54 = vrot.slane %v17374_v8, 4  ;;  %v2132_v57 = vor.u32 %v2131_v58, %v2130_v27  ;;  %v13370_v56 = vsel %vm1490_vm2, %v1498_v50, %v13081_v12 }
 0x178   :  { %v2138_v15 = vrot.slane %v17375_v33, 3  ;;  %v13373_v61 = vsel %vm2097_vm3, %v2128_v52, %v2136_v46  ;;  %v17376_v60 = vshll.u32 %v12750_v1, 16  ;;  %v17377_v14 = vshrl.u32 %v12801_v62, 16 }
 0x179   :  { %v2144_v6 = vor.u32 %v2143_v54, %v2142_v49  ;;  %v13378_v7 = vsel %vm2097_vm3, %v2124_v25, %v2132_v57  ;;  %v17378_v39 = vshll.u32 %v12801_v62, 16  ;;  %v17379_v12 = vshrl.u32 %v12775_v28, 16 }
 0x17a   :  { %v2139_v55 = vrot.slane %v17376_v60, 4  ;;  %v2150_v11 = vrot.slane %v17377_v14, 3  ;;  %v17380_v5 = vshll.u32 %v12775_v28, 16  ;;  %v17381_v25 = vshrl.u32 %v12838_v63, 16 }
 0x17b   :  { %v2151_v2 = vrot.slane %v17378_v39, 4  ;;  %v2146_v50 = vrot.slane %v17379_v12, 3  ;;  %v13388_v52 = vsel %vm2097_vm3, %v2136_v46, %v2144_v6  ;;  %v17382_v32 = vshll.u32 %v12838_v63, 16 }
 0x17c   :  { %v2140_v1 = vor.u32 %v2139_v55, %v2138_v15  ;;  %v2147_v27 = vrot.slane %v17380_v5, 4  ;;  %v2158_v3 = vrot.slane %v17381_v25, 3  ;;  %v17383_v49 = vshrl.u32 %v12821_v40, 16  ;;  %1482 = vmatmul.mubr.bf16.gmra.mrb[52].mxu0 %v13296_v48 }
 0x17d   :  { %v2152_v58 = vor.u32 %v2151_v2, %v2150_v11  ;;  %v2159_v62 = vrot.slane %v17382_v32, 4  ;;  %v17384_v54 = vshll.u32 %v12821_v40, 16  ;;  %v17385_v28 = vshrl.u32 %v12882_v53, 16  ;;  %9773 = vmatprep.mubr.msk.bf16.mxu0 %vm338_vm0, %v1524_v24 }
 0x17e   :  { %v2154_v8 = vrot.slane %v17383_v49, 3  ;;  %v13401_v46 = vsel %vm2097_vm3, %v2132_v57, %v2140_v1  ;;  %v2148_v33 = vor.u32 %v2147_v27, %v2146_v50  ;;  %v17386_v60 = vshll.u32 %v12882_v53, 16 }
 0x17f   :  { %v2155_v26 = vrot.slane %v17384_v54, 4  ;;  %v2166_v15 = vrot.slane %v17385_v28, 3  ;;  %v13408_v14 = vsel %vm2097_vm3, %v2144_v6, %v2152_v58  ;;  %v2160_v63 = vor.u32 %v2159_v62, %v2158_v3 }
 0x180   :  { %v2167_v55 = vrot.slane %v17386_v60, 4  ;;  %v17387_v39 = vshrl.u32 %v12863_v47, 16  ;;  %v13413_v40 = vsel %vm2097_vm3, %v2140_v1, %v2148_v33  ;;  %v17388_v12 = vshll.u32 %v12863_v47, 16 }
 0x181   :  { %v2156_v11 = vor.u32 %v2155_v26, %v2154_v8  ;;  %v17389_v5 = vshrl.u32 %v12929_v35, 16  ;;  %v13420_v53 = vsel %vm2097_vm3, %v2152_v58, %v2160_v63  ;;  %v17391_v25 = vshll.u32 %v12929_v35, 16 }
 0x182   :  { %v2162_v2 = vrot.slane %v17387_v39, 3  ;;  %v2168_v57 = vor.u32 %v2167_v55, %v2166_v15  ;;  %v2163_v50 = vrot.slane %v17388_v12, 4  ;;  %v17392_v32 = vshrl.u32 %v12909_v17, 16 }
 0x183   :  { %v2174_v27 = vrot.slane %v17389_v5, 3  ;;  %v13423_v6 = vsel %vm2097_vm3, %v2148_v33, %v2156_v11  ;;  %v2175_v3 = vrot.slane %v17391_v25, 4  ;;  %v17394_v49 = vshll.u32 %v12909_v17, 16 }
 0x184   :  { %17390 = vst [vmem:[#allocation45_spill] sm:$0xff] %v13423_v6  ;;  %v2170_v1 = vrot.slane %v17392_v32, 3  ;;  %v13430_v62 = vsel %vm2097_vm3, %v2160_v63, %v2168_v57  ;;  %v2164_v47 = vor.u32 %v2163_v50, %v2162_v2  ;;  %v17395_v54 = vshrl.u32 %v12946_v29, 16  ;;  %1930 = vmatmul.mubr.bf16.vlgmr.msra.gmra.mrb[0].mxu0 %v13370_v56  ;;  %v11160_v56 = vld [vmem:[%s16979_s4 + $0x164] ss:$8 sps:$4 sm:$0xff]  }
 0x185   :  { %17393 = vst [vmem:[#allocation40_spill] sm:$0xff] %v13430_v62  ;;  %v2171_v8 = vrot.slane %v17394_v49, 4  ;;  %v2176_v26 = vor.u32 %v2175_v3, %v2174_v27  ;;  %v17396_v33 = vshll.u32 %v12946_v29, 16  ;;  %v17397_v28 = vshrl.u32 %v12933_v10, 16  ;;  %9774 = vmatprep.mubr.msk.bf16.mxu0 %vm338_vm0, %v13098_v51 }
 0x186   :  { %v2182_v58 = vrot.slane %v17395_v54, 3  ;;  %v17398_v60 = vshll.u32 %v12933_v10, 16  ;;  %v13445_v17 = vsel %vm2097_vm3, %v2156_v11, %v2164_v47  ;;  %v17400_v39 = vshrl.u32 %v12961_v31, 16 }
 0x187   :  { %v2183_v35 = vrot.slane %v17396_v33, 4  ;;  %v2178_v15 = vrot.slane %v17397_v28, 3  ;;  %17399 = vst [vmem:[#allocation44_spill] sm:$0xff] %v13445_v17  ;;  %v2172_v63 = vor.u32 %v2171_v8, %v2170_v1  ;;  %v17401_v48 = vshll.u32 %v12961_v31, 16  ;;  %v2070_v33 = vld [vmem:[#allocation2 + $0x1b0] sm:$0x7f] }
 0x188   :  { %v2179_v55 = vrot.slane %v17398_v60, 4  ;;  %v2190_v2 = vrot.slane %v17400_v39, 3  ;;  %v13452_v29 = vsel %vm2097_vm3, %v2168_v57, %v2176_v26  ;;  %v17403_v10 = vshrl.u32 %v12948_v44, 16 }
 0x189   :  { %v2191_v12 = vrot.slane %v17401_v48, 4  ;;  %17402 = vst [vmem:[#allocation43_spill] sm:$0xff] %v13452_v29  ;;  %v2184_v50 = vor.u32 %v2183_v35, %v2182_v58  ;;  %v13457_v24 = vsel %vm2097_vm3, %v2164_v47, %v2172_v63  ;;  %v17405_v25 = vshll.u32 %v12948_v44, 16  ;;  %v2071_v58 = vld [vmem:[#allocation2 + $0x1b8] sm:$0x7f] }
 0x18a   :  { %v2180_v5 = vor.u32 %v2179_v55, %v2178_v15  ;;  %v2186_v27 = vrot.slane %v17403_v10, 3  ;;  %17404 = vst [vmem:[#allocation51_spill] sm:$0xff] %v13457_v24  ;;  %v17406_v32 = vshrl.u32 %v12992_v23, 16  ;;  %v17409_v49 = vshll.u32 %v12992_v23, 16  ;;  %v11152_v44 = vld [vmem:[%s16979_s4 + $0x140] ss:$8 sps:$4 sm:$0xff]  }
 0x18b   :  { %v2192_v11 = vor.u32 %v2191_v12, %v2190_v2  ;;  %v2187_v3 = vrot.slane %v17405_v25, 4  ;;  %v13464_v31 = vsel %vm2097_vm3, %v2176_v26, %v2184_v50  ;;  %v17410_v54 = vshrl.u32 %v12963_v19, 16  ;;  %v11157_v55 = vld [vmem:[%s16979_s4 + $0x154] ss:$8 sps:$4 sm:$0xff]   ;;  %2385 = vmatpush1.bf16.msra.mxu0 %v11152_v44  ;;  %v11158_v44 = vld [vmem:[%s16979_s4 + $0x160] ss:$8 sps:$4 sm:$0xff]  }
 0x18c   :  { %v2198_v1 = vrot.slane %v17406_v32, 3  ;;  %17407 = vst [vmem:[#allocation46_spill] sm:$0xff] %v13464_v31  ;;  %v13467_v57 = vsel %vm2097_vm3, %v2172_v63, %v2180_v5  ;;  %v2199_v8 = vrot.slane %v17409_v49, 4  ;;  %v17412_v28 = vshll.u32 %v12963_v19, 16  ;;  %2386 = vmatprep.subr.bf16.mxu0 %v11157_v55  ;;  %1940 = vmatmul.mubr.bf16.gmra.mrb[4].mxu0 %v13110_v30  ;;  %v11161_v55 = vld [vmem:[%s16979_s4 + $0x170] ss:$8 sps:$4 sm:$0xff]  }
 0x18d   :  { %17408 = vst [vmem:[#allocation50_spill] sm:$0xff] %v13467_v57  ;;  %v2194_v47 = vrot.slane %v17410_v54, 3  ;;  %v13477_v35 = vsel %vm2097_vm3, %v2184_v50, %v2192_v11  ;;  %v2188_v26 = vor.u32 %v2187_v3, %v2186_v27  ;;  %v17413_v60 = vshrl.u32 %v13039_v43, 16  ;;  %9775 = vmatprep.mubr.msk.bf16.mxu0 %vm338_vm0, %v13119_v36  ;;  %v11164_v30 = vld [vmem:[%s16979_s4 + $0x180] ss:$8 sps:$4 sm:$0xff]  }
 0x18e   :  { %17411 = vst [vmem:[#allocation49_spill] sm:$0xff] %v13477_v35  ;;  %v2195_v15 = vrot.slane %v17412_v28, 4  ;;  %v2200_v63 = vor.u32 %v2199_v8, %v2198_v1  ;;  %v17414_v39 = vshll.u32 %v13039_v43, 16  ;;  %v17415_v48 = vshrl.u32 %v13008_v16, 16  ;;  %v11163_v28 = vld [vmem:[%s16979_s4 + $0x174] ss:$8 sps:$4 sm:$0xff]  }
 0x18f   :  { %v2206_v23 = vrot.slane %v17413_v60, 3  ;;  %v17416_v50 = vshll.u32 %v13008_v16, 16  ;;  %v13493_v19 = vsel %vm2097_vm3, %v2180_v5, %v2188_v26  ;;  %v2075_v25 = vpack.c.bf16 %v2071_v58, %v13077_v18  ;;  %v11155_v16 = vld [vmem:[%s16979_s4 + $0x150] ss:$8 sps:$4 sm:$0xff]   ;;  %v11169_v36 = vld [vmem:[%s16979_s4 + $0x194] ss:$8 sps:$4 sm:$0xff]  }
 0x190   :  { %v2207_v2 = vrot.slane %v17414_v39, 4  ;;  %v2202_v12 = vrot.slane %v17415_v48, 3  ;;  %17417 = vst [vmem:[#allocation52_spill] sm:$0xff] %v13493_v19  ;;  %v2196_v27 = vor.u32 %v2195_v15, %v2194_v47  ;;  %v2074_v3 = vpack.c.bf16 %v2070_v33, %v12995_v38  ;;  %2387 = vmatpush1.bf16.msra.mxu0 %v11155_v16  ;;  %v11167_v39 = vld [vmem:[%s16979_s4 + $0x190] ss:$8 sps:$4 sm:$0xff]   ;;  %v3038_v16 = vld [vmem:[#allocation2 + $0x68] sm:$0xff] }
 0x191   :  { %v2203_v10 = vrot.slane %v17416_v50, 4  ;;  %v13499_v32 = vsel %vm2097_vm3, %v2192_v11, %v2200_v63  ;;  %v2220_v18 = vshrl.u32 %v2075_v25, 16  ;;  %v2223_v38 = vshll.u32 %v2075_v25, 16  ;;  %2388 = vmatprep.subr.bf16.mxu0 %v11160_v56  ;;  %v11170_v48 = vld [vmem:[%s16979_s4 + $0x1a0] ss:$8 sps:$4 sm:$0xff]   ;;  %v3035_v56 = vld [vmem:[#allocation2 + $0x50] sm:$0xff] }
 0x192   :  { %17418 = vst [vmem:[#allocation57_spill] sm:$0xff] %v13499_v32  ;;  %v2208_v43 = vor.u32 %v2207_v2, %v2206_v23  ;;  %v13507_v5 = vsel %vm2097_vm3, %v2188_v26, %v2196_v27  ;;  %v2211_v51 = vshrl.u32 %v2074_v3, 16  ;;  %v2214_v8 = vshll.u32 %v2074_v3, 16  ;;  %v11172_v2 = vld [vmem:[%s16979_s4 + $0x1a4] ss:$8 sps:$4 sm:$0xff]   ;;  %v3032_v3 = vld [vmem:[#allocation2 + $0x38] sm:$0xff] }
 0x193   :  { %v2204_v1 = vor.u32 %v2203_v10, %v2202_v12  ;;  %17419 = vst [vmem:[#allocation58_spill] sm:$0xff] %v13507_v5  ;;  %v2222_v54 = vrot.slane %v2220_v18, 3  ;;  %v2225_v47 = vrot.slane %v2223_v38, 4  ;;  %v11173_v12 = vld [vmem:[%s16979_s4 + $0x1b0] ss:$8 sps:$4 sm:$0xff]   ;;  %v3033_v25 = vld [vmem:[#allocation2 + $0x40] sm:$0xff] }
 0x194   :  { %v13513_v11 = vsel %vm2097_vm3, %v2200_v63, %v2208_v43  ;;  %v2213_v58 = vrot.slane %v2211_v51, 3  ;;  %v2216_v33 = vrot.slane %v2214_v8, 4  ;;  %2389 = vmatpush1.bf16.msra.mxu0 %v11158_v44  ;;  %v11166_v63 = vld [vmem:[%s16979_s4 + $0x184] ss:$8 sps:$4 sm:$0xff]   ;;  %v13575_v10 = vld [vmem:[#allocation2 + $0x18] sm:$0xff] }
 0x195   :  { %17420 = vst [vmem:[#allocation59_spill] sm:$0xff] %v13513_v11  ;;  %v13516_v49 = vsel %vm2097_vm3, %v2196_v27, %v2204_v1  ;;  %v13521_v26 = vor.u32 %v2225_v47, %v2222_v54  ;;  %2390 = vmatprep.subr.bf16.mxu0 %v11163_v28  ;;  %1950 = vmatmul.mubr.bf16.gmra.mrb[8].mxu0 %v13129_v4  ;;  %v11175_v4 = vld [vmem:[%s16979_s4 + $0x1b4] ss:$8 sps:$4 sm:$0xff]   ;;  %v11178_v50 = vld [vmem:[%s16979_s4 + $0x1c4] ss:$8 sps:$4 sm:$0xff]   ;;  %17426 = vst [vmem:[#allocation65_spill] sm:$0xff] %v13575_v10 }
 0x196   :  { %17421 = vst [vmem:[#allocation60_spill] sm:$0xff] %v13516_v49  ;;  %v13526_v15 = vor.u32 %v2216_v33, %v2213_v58  ;;  %9776 = vmatprep.mubr.msk.bf16.mxu0 %vm338_vm0, %v13137_v13  ;;  %v2069_v13 = vld [vmem:[#allocation2 + $0x8] sm:$0x80]  ;;  %v11181_v18 = vld [vmem:[%s16979_s4 + $0x1d4] ss:$8 sps:$4 sm:$0xff]   ;;  %v3037_v51 = vld [vmem:[#allocation2 + $0x60] sm:$0xff] }
 0x197   :  { %17422 = vst [vmem:[#allocation61_spill] sm:$0xff] %v13521_v26  ;;  %v13530_v60 = vsel %vm2097_vm3, %v2208_v43, %v13521_v26  ;;  %v13578_v27 = vpack.c.bf16 %v13575_v10, %v2069_v13  ;;  %v3034_v43 = vld [vmem:[#allocation2 + $0x48] sm:$0xff]  ;;  %v3040_v54 = vld [vmem:[#allocation2 + $0x78] sm:$0xff]  ;;  %v3039_v58 = vld [vmem:[#allocation2 + $0x70] sm:$0xff] }
 0x198   :  { %17423 = vst [vmem:[#allocation62_spill] sm:$0xff] %v13526_v15  ;;  %17424 = vst [vmem:[#allocation63_spill] sm:$0xff] %v13530_v60  ;;  %v13535_v23 = vsel %vm2097_vm3, %v2204_v1, %v13526_v15  ;;  %2391 = vmatpush1.bf16.msra.mxu0 %v11161_v55  ;;  %v3036_v1 = vld [vmem:[#allocation2 + $0x58] sm:$0xff]  ;;  %v3042_v47 = vld [vmem:[#allocation2 + $0x88] sm:$0xff]  ;;  %v13590_v44 = vpack.c.bf16 %v3034_v43, %v3032_v3 }
 0x199   :  { %17425 = vst [vmem:[#allocation64_spill] sm:$0xff] %v13535_v23  ;;  %2392 = vmatprep.subr.bf16.mxu0 %v11166_v63  ;;  %v2111_v8 = vshrl.u32 %v13578_v27, 16  ;;  %v17428_v33 = vld [vmem:[#allocation22_spill] sm:$0xff]  ;;  %v3041_v28 = vld [vmem:[#allocation2 + $0x80] sm:$0xff]  ;;  %v3044_v55 = vld [vmem:[#allocation2 + $0x98] sm:$0xff]  ;;  %v13608_v43 = vpack.c.bf16 %v3042_v47, %v3040_v54 }
 0x19a   :  { %17429 = vst [vmem:[#allocation22_spill] sm:$0xff] %v13590_v44  ;;  %v3046_v63 = vld [vmem:[#allocation2 + $0xa8] sm:$0xff]  ;;  %v3053_v15 = vld [vmem:[#allocation2 + $0xe0] sm:$0xff]  ;;  %v3056_v10 = vld [vmem:[#allocation2 + $0xf8] sm:$0xff] }
 0x19b   :  { %v11184_v13 = vld [vmem:[%s16979_s4 + $0x1e4] ss:$8 sps:$4 sm:$0xff]   ;;  %v3060_v47 = vld [vmem:[#allocation2 + $0x118] sm:$0xff] }
 0x19c   :  { %2393 = vmatpush1.bf16.msra.mxu0 %v11164_v30  ;;  %v17430_v30 = vld [vmem:[#allocation20_spill] sm:$0xff]  ;;  %v3064_v54 = vld [vmem:[#allocation2 + $0x138] sm:$0xff]  ;;  %v3066_v60 = vld [vmem:[#allocation2 + $0x148] sm:$0xff] }
 0x19d   :  { %2394 = vmatprep.subr.bf16.mxu0 %v11169_v36  ;;  %1960 = vmatmul.mubr.bf16.gmra.mrb[12].mxu0 %v13153_v21  ;;  %v3031_v21 = vld [vmem:[#allocation2 + $0x30] sm:$0xff]  ;;  %v17433_v26 = vld [vmem:[#allocation28_spill] sm:$0xff]  ;;  %v3068_v11 = vld [vmem:[#allocation2 + $0x158] sm:$0xff] }
 0x19e   :  { %9777 = vmatprep.mubr.msk.bf16.mxu0 %vm338_vm0, %v13160_v0  ;;  %v11176_v0 = vld [vmem:[%s16979_s4 + $0x1c0] ss:$8 sps:$4 sm:$0xff]   ;;  %v13586_v38 = vpack.c.bf16 %v3033_v25, %v3031_v21  ;;  %v11179_v36 = vld [vmem:[%s16979_s4 + $0x1d0] ss:$8 sps:$4 sm:$0xff]   ;;  %v13605_v25 = vrot.slane %v2111_v8, 3 }
 0x19f   :  { %v3047_v21 = vld [vmem:[#allocation2 + $0xb0] sm:$0xff]  ;;  %v3057_v8 = vld [vmem:[#allocation2 + $0x100] sm:$0xff]  ;;  %v3070_v5 = vld [vmem:[#allocation2 + $0x168] sm:$0xff] }
 0x1a0   :  { %2395 = vmatpush1.bf16.msra.mxu0 %v11167_v39  ;;  %17427 = vst [vmem:[#allocation66_spill] sm:$0xff] %v13586_v38  ;;  %v13597_v39 = vpack.c.bf16 %v3038_v16, %v3036_v1  ;;  %v3049_v1 = vld [vmem:[#allocation2 + $0xc0] sm:$0xff]  ;;  %v3052_v16 = vld [vmem:[#allocation2 + $0xd8] sm:$0xff]  ;;  %v3074_v57 = vld [vmem:[#allocation2 + $0x188] sm:$0xff] }
 0x1a1   :  { %2396 = vmatprep.subr.bf16.mxu0 %v11172_v2  ;;  %v13599_v2 = vpack.c.bf16 %v3037_v51, %v3035_v56  ;;  %v13612_v51 = vpack.c.bf16 %v3041_v28, %v3039_v58  ;;  %v3055_v56 = vld [vmem:[#allocation2 + $0xf0] sm:$0xff]  ;;  %v3062_v28 = vld [vmem:[#allocation2 + $0x128] sm:$0xff]  ;;  %v17434_v23 = vld [vmem:[#allocation24_spill] sm:$0xff] }
 0x1a2   :  { %v3065_v49 = vld [vmem:[#allocation2 + $0x140] sm:$0xff]  ;;  %v3072_v35 = vld [vmem:[#allocation2 + $0x178] sm:$0xff] }
 0x1a3   :  { %17431 = vst [vmem:[#allocation20_spill] sm:$0xff] %v13599_v2  ;;  %v3069_v32 = vld [vmem:[#allocation2 + $0x160] sm:$0xff] }
 0x1a4   :  { %2397 = vmatpush1.bf16.msra.mxu0 %v11170_v48  ;;  %v3043_v48 = vld [vmem:[#allocation2 + $0x90] sm:$0xff] }
 0x1a5   :  { %2398 = vmatprep.subr.bf16.mxu0 %v11175_v4  ;;  %1970 = vmatmul.mubr.bf16.gmra.mrb[16].mxu0 %v17428_v33  ;;  %v3048_v4 = vld [vmem:[#allocation2 + $0xb8] sm:$0xff]  ;;  %v13614_v33 = vpack.c.bf16 %v3046_v63, %v3044_v55  ;;  %v13628_v63 = vpack.c.bf16 %v3049_v1, %v3047_v21  ;;  %v3078_v21 = vld [vmem:[#allocation2 + $0x1a8] sm:$0xff] }
 0x1a6   :  { %9778 = vmatprep.mubr.msk.bf16.mxu0 %vm338_vm0, %v17430_v30  ;;  %v3054_v30 = vld [vmem:[#allocation2 + $0xe8] sm:$0xff] }
 0x1a8   :  { %2399 = vmatpush1.bf16.msra.mxu0 %v11173_v12  ;;  %v3051_v12 = vld [vmem:[#allocation2 + $0xd0] sm:$0xff] }
 0x1a9   :  { %2400 = vmatprep.subr.bf16.mxu0 %v11178_v50  ;;  %v3045_v50 = vld [vmem:[#allocation2 + $0xa0] sm:$0xff] }
 0x1aa   :  { %v13619_v3 = vpack.c.bf16 %v3045_v50, %v3043_v48  ;;  %v13632_v50 = vpack.c.bf16 %v3054_v30, %v3052_v16  ;;  %v3061_v30 = vld [vmem:[#allocation2 + $0x120] sm:$0xff]  ;;  %v13649_v48 = vld [vmem:[#allocation2 + $0x1b8] sm:$0xff] }
 0x1ac   :  { %2401 = vmatpush1.bf16.msra.mxu0 %v11176_v0  ;;  %v3050_v0 = vld [vmem:[#allocation2 + $0xc8] sm:$0xff] }
 0x1ad   :  { %2402 = vmatprep.subr.bf16.mxu0 %v11181_v18  ;;  %v17432_v18 = vshrl.u32 %v13586_v38, 16  ;;  %v13626_v55 = vpack.c.bf16 %v3050_v0, %v3048_v4  ;;  %1980 = vmatmul.mubr.bf16.gmra.mrb[20].mxu0 %v17433_v26  ;;  %v13647_v26 = vpack.c.bf16 %v3057_v8, %v3055_v56  ;;  %v3076_v4 = vld [vmem:[#allocation2 + $0x198] sm:$0xff]  ;;  %v13685_v0 = vld [vmem:[#allocation2 + $0x28] sm:$0xff] }
 0x1ae   :  { %9779 = vmatprep.mubr.msk.bf16.mxu0 %vm338_vm0, %v17434_v23  ;;  %v13664_v19 = vpack.c.bf16 %v3078_v21, %v3076_v4  ;;  %v3073_v4 = vld [vmem:[#allocation2 + $0x180] sm:$0xff]  ;;  %17437 = vst [vmem:[#allocation24_spill] sm:$0xff] %v13685_v0  ;;  %v3737_v56 = vld [vmem:[#allocation2 + $0x18] sm:$0xfc] }
 0x1af   :  { %v13623_v58 = vrot.slane %v17432_v18, 1  ;;  %v3059_v18 = vld [vmem:[#allocation2 + $0x110] sm:$0xff] }
 0x1b0   :  { %2403 = vmatpush1.bf16.msra.mxu0 %v11179_v36  ;;  %v3058_v36 = vld [vmem:[#allocation2 + $0x108] sm:$0xff]  ;;  %v13662_v23 = vpack.c.bf16 %v3061_v30, %v3059_v18  ;;  %v13674_v18 = vpack.c.bf16 %v3070_v5, %v3068_v11  ;;  %v3071_v30 = vld [vmem:[#allocation2 + $0x170] sm:$0xff]  ;;  %v17141_v21 = vshll.u32 %v13664_v19, 16  ;;  %v13688_v11 = vpack.c.bf16 %v3074_v57, %v3072_v35 }
 0x1b1   :  { %2802 = vmatprep.subr.bf16.mxu0 %v11184_v13  ;;  %v13634_v13 = vpack.c.bf16 %v3053_v15, %v3051_v12  ;;  %v13645_v16 = vpack.c.bf16 %v3058_v36, %v3056_v10  ;;  %v3063_v12 = vld [vmem:[#allocation2 + $0x130] sm:$0xff]  ;;  %v13658_v36 = vpack.c.bf16 %v3062_v28, %v3060_v47  ;;  %v3082_v10 = vld [vmem:[#allocation2 + $0x1c8] sm:$0x1]  ;;  %v13669_v28 = vpack.c.bf16 %v3066_v60, %v3064_v54  ;;  %v17436_v54 = vld [vmem:[#allocation27_spill] sm:$0xff] }
 0x1b2   :  { %v3067_v15 = vld [vmem:[#allocation2 + $0x150] sm:$0xff]  ;;  %v13672_v1 = vpack.c.bf16 %v3065_v49, %v3063_v12  ;;  %v13682_v60 = vpack.c.bf16 %v3082_v10, %v13649_v48  ;;  %v13692_v49 = vrot.slane %v17141_v21, 1  ;;  %v17143_v12 = vshrl.u32 %v13664_v19, 16  ;;  %v3077_v10 = vld [vmem:[#allocation2 + $0x1a0] sm:$0xff] }
 0x1b3   :  { %v13679_v31 = vpack.c.bf16 %v3069_v32, %v3067_v15  ;;  %v17439_v32 = vld [vmem:[#allocation25_spill] sm:$0xff]  ;;  %v3736_v47 = vld [vmem:[#allocation2 + $0x10] sm:$0xfc]  ;;  %v3741_v57 = vpack.c.bf16 %v13685_v0, %v3737_v56  ;;  %v3795_v21 = vrot.slane %v13586_v38, 1  ;;  %v3800_v35 = vrot.slane %v13599_v2, 1 }
 0x1b4   :  { %17435 = vst [vmem:[#allocation28_spill] sm:$0xff] %v13682_v60  ;;  %17438 = vst [vmem:[#allocation27_spill] sm:$0xff] %v13692_v49  ;;  %v3345_v5 = vshll.u32 %v13682_v60, 16  ;;  %v3343_v8 = vor.u32 %v17143_v12, %v13692_v49  ;;  %v3798_v49 = vrot.slane %v13590_v44, 1  ;;  %v3802_v12 = vrot.slane %v13597_v39, 1 }
 0x1b5   :  { %1990 = vmatmul.mubr.bf16.gmra.mrb[24].mxu0 %v17436_v54  ;;  %v13699_v54 = vpack.c.bf16 %v3073_v4, %v3071_v30  ;;  %v3075_v4 = vld [vmem:[#allocation2 + $0x190] sm:$0xff]  ;;  %v3797_v30 = vrot.slane %v3741_v57, 1  ;;  %v17444_v57 = vld [vmem:[#allocation33_spill] sm:$0xff] }
 0x1b6   :  { %9780 = vmatprep.mubr.msk.bf16.mxu0 %vm338_vm0, %v17439_v32  ;;  %v13708_v32 = vld [vmem:[#allocation2 + $0x20] sm:$0xff]  ;;  %v13712_v60 = vrot.slane %v3345_v5, 1  ;;  %v13725_v29 = vpack.c.bf16 %v3077_v10, %v3075_v4  ;;  %v3804_v5 = vrot.slane %v13612_v51, 1  ;;  %v3810_v10 = vrot.slane %v13614_v33, 1  ;;  %v17445_v4 = vld [vmem:[#allocation29_spill] sm:$0xff] }
 0x1b7   :  { %17440 = vst [vmem:[#allocation25_spill] sm:$0xff] %v13708_v32  ;;  %v3740_v56 = vpack.c.bf16 %v13708_v32, %v3736_v47  ;;  %v13730_v24 = vsel %vm3793_vm5, %v3797_v30, %v3798_v49  ;;  %v3808_v47 = vrot.slane %v13619_v3, 1  ;;  %v13742_v30 = vsel %vm3793_vm5, %v3798_v49, %v3802_v12 }
 0x1b8   :  { %17441 = vst [vmem:[#allocation67_spill] sm:$0xff] %v13712_v60  ;;  %v13721_v15 = vsel %vm3132_vm4, %v3343_v8, %v13712_v60  ;;  %17443 = vst [vmem:[#allocation69_spill] sm:$0xff] %v13730_v24  ;;  %v3806_v8 = vrot.slane %v13608_v43, 1  ;;  %v13745_v24 = vsel %vm3793_vm5, %v3795_v21, %v3800_v35  ;;  %v13755_v17 = vsel %vm3793_vm5, %v3800_v35, %v3804_v5 }
 0x1b9   :  { %17442 = vst [vmem:[#allocation68_spill] sm:$0xff] %v13721_v15  ;;  %v3794_v60 = vrot.slane %v3740_v56, 1  ;;  %17446 = vst [vmem:[#allocation33_spill] sm:$0xff] %v13742_v30  ;;  %v3814_v56 = vrot.slane %v13626_v55, 1  ;;  %v13761_v49 = vsel %vm3793_vm5, %v3804_v5, %v3808_v47  ;;  %v3826_v35 = vrot.slane %v13658_v36, 1 }
 0x1ba   :  { %17447 = vst [vmem:[#allocation29_spill] sm:$0xff] %v13745_v24  ;;  %v13748_v15 = vsel %vm3793_vm5, %v3802_v12, %v3806_v8  ;;  %17450 = vst [vmem:[#allocation72_spill] sm:$0xff] %v13755_v17  ;;  %v13758_v62 = vsel %vm3793_vm5, %v3806_v8, %v3810_v10  ;;  %v3812_v12 = vrot.slane %v13628_v63, 1  ;;  %v3816_v24 = vrot.slane %v13634_v13, 1 }
 0x1bb   :  { %17448 = vst [vmem:[#allocation70_spill] sm:$0xff] %v13748_v15  ;;  %17451 = vst [vmem:[#allocation73_spill] sm:$0xff] %v13758_v62  ;;  %v3818_v15 = vrot.slane %v13632_v50, 1  ;;  %v3824_v8 = vrot.slane %v13662_v23, 1 }
 0x1bc   :  { %17452 = vst [vmem:[#allocation74_spill] sm:$0xff] %v13761_v49  ;;  %v13774_v5 = vsel %vm3793_vm5, %v3808_v47, %v3812_v12  ;;  %v3830_v49 = vrot.slane %v13669_v28, 1 }
 0x1bd   :  { %2000 = vmatmul.mubr.bf16.gmra.mrb[28].mxu0 %v17444_v57  ;;  %v13752_v57 = vsel %vm3793_vm5, %v3794_v60, %v3795_v21  ;;  %v3822_v21 = vrot.slane %v13645_v16, 1  ;;  %v3820_v60 = vrot.slane %v13647_v26, 1  ;;  %17454 = vst [vmem:[#allocation76_spill] sm:$0xff] %v13774_v5  ;;  %v3739_v5 = vld [vmem:[#allocation2 + $0x1c8] sm:$0x3] }
 0x1be   :  { %9781 = vmatprep.mubr.msk.bf16.mxu0 %vm338_vm0, %v17445_v4  ;;  %17449 = vst [vmem:[#allocation71_spill] sm:$0xff] %v13752_v57  ;;  %v13764_v4 = vsel %vm3793_vm5, %v3810_v10, %v3814_v56  ;;  %v13777_v10 = vsel %vm3793_vm5, %v3814_v56, %v3818_v15  ;;  %v13796_v56 = vsel %vm3793_vm5, %v3826_v35, %v3830_v49  ;;  %v4229_v57 = vld [vmem:[#allocation2 + $0x10] sm:$0xf8] }
 0x1bf   :  { %17453 = vst [vmem:[#allocation75_spill] sm:$0xff] %v13764_v4  ;;  %17455 = vst [vmem:[#allocation77_spill] sm:$0xff] %v13777_v10  ;;  %v13780_v4 = vsel %vm3793_vm5, %v3812_v12, %v3816_v24  ;;  %v13784_v62 = vsel %vm3793_vm5, %v3818_v15, %v3822_v21  ;;  %v13787_v17 = vsel %vm3793_vm5, %v3816_v24, %v3820_v60  ;;  %v3828_v12 = vrot.slane %v13672_v1, 1 }
 0x1c0   :  { %17456 = vst [vmem:[#allocation78_spill] sm:$0xff] %v13780_v4  ;;  %17457 = vst [vmem:[#allocation79_spill] sm:$0xff] %v13784_v62  ;;  %v13790_v30 = vsel %vm3793_vm5, %v3822_v21, %v3826_v35  ;;  %v13793_v47 = vsel %vm3793_vm5, %v3820_v60, %v3824_v8  ;;  %v3834_v4 = vrot.slane %v13674_v18, 1  ;;  %v3832_v15 = vrot.slane %v13679_v31, 1  ;;  %v17462_v62 = vld [vmem:[#allocation32_spill] sm:$0xff] }
 0x1c1   :  { %17458 = vst [vmem:[#allocation80_spill] sm:$0xff] %v13787_v17  ;;  %17459 = vst [vmem:[#allocation81_spill] sm:$0xff] %v13790_v30  ;;  %v3838_v24 = vrot.slane %v13688_v11, 1  ;;  %v3836_v21 = vrot.slane %v13699_v54, 1  ;;  %v3842_v30 = vrot.slane %v13664_v19, 1  ;;  %v17463_v17 = vld [vmem:[#allocation31_spill] sm:$0xff]  ;;  %v13809_v35 = vsel %vm3793_vm5, %v3824_v8, %v3828_v12 }
 0x1c2   :  { %17460 = vst [vmem:[#allocation82_spill] sm:$0xff] %v13793_v47  ;;  %17461 = vst [vmem:[#allocation83_spill] sm:$0xff] %v13796_v56  ;;  %v4230_v47 = vld [vmem:[#allocation2 + $0x18] sm:$0xf8]  ;;  %v13812_v56 = vsel %vm3793_vm5, %v3830_v49, %v3834_v4  ;;  %v3743_v10 = vpack.c.bf16 %v3739_v5, %v13649_v48  ;;  %v17470_v8 = vrot.slane %v13725_v29, 1 }
 0x1c3   :  { %17464 = vst [vmem:[#allocation32_spill] sm:$0xff] %v13809_v35  ;;  %17465 = vst [vmem:[#allocation31_spill] sm:$0xff] %v13812_v56  ;;  %v13819_v6 = vsel %vm3793_vm5, %v3834_v4, %v3838_v24  ;;  %v13822_v60 = vsel %vm3793_vm5, %v3832_v15, %v3836_v21  ;;  %v4234_v4 = vpack.c.bf16 %v13685_v0, %v4230_v47  ;;  %v17475_v56 = vshll.u32 %v13586_v38, 16 }
 0x1c4   :  { %17467 = vst [vmem:[#allocation85_spill] sm:$0xff] %v13819_v6  ;;  %17468 = vst [vmem:[#allocation86_spill] sm:$0xff] %v13822_v60  ;;  %v13830_v49 = vsel %vm3793_vm5, %v3836_v21, %v17470_v8  ;;  %v13834_v5 = vrot.slane %v3743_v10, 1  ;;  %v17473_v6 = vshrl.u32 %v13590_v44, 16  ;;  %v17474_v60 = vshll.u32 %v13590_v44, 16 }
 0x1c5   :  { %2010 = vmatmul.mubr.bf16.gmra.mrb[32].mxu0 %v17462_v62  ;;  %v13815_v62 = vsel %vm3793_vm5, %v3828_v12, %v3832_v15  ;;  %17471 = vst [vmem:[#allocation88_spill] sm:$0xff] %v13830_v49  ;;  %v4268_v21 = vrot.slane %v17475_v56, 2  ;;  %v4272_v10 = vshrl.u32 %v4234_v4, 16  ;;  %v4275_v12 = vshll.u32 %v4234_v4, 16  ;;  %v4232_v44 = vld [vmem:[#allocation2 + $0x1c8] sm:$0x7] }
 0x1c6   :  { %9782 = vmatprep.mubr.msk.bf16.mxu0 %vm338_vm0, %v17463_v17  ;;  %17466 = vst [vmem:[#allocation84_spill] sm:$0xff] %v13815_v62  ;;  %v13825_v17 = vsel %vm3793_vm5, %v3838_v24, %v3842_v30  ;;  %17472 = vst [vmem:[#allocation89_spill] sm:$0xff] %v13834_v5  ;;  %v4279_v15 = vrot.slane %v17473_v6, 1  ;;  %v4280_v24 = vrot.slane %v17474_v60, 2  ;;  %v13847_v62 = vsel %vm3793_vm5, %v3842_v30, %v13834_v5 }
 0x1c7   :  { %17469 = vst [vmem:[#allocation87_spill] sm:$0xff] %v13825_v17  ;;  %v4233_v17 = vpack.c.bf16 %v13708_v32, %v4229_v57  ;;  %17476 = vst [vmem:[#allocation90_spill] sm:$0xff] %v13847_v62  ;;  %v4269_v6 = vor.u32 %v4268_v21, %v13623_v58  ;;  %v4274_v60 = vrot.slane %v4272_v10, 1  ;;  %v4277_v57 = vrot.slane %v4275_v12, 2  ;;  %v17478_v32 = vld [vmem:[#allocation39_spill] sm:$0xff] }
 0x1c8   :  { %v4281_v47 = vor.u32 %v4280_v24, %v4279_v15  ;;  %v17477_v38 = vshrl.u32 %v13597_v39, 16  ;;  %v17479_v30 = vshll.u32 %v13597_v39, 16  ;;  %v17480_v4 = vshrl.u32 %v13599_v2, 16 }
 0x1c9   :  { %v4260_v49 = vshrl.u32 %v4233_v17, 16  ;;  %v4263_v35 = vshll.u32 %v4233_v17, 16  ;;  %v17481_v17 = vld [vmem:[#allocation35_spill] sm:$0xff]  ;;  %v4278_v58 = vor.u32 %v4277_v57, %v4274_v60  ;;  %v17482_v24 = vshll.u32 %v13599_v2, 16 }
 0x1ca   :  { %v4287_v56 = vrot.slane %v17477_v38, 1  ;;  %v4288_v5 = vrot.slane %v17479_v30, 2  ;;  %v4283_v15 = vrot.slane %v17480_v4, 1  ;;  %v17483_v21 = vshrl.u32 %v13608_v43, 16 }
 0x1cb   :  { %v4262_v8 = vrot.slane %v4260_v49, 1  ;;  %v4265_v0 = vrot.slane %v4263_v35, 2  ;;  %v4284_v12 = vrot.slane %v17482_v24, 2  ;;  %v17484_v10 = vshll.u32 %v13608_v43, 16 }
 0x1cc   :  { %v4295_v38 = vrot.slane %v17483_v21, 1  ;;  %v4289_v49 = vor.u32 %v4288_v5, %v4287_v56  ;;  %v17485_v4 = vshrl.u32 %v13612_v51, 16  ;;  %v17486_v57 = vshll.u32 %v13612_v51, 16 }
 0x1cd   :  { %2020 = vmatmul.mubr.bf16.gmra.mrb[36].mxu0 %v17478_v32  ;;  %v13864_v32 = vpack.c.bf16 %v4232_v44, %v13649_v48  ;;  %v4266_v35 = vor.u32 %v4265_v0, %v4262_v8  ;;  %v4296_v30 = vrot.slane %v17484_v10, 2  ;;  %v4285_v60 = vor.u32 %v4284_v12, %v4283_v15 }
 0x1ce   :  { %9783 = vmatprep.mubr.msk.bf16.mxu0 %vm338_vm0, %v17481_v17  ;;  %v4291_v62 = vrot.slane %v17485_v4, 1  ;;  %v13871_v17 = vsel %vm4258_vm6, %v4278_v58, %v4281_v47  ;;  %v4292_v24 = vrot.slane %v17486_v57, 2  ;;  %v17487_v21 = vshrl.u32 %v13614_v33, 16 }
 0x1cf   :  { %v13878_v44 = vsel %vm4258_vm6, %v4266_v35, %v4269_v6  ;;  %v13881_v0 = vsel %vm4258_vm6, %v4281_v47, %v4289_v49  ;;  %v4297_v5 = vor.u32 %v4296_v30, %v4295_v38  ;;  %v17489_v8 = vshll.u32 %v13614_v33, 16 }
 0x1d0   :  { %v4303_v2 = vrot.slane %v17487_v21, 1  ;;  %17488 = vst [vmem:[#allocation39_spill] sm:$0xff] %v13881_v0  ;;  %v13886_v58 = vsel %vm4258_vm6, %v4269_v6, %v4285_v60  ;;  %v4293_v15 = vor.u32 %v4292_v24, %v4291_v62  ;;  %v17491_v12 = vshrl.u32 %v13619_v3, 16  ;;  %v17499_v0 = vld [vmem:[#allocation38_spill] sm:$0xff] }
 0x1d1   :  { %v4304_v56 = vrot.slane %v17489_v8, 2  ;;  %17490 = vst [vmem:[#allocation35_spill] sm:$0xff] %v13886_v58  ;;  %v17492_v4 = vshll.u32 %v13619_v3, 16  ;;  %v13893_v35 = vsel %vm4258_vm6, %v4289_v49, %v4297_v5  ;;  %v17494_v47 = vshrl.u32 %v13626_v55, 16 }
 0x1d2   :  { %v4299_v10 = vrot.slane %v17491_v12, 1  ;;  %17493 = vst [vmem:[#allocation91_spill] sm:$0xff] %v13893_v35  ;;  %v17495_v30 = vshll.u32 %v13626_v55, 16  ;;  %v13900_v6 = vsel %vm4258_vm6, %v4285_v60, %v4293_v15  ;;  %v17497_v24 = vshrl.u32 %v13628_v63, 16 }
 0x1d3   :  { %v4300_v57 = vrot.slane %v17492_v4, 2  ;;  %v4305_v21 = vor.u32 %v4304_v56, %v4303_v2  ;;  %v4311_v38 = vrot.slane %v17494_v47, 1  ;;  %17496 = vst [vmem:[#allocation92_spill] sm:$0xff] %v13900_v6  ;;  %v17498_v58 = vshll.u32 %v13628_v63, 16  ;;  %v17503_v6 = vld [vmem:[#allocation37_spill] sm:$0xff] }
 0x1d4   :  { %v4312_v8 = vrot.slane %v17495_v30, 2  ;;  %v4307_v12 = vrot.slane %v17497_v24, 1  ;;  %v17501_v56 = vshrl.u32 %v13632_v50, 16  ;;  %v17502_v30 = vshll.u32 %v13632_v50, 16 }
 0x1d5   :  { %v4301_v62 = vor.u32 %v4300_v57, %v4299_v10  ;;  %v4308_v4 = vrot.slane %v17498_v58, 2  ;;  %2030 = vmatmul.mubr.bf16.gmra.mrb[40].mxu0 %v17499_v0  ;;  %v13908_v2 = vsel %vm4258_vm6, %v4297_v5, %v4305_v21  ;;  %v17505_v58 = vshrl.u32 %v13634_v13, 16 }
 0x1d6   :  { %17500 = vst [vmem:[#allocation38_spill] sm:$0xff] %v13908_v2  ;;  %v4313_v49 = vor.u32 %v4312_v8, %v4311_v38  ;;  %v4319_v47 = vrot.slane %v17501_v56, 1  ;;  %v4320_v60 = vrot.slane %v17502_v30, 2  ;;  %9784 = vmatprep.mubr.msk.bf16.mxu0 %vm338_vm0, %v17503_v6  ;;  %v17506_v5 = vshll.u32 %v13634_v13, 16 }
 0x1d7   :  { %v13917_v10 = vsel %vm4258_vm6, %v4293_v15, %v4301_v62  ;;  %v4309_v57 = vor.u32 %v4308_v4, %v4307_v12  ;;  %v4315_v0 = vrot.slane %v17505_v58, 1  ;;  %v17508_v56 = vshrl.u32 %v13645_v16, 16 }
 0x1d8   :  { %17504 = vst [vmem:[#allocation37_spill] sm:$0xff] %v13917_v10  ;;  %v4316_v24 = vrot.slane %v17506_v5, 2  ;;  %v13924_v38 = vsel %vm4258_vm6, %v4305_v21, %v4313_v49  ;;  %v4321_v8 = vor.u32 %v4320_v60, %v4319_v47  ;;  %v17509_v2 = vshll.u32 %v13645_v16, 16 }
 0x1d9   :  { %17507 = vst [vmem:[#allocation93_spill] sm:$0xff] %v13924_v38  ;;  %v4327_v30 = vrot.slane %v17508_v56, 1  ;;  %v13931_v15 = vsel %vm4258_vm6, %v4301_v62, %v4309_v57  ;;  %v17511_v4 = vshrl.u32 %v13647_v26, 16  ;;  %v17512_v10 = vshll.u32 %v13647_v26, 16 }
 0x1da   :  { %v4328_v6 = vrot.slane %v17509_v2, 2  ;;  %17510 = vst [vmem:[#allocation94_spill] sm:$0xff] %v13931_v15  ;;  %v4317_v12 = vor.u32 %v4316_v24, %v4315_v0  ;;  %v13938_v21 = vsel %vm4258_vm6, %v4313_v49, %v4321_v8  ;;  %v17514_v60 = vshrl.u32 %v13658_v36, 16 }
 0x1db   :  { %v4323_v58 = vrot.slane %v17511_v4, 1  ;;  %v4324_v5 = vrot.slane %v17512_v10, 2  ;;  %17513 = vst [vmem:[#allocation95_spill] sm:$0xff] %v13938_v21  ;;  %v17515_v38 = vshll.u32 %v13658_v36, 16  ;;  %v17517_v24 = vshrl.u32 %v13662_v23, 16 }
 0x1dc   :  { %v4329_v47 = vor.u32 %v4328_v6, %v4327_v30  ;;  %v4335_v56 = vrot.slane %v17514_v60, 1  ;;  %v13945_v62 = vsel %vm4258_vm6, %v4309_v57, %v4317_v12  ;;  %v17518_v15 = vshll.u32 %v13662_v23, 16 }
 0x1dd   :  { %v4336_v2 = vrot.slane %v17515_v38, 2  ;;  %17516 = vst [vmem:[#allocation96_spill] sm:$0xff] %v13945_v62  ;;  %v4325_v0 = vor.u32 %v4324_v5, %v4323_v58  ;;  %v4331_v4 = vrot.slane %v17517_v24, 1  ;;  %v17520_v6 = vshrl.u32 %v13669_v28, 16  ;;  %2040 = vmatmul.mubr.bf16.gmra.mrb[44].mxu0 %v13301_v45 }
 0x1de   :  { %v4332_v10 = vrot.slane %v17518_v15, 2  ;;  %v13952_v49 = vsel %vm4258_vm6, %v4321_v8, %v4329_v47  ;;  %v17521_v21 = vshll.u32 %v13669_v28, 16  ;;  %v17523_v5 = vshrl.u32 %v13672_v1, 16  ;;  %9785 = vmatprep.mubr.msk.bf16.mxu0 %vm338_vm0, %v13319_v59 }
 0x1df   :  { %17519 = vst [vmem:[#allocation97_spill] sm:$0xff] %v13952_v49  ;;  %v4337_v30 = vor.u32 %v4336_v2, %v4335_v56  ;;  %v4343_v60 = vrot.slane %v17520_v6, 1  ;;  %v13959_v57 = vsel %vm4258_vm6, %v4317_v12, %v4325_v0  ;;  %v17524_v62 = vshll.u32 %v13672_v1, 16 }
 0x1e0   :  { %v4344_v38 = vrot.slane %v17521_v21, 2  ;;  %17522 = vst [vmem:[#allocation98_spill] sm:$0xff] %v13959_v57  ;;  %v4333_v58 = vor.u32 %v4332_v10, %v4331_v4  ;;  %v4339_v24 = vrot.slane %v17523_v5, 1  ;;  %v17526_v2 = vshrl.u32 %v13674_v18, 16  ;;  %v2068_v57 = vld [vmem:[#allocation2] sm:$0x80] }
 0x1e1   :  { %v4340_v15 = vrot.slane %v17524_v62, 2  ;;  %v13967_v8 = vsel %vm4258_vm6, %v4329_v47, %v4337_v30  ;;  %v17527_v21 = vshll.u32 %v13674_v18, 16  ;;  %v17529_v62 = vshrl.u32 %v13679_v31, 16 }
 0x1e2   :  { %17525 = vst [vmem:[#allocation99_spill] sm:$0xff] %v13967_v8  ;;  %v4345_v56 = vor.u32 %v4344_v38, %v4343_v60  ;;  %v4351_v6 = vrot.slane %v17526_v2, 1  ;;  %v13976_v4 = vsel %vm4258_vm6, %v4325_v0, %v4333_v58  ;;  %v17530_v47 = vshll.u32 %v13679_v31, 16 }
 0x1e3   :  { %v4352_v12 = vrot.slane %v17527_v21, 2  ;;  %17528 = vst [vmem:[#allocation100_spill] sm:$0xff] %v13976_v4  ;;  %v4341_v10 = vor.u32 %v4340_v15, %v4339_v24  ;;  %v4347_v45 = vrot.slane %v17529_v62, 1  ;;  %v17532_v2 = vshrl.u32 %v13688_v11, 16 }
 0x1e4   :  { %v4348_v5 = vrot.slane %v17530_v47, 2  ;;  %v13983_v60 = vsel %vm4258_vm6, %v4337_v30, %v4345_v56  ;;  %v17533_v8 = vshll.u32 %v13688_v11, 16  ;;  %v17535_v15 = vshrl.u32 %v13699_v54, 16  ;;  %v13996_v30 = vld [vmem:[#allocation2 + $0x1b0] sm:$0xff] }
 0x1e5   :  { %17531 = vst [vmem:[#allocation101_spill] sm:$0xff] %v13983_v60  ;;  %v4353_v38 = vor.u32 %v4352_v12, %v4351_v6  ;;  %v4359_v21 = vrot.slane %v17532_v2, 1  ;;  %v13990_v0 = vsel %vm4258_vm6, %v4333_v58, %v4341_v10  ;;  %v17536_v47 = vshll.u32 %v13699_v54, 16  ;;  %2050 = vmatmul.mubr.bf16.gmra.mrb[48].mxu0 %v13330_v34 }
 0x1e6   :  { %v4360_v59 = vrot.slane %v17533_v8, 2  ;;  %17534 = vst [vmem:[#allocation102_spill] sm:$0xff] %v13990_v0  ;;  %v4349_v24 = vor.u32 %v4348_v5, %v4347_v45  ;;  %v4355_v62 = vrot.slane %v17535_v15, 1  ;;  %v17537_v2 = vshrl.u32 %v13664_v19, 16  ;;  %v4231_v0 = vld [vmem:[#allocation2 + $0x1c0] sm:$0x7]  ;;  %9786 = vmatprep.mubr.msk.bf16.mxu0 %vm338_vm0, %v13303_v42 }
 0x1e7   :  { %v4356_v4 = vrot.slane %v17536_v47, 2  ;;  %v13999_v6 = vsel %vm4258_vm6, %v4345_v56, %v4353_v38  ;;  %v17538_v60 = vshll.u32 %v13664_v19, 16  ;;  %v17539_v15 = vshrl.u32 %v13725_v29, 16 }
 0x1e8   :  { %v4361_v12 = vor.u32 %v4360_v59, %v4359_v21  ;;  %v4367_v8 = vrot.slane %v17537_v2, 1  ;;  %v14006_v45 = vsel %vm4258_vm6, %v4341_v10, %v4349_v24  ;;  %v17540_v49 = vshll.u32 %v13725_v29, 16 }
 0x1e9   :  { %v4368_v58 = vrot.slane %v17538_v60, 2  ;;  %v4357_v5 = vor.u32 %v4356_v4, %v4355_v62  ;;  %v4363_v47 = vrot.slane %v17539_v15, 1  ;;  %v4381_v59 = vshrl.u32 %v13864_v32, 16  ;;  %v14017_v60 = vld [vmem:[#allocation2 + $0x10] sm:$0xff] }
 0x1ea   :  { %v4364_v35 = vrot.slane %v17540_v49, 2  ;;  %v14013_v56 = vsel %vm4258_vm6, %v4353_v38, %v4361_v12  ;;  %v4384_v19 = vshll.u32 %v13864_v32, 16  ;;  %v2072_v10 = vpack.c.bf16 %v14017_v60, %v2068_v57 }
 0x1eb   :  { %v4369_v21 = vor.u32 %v4368_v58, %v4367_v8  ;;  %v14021_v4 = vsel %vm4258_vm6, %v4349_v24, %v4357_v5  ;;  %v4235_v2 = vpack.c.bf16 %v4231_v0, %v13996_v30  ;;  %v17541_v49 = vshll.u32 %v13578_v27, 16 }
 0x1ec   :  { %v4365_v62 = vor.u32 %v4364_v35, %v4363_v47  ;;  %v4383_v58 = vrot.slane %v4381_v59, 1  ;;  %v4386_v32 = vrot.slane %v4384_v19, 2  ;;  %v2099_v0 = vshrl.u32 %v2072_v10, 16 }
 0x1ed   :  { %v2116_v38 = vrot.slane %v17541_v49, 4  ;;  %v14028_v8 = vsel %vm4258_vm6, %v4361_v12, %v4369_v21  ;;  %v4372_v24 = vshrl.u32 %v4235_v2, 16  ;;  %v4375_v35 = vshll.u32 %v4235_v2, 16  ;;  %2060 = vmatmul.mubr.bf16.gmra.mrb[52].mxu0 %v13307_v22  ;;  %v11187_v2 = vld [vmem:[%s16979_s4 + $0x1f4] ss:$8 sps:$4 sm:$0xff]  }
 0x1ee   :  { %v14033_v57 = vsel %vm4258_vm6, %v4357_v5, %v4365_v62  ;;  %v14035_v15 = vor.u32 %v4386_v32, %v4383_v58  ;;  %v2102_v34 = vshll.u32 %v2072_v10, 16  ;;  %v2101_v42 = vrot.slane %v2099_v0, 3  ;;  %v11185_v22 = vld [vmem:[%s16979_s4 + $0x1f0] ss:$8 sps:$4 sm:$0xff]   ;;  %v11196_v58 = vld [vmem:[%s16979_s4 + $0x224] ss:$8 sps:$4 sm:$0xff]  }
 0x1ef   :  { %v4374_v47 = vrot.slane %v4372_v24, 1  ;;  %v4377_v27 = vrot.slane %v4375_v35, 2  ;;  %v2117_v49 = vor.u32 %v2116_v38, %v13605_v25  ;;  %v11188_v38 = vld [vmem:[%s16979_s4 + $0x200] ss:$8 sps:$4 sm:$0xff]   ;;  %v11202_v24 = vld [vmem:[%s16979_s4 + $0x244] ss:$8 sps:$4 sm:$0xff]  }
 0x1f0   :  { %v14040_v12 = vsel %vm4258_vm6, %v4369_v21, %v14035_v15  ;;  %v2104_v19 = vrot.slane %v2102_v34, 4  ;;  %v11182_v21 = vld [vmem:[%s16979_s4 + $0x1e0] ss:$8 sps:$4 sm:$0xff]   ;;  %v11208_v0 = vld [vmem:[%s16979_s4 + $0x264] ss:$8 sps:$4 sm:$0xff]  }
 0x1f1   :  { %v14042_v59 = vor.u32 %v4377_v27, %v4374_v47  ;;  %v2121_v10 = vsel %vm2097_vm3, %v2117_v49, %v13321_v37  ;;  %v11190_v37 = vld [vmem:[%s16979_s4 + $0x204] ss:$8 sps:$4 sm:$0xff]   ;;  %v11194_v32 = vld [vmem:[%s16979_s4 + $0x220] ss:$8 sps:$4 sm:$0xff]  }
 0x1f2   :  { %9827 = vmatprep.mubr.msk.bf16.mxu0 %vm338_vm0, %v2121_v10  ;;  %v2105_v25 = vor.u32 %v2104_v19, %v2101_v42  ;;  %v11200_v35 = vld [vmem:[%s16979_s4 + $0x240] ss:$8 sps:$4 sm:$0xff]   ;;  %v11214_v47 = vld [vmem:[%s16979_s4 + $0x284] ss:$8 sps:$4 sm:$0xff]   ;;  %v17546_v42 = vld [vmem:[#allocation51_spill] sm:$0xff] }
 0x1f3   :  { %v14046_v5 = vsel %vm4258_vm6, %v4365_v62, %v14042_v59  ;;  %v11206_v34 = vld [vmem:[%s16979_s4 + $0x260] ss:$8 sps:$4 sm:$0xff]   ;;  %v17547_v19 = vld [vmem:[#allocation46_spill] sm:$0xff] }
 0x1f4   :  { %v2109_v62 = vsel %vm2097_vm3, %v2105_v25, %v13332_v9  ;;  %v11193_v9 = vld [vmem:[%s16979_s4 + $0x214] ss:$8 sps:$4 sm:$0xff]   ;;  %v17542_v27 = vld [vmem:[#allocation45_spill] sm:$0xff]  ;;  %v17543_v49 = vld [vmem:[#allocation40_spill] sm:$0xff] }
 0x1f5   :  { %2417 = vmatmul.mubr.bf16.vlgmr.msra.gmra.mrb[0].mxu0 %v2109_v62  ;;  %v17548_v10 = vld [vmem:[#allocation50_spill] sm:$0xff]  ;;  %v17549_v25 = vld [vmem:[#allocation49_spill] sm:$0xff] }
 0x1f6   :  { %2803 = vmatpush1.bf16.msra.mxu0 %v11182_v21  ;;  %9828 = vmatprep.mubr.msk.bf16.mxu0 %vm338_vm0, %v13360_v41  ;;  %v11191_v41 = vld [vmem:[%s16979_s4 + $0x210] ss:$8 sps:$4 sm:$0xff]   ;;  %v17550_v21 = vld [vmem:[#allocation52_spill] sm:$0xff] }
 0x1f7   :  { %2804 = vmatprep.subr.bf16.mxu0 %v11187_v2  ;;  %v17551_v2 = vld [vmem:[#allocation57_spill] sm:$0xff]  ;;  %v17552_v62 = vld [vmem:[#allocation58_spill] sm:$0xff] }
 0x1fa   :  { %2805 = vmatpush1.bf16.msra.mxu0 %v11185_v22  ;;  %v17553_v22 = vld [vmem:[#allocation59_spill] sm:$0xff] }
 0x1fb   :  { %2806 = vmatprep.subr.bf16.mxu0 %v11190_v37  ;;  %v17554_v37 = vld [vmem:[#allocation60_spill] sm:$0xff] }
 0x1fd   :  { %2427 = vmatmul.mubr.bf16.gmra.mrb[4].mxu0 %v13364_v20  ;;  %v11199_v20 = vld [vmem:[%s16979_s4 + $0x234] ss:$8 sps:$4 sm:$0xff]  }
 0x1fe   :  { %9829 = vmatprep.mubr.msk.bf16.mxu0 %vm338_vm0, %v13373_v61  ;;  %2807 = vmatpush1.bf16.msra.mxu0 %v11188_v38  ;;  %v11197_v61 = vld [vmem:[%s16979_s4 + $0x230] ss:$8 sps:$4 sm:$0xff]  }
 0x1ff   :  { %2808 = vmatprep.subr.bf16.mxu0 %v11193_v9  ;;  %v17555_v38 = vld [vmem:[#allocation63_spill] sm:$0xff]  ;;  %v17556_v9 = vld [vmem:[#allocation64_spill] sm:$0xff] }
 0x202   :  { %2809 = vmatpush1.bf16.msra.mxu0 %v11191_v41  ;;  %v17557_v41 = vld [vmem:[#allocation61_spill] sm:$0xff] }
 0x203   :  { %2810 = vmatprep.subr.bf16.mxu0 %v11196_v58  ;;  %v11530_v58 = vld [vmem:[#allocation2 + $0x28] sm:$0xff] }
 0x205   :  { %2437 = vmatmul.mubr.bf16.gmra.mrb[8].mxu0 %v13378_v7  ;;  %v11205_v7 = vld [vmem:[%s16979_s4 + $0x254] ss:$8 sps:$4 sm:$0xff]  }
 0x206   :  { %9830 = vmatprep.mubr.msk.bf16.mxu0 %vm338_vm0, %v13388_v52  ;;  %2811 = vmatpush1.bf16.msra.mxu0 %v11194_v32  ;;  %v11203_v52 = vld [vmem:[%s16979_s4 + $0x250] ss:$8 sps:$4 sm:$0xff]   ;;  %v17558_v32 = vld [vmem:[#allocation65_spill] sm:$0xff] }
 0x207   :  { %2812 = vmatprep.subr.bf16.mxu0 %v11199_v20  ;;  %v2612_v20 = vpack.c.bf16 %v11530_v58, %v17558_v32  ;;  %v11227_v32 = vld [vmem:[%s16979_s4 + $0x2d0] ss:$8 sps:$4 sm:$0xff]  }
 0x20a   :  { %2813 = vmatpush1.bf16.msra.mxu0 %v11197_v61  ;;  %v17559_v61 = vld [vmem:[#allocation62_spill] sm:$0xff] }
 0x20b   :  { %2814 = vmatprep.subr.bf16.mxu0 %v11202_v24  ;;  %v11212_v24 = vld [vmem:[%s16979_s4 + $0x280] ss:$8 sps:$4 sm:$0xff]  }
 0x20d   :  { %2447 = vmatmul.mubr.bf16.gmra.mrb[12].mxu0 %v13401_v46  ;;  %v11211_v46 = vld [vmem:[%s16979_s4 + $0x274] ss:$8 sps:$4 sm:$0xff]  }
 0x20e   :  { %9831 = vmatprep.mubr.msk.bf16.mxu0 %vm338_vm0, %v13408_v14  ;;  %2815 = vmatpush1.bf16.msra.mxu0 %v11200_v35  ;;  %v11209_v14 = vld [vmem:[%s16979_s4 + $0x270] ss:$8 sps:$4 sm:$0xff]   ;;  %v11531_v35 = vld [vmem:[#allocation2 + $0x20] sm:$0xff] }
 0x20f   :  { %2816 = vmatprep.subr.bf16.mxu0 %v11205_v7  ;;  %v2611_v7 = vpack.c.bf16 %v11531_v35, %v14017_v60  ;;  %v11220_v60 = vld [vmem:[%s16979_s4 + $0x2a4] ss:$8 sps:$4 sm:$0xff]  }
 0x210   :  { %v11543_v35 = vld [vmem:[#allocation2 + $0x80] sm:$0xff] }
 0x212   :  { %2817 = vmatpush1.bf16.msra.mxu0 %v11203_v52  ;;  %v11217_v52 = vld [vmem:[%s16979_s4 + $0x294] ss:$8 sps:$4 sm:$0xff]  }
 0x213   :  { %2818 = vmatprep.subr.bf16.mxu0 %v11208_v0  ;;  %v11532_v0 = vld [vmem:[#allocation2 + $0x38] sm:$0xff] }
 0x215   :  { %2457 = vmatmul.mubr.bf16.gmra.mrb[16].mxu0 %v13413_v40  ;;  %v17544_v40 = vld [vmem:[#allocation44_spill] sm:$0xff] }
 0x216   :  { %9832 = vmatprep.mubr.msk.bf16.mxu0 %vm338_vm0, %v13420_v53  ;;  %2819 = vmatpush1.bf16.msra.mxu0 %v11206_v34  ;;  %v17545_v53 = vld [vmem:[#allocation43_spill] sm:$0xff]  ;;  %v11533_v34 = vld [vmem:[#allocation2 + $0x48] sm:$0xff] }
 0x217   :  { %2820 = vmatprep.subr.bf16.mxu0 %v11211_v46  ;;  %v2614_v46 = vpack.c.bf16 %v11533_v34, %v11532_v0  ;;  %v11544_v0 = vld [vmem:[#allocation2 + $0x98] sm:$0xff]  ;;  %v11545_v34 = vld [vmem:[#allocation2 + $0xa8] sm:$0xff] }
 0x21a   :  { %2821 = vmatpush1.bf16.msra.mxu0 %v11209_v14  ;;  %v11215_v14 = vld [vmem:[%s16979_s4 + $0x290] ss:$8 sps:$4 sm:$0xff]  }
 0x21b   :  { %3511 = vmatprep.subr.bf16.mxu0 %v11214_v47  ;;  %v11218_v47 = vld [vmem:[%s16979_s4 + $0x2a0] ss:$8 sps:$4 sm:$0xff]  }
 0x21d   :  { %2467 = vmatmul.mubr.bf16.gmra.mrb[20].mxu0 %v17542_v27  ;;  %v11534_v27 = vld [vmem:[#allocation2 + $0x30] sm:$0xff] }
 0x21e   :  { %9833 = vmatprep.mubr.msk.bf16.mxu0 %vm338_vm0, %v17543_v49  ;;  %v11535_v49 = vld [vmem:[#allocation2 + $0x40] sm:$0xff] }
 0x225   :  { %2477 = vmatmul.mubr.bf16.gmra.mrb[24].mxu0 %v17544_v40  ;;  %v2613_v40 = vpack.c.bf16 %v11535_v49, %v11534_v27  ;;  %v11546_v27 = vld [vmem:[#allocation2 + $0x90] sm:$0xff]  ;;  %v11547_v49 = vld [vmem:[#allocation2 + $0xa0] sm:$0xff] }
 0x226   :  { %9834 = vmatprep.mubr.msk.bf16.mxu0 %vm338_vm0, %v17545_v53  ;;  %v11223_v53 = vld [vmem:[%s16979_s4 + $0x2b4] ss:$8 sps:$4 sm:$0xff]  }
 0x22d   :  { %2487 = vmatmul.mubr.bf16.gmra.mrb[28].mxu0 %v17546_v42  ;;  %v11536_v42 = vld [vmem:[#allocation2 + $0x58] sm:$0xff] }
 0x22e   :  { %9835 = vmatprep.mubr.msk.bf16.mxu0 %vm338_vm0, %v17547_v19  ;;  %v11537_v19 = vld [vmem:[#allocation2 + $0x68] sm:$0xff] }
 0x235   :  { %2497 = vmatmul.mubr.bf16.gmra.mrb[32].mxu0 %v17548_v10  ;;  %v2616_v10 = vpack.c.bf16 %v11537_v19, %v11536_v42  ;;  %v11548_v42 = vld [vmem:[#allocation2 + $0xb8] sm:$0xff]  ;;  %v11549_v19 = vld [vmem:[#allocation2 + $0xc8] sm:$0xff] }
 0x236   :  { %9836 = vmatprep.mubr.msk.bf16.mxu0 %vm338_vm0, %v17549_v25  ;;  %v11221_v25 = vld [vmem:[%s16979_s4 + $0x2b0] ss:$8 sps:$4 sm:$0xff]  }
 0x23d   :  { %2507 = vmatmul.mubr.bf16.gmra.mrb[36].mxu0 %v17550_v21  ;;  %v11226_v21 = vld [vmem:[%s16979_s4 + $0x2c4] ss:$8 sps:$4 sm:$0xff]  }
 0x23e   :  { %9837 = vmatprep.mubr.msk.bf16.mxu0 %vm338_vm0, %v17551_v2  ;;  %v11224_v2 = vld [vmem:[%s16979_s4 + $0x2c0] ss:$8 sps:$4 sm:$0xff]  }
 0x245   :  { %2517 = vmatmul.mubr.bf16.gmra.mrb[40].mxu0 %v17552_v62  ;;  %v11538_v62 = vld [vmem:[#allocation2 + $0x50] sm:$0xff] }
 0x246   :  { %9838 = vmatprep.mubr.msk.bf16.mxu0 %vm338_vm0, %v17553_v22  ;;  %v11539_v22 = vld [vmem:[#allocation2 + $0x60] sm:$0xff] }
 0x24d   :  { %2527 = vmatmul.mubr.bf16.gmra.mrb[44].mxu0 %v17554_v37  ;;  %v2615_v37 = vpack.c.bf16 %v11539_v22, %v11538_v62  ;;  %v11551_v62 = vld [vmem:[#allocation2 + $0xc0] sm:$0xff] }
 0x24e   :  { %9839 = vmatprep.mubr.msk.bf16.mxu0 %vm338_vm0, %v17555_v38  ;;  %v11229_v38 = vld [vmem:[%s16979_s4 + $0x2d4] ss:$8 sps:$4 sm:$0xff]  }
 0x255   :  { %2537 = vmatmul.mubr.bf16.gmra.mrb[48].mxu0 %v17556_v9  ;;  %v11540_v9 = vld [vmem:[#allocation2 + $0x78] sm:$0xff] }
 0x256   :  { %9840 = vmatprep.mubr.msk.bf16.mxu0 %vm338_vm0, %v17557_v41  ;;  %v11541_v41 = vld [vmem:[#allocation2 + $0x88] sm:$0xff] }
 0x257   :  { %v2618_v58 = vpack.c.bf16 %v11541_v41, %v11540_v9  ;;  %v11554_v41 = vld [vmem:[#allocation2 + $0xd0] sm:$0xff] }
 0x25d   :  { %2547 = vmatmul.mubr.bf16.gmra.mrb[52].mxu0 %v17559_v61  ;;  %v11230_v61 = vld [vmem:[%s16979_s4 + $0x2e0] ss:$8 sps:$4 sm:$0xff]  }
 0x25e   :  { %9881 = vmatprep.mubr.msk.bf16.mxu0 %vm338_vm0, %v2612_v20  ;;  %v11232_v20 = vld [vmem:[%s16979_s4 + $0x2e4] ss:$8 sps:$4 sm:$0xff]  }
 0x265   :  { %2835 = vmatmul.mubr.bf16.vlgmr.msra.gmra.mrb[0].mxu0 %v2611_v7 }
 0x266   :  { %3512 = vmatpush1.bf16.msra.mxu0 %v11212_v24  ;;  %9882 = vmatprep.mubr.msk.bf16.mxu0 %vm338_vm0, %v2614_v46  ;;  %v11542_v24 = vld [vmem:[#allocation2 + $0x70] sm:$0xff]  ;;  %v2620_v46 = vpack.c.bf16 %v11545_v34, %v11544_v0  ;;  %v11560_v0 = vld [vmem:[#allocation2 + $0x118] sm:$0xff]  ;;  %v11561_v34 = vld [vmem:[#allocation2 + $0x128] sm:$0xff] }
 0x267   :  { %3513 = vmatprep.subr.bf16.mxu0 %v11217_v52  ;;  %v2617_v7 = vpack.c.bf16 %v11543_v35, %v11542_v24  ;;  %v11235_v52 = vld [vmem:[%s16979_s4 + $0x2f4] ss:$8 sps:$4 sm:$0xff]  }
 0x268   :  { %v11558_v35 = vld [vmem:[#allocation2 + $0xf0] sm:$0xff] }
 0x26a   :  { %3514 = vmatpush1.bf16.msra.mxu0 %v11215_v14  ;;  %v11233_v14 = vld [vmem:[%s16979_s4 + $0x2f0] ss:$8 sps:$4 sm:$0xff]  }
 0x26b   :  { %3515 = vmatprep.subr.bf16.mxu0 %v11220_v60  ;;  %v11238_v60 = vld [vmem:[%s16979_s4 + $0x304] ss:$8 sps:$4 sm:$0xff]  }
 0x26d   :  { %2845 = vmatmul.mubr.bf16.gmra.mrb[4].mxu0 %v2613_v40  ;;  %v2619_v40 = vpack.c.bf16 %v11547_v49, %v11546_v27  ;;  %v11564_v27 = vld [vmem:[#allocation2 + $0x138] sm:$0xff]  ;;  %v11565_v49 = vld [vmem:[#allocation2 + $0x148] sm:$0xff] }
 0x26e   :  { %9883 = vmatprep.mubr.msk.bf16.mxu0 %vm338_vm0, %v2616_v10  ;;  %3516 = vmatpush1.bf16.msra.mxu0 %v11218_v47  ;;  %v11236_v47 = vld [vmem:[%s16979_s4 + $0x300] ss:$8 sps:$4 sm:$0xff]   ;;  %v2622_v10 = vpack.c.bf16 %v11549_v19, %v11548_v42 }
 0x26f   :  { %3517 = vmatprep.subr.bf16.mxu0 %v11223_v53  ;;  %v11241_v53 = vld [vmem:[%s16979_s4 + $0x314] ss:$8 sps:$4 sm:$0xff]   ;;  %v11567_v42 = vld [vmem:[#allocation2 + $0x140] sm:$0xff] }
 0x272   :  { %3518 = vmatpush1.bf16.msra.mxu0 %v11221_v25  ;;  %v11239_v25 = vld [vmem:[%s16979_s4 + $0x310] ss:$8 sps:$4 sm:$0xff]  }
 0x273   :  { %3519 = vmatprep.subr.bf16.mxu0 %v11226_v21  ;;  %v11244_v21 = vld [vmem:[%s16979_s4 + $0x324] ss:$8 sps:$4 sm:$0xff]  }
 0x275   :  { %2855 = vmatmul.mubr.bf16.gmra.mrb[8].mxu0 %v2615_v37  ;;  %v11552_v37 = vld [vmem:[#allocation2 + $0xd8] sm:$0xff] }
 0x276   :  { %9884 = vmatprep.mubr.msk.bf16.mxu0 %vm338_vm0, %v2618_v58  ;;  %3520 = vmatpush1.bf16.msra.mxu0 %v11224_v2  ;;  %v11550_v2 = vld [vmem:[#allocation2 + $0xb0] sm:$0xff]  ;;  %v11555_v58 = vld [vmem:[#allocation2 + $0xe0] sm:$0xff] }
 0x277   :  { %3521 = vmatprep.subr.bf16.mxu0 %v11229_v38  ;;  %v2621_v22 = vpack.c.bf16 %v11551_v62, %v11550_v2  ;;  %v11553_v38 = vld [vmem:[#allocation2 + $0xe8] sm:$0xff]  ;;  %v11570_v2 = vld [vmem:[#allocation2 + $0x150] sm:$0xff]  ;;  %v11571_v62 = vld [vmem:[#allocation2 + $0x160] sm:$0xff] }
 0x278   :  { %v2624_v9 = vpack.c.bf16 %v11553_v38, %v11552_v37  ;;  %v11572_v37 = vld [vmem:[#allocation2 + $0x178] sm:$0xff]  ;;  %v11573_v38 = vld [vmem:[#allocation2 + $0x188] sm:$0xff] }
 0x27a   :  { %3522 = vmatpush1.bf16.msra.mxu0 %v11227_v32  ;;  %v2623_v32 = vpack.c.bf16 %v11555_v58, %v11554_v41  ;;  %v3028_v41 = vld [vmem:[#allocation2 + $0x18] sm:$0xfe]  ;;  %v11574_v58 = vld [vmem:[#allocation2 + $0x170] sm:$0xff] }
 0x27b   :  { %3523 = vmatprep.subr.bf16.mxu0 %v11232_v20  ;;  %v11556_v20 = vld [vmem:[#allocation2 + $0xf8] sm:$0xff] }
 0x27d   :  { %2865 = vmatmul.mubr.bf16.gmra.mrb[12].mxu0 %v2617_v7  ;;  %v11559_v7 = vld [vmem:[#allocation2 + $0x100] sm:$0xff] }
 0x27e   :  { %9885 = vmatprep.mubr.msk.bf16.mxu0 %vm338_vm0, %v2620_v46  ;;  %3524 = vmatpush1.bf16.msra.mxu0 %v11230_v61  ;;  %v11557_v61 = vld [vmem:[#allocation2 + $0x108] sm:$0xff]  ;;  %v2628_v46 = vpack.c.bf16 %v11561_v34, %v11560_v0  ;;  %v3027_v34 = vld [vmem:[#allocation2 + $0x10] sm:$0xfe] }
 0x27f   :  { %3525 = vmatprep.subr.bf16.mxu0 %v11235_v52  ;;  %v2626_v24 = vpack.c.bf16 %v11557_v61, %v11556_v20  ;;  %v2625_v52 = vpack.c.bf16 %v11559_v7, %v11558_v35  ;;  %v11576_v61 = vld [vmem:[#allocation2 + $0x198] sm:$0xff]  ;;  %v17560_v7 = vld [vmem:[#allocation24_spill] sm:$0xff] }
 0x282   :  { %3526 = vmatpush1.bf16.msra.mxu0 %v11233_v14  ;;  %v11562_v14 = vld [vmem:[#allocation2 + $0x110] sm:$0xff] }
 0x283   :  { %3527 = vmatprep.subr.bf16.mxu0 %v11238_v60  ;;  %v11563_v60 = vld [vmem:[#allocation2 + $0x120] sm:$0xff] }
 0x285   :  { %2875 = vmatmul.mubr.bf16.gmra.mrb[16].mxu0 %v2619_v40  ;;  %v2630_v40 = vpack.c.bf16 %v11565_v49, %v11564_v27  ;;  %v17561_v27 = vld [vmem:[#allocation25_spill] sm:$0xff] }
 0x286   :  { %9886 = vmatprep.mubr.msk.bf16.mxu0 %vm338_vm0, %v2622_v10  ;;  %3528 = vmatpush1.bf16.msra.mxu0 %v11236_v47  ;;  %v2627_v47 = vpack.c.bf16 %v11563_v60, %v11562_v14  ;;  %v11568_v10 = vld [vmem:[#allocation2 + $0x158] sm:$0xff]  ;;  %v11579_v14 = vld [vmem:[#allocation2 + $0x1a0] sm:$0xff]  ;;  %v3083_v49 = vpack.c.bf16 %v17561_v27, %v3027_v34 }
 0x287   :  { %3529 = vmatprep.subr.bf16.mxu0 %v11241_v53  ;;  %v11566_v53 = vld [vmem:[#allocation2 + $0x130] sm:$0xff]  ;;  %v11250_v34 = vld [vmem:[%s16979_s4 + $0x344] ss:$8 sps:$4 sm:$0xff]  }
 0x288   :  { %v2629_v19 = vpack.c.bf16 %v11567_v42, %v11566_v53  ;;  %v3136_v42 = vshll.u32 %v3083_v49, 16  ;;  %v17570_v27 = vld [vmem:[#allocation20_spill] sm:$0xff] }
 0x28a   :  { %3530 = vmatpush1.bf16.msra.mxu0 %v11239_v25  ;;  %v11569_v25 = vld [vmem:[#allocation2 + $0x168] sm:$0xff] }
 0x28b   :  { %4004 = vmatprep.subr.bf16.mxu0 %v11244_v21  ;;  %v2632_v21 = vpack.c.bf16 %v11569_v25, %v11568_v10  ;;  %v2637_v10 = vpack.c.bf16 %v13996_v30, %v13996_v30  ;;  %v17562_v25 = vld [vmem:[#allocation22_spill] sm:$0xff] }
 0x28d   :  { %2885 = vmatmul.mubr.bf16.gmra.mrb[20].mxu0 %v2621_v22  ;;  %v2631_v22 = vpack.c.bf16 %v11571_v62, %v11570_v2  ;;  %v3138_v62 = vrot.slane %v3136_v42, 1  ;;  %v17572_v42 = vshll.u32 %v13608_v43, 16 }
 0x28e   :  { %9887 = vmatprep.mubr.msk.bf16.mxu0 %vm338_vm0, %v2624_v9  ;;  %v2634_v9 = vpack.c.bf16 %v11573_v38, %v11572_v37  ;;  %v17564_v38 = vshrl.u32 %v17562_v25, 16 }
 0x295   :  { %2895 = vmatmul.mubr.bf16.gmra.mrb[24].mxu0 %v2623_v32  ;;  %v11575_v32 = vld [vmem:[#allocation2 + $0x180] sm:$0xff] }
 0x296   :  { %9888 = vmatprep.mubr.msk.bf16.mxu0 %vm338_vm0, %v2626_v24  ;;  %v2633_v20 = vpack.c.bf16 %v11575_v32, %v11574_v58  ;;  %v11577_v24 = vld [vmem:[#allocation2 + $0x1a8] sm:$0xff]  ;;  %v17565_v58 = vld [vmem:[#allocation66_spill] sm:$0xff] }
 0x297   :  { %v2636_v35 = vpack.c.bf16 %v11577_v24, %v11576_v61  ;;  %v17566_v32 = vshll.u32 %v17565_v58, 16  ;;  %v17567_v61 = vshll.u32 %v13597_v39, 16 }
 0x299   :  { %v3171_v24 = vrot.slane %v17567_v61, 1 }
 0x29d   :  { %2905 = vmatmul.mubr.bf16.gmra.mrb[28].mxu0 %v2625_v52  ;;  %v3084_v52 = vpack.c.bf16 %v17560_v7, %v3028_v41  ;;  %v11242_v41 = vld [vmem:[%s16979_s4 + $0x320] ss:$8 sps:$4 sm:$0xff]  }
 0x29e   :  { %9889 = vmatprep.mubr.msk.bf16.mxu0 %vm338_vm0, %v2628_v46  ;;  %v11578_v46 = vld [vmem:[#allocation2 + $0x190] sm:$0xff] }
 0x29f   :  { %v3148_v0 = vshll.u32 %v3084_v52, 16  ;;  %v2635_v60 = vpack.c.bf16 %v11579_v14, %v11578_v46  ;;  %v3146_v53 = vshrl.u32 %v3084_v52, 16  ;;  %v17568_v46 = vshrl.u32 %v17565_v58, 16 }
 0x2a0   :  { %v17576_v58 = vshll.u32 %v13614_v33, 16 }
 0x2a5   :  { %2915 = vmatmul.mubr.bf16.gmra.mrb[32].mxu0 %v2627_v47  ;;  %v2638_v47 = vpack.c.bf16 %v13649_v48, %v13649_v48  ;;  %v3134_v48 = vshrl.u32 %v3083_v49, 16  ;;  %v17571_v49 = vshll.u32 %v17570_v27, 16 }
 0x2a6   :  { %9890 = vmatprep.mubr.msk.bf16.mxu0 %vm338_vm0, %v2630_v40  ;;  %v3150_v40 = vrot.slane %v3148_v0, 1  ;;  %v11245_v0 = vld [vmem:[%s16979_s4 + $0x330] ss:$8 sps:$4 sm:$0xff]  }
 0x2a7   :  { %v3139_v37 = vor.u32 %v3138_v62, %v3134_v48  ;;  %v17573_v62 = vshrl.u32 %v17570_v27, 16  ;;  %v17574_v48 = vshrl.u32 %v13608_v43, 16 }
 0x2ad   :  { %2925 = vmatmul.mubr.bf16.gmra.mrb[36].mxu0 %v2629_v19  ;;  %v3151_v19 = vor.u32 %v3150_v40, %v3146_v53  ;;  %v3163_v40 = vrot.slane %v17571_v49, 1  ;;  %v11248_v53 = vld [vmem:[%s16979_s4 + $0x340] ss:$8 sps:$4 sm:$0xff]  }
 0x2ae   :  { %9891 = vmatprep.mubr.msk.bf16.mxu0 %vm338_vm0, %v2632_v21  ;;  %v17563_v21 = vshll.u32 %v17562_v25, 16 }
 0x2b0   :  { %v3155_v2 = vrot.slane %v17563_v21, 1  ;;  %v11251_v21 = vld [vmem:[%s16979_s4 + $0x350] ss:$8 sps:$4 sm:$0xff]  }
 0x2b5   :  { %2935 = vmatmul.mubr.bf16.gmra.mrb[40].mxu0 %v2631_v22  ;;  %v3156_v22 = vsel %vm3132_vm4, %v3151_v19, %v3155_v2  ;;  %v3187_v19 = vrot.slane %v17572_v42, 1  ;;  %v17581_v42 = vshrl.u32 %v13619_v3, 16 }
 0x2b6   :  { %9892 = vmatprep.mubr.msk.bf16.mxu0 %vm338_vm0, %v2634_v9  ;;  %v3167_v9 = vor.u32 %v17564_v38, %v3155_v2  ;;  %v11256_v2 = vld [vmem:[%s16979_s4 + $0x364] ss:$8 sps:$4 sm:$0xff]   ;;  %v17575_v38 = vshll.u32 %v13612_v51, 16 }
 0x2b8   :  { %v3172_v52 = vsel %vm3132_vm4, %v3167_v9, %v3171_v24  ;;  %v3179_v9 = vrot.slane %v17575_v38, 1  ;;  %v11274_v38 = vld [vmem:[%s16979_s4 + $0x3c4] ss:$8 sps:$4 sm:$0xff]  }
 0x2bd   :  { %2945 = vmatmul.mubr.bf16.gmra.mrb[44].mxu0 %v2633_v20  ;;  %v3143_v20 = vrot.slane %v17566_v32, 1  ;;  %v3203_v32 = vrot.slane %v17576_v58, 1  ;;  %v17586_v58 = vshrl.u32 %v13632_v50, 16 }
 0x2be   :  { %9893 = vmatprep.mubr.msk.bf16.mxu0 %vm338_vm0, %v2636_v35  ;;  %v11247_v35 = vld [vmem:[%s16979_s4 + $0x334] ss:$8 sps:$4 sm:$0xff]  }
 0x2bf   :  { %v3144_v7 = vsel %vm3132_vm4, %v3139_v37, %v3143_v20  ;;  %v3159_v14 = vor.u32 %v17568_v46, %v3143_v20  ;;  %v3199_v37 = vor.u32 %v17574_v48, %v3187_v19  ;;  %v11259_v20 = vld [vmem:[%s16979_s4 + $0x374] ss:$8 sps:$4 sm:$0xff]   ;;  %v17579_v46 = vshll.u32 %v13619_v3, 16 }
 0x2c0   :  { %v11271_v3 = vld [vmem:[%s16979_s4 + $0x3b4] ss:$8 sps:$4 sm:$0xff]  }
 0x2c1   :  { %v3164_v25 = vsel %vm3132_vm4, %v3159_v14, %v3163_v40  ;;  %v3204_v43 = vsel %vm3132_vm4, %v3199_v37, %v3203_v32  ;;  %v3195_v14 = vrot.slane %v17579_v46, 1  ;;  %v11269_v37 = vld [vmem:[%s16979_s4 + $0x3b0] ss:$8 sps:$4 sm:$0xff]  }
 0x2c5   :  { %2955 = vmatmul.mubr.bf16.gmra.mrb[48].mxu0 %v2635_v60  ;;  %v17569_v60 = vshrl.u32 %v13597_v39, 16 }
 0x2c6   :  { %9894 = vmatprep.mubr.msk.bf16.mxu0 %vm338_vm0, %v2638_v47 }
 0x2c7   :  { %v3183_v47 = vor.u32 %v17569_v60, %v3171_v24  ;;  %v11257_v24 = vld [vmem:[%s16979_s4 + $0x370] ss:$8 sps:$4 sm:$0xff]   ;;  %v11260_v60 = vld [vmem:[%s16979_s4 + $0x380] ss:$8 sps:$4 sm:$0xff]  }
 0x2c9   :  { %v3188_v39 = vsel %vm3132_vm4, %v3183_v47, %v3187_v19  ;;  %v17580_v47 = vshll.u32 %v13626_v55, 16  ;;  %v3207_v19 = vor.u32 %v17581_v42, %v3195_v14 }
 0x2cb   :  { %v3219_v27 = vrot.slane %v17580_v47, 1 }
 0x2cd   :  { %2965 = vmatmul.mubr.bf16.gmra.mrb[52].mxu0 %v2637_v10  ;;  %v11253_v10 = vld [vmem:[%s16979_s4 + $0x354] ss:$8 sps:$4 sm:$0xff]  }
 0x2ce   :  { %9935 = vmatprep.mubr.msk.bf16.mxu0 %vm338_vm0, %v3156_v22  ;;  %v3175_v22 = vor.u32 %v17573_v62, %v3163_v40  ;;  %v11263_v40 = vld [vmem:[%s16979_s4 + $0x390] ss:$8 sps:$4 sm:$0xff]   ;;  %v17584_v62 = vshll.u32 %v13632_v50, 16  ;;  %v17590_v50 = vshrl.u32 %v13645_v16, 16 }
 0x2d0   :  { %v3180_v61 = vsel %vm3132_vm4, %v3175_v22, %v3179_v9  ;;  %v3235_v22 = vrot.slane %v17584_v62, 1  ;;  %v17600_v62 = vshll.u32 %v13674_v18, 16 }
 0x2d5   :  { %3544 = vmatmul.mubr.bf16.vlgmr.msra.gmra.mrb[0].mxu0 %v3144_v7  ;;  %v17577_v7 = vshrl.u32 %v13612_v51, 16  ;;  %v11265_v51 = vld [vmem:[%s16979_s4 + $0x394] ss:$8 sps:$4 sm:$0xff]  }
 0x2d6   :  { %4005 = vmatpush1.bf16.msra.mxu0 %v11242_v41  ;;  %9936 = vmatprep.mubr.msk.bf16.mxu0 %vm338_vm0, %v3172_v52  ;;  %v11254_v41 = vld [vmem:[%s16979_s4 + $0x360] ss:$8 sps:$4 sm:$0xff]  }
 0x2d7   :  { %4006 = vmatprep.subr.bf16.mxu0 %v11247_v35  ;;  %v11262_v35 = vld [vmem:[%s16979_s4 + $0x384] ss:$8 sps:$4 sm:$0xff]   ;;  %v3191_v52 = vor.u32 %v17577_v7, %v3179_v9  ;;  %v17585_v9 = vshrl.u32 %v13628_v63, 16 }
 0x2d9   :  { %v3196_v49 = vsel %vm3132_vm4, %v3191_v52, %v3195_v14  ;;  %v17592_v14 = vshll.u32 %v13658_v36, 16 }
 0x2da   :  { %4007 = vmatpush1.bf16.msra.mxu0 %v11245_v0  ;;  %v17578_v0 = vshrl.u32 %v13614_v33, 16 }
 0x2db   :  { %4008 = vmatprep.subr.bf16.mxu0 %v11250_v34 }
 0x2dc   :  { %v3215_v34 = vor.u32 %v17578_v0, %v3203_v32  ;;  %v3247_v32 = vor.u32 %v17586_v58, %v3235_v22 }
 0x2dd   :  { %3554 = vmatmul.mubr.bf16.gmra.mrb[4].mxu0 %v3164_v25 }
 0x2de   :  { %9937 = vmatprep.mubr.msk.bf16.mxu0 %vm338_vm0, %v3188_v39  ;;  %4009 = vmatpush1.bf16.msra.mxu0 %v11248_v53  ;;  %v3220_v33 = vsel %vm3132_vm4, %v3215_v34, %v3219_v27  ;;  %v11268_v53 = vld [vmem:[%s16979_s4 + $0x3a4] ss:$8 sps:$4 sm:$0xff]   ;;  %v17583_v39 = vshll.u32 %v13628_v63, 16  ;;  %v17589_v63 = vshrl.u32 %v13634_v13, 16  ;;  %v17591_v34 = vshll.u32 %v13647_v26, 16 }
 0x2df   :  { %4010 = vmatprep.subr.bf16.mxu0 %v11253_v10  ;;  %v17582_v10 = vshrl.u32 %v13626_v55, 16 }
 0x2e0   :  { %v3243_v46 = vrot.slane %v17591_v34, 1 }
 0x2e1   :  { %v3231_v25 = vor.u32 %v17582_v10, %v3219_v27 }
 0x2e2   :  { %4011 = vmatpush1.bf16.msra.mxu0 %v11251_v21  ;;  %v3211_v21 = vrot.slane %v17583_v39, 1  ;;  %v17598_v39 = vshrl.u32 %v13669_v28, 16 }
 0x2e3   :  { %4012 = vmatprep.subr.bf16.mxu0 %v11256_v2  ;;  %v11266_v2 = vld [vmem:[%s16979_s4 + $0x3a0] ss:$8 sps:$4 sm:$0xff]   ;;  %v3236_v55 = vsel %vm3132_vm4, %v3231_v25, %v3235_v22  ;;  %v17597_v25 = vshrl.u32 %v13662_v23, 16  ;;  %v3299_v22 = vrot.slane %v17600_v62, 1  ;;  %v11283_v62 = vld [vmem:[%s16979_s4 + $0x3f4] ss:$8 sps:$4 sm:$0xff]  }
 0x2e4   :  { %v3212_v48 = vsel %vm3132_vm4, %v3207_v19, %v3211_v21 }
 0x2e5   :  { %3564 = vmatmul.mubr.bf16.gmra.mrb[8].mxu0 %v3180_v61 }
 0x2e6   :  { %9938 = vmatprep.mubr.msk.bf16.mxu0 %vm338_vm0, %v3204_v43  ;;  %4013 = vmatpush1.bf16.msra.mxu0 %v11254_v41  ;;  %v3223_v41 = vor.u32 %v17585_v9, %v3211_v21  ;;  %v17588_v43 = vshll.u32 %v13645_v16, 16  ;;  %v17599_v21 = vshll.u32 %v13672_v1, 16 }
 0x2e7   :  { %4014 = vmatprep.subr.bf16.mxu0 %v11259_v20  ;;  %v17587_v20 = vshll.u32 %v13634_v13, 16 }
 0x2e9   :  { %v3227_v61 = vrot.slane %v17587_v20, 1 }
 0x2ea   :  { %4015 = vmatpush1.bf16.msra.mxu0 %v11257_v24  ;;  %v3251_v24 = vrot.slane %v17588_v43, 1  ;;  %v17606_v43 = vshrl.u32 %v13688_v11, 16 }
 0x2eb   :  { %4016 = vmatprep.subr.bf16.mxu0 %v11262_v35  ;;  %v3228_v35 = vsel %vm3132_vm4, %v3223_v41, %v3227_v61  ;;  %v3239_v52 = vor.u32 %v17589_v63, %v3227_v61  ;;  %v17604_v41 = vshll.u32 %v13688_v11, 16  ;;  %v17605_v61 = vshrl.u32 %v13679_v31, 16  ;;  %v17608_v63 = vld [vmem:[#allocation27_spill] sm:$0xff] }
 0x2ec   :  { %v3252_v7 = vsel %vm3132_vm4, %v3247_v32, %v3251_v24  ;;  %v3263_v0 = vor.u32 %v17590_v50, %v3251_v24  ;;  %v17607_v24 = vshll.u32 %v13699_v54, 16  ;;  %v3081_v50 = vld [vmem:[#allocation2 + $0x1c0] sm:$0x1] }
 0x2ed   :  { %3574 = vmatmul.mubr.bf16.gmra.mrb[12].mxu0 %v3196_v49  ;;  %v3244_v47 = vsel %vm3132_vm4, %v3239_v52, %v3243_v46  ;;  %v17594_v49 = vshrl.u32 %v13658_v36, 16  ;;  %v3315_v58 = vrot.slane %v17604_v41, 1  ;;  %v3109_v11 = vpack.c.bf16 %v3081_v50, %v13996_v30  ;;  %v11292_v41 = vld [vmem:[%s16979_s4 + $0x424] ss:$8 sps:$4 sm:$0xff]   ;;  %v17627_v50 = vld [vmem:[#allocation79_spill] sm:$0xff] }
 0x2ee   :  { %9939 = vmatprep.mubr.msk.bf16.mxu0 %vm338_vm0, %v3220_v33  ;;  %4017 = vmatpush1.bf16.msra.mxu0 %v11260_v60  ;;  %v3267_v60 = vrot.slane %v17592_v14, 1  ;;  %v17595_v33 = vshll.u32 %v13662_v23, 16 }
 0x2ef   :  { %4018 = vmatprep.subr.bf16.mxu0 %v11265_v51  ;;  %v17593_v51 = vshrl.u32 %v13647_v26, 16 }
 0x2f0   :  { %v3268_v27 = vsel %vm3132_vm4, %v3263_v0, %v3267_v60  ;;  %v3279_v16 = vor.u32 %v17594_v49, %v3267_v60  ;;  %v17609_v0 = vshrl.u32 %v13699_v54, 16  ;;  %v17611_v60 = vld [vmem:[#allocation68_spill] sm:$0xff] }
 0x2f1   :  { %v3255_v13 = vor.u32 %v17593_v51, %v3243_v46  ;;  %v17613_v49 = vld [vmem:[#allocation28_spill] sm:$0xff] }
 0x2f2   :  { %4019 = vmatpush1.bf16.msra.mxu0 %v11263_v40  ;;  %v3259_v40 = vrot.slane %v17595_v33, 1  ;;  %v17614_v33 = vld [vmem:[#allocation67_spill] sm:$0xff] }
 0x2f3   :  { %4020 = vmatprep.subr.bf16.mxu0 %v11268_v53  ;;  %v17596_v53 = vshll.u32 %v13669_v28, 16 }
 0x2f4   :  { %v3260_v19 = vsel %vm3132_vm4, %v3255_v13, %v3259_v40  ;;  %v3271_v26 = vor.u32 %v17597_v25, %v3259_v40  ;;  %v11277_v25 = vld [vmem:[%s16979_s4 + $0x3d4] ss:$8 sps:$4 sm:$0xff]  }
 0x2f5   :  { %3584 = vmatmul.mubr.bf16.gmra.mrb[16].mxu0 %v3212_v48  ;;  %v3283_v42 = vrot.slane %v17596_v53, 1  ;;  %v3349_v53 = vshrl.u32 %v3109_v11, 16 }
 0x2f6   :  { %9940 = vmatprep.mubr.msk.bf16.mxu0 %vm338_vm0, %v3236_v55  ;;  %4021 = vmatpush1.bf16.msra.mxu0 %v11266_v2  ;;  %v3275_v2 = vrot.slane %v17599_v21, 1  ;;  %v17601_v55 = vshrl.u32 %v13672_v1, 16  ;;  %v11280_v21 = vld [vmem:[%s16979_s4 + $0x3e4] ss:$8 sps:$4 sm:$0xff]  }
 0x2f7   :  { %4022 = vmatprep.subr.bf16.mxu0 %v11271_v3  ;;  %v3284_v10 = vsel %vm3132_vm4, %v3279_v16, %v3283_v42  ;;  %v3295_v36 = vor.u32 %v17598_v39, %v3283_v42  ;;  %v3352_v16 = vshrl.u32 %v17613_v49, 16  ;;  %v17617_v39 = vld [vmem:[#allocation33_spill] sm:$0xff] }
 0x2f8   :  { %v3276_v3 = vsel %vm3132_vm4, %v3271_v26, %v3275_v2  ;;  %v3287_v23 = vor.u32 %v17601_v55, %v3275_v2  ;;  %v17616_v26 = vld [vmem:[#allocation71_spill] sm:$0xff]  ;;  %v11278_v2 = vld [vmem:[%s16979_s4 + $0x3e0] ss:$8 sps:$4 sm:$0xff]   ;;  %v11286_v55 = vld [vmem:[%s16979_s4 + $0x404] ss:$8 sps:$4 sm:$0xff]  }
 0x2f9   :  { %v3300_v48 = vsel %vm3132_vm4, %v3295_v36, %v3299_v22  ;;  %v3354_v40 = vor.u32 %v3352_v16, %v17614_v33  ;;  %v11275_v36 = vld [vmem:[%s16979_s4 + $0x3d0] ss:$8 sps:$4 sm:$0xff]   ;;  %v17638_v16 = vld [vmem:[#allocation88_spill] sm:$0xff] }
 0x2fa   :  { %4023 = vmatpush1.bf16.msra.mxu0 %v11269_v37  ;;  %v17602_v37 = vshrl.u32 %v13674_v18, 16  ;;  %v3327_v18 = vor.u32 %v17606_v43, %v3315_v58  ;;  %v11298_v43 = vld [vmem:[%s16979_s4 + $0x444] ss:$8 sps:$4 sm:$0xff]  }
 0x2fb   :  { %4545 = vmatprep.subr.bf16.mxu0 %v11274_v38  ;;  %v17603_v38 = vshll.u32 %v13679_v31, 16  ;;  %v17610_v31 = vshll.u32 %v13725_v29, 16 }
 0x2fc   :  { %v3311_v28 = vor.u32 %v17602_v37, %v3299_v22  ;;  %v3332_v52 = vsel %vm3132_vm4, %v3327_v18, %v17608_v63  ;;  %v17618_v22 = vld [vmem:[#allocation29_spill] sm:$0xff]  ;;  %v11289_v37 = vld [vmem:[%s16979_s4 + $0x414] ss:$8 sps:$4 sm:$0xff]   ;;  %v11299_v63 = vld [vmem:[%s16979_s4 + $0x450] ss:$8 sps:$4 sm:$0xff]  }
 0x2fd   :  { %3594 = vmatmul.mubr.bf16.gmra.mrb[20].mxu0 %v3228_v35  ;;  %v3291_v9 = vrot.slane %v17603_v38, 1  ;;  %v3307_v35 = vrot.slane %v17607_v24, 1  ;;  %v3323_v46 = vrot.slane %v17610_v31, 1  ;;  %v17621_v38 = vld [vmem:[#allocation73_spill] sm:$0xff]  ;;  %v11301_v24 = vld [vmem:[%s16979_s4 + $0x454] ss:$8 sps:$4 sm:$0xff]  }
 0x2fe   :  { %9941 = vmatprep.mubr.msk.bf16.mxu0 %vm338_vm0, %v3252_v7  ;;  %v3316_v20 = vsel %vm3132_vm4, %v3311_v28, %v3315_v58  ;;  %v17620_v28 = vld [vmem:[#allocation72_spill] sm:$0xff]  ;;  %v17630_v31 = vld [vmem:[#allocation82_spill] sm:$0xff] }
 0x2ff   :  { %v3292_v32 = vsel %vm3132_vm4, %v3287_v23, %v3291_v9  ;;  %v3303_v1 = vor.u32 %v17605_v61, %v3291_v9  ;;  %v3319_v34 = vor.u32 %v17609_v0, %v3307_v35  ;;  %v11284_v23 = vld [vmem:[%s16979_s4 + $0x400] ss:$8 sps:$4 sm:$0xff]   ;;  %v11287_v9 = vld [vmem:[%s16979_s4 + $0x410] ss:$8 sps:$4 sm:$0xff]  }
 0x300   :  { %v11290_v58 = vld [vmem:[%s16979_s4 + $0x420] ss:$8 sps:$4 sm:$0xff]   ;;  %v17623_v61 = vld [vmem:[#allocation75_spill] sm:$0xff] }
 0x301   :  { %v3308_v7 = vsel %vm3132_vm4, %v3303_v1, %v3307_v35  ;;  %v3324_v14 = vsel %vm3132_vm4, %v3319_v34, %v3323_v46  ;;  %v11293_v1 = vld [vmem:[%s16979_s4 + $0x430] ss:$8 sps:$4 sm:$0xff]   ;;  %v11296_v18 = vld [vmem:[%s16979_s4 + $0x440] ss:$8 sps:$4 sm:$0xff]  }
 0x302   :  { %v17624_v35 = vld [vmem:[#allocation76_spill] sm:$0xff]  ;;  %v17629_v34 = vld [vmem:[#allocation81_spill] sm:$0xff] }
 0x303   :  { %v17628_v0 = vld [vmem:[#allocation80_spill] sm:$0xff] }
 0x305   :  { %3604 = vmatmul.mubr.bf16.gmra.mrb[24].mxu0 %v3244_v47  ;;  %v3337_v47 = vshll.u32 %v3109_v11, 16  ;;  %v17632_v11 = vld [vmem:[#allocation32_spill] sm:$0xff] }
 0x306   :  { %9942 = vmatprep.mubr.msk.bf16.mxu0 %vm338_vm0, %v3268_v27  ;;  %v17612_v27 = vshrl.u32 %v13725_v29, 16 }
 0x307   :  { %v3339_v13 = vrot.slane %v3337_v47, 1  ;;  %v17635_v47 = vld [vmem:[#allocation85_spill] sm:$0xff] }
 0x308   :  { %v3335_v51 = vor.u32 %v17612_v27, %v3323_v46  ;;  %v17631_v46 = vld [vmem:[#allocation83_spill] sm:$0xff]  ;;  %v17636_v27 = vld [vmem:[#allocation86_spill] sm:$0xff] }
 0x309   :  { %v3351_v42 = vor.u32 %v3349_v53, %v3339_v13 }
 0x30a   :  { %v3340_v54 = vsel %vm3132_vm4, %v3335_v51, %v3339_v13  ;;  %v17637_v51 = vld [vmem:[#allocation87_spill] sm:$0xff]  ;;  %v3738_v13 = vld [vmem:[#allocation2 + $0x1c0] sm:$0x3] }
 0x30b   :  { %v3742_v49 = vpack.c.bf16 %v3738_v13, %v13996_v30  ;;  %v17642_v30 = vld [vmem:[#allocation39_spill] sm:$0xff] }
 0x30d   :  { %3614 = vmatmul.mubr.bf16.gmra.mrb[28].mxu0 %v3260_v19  ;;  %v17615_v19 = vld [vmem:[#allocation69_spill] sm:$0xff]  ;;  %v3844_v33 = vrot.slane %v3742_v49, 1 }
 0x30e   :  { %9943 = vmatprep.mubr.msk.bf16.mxu0 %vm338_vm0, %v3284_v10  ;;  %v11272_v10 = vld [vmem:[%s16979_s4 + $0x3c0] ss:$8 sps:$4 sm:$0xff]  }
 0x315   :  { %3624 = vmatmul.mubr.bf16.gmra.mrb[32].mxu0 %v3276_v3  ;;  %v17619_v3 = vld [vmem:[#allocation70_spill] sm:$0xff] }
 0x316   :  { %9944 = vmatprep.mubr.msk.bf16.mxu0 %vm338_vm0, %v3300_v48  ;;  %v11281_v48 = vld [vmem:[%s16979_s4 + $0x3f0] ss:$8 sps:$4 sm:$0xff]  }
 0x31d   :  { %3634 = vmatmul.mubr.bf16.gmra.mrb[36].mxu0 %v3292_v32  ;;  %v11295_v32 = vld [vmem:[%s16979_s4 + $0x434] ss:$8 sps:$4 sm:$0xff]  }
 0x31e   :  { %9945 = vmatprep.mubr.msk.bf16.mxu0 %vm338_vm0, %v3316_v20  ;;  %v17622_v20 = vld [vmem:[#allocation74_spill] sm:$0xff] }
 0x325   :  { %3644 = vmatmul.mubr.bf16.gmra.mrb[40].mxu0 %v3308_v7  ;;  %v17625_v7 = vld [vmem:[#allocation77_spill] sm:$0xff] }
 0x326   :  { %9946 = vmatprep.mubr.msk.bf16.mxu0 %vm338_vm0, %v3332_v52  ;;  %v17626_v52 = vld [vmem:[#allocation78_spill] sm:$0xff] }
 0x32d   :  { %3654 = vmatmul.mubr.bf16.gmra.mrb[44].mxu0 %v3324_v14  ;;  %v17633_v14 = vld [vmem:[#allocation31_spill] sm:$0xff] }
 0x32e   :  { %9947 = vmatprep.mubr.msk.bf16.mxu0 %vm338_vm0, %v17611_v60  ;;  %v17634_v60 = vld [vmem:[#allocation84_spill] sm:$0xff] }
 0x335   :  { %3664 = vmatmul.mubr.bf16.gmra.mrb[48].mxu0 %v3340_v54  ;;  %v17639_v54 = vld [vmem:[#allocation90_spill] sm:$0xff] }
 0x336   :  { %9948 = vmatprep.mubr.msk.bf16.mxu0 %vm338_vm0, %v3354_v40  ;;  %v17640_v40 = vrot.slane %v13725_v29, 1  ;;  %v17645_v29 = vld [vmem:[#allocation92_spill] sm:$0xff] }
 0x338   :  { %v3845_v53 = vsel %vm3793_vm5, %v17640_v40, %v3844_v33 }
 0x33d   :  { %3674 = vmatmul.mubr.bf16.gmra.mrb[52].mxu0 %v3351_v42  ;;  %v17641_v42 = vld [vmem:[#allocation89_spill] sm:$0xff] }
 0x33e   :  { %9989 = vmatprep.mubr.msk.bf16.mxu0 %vm338_vm0, %v17615_v19  ;;  %v17643_v19 = vld [vmem:[#allocation35_spill] sm:$0xff] }
 0x345   :  { %4037 = vmatmul.mubr.bf16.vlgmr.msra.gmra.mrb[0].mxu0 %v17616_v26  ;;  %v17647_v26 = vld [vmem:[#allocation37_spill] sm:$0xff] }
 0x346   :  { %4546 = vmatpush1.bf16.msra.mxu0 %v11272_v10  ;;  %9990 = vmatprep.mubr.msk.bf16.mxu0 %vm338_vm0, %v17617_v39  ;;  %v17644_v10 = vld [vmem:[#allocation91_spill] sm:$0xff]  ;;  %v17648_v39 = vld [vmem:[#allocation93_spill] sm:$0xff] }
 0x347   :  { %4547 = vmatprep.subr.bf16.mxu0 %v11277_v25  ;;  %v17646_v25 = vld [vmem:[#allocation38_spill] sm:$0xff] }
 0x34a   :  { %4548 = vmatpush1.bf16.msra.mxu0 %v11275_v36  ;;  %v17651_v36 = vld [vmem:[#allocation96_spill] sm:$0xff] }
 0x34b   :  { %4549 = vmatprep.subr.bf16.mxu0 %v11280_v21  ;;  %v17652_v21 = vld [vmem:[#allocation97_spill] sm:$0xff] }
 0x34d   :  { %4047 = vmatmul.mubr.bf16.gmra.mrb[4].mxu0 %v17618_v22  ;;  %v17655_v22 = vld [vmem:[#allocation100_spill] sm:$0xff] }
 0x34e   :  { %9991 = vmatprep.mubr.msk.bf16.mxu0 %vm338_vm0, %v17619_v3  ;;  %4550 = vmatpush1.bf16.msra.mxu0 %v11278_v2  ;;  %v17653_v2 = vld [vmem:[#allocation98_spill] sm:$0xff]  ;;  %v17656_v3 = vld [vmem:[#allocation101_spill] sm:$0xff] }
 0x34f   :  { %4551 = vmatprep.subr.bf16.mxu0 %v11283_v62  ;;  %v17654_v62 = vld [vmem:[#allocation99_spill] sm:$0xff] }
 0x352   :  { %4552 = vmatpush1.bf16.msra.mxu0 %v11281_v48  ;;  %v17657_v48 = vld [vmem:[#allocation102_spill] sm:$0xff] }
 0x353   :  { %4553 = vmatprep.subr.bf16.mxu0 %v11286_v55 }
 0x355   :  { %4057 = vmatmul.mubr.bf16.gmra.mrb[8].mxu0 %v17620_v28 }
 0x356   :  { %9992 = vmatprep.mubr.msk.bf16.mxu0 %vm338_vm0, %v17621_v38  ;;  %4554 = vmatpush1.bf16.msra.mxu0 %v11284_v23 }
 0x357   :  { %4555 = vmatprep.subr.bf16.mxu0 %v11289_v37 }
 0x35a   :  { %4556 = vmatpush1.bf16.msra.mxu0 %v11287_v9 }
 0x35b   :  { %4557 = vmatprep.subr.bf16.mxu0 %v11292_v41 }
 0x35d   :  { %4067 = vmatmul.mubr.bf16.gmra.mrb[12].mxu0 %v17622_v20 }
 0x35e   :  { %9993 = vmatprep.mubr.msk.bf16.mxu0 %vm338_vm0, %v17623_v61  ;;  %4558 = vmatpush1.bf16.msra.mxu0 %v11290_v58 }
 0x35f   :  { %4559 = vmatprep.subr.bf16.mxu0 %v11295_v32 }
 0x362   :  { %4560 = vmatpush1.bf16.msra.mxu0 %v11293_v1 }
 0x363   :  { %4561 = vmatprep.subr.bf16.mxu0 %v11298_v43 }
 0x365   :  { %4077 = vmatmul.mubr.bf16.gmra.mrb[16].mxu0 %v17624_v35 }
 0x366   :  { %9994 = vmatprep.mubr.msk.bf16.mxu0 %vm338_vm0, %v17625_v7  ;;  %4562 = vmatpush1.bf16.msra.mxu0 %v11296_v18  ;;  %v17660_v18 = vld [vmem:[#allocation4_spill] sm:$0xff] }
 0x367   :  { %4563 = vmatprep.subr.bf16.mxu0 %v11301_v24 }
 0x36a   :  { %4564 = vmatpush1.bf16.msra.mxu0 %v11299_v63 }
 0x36d   :  { %4087 = vmatmul.mubr.bf16.gmra.mrb[20].mxu0 %v17626_v52 }
 0x36e   :  { %9995 = vmatprep.mubr.msk.bf16.mxu0 %vm338_vm0, %v17627_v50 }
 0x375   :  { %4097 = vmatmul.mubr.bf16.gmra.mrb[24].mxu0 %v17628_v0  ;;  %v17661_v0 = vld [vmem:[#allocation6_spill] sm:$0xff] }
 0x376   :  { %9996 = vmatprep.mubr.msk.bf16.mxu0 %vm338_vm0, %v17629_v34 }
 0x37d   :  { %4107 = vmatmul.mubr.bf16.gmra.mrb[28].mxu0 %v17630_v31 }
 0x37e   :  { %9997 = vmatprep.mubr.msk.bf16.mxu0 %vm338_vm0, %v17631_v46 }
 0x385   :  { %4117 = vmatmul.mubr.bf16.gmra.mrb[32].mxu0 %v17632_v11 }
 0x386   :  { %9998 = vmatprep.mubr.msk.bf16.mxu0 %vm338_vm0, %v17633_v14 }
 0x38d   :  { %4127 = vmatmul.mubr.bf16.gmra.mrb[36].mxu0 %v17634_v60 }
 0x38e   :  { %9999 = vmatprep.mubr.msk.bf16.mxu0 %vm338_vm0, %v17635_v47 }
 0x395   :  { %4137 = vmatmul.mubr.bf16.gmra.mrb[40].mxu0 %v17636_v27 }
 0x396   :  { %10000 = vmatprep.mubr.msk.bf16.mxu0 %vm338_vm0, %v17637_v51 }
 0x39d   :  { %4147 = vmatmul.mubr.bf16.gmra.mrb[44].mxu0 %v17638_v16 }
 0x39e   :  { %10001 = vmatprep.mubr.msk.bf16.mxu0 %vm338_vm0, %v17639_v54 }
 0x3a5   :  { %4157 = vmatmul.mubr.bf16.gmra.mrb[48].mxu0 %v3845_v53 }
 0x3a6   :  { %10002 = vmatprep.mubr.msk.bf16.mxu0 %vm338_vm0, %v17641_v42 }
 0x3ad   :  { %4167 = vmatmul.mubr.bf16.gmra.mrb[52].mxu0 %v3844_v33 }
 0x3ae   :  { %10043 = vmatprep.mubr.msk.bf16.mxu0 %vm338_vm0, %v13871_v17  ;;  %v17649_v17 = vld [vmem:[#allocation94_spill] sm:$0xff] }
 0x3b5   :  { %4578 = vmatmul.mubr.bf16.vlgmr.msra.gmra.mrb[0].mxu0 %v13878_v44  ;;  %v17650_v44 = vld [vmem:[#allocation95_spill] sm:$0xff] }
 0x3b6   :  { %10044 = vmatprep.mubr.msk.bf16.mxu0 %vm338_vm0, %v17642_v30 }
 0x3bd   :  { %4588 = vmatmul.mubr.bf16.gmra.mrb[4].mxu0 %v17643_v19  ;;  %v17662_v19 = vld [vmem:[#allocation9_spill] sm:$0xff] }
 0x3be   :  { %10045 = vmatprep.mubr.msk.bf16.mxu0 %vm338_vm0, %v17644_v10 }
 0x3c5   :  { %4598 = vmatmul.mubr.bf16.gmra.mrb[8].mxu0 %v17645_v29 }
 0x3c6   :  { %10046 = vmatprep.mubr.msk.bf16.mxu0 %vm338_vm0, %v17646_v25 }
 0x3cd   :  { %4608 = vmatmul.mubr.bf16.gmra.mrb[12].mxu0 %v17647_v26 }
 0x3ce   :  { %10047 = vmatprep.mubr.msk.bf16.mxu0 %vm338_vm0, %v17648_v39 }
 0x3d5   :  { %4618 = vmatmul.mubr.bf16.gmra.mrb[16].mxu0 %v17649_v17 }
 0x3d6   :  { %10048 = vmatprep.mubr.msk.bf16.mxu0 %vm338_vm0, %v17650_v44  ;;  %v17663_v44 = vld [vmem:[#allocation8_spill] sm:$0xff] }
 0x3dd   :  { %4628 = vmatmul.mubr.bf16.gmra.mrb[20].mxu0 %v17651_v36 }
 0x3de   :  { %10049 = vmatprep.mubr.msk.bf16.mxu0 %vm338_vm0, %v17652_v21 }
 0x3e5   :  { %4638 = vmatmul.mubr.bf16.gmra.mrb[24].mxu0 %v17653_v2 }
 0x3e6   :  { %10050 = vmatprep.mubr.msk.bf16.mxu0 %vm338_vm0, %v17654_v62 }
 0x3ed   :  { %4648 = vmatmul.mubr.bf16.gmra.mrb[28].mxu0 %v17655_v22 }
 0x3ee   :  { %10051 = vmatprep.mubr.msk.bf16.mxu0 %vm338_vm0, %v17656_v3 }
 0x3f5   :  { %4658 = vmatmul.mubr.bf16.gmra.mrb[32].mxu0 %v17657_v48 }
 0x3f6   :  { %10052 = vmatprep.mubr.msk.bf16.mxu0 %vm338_vm0, %v13999_v6 }
 0x3fd   :  { %4668 = vmatmul.mubr.bf16.gmra.mrb[36].mxu0 %v14006_v45  ;;  %v17658_v45 = vld [vmem:[#allocation5_spill] sm:$0xff] }
 0x3fe   :  { %10053 = vmatprep.mubr.msk.bf16.mxu0 %vm338_vm0, %v14013_v56 }
 0x405   :  { %4678 = vmatmul.mubr.bf16.gmra.mrb[40].mxu0 %v14021_v4 }
 0x406   :  { %10054 = vmatprep.mubr.msk.bf16.mxu0 %vm338_vm0, %v14028_v8 }
 0x40d   :  { %4688 = vmatmul.mubr.bf16.gmra.mrb[44].mxu0 %v14033_v57 }
 0x40e   :  { %10055 = vmatprep.mubr.msk.bf16.mxu0 %vm338_vm0, %v14040_v12  ;;  %v17659_v12 = vld [vmem:[#allocation7_spill] sm:$0xff] }
 0x415   :  { %4698 = vmatmul.mubr.bf16.gmra.mrb[48].mxu0 %v14046_v5 }
 0x416   :  { %10056 = vmatprep.mubr.msk.bf16.mxu0 %vm338_vm0, %v14035_v15 }
 0x41d   :  { %4708 = vmatmul.mubr.bf16.gmra.mrb[52].mxu0 %v14042_v59 }
 0x488   :  { %v14574_v6 = vpop.f32.mrb[0].mxu0 }
 0x489   :  { %v4770_v56 = vmul.f32 %v14574_v6, %v17658_v45  ;;  %v14578_v4 = vpop.f32.mrb[1].mxu0 }
 0x48a   :  { %v4771_v8 = vmul.f32 %v14578_v4, %v17658_v45  ;;  %v14582_v57 = vpop.f32.mrb[2].mxu0 }
 0x48b   :  { %v4772_v5 = vmul.f32 %v14582_v57, %v17659_v12  ;;  %v14586_v55 = vpop.f32.mrb[3].mxu0  ;;  %v4917_v23 = vmul.f32 %v4770_v56, %v4770_v56 }
 0x48c   :  { %v4918_v15 = vmul.f32 %v4771_v8, %v4771_v8  ;;  %v4773_v59 = vmul.f32 %v14586_v55, %v17659_v12  ;;  %v4856_v38 = vsel %vm338_vm0, %v4771_v8, 0.0 }
 0x48d   :  { %v4824_v37 = vadd.f32 %v4772_v5, %v4770_v56  ;;  %v4919_v28 = vmul.f32 %v4772_v5, %v4772_v5 }
 0x48e   :  { %v4857_v9 = vsel %vm338_vm0, %v4773_v59, 0.0  ;;  %v4920_v41 = vmul.f32 %v4773_v59, %v4773_v59  ;;  %v5003_v20 = vsel %vm338_vm0, %v4918_v15, 0.0 }
 0x48f   :  { %v4971_v58 = vadd.f32 %v4919_v28, %v4917_v23  ;;  %v4858_v32 = vadd.f32 %v4857_v9, %v4856_v38 }
 0x490   :  { %v5004_v61 = vsel %vm338_vm0, %v4920_v41, 0.0  ;;  %v14594_v1 = vpop.f32.mrb[4].mxu0 }
 0x491   :  { %v5005_v43 = vadd.f32 %v5004_v61, %v5003_v20  ;;  %v4774_v24 = vmul.f32 %v14594_v1, %v17660_v18  ;;  %v14598_v35 = vpop.f32.mrb[5].mxu0 }
 0x492   :  { %v4775_v7 = vmul.f32 %v14598_v35, %v17660_v18  ;;  %v14602_v63 = vpop.f32.mrb[6].mxu0 }
 0x493   :  { %v4825_v52 = vadd.f32 %v4824_v37, %v4774_v24  ;;  %v4921_v50 = vmul.f32 %v4774_v24, %v4774_v24  ;;  %v4776_v34 = vmul.f32 %v14602_v63, %v17661_v0  ;;  %v14606_v31 = vpop.f32.mrb[7].mxu0 }
 0x494   :  { %v4859_v46 = vsel %vm338_vm0, %v4775_v7, 0.0  ;;  %v4922_v11 = vmul.f32 %v4775_v7, %v4775_v7  ;;  %v4777_v14 = vmul.f32 %v14606_v31, %v17661_v0  ;;  %v11328_v0 = vld [vmem:[%s16983_s7 + $0x120] ss:$8 sps:$4 sm:$0xff]  }
 0x495   :  { %v4972_v60 = vadd.f32 %v4971_v58, %v4921_v50  ;;  %v4860_v47 = vadd.f32 %v4859_v46, %v4858_v32  ;;  %v4826_v27 = vadd.f32 %v4825_v52, %v4776_v34  ;;  %v4923_v51 = vmul.f32 %v4776_v34, %v4776_v34  ;;  %v17664_v58 = vld [vmem:[#allocation11_spill] sm:$0xff]  ;;  %v17665_v52 = vld [vmem:[#allocation10_spill] sm:$0xff] }
 0x496   :  { %v5006_v13 = vsel %vm338_vm0, %v4922_v11, 0.0  ;;  %v4861_v49 = vsel %vm338_vm0, %v4777_v14, 0.0  ;;  %v4924_v16 = vmul.f32 %v4777_v14, %v4777_v14 }
 0x497   :  { %v5007_v54 = vadd.f32 %v5006_v13, %v5005_v43  ;;  %v4973_v33 = vadd.f32 %v4972_v60, %v4923_v51  ;;  %v4862_v40 = vadd.f32 %v4861_v49, %v4860_v47 }
 0x498   :  { %v5008_v53 = vsel %vm338_vm0, %v4924_v16, 0.0  ;;  %v14614_v42 = vpop.f32.mrb[8].mxu0 }
 0x499   :  { %v5009_v30 = vadd.f32 %v5008_v53, %v5007_v54  ;;  %v4778_v10 = vmul.f32 %v14614_v42, %v17662_v19  ;;  %v14618_v29 = vpop.f32.mrb[9].mxu0 }
 0x49a   :  { %v4779_v25 = vmul.f32 %v14618_v29, %v17662_v19  ;;  %v14622_v26 = vpop.f32.mrb[10].mxu0 }
 0x49b   :  { %v4827_v39 = vadd.f32 %v4826_v27, %v4778_v10  ;;  %v4925_v17 = vmul.f32 %v4778_v10, %v4778_v10  ;;  %v4780_v36 = vmul.f32 %v14622_v26, %v17663_v44  ;;  %v14626_v21 = vpop.f32.mrb[11].mxu0 }
 0x49c   :  { %v4863_v2 = vsel %vm338_vm0, %v4779_v25, 0.0  ;;  %v4926_v62 = vmul.f32 %v4779_v25, %v4779_v25  ;;  %v4781_v22 = vmul.f32 %v14626_v21, %v17663_v44  ;;  %v17666_v25 = vld [vmem:[#allocation13_spill] sm:$0xff] }
 0x49d   :  { %v4974_v3 = vadd.f32 %v4973_v33, %v4925_v17  ;;  %v4864_v48 = vadd.f32 %v4863_v2, %v4862_v40  ;;  %v4828_v56 = vadd.f32 %v4827_v39, %v4780_v36  ;;  %v4927_v8 = vmul.f32 %v4780_v36, %v4780_v36 }
 0x49e   :  { %v5010_v5 = vsel %vm338_vm0, %v4926_v62, 0.0  ;;  %v4865_v15 = vsel %vm338_vm0, %v4781_v22, 0.0  ;;  %v4928_v59 = vmul.f32 %v4781_v22, %v4781_v22 }
 0x49f   :  { %v5011_v23 = vadd.f32 %v5010_v5, %v5009_v30  ;;  %v4975_v37 = vadd.f32 %v4974_v3, %v4927_v8  ;;  %v4866_v28 = vadd.f32 %v4865_v15, %v4864_v48  ;;  %v17667_v3 = vld [vmem:[#allocation12_spill] sm:$0xff] }
 0x4a0   :  { %v5012_v38 = vsel %vm338_vm0, %v4928_v59, 0.0  ;;  %v14634_v9 = vpop.f32.mrb[12].mxu0 }
 0x4a1   :  { %v5013_v41 = vadd.f32 %v5012_v38, %v5011_v23  ;;  %v4782_v32 = vmul.f32 %v14634_v9, %v17664_v58  ;;  %v14638_v20 = vpop.f32.mrb[13].mxu0 }
 0x4a2   :  { %v4783_v61 = vmul.f32 %v14638_v20, %v17664_v58  ;;  %v14642_v43 = vpop.f32.mrb[14].mxu0 }
 0x4a3   :  { %v4829_v24 = vadd.f32 %v4828_v56, %v4782_v32  ;;  %v4929_v7 = vmul.f32 %v4782_v32, %v4782_v32  ;;  %v4784_v50 = vmul.f32 %v14642_v43, %v17665_v52  ;;  %v14646_v34 = vpop.f32.mrb[15].mxu0 }
 0x4a4   :  { %v4867_v46 = vsel %vm338_vm0, %v4783_v61, 0.0  ;;  %v4930_v11 = vmul.f32 %v4783_v61, %v4783_v61  ;;  %v4785_v14 = vmul.f32 %v14646_v34, %v17665_v52 }
 0x4a5   :  { %v4976_v60 = vadd.f32 %v4975_v37, %v4929_v7  ;;  %v4868_v47 = vadd.f32 %v4867_v46, %v4866_v28  ;;  %v4830_v27 = vadd.f32 %v4829_v24, %v4784_v50  ;;  %v4931_v51 = vmul.f32 %v4784_v50, %v4784_v50 }
 0x4a6   :  { %v5014_v13 = vsel %vm338_vm0, %v4930_v11, 0.0  ;;  %v4869_v49 = vsel %vm338_vm0, %v4785_v14, 0.0  ;;  %v4932_v16 = vmul.f32 %v4785_v14, %v4785_v14  ;;  %v17668_v14 = vld [vmem:[#allocation15_spill] sm:$0xff] }
 0x4a7   :  { %v5015_v54 = vadd.f32 %v5014_v13, %v5013_v41  ;;  %v4977_v33 = vadd.f32 %v4976_v60, %v4931_v51  ;;  %v4870_v40 = vadd.f32 %v4869_v49, %v4868_v47  ;;  %v11304_v49 = vld [vmem:[%s16983_s7 + $0xa0] ss:$8 sps:$4 sm:$0xff]  }
 0x4a8   :  { %v5016_v53 = vsel %vm338_vm0, %v4932_v16, 0.0  ;;  %v14654_v30 = vpop.f32.mrb[16].mxu0 }
 0x4a9   :  { %v5017_v10 = vadd.f32 %v5016_v53, %v5015_v54  ;;  %v4786_v39 = vmul.f32 %v14654_v30, %v17666_v25  ;;  %v14658_v17 = vpop.f32.mrb[17].mxu0 }
 0x4aa   :  { %v4787_v36 = vmul.f32 %v14658_v17, %v17666_v25  ;;  %v14662_v2 = vpop.f32.mrb[18].mxu0 }
 0x4ab   :  { %v4831_v62 = vadd.f32 %v4830_v27, %v4786_v39  ;;  %v4933_v22 = vmul.f32 %v4786_v39, %v4786_v39  ;;  %v4788_v48 = vmul.f32 %v14662_v2, %v17667_v3  ;;  %v14666_v56 = vpop.f32.mrb[19].mxu0  ;;  %v11302_v27 = vld [vmem:[%s16983_s7 + $0xa4] ss:$8 sps:$4 sm:$0xff]  }
 0x4ac   :  { %v4871_v8 = vsel %vm338_vm0, %v4787_v36, 0.0  ;;  %v4934_v5 = vmul.f32 %v4787_v36, %v4787_v36  ;;  %v4789_v15 = vmul.f32 %v14666_v56, %v17667_v3  ;;  %5812 = vmatprep.subr.bf16.mxu1 %v11302_v27 }
 0x4ad   :  { %v4978_v59 = vadd.f32 %v4977_v33, %v4933_v22  ;;  %v4872_v23 = vadd.f32 %v4871_v8, %v4870_v40  ;;  %v4832_v37 = vadd.f32 %v4831_v62, %v4788_v48  ;;  %v4935_v28 = vmul.f32 %v4788_v48, %v4788_v48  ;;  %v17669_v33 = vld [vmem:[#allocation14_spill] sm:$0xff]  ;;  %5813 = vmatpush1.bf16.msra.mxu1 %v11304_v49 }
 0x4ae   :  { %v5018_v38 = vsel %vm338_vm0, %v4934_v5, 0.0  ;;  %v4873_v41 = vsel %vm338_vm0, %v4789_v15, 0.0  ;;  %v4936_v32 = vmul.f32 %v4789_v15, %v4789_v15  ;;  %v11307_v22 = vld [vmem:[%s16983_s7 + $0xb0] ss:$8 sps:$4 sm:$0xff]  }
 0x4af   :  { %v5019_v61 = vadd.f32 %v5018_v38, %v5017_v10  ;;  %v4979_v24 = vadd.f32 %v4978_v59, %v4935_v28  ;;  %v4874_v7 = vadd.f32 %v4873_v41, %v4872_v23  ;;  %v11305_v10 = vld [vmem:[%s16983_s7 + $0xb4] ss:$8 sps:$4 sm:$0xff]   ;;  %v11308_v59 = vld [vmem:[%s16983_s7 + $0xc4] ss:$8 sps:$4 sm:$0xff]  }
 0x4b0   :  { %v5020_v50 = vsel %vm338_vm0, %v4936_v32, 0.0  ;;  %v14674_v46 = vpop.f32.mrb[20].mxu0  ;;  %5814 = vmatprep.subr.bf16.mxu1 %v11305_v10  ;;  %v17671_v10 = vld [vmem:[#allocation16_spill] sm:$0xff] }
 0x4b1   :  { %v5021_v11 = vadd.f32 %v5020_v50, %v5019_v61  ;;  %v4790_v60 = vmul.f32 %v14674_v46, %v17668_v14  ;;  %v14678_v47 = vpop.f32.mrb[21].mxu0  ;;  %5815 = vmatpush1.bf16.msra.mxu1 %v11307_v22 }
 0x4b2   :  { %v4791_v51 = vmul.f32 %v14678_v47, %v17668_v14  ;;  %v14685_v13 = vpop.f32.mrb[22].mxu0  ;;  %5816 = vmatprep.subr.bf16.mxu1 %v11308_v59  ;;  %v5443_v59 = vld [vmem:[#allocation3 + $0x48] sm:$0xff] }
 0x4b3   :  { %v4833_v16 = vadd.f32 %v4832_v37, %v4790_v60  ;;  %v4937_v54 = vmul.f32 %v4790_v60, %v4790_v60  ;;  %v4792_v40 = vmul.f32 %v14685_v13, %v17669_v33  ;;  %v14692_v53 = vpop.f32.mrb[23].mxu0  ;;  %v17670_v60 = vld [vmem:[#allocation17_spill] sm:$0xff] }
 0x4b4   :  { %v4875_v39 = vsel %vm338_vm0, %v4791_v51, 0.0  ;;  %v4938_v36 = vmul.f32 %v4791_v51, %v4791_v51  ;;  %v4793_v62 = vmul.f32 %v14692_v53, %v17669_v33 }
 0x4b5   :  { %v4980_v48 = vadd.f32 %v4979_v24, %v4937_v54  ;;  %v4876_v8 = vadd.f32 %v4875_v39, %v4874_v7  ;;  %v4834_v5 = vadd.f32 %v4833_v16, %v4792_v40  ;;  %v4939_v15 = vmul.f32 %v4792_v40, %v4792_v40  ;;  %v11310_v24 = vld [vmem:[%s16983_s7 + $0xc0] ss:$8 sps:$4 sm:$0xff]  }
 0x4b6   :  { %v5022_v23 = vsel %vm338_vm0, %v4938_v36, 0.0  ;;  %v4877_v37 = vsel %vm338_vm0, %v4793_v62, 0.0  ;;  %v4940_v28 = vmul.f32 %v4793_v62, %v4793_v62  ;;  %v5441_v62 = vld [vmem:[#allocation3 + $0x38] sm:$0xff]  ;;  %5817 = vmatpush1.bf16.msra.mxu1 %v11310_v24 }
 0x4b7   :  { %v5023_v38 = vadd.f32 %v5022_v23, %v5021_v11  ;;  %v4981_v41 = vadd.f32 %v4980_v48, %v4939_v15  ;;  %v4878_v32 = vadd.f32 %v4877_v37, %v4876_v8  ;;  %v11311_v11 = vld [vmem:[%s16983_s7 + $0xd4] ss:$8 sps:$4 sm:$0xff]   ;;  %v11313_v15 = vld [vmem:[%s16983_s7 + $0xd0] ss:$8 sps:$4 sm:$0xff]   ;;  %v5445_v24 = vld [vmem:[#allocation3 + $0x58] sm:$0xff] }
 0x4b8   :  { %v5024_v61 = vsel %vm338_vm0, %v4940_v28, 0.0  ;;  %v14709_v50 = vpop.f32.mrb[24].mxu0  ;;  %5818 = vmatprep.subr.bf16.mxu1 %v11311_v11  ;;  %v14740_v14 = vpack.c.bf16 %v5445_v24, %v5443_v59  ;;  %v11316_v11 = vld [vmem:[%s16983_s7 + $0xe0] ss:$8 sps:$4 sm:$0xff]  }
 0x4b9   :  { %v5025_v7 = vadd.f32 %v5024_v61, %v5023_v38  ;;  %v4794_v27 = vmul.f32 %v14709_v50, %v17670_v60  ;;  %v14716_v51 = vpop.f32.mrb[25].mxu0  ;;  %v11314_v38 = vld [vmem:[%s16983_s7 + $0xe4] ss:$8 sps:$4 sm:$0xff]  }
 0x4ba   :  { %v4795_v49 = vmul.f32 %v14716_v51, %v17670_v60  ;;  %v14723_v16 = vpop.f32.mrb[26].mxu0  ;;  %5819 = vmatpush1.bf16.msra.mxu1 %v11313_v15  ;;  %v17166_v59 = vrot.slane %v14740_v14, 2 }
 0x4bb   :  { %v4835_v54 = vadd.f32 %v4834_v5, %v4794_v27  ;;  %v4941_v40 = vmul.f32 %v4794_v27, %v4794_v27  ;;  %v4796_v39 = vmul.f32 %v14723_v16, %v17671_v10  ;;  %v14727_v36 = vpop.f32.mrb[27].mxu0  ;;  %5820 = vmatprep.subr.bf16.mxu1 %v11314_v38 }
 0x4bc   :  { %v4879_v22 = vsel %vm338_vm0, %v4795_v49, 0.0  ;;  %v4942_v48 = vmul.f32 %v4795_v49, %v4795_v49  ;;  %v4797_v8 = vmul.f32 %v14727_v36, %v17671_v10 }
 0x4bd   :  { %v4982_v5 = vadd.f32 %v4981_v41, %v4941_v40  ;;  %v4880_v23 = vadd.f32 %v4879_v22, %v4878_v32  ;;  %v4836_v37 = vadd.f32 %v4835_v54, %v4796_v39  ;;  %v4943_v28 = vmul.f32 %v4796_v39, %v4796_v39  ;;  %v5539_v41 = vld [vmem:[#allocation3 + $0x28] sm:$0xf0] }
 0x4be   :  { %v5026_v61 = vsel %vm338_vm0, %v4942_v48, 0.0  ;;  %v4881_v27 = vsel %vm338_vm0, %v4797_v8, 0.0  ;;  %v4944_v49 = vmul.f32 %v4797_v8, %v4797_v8  ;;  %v5547_v40 = vpack.c.bf16 %v5441_v62, %v5539_v41  ;;  %v17672_v22 = vld [vmem:[#allocation19_spill] sm:$0xff]  ;;  %5821 = vmatpush1.bf16.msra.mxu1 %v11316_v11  ;;  %v11322_v11 = vld [vmem:[%s16983_s7 + $0x100] ss:$8 sps:$4 sm:$0xff]  }
 0x4bf   :  { %v5027_v10 = vadd.f32 %v5026_v61, %v5025_v7  ;;  %v4983_v60 = vadd.f32 %v4982_v5, %v4943_v28  ;;  %v4882_v33 = vadd.f32 %v4881_v27, %v4880_v23  ;;  %v11317_v8 = vld [vmem:[%s16983_s7 + $0xf4] ss:$8 sps:$4 sm:$0xff]  }
 0x4c0   :  { %v5028_v32 = vsel %vm338_vm0, %v4944_v49, 0.0  ;;  %v14743_v54 = vpop.f32.mrb[28].mxu0  ;;  %v5605_v62 = vrot.slane %v5547_v40, 2  ;;  %v17673_v61 = vld [vmem:[#allocation18_spill] sm:$0xff]  ;;  %v11320_v49 = vld [vmem:[%s16983_s7 + $0x104] ss:$8 sps:$4 sm:$0xff]   ;;  %5822 = vmatprep.subr.bf16.mxu1 %v11317_v8 }
 0x4c1   :  { %v5029_v39 = vadd.f32 %v5028_v32, %v5027_v10  ;;  %v4798_v7 = vmul.f32 %v14743_v54, %v17672_v22  ;;  %v14750_v48 = vpop.f32.mrb[29].mxu0  ;;  %v11319_v10 = vld [vmem:[%s16983_s7 + $0xf0] ss:$8 sps:$4 sm:$0xff]  }
 0x4c2   :  { %v4799_v15 = vmul.f32 %v14750_v48, %v17672_v22  ;;  %v14758_v5 = vpop.f32.mrb[30].mxu0  ;;  %5823 = vmatpush1.bf16.msra.mxu1 %v11319_v10 }
 0x4c3   :  { %v4837_v23 = vadd.f32 %v4836_v37, %v4798_v7  ;;  %v4945_v28 = vmul.f32 %v4798_v7, %v4798_v7  ;;  %v4800_v38 = vmul.f32 %v14758_v5, %v17673_v61  ;;  %v14765_v27 = vpop.f32.mrb[31].mxu0  ;;  %v5607_v37 = vsel %vm5601_vm7, %v5605_v62, %v17166_v59  ;;  %5824 = vmatprep.subr.bf16.mxu1 %v11320_v49  ;;  %v11326_v49 = vld [vmem:[%s16983_s7 + $0x124] ss:$8 sps:$4 sm:$0xff]  }
 0x4c4   :  { %v4883_v24 = vsel %vm338_vm0, %v4799_v15, 0.0  ;;  %v4946_v41 = vmul.f32 %v4799_v15, %v4799_v15  ;;  %v4801_v32 = vmul.f32 %v14765_v27, %v17673_v61  ;;  %10097 = vmatprep.mubr.msk.bf16.mxu1 %vm338_vm0, %v5607_v37 }
 0x4c5   :  { %v4984_v40 = vadd.f32 %v4983_v60, %v4945_v28  ;;  %v4884_v7 = vadd.f32 %v4883_v24, %v4882_v33  ;;  %v4838_v22 = vadd.f32 %v4837_v23, %v4800_v38  ;;  %v4947_v3 = vmul.f32 %v4800_v38, %v4800_v38  ;;  %v11323_v33 = vld [vmem:[%s16983_s7 + $0x114] ss:$8 sps:$4 sm:$0xff]   ;;  %v17675_v23 = vld [vmem:[#allocation21_spill] sm:$0xff] }
 0x4c6   :  { %v5030_v25 = vsel %vm338_vm0, %v4946_v41, 0.0  ;;  %v4885_v52 = vsel %vm338_vm0, %v4801_v32, 0.0  ;;  %v4948_v58 = vmul.f32 %v4801_v32, %v4801_v32  ;;  %v17677_v24 = vld [vmem:[#allocation23_spill] sm:$0xff]  ;;  %v5538_v32 = vld [vmem:[#allocation3 + $0x20] sm:$0xf0]  ;;  %5825 = vmatpush1.bf16.msra.mxu1 %v11322_v11 }
 0x4c7   :  { %v5031_v15 = vadd.f32 %v5030_v25, %v5029_v39  ;;  %v4985_v44 = vadd.f32 %v4984_v40, %v4947_v3  ;;  %v4886_v61 = vadd.f32 %v4885_v52, %v4884_v7  ;;  %v11325_v39 = vld [vmem:[%s16983_s7 + $0x110] ss:$8 sps:$4 sm:$0xff]   ;;  %5826 = vmatprep.subr.bf16.mxu1 %v11323_v33 }
 0x4c8   :  { %v5032_v60 = vsel %vm338_vm0, %v4948_v58, 0.0  ;;  %v14786_v8 = vpop.f32.mrb[32].mxu0 }
 0x4c9   :  { %17674 = vst [vmem:[#allocation45_spill] sm:$0xff] %v14786_v8  ;;  %v5033_v62 = vadd.f32 %v5032_v60, %v5031_v15  ;;  %v4802_v28 = vmul.f32 %v14786_v8, %v17675_v23  ;;  %v14790_v25 = vpop.f32.mrb[33].mxu0 }
 0x4ca   :  { %v4803_v52 = vmul.f32 %v14790_v25, %v17675_v23  ;;  %v14794_v3 = vpop.f32.mrb[34].mxu0  ;;  %5827 = vmatpush1.bf16.msra.mxu1 %v11325_v39 }
 0x4cb   :  { %17676 = vst [vmem:[#allocation40_spill] sm:$0xff] %v14794_v3  ;;  %v4839_v58 = vadd.f32 %v4838_v22, %v4802_v28  ;;  %v4949_v38 = vmul.f32 %v4802_v28, %v4802_v28  ;;  %v4804_v10 = vmul.f32 %v14794_v3, %v17677_v24  ;;  %v14801_v41 = vpop.f32.mrb[35].mxu0  ;;  %5828 = vmatprep.subr.bf16.mxu1 %v11326_v49  ;;  %v11334_v49 = vld [vmem:[%s16983_s7 + $0x4] ss:$8 sps:$4 sm:$0xff]  }
 0x4cc   :  { %17678 = vst [vmem:[#allocation44_spill] sm:$0xff] %v14801_v41  ;;  %v4887_v37 = vsel %vm338_vm0, %v4803_v52, 0.0  ;;  %v4950_v40 = vmul.f32 %v4803_v52, %v4803_v52  ;;  %v4805_v7 = vmul.f32 %v14801_v41, %v17677_v24 }
 0x4cd   :  { %v4986_v15 = vadd.f32 %v4985_v44, %v4949_v38  ;;  %v4888_v22 = vadd.f32 %v4887_v37, %v4886_v61  ;;  %v4840_v60 = vadd.f32 %v4839_v58, %v4804_v10  ;;  %v4951_v28 = vmul.f32 %v4804_v10, %v4804_v10  ;;  %v11329_v44 = vld [vmem:[%s16983_s7 + $0x134] ss:$8 sps:$4 sm:$0xff]   ;;  %v14817_v61 = vld [vmem:[#allocation2] sm:$0xff] }
 0x4ce   :  { %v5034_v59 = vsel %vm338_vm0, %v4950_v40, 0.0  ;;  %v4889_v23 = vsel %vm338_vm0, %v4805_v7, 0.0  ;;  %v4952_v19 = vmul.f32 %v4805_v7, %v4805_v7  ;;  %v14821_v11 = vpack.c.bf16 %v14817_v61, %v14817_v61  ;;  %5829 = vmatpush1.bf16.msra.mxu1 %v11328_v0  ;;  %v11337_v0 = vld [vmem:[%s16983_s7 + $0x14] ss:$8 sps:$4 sm:$0xff]  }
 0x4cf   :  { %v5035_v18 = vadd.f32 %v5034_v59, %v5033_v62  ;;  %v4987_v52 = vadd.f32 %v4986_v15, %v4951_v28  ;;  %v4890_v12 = vadd.f32 %v4889_v23, %v4888_v22  ;;  %v5546_v38 = vpack.c.bf16 %v14817_v61, %v5538_v32  ;;  %v17680_v62 = vld [vmem:[#allocation26_spill] sm:$0xff]  ;;  %5830 = vmatprep.subr.bf16.mxu1 %v11329_v44 }
 0x4d0   :  { %v5036_v33 = vsel %vm338_vm0, %v4952_v19, 0.0  ;;  %v14824_v58 = vpop.f32.mrb[36].mxu0  ;;  %v11331_v19 = vld [vmem:[%s16983_s7 + $0x130] ss:$8 sps:$4 sm:$0xff]   ;;  %v17685_v44 = vrot.slane %v14821_v11, 2 }
 0x4d1   :  { %17679 = vst [vmem:[#allocation43_spill] sm:$0xff] %v14824_v58  ;;  %v5037_v59 = vadd.f32 %v5036_v33, %v5035_v18  ;;  %v4806_v23 = vmul.f32 %v14824_v58, %v17680_v62  ;;  %v14829_v10 = vpop.f32.mrb[37].mxu0  ;;  %v17683_v15 = vld [vmem:[#allocation30_spill] sm:$0xff] }
 0x4d2   :  { %17681 = vst [vmem:[#allocation51_spill] sm:$0xff] %v14829_v10  ;;  %v4807_v37 = vmul.f32 %v14829_v10, %v17680_v62  ;;  %v14833_v40 = vpop.f32.mrb[38].mxu0  ;;  %5831 = vmatpush1.bf16.msra.mxu1 %v11331_v19 }
 0x4d3   :  { %17682 = vst [vmem:[#allocation46_spill] sm:$0xff] %v14833_v40  ;;  %v4841_v7 = vadd.f32 %v4840_v60, %v4806_v23  ;;  %v4953_v39 = vmul.f32 %v4806_v23, %v4806_v23  ;;  %v4808_v18 = vmul.f32 %v14833_v40, %v17683_v15  ;;  %v14840_v32 = vpop.f32.mrb[39].mxu0  ;;  %v5602_v60 = vrot.slane %v5546_v38, 2  ;;  %6199 = vmatprep.subr.bf16.mxu1 %v11334_v49  ;;  %v11340_v49 = vld [vmem:[%s16983_s7 + $0x24] ss:$8 sps:$4 sm:$0xff]  }
 0x4d4   :  { %v4891_v28 = vsel %vm338_vm0, %v4807_v37, 0.0  ;;  %v4954_v33 = vmul.f32 %v4807_v37, %v4807_v37  ;;  %v4809_v62 = vmul.f32 %v14840_v32, %v17683_v15  ;;  %v11332_v37 = vld [vmem:[%s16983_s7] ss:$8 sps:$4 sm:$0xff]  }
 0x4d5   :  { %v4988_v23 = vadd.f32 %v4987_v52, %v4953_v39  ;;  %v4892_v24 = vadd.f32 %v4891_v28, %v4890_v12  ;;  %v4842_v45 = vadd.f32 %v4841_v7, %v4808_v18  ;;  %v4955_v40 = vmul.f32 %v4808_v18, %v4808_v18  ;;  %v17688_v39 = vld [vmem:[#allocation36_spill] sm:$0xff] }
 0x4d6   :  { %v5038_v58 = vsel %vm338_vm0, %v4954_v33, 0.0  ;;  %v4893_v3 = vsel %vm338_vm0, %v4809_v62, 0.0  ;;  %v4956_v10 = vmul.f32 %v4809_v62, %v4809_v62  ;;  %v5604_v38 = vsel %vm5601_vm7, %v5602_v60, %v17685_v44 }
 0x4d7   :  { %v5039_v41 = vadd.f32 %v5038_v58, %v5037_v59  ;;  %v4989_v22 = vadd.f32 %v4988_v23, %v4955_v40  ;;  %v4894_v8 = vadd.f32 %v4893_v3, %v4892_v24  ;;  %v17686_v59 = vld [vmem:[#allocation34_spill] sm:$0xff]  ;;  %5845 = vmatmul.mubr.bf16.vlgmr.msra.gmra.mrb[0].mxu1 %v5604_v38 }
 0x4d8   :  { %v5040_v12 = vsel %vm338_vm0, %v4956_v10, 0.0  ;;  %v14858_v52 = vpop.f32.mrb[40].mxu0  ;;  %v11335_v10 = vld [vmem:[%s16983_s7 + $0x10] ss:$8 sps:$4 sm:$0xff]   ;;  %6200 = vmatpush1.bf16.msra.mxu1 %v11332_v37 }
 0x4d9   :  { %17684 = vst [vmem:[#allocation50_spill] sm:$0xff] %v14858_v52  ;;  %v5041_v58 = vadd.f32 %v5040_v12, %v5039_v41  ;;  %v4810_v3 = vmul.f32 %v14858_v52, %v17686_v59  ;;  %v14865_v24 = vpop.f32.mrb[41].mxu0  ;;  %6201 = vmatprep.subr.bf16.mxu1 %v11337_v0 }
 0x4da   :  { %v4811_v62 = vmul.f32 %v14865_v24, %v17686_v59  ;;  %v14869_v40 = vpop.f32.mrb[42].mxu0 }
 0x4db   :  { %17687 = vst [vmem:[#allocation49_spill] sm:$0xff] %v14869_v40  ;;  %v4843_v19 = vadd.f32 %v4842_v45, %v4810_v3  ;;  %v4957_v7 = vmul.f32 %v4810_v3, %v4810_v3  ;;  %v4812_v41 = vmul.f32 %v14869_v40, %v17688_v39  ;;  %v14876_v18 = vpop.f32.mrb[43].mxu0 }
 0x4dc   :  { %17689 = vst [vmem:[#allocation52_spill] sm:$0xff] %v14876_v18  ;;  %v4895_v28 = vsel %vm338_vm0, %v4811_v62, 0.0  ;;  %v4958_v33 = vmul.f32 %v4811_v62, %v4811_v62  ;;  %v4813_v60 = vmul.f32 %v14876_v18, %v17688_v39  ;;  %v11338_v62 = vld [vmem:[%s16983_s7 + $0x20] ss:$8 sps:$4 sm:$0xff]   ;;  %6202 = vmatpush1.bf16.msra.mxu1 %v11335_v10 }
 0x4dd   :  { %v4990_v23 = vadd.f32 %v4989_v22, %v4957_v7  ;;  %v4896_v45 = vadd.f32 %v4895_v28, %v4894_v8  ;;  %v4844_v12 = vadd.f32 %v4843_v19, %v4812_v41  ;;  %v4959_v44 = vmul.f32 %v4812_v41, %v4812_v41  ;;  %v11343_v22 = vld [vmem:[%s16983_s7 + $0x34] ss:$8 sps:$4 sm:$0xff]   ;;  %v17691_v19 = vld [vmem:[#allocation41_spill] sm:$0xff]  ;;  %6203 = vmatprep.subr.bf16.mxu1 %v11340_v49 }
 0x4de   :  { %v5042_v3 = vsel %vm338_vm0, %v4958_v33, 0.0  ;;  %v4897_v38 = vsel %vm338_vm0, %v4813_v60, 0.0  ;;  %v4960_v59 = vmul.f32 %v4813_v60, %v4813_v60  ;;  %v11341_v33 = vld [vmem:[%s16983_s7 + $0x30] ss:$8 sps:$4 sm:$0xff]   ;;  %v11346_v49 = vld [vmem:[%s16983_s7 + $0x44] ss:$8 sps:$4 sm:$0xff]  }
 0x4df   :  { %v5043_v15 = vadd.f32 %v5042_v3, %v5041_v58  ;;  %v4991_v40 = vadd.f32 %v4990_v23, %v4959_v44  ;;  %v4898_v52 = vadd.f32 %v4897_v38, %v4896_v45  ;;  %v17694_v23 = vld [vmem:[#allocation42_spill] sm:$0xff] }
 0x4e0   :  { %v5044_v8 = vsel %vm338_vm0, %v4960_v59, 0.0  ;;  %v14893_v37 = vpop.f32.mrb[44].mxu0  ;;  %6204 = vmatpush1.bf16.msra.mxu1 %v11338_v62 }
 0x4e1   :  { %17690 = vst [vmem:[#allocation57_spill] sm:$0xff] %v14893_v37  ;;  %v5045_v0 = vadd.f32 %v5044_v8, %v5043_v15  ;;  %v4814_v7 = vmul.f32 %v14893_v37, %v17691_v19  ;;  %v14897_v58 = vpop.f32.mrb[45].mxu0  ;;  %6205 = vmatprep.subr.bf16.mxu1 %v11343_v22 }
 0x4e2   :  { %17692 = vst [vmem:[#allocation58_spill] sm:$0xff] %v14897_v58  ;;  %v4815_v41 = vmul.f32 %v14897_v58, %v17691_v19  ;;  %v14901_v28 = vpop.f32.mrb[46].mxu0 }
 0x4e3   :  { %17693 = vst [vmem:[#allocation59_spill] sm:$0xff] %v14901_v28  ;;  %v4845_v59 = vadd.f32 %v4844_v12, %v4814_v7  ;;  %v4961_v60 = vmul.f32 %v4814_v7, %v4814_v7  ;;  %v4816_v15 = vmul.f32 %v14901_v28, %v17694_v23  ;;  %v14908_v10 = vpop.f32.mrb[47].mxu0 }
 0x4e4   :  { %v4899_v45 = vsel %vm338_vm0, %v4815_v41, 0.0  ;;  %v4962_v44 = vmul.f32 %v4815_v41, %v4815_v41  ;;  %v4817_v3 = vmul.f32 %v14908_v10, %v17694_v23  ;;  %v11344_v41 = vld [vmem:[%s16983_s7 + $0x40] ss:$8 sps:$4 sm:$0xff]   ;;  %6206 = vmatpush1.bf16.msra.mxu1 %v11341_v33 }
 0x4e5   :  { %v4992_v38 = vadd.f32 %v4991_v40, %v4961_v60  ;;  %v4900_v8 = vadd.f32 %v4899_v45, %v4898_v52  ;;  %v4846_v12 = vadd.f32 %v4845_v59, %v4816_v15  ;;  %v4963_v7 = vmul.f32 %v4816_v15, %v4816_v15  ;;  %v11349_v40 = vld [vmem:[%s16983_s7 + $0x54] ss:$8 sps:$4 sm:$0xff]   ;;  %6207 = vmatprep.subr.bf16.mxu1 %v11346_v49  ;;  %v11347_v49 = vld [vmem:[%s16983_s7 + $0x50] ss:$8 sps:$4 sm:$0xff]  }
 0x4e6   :  { %v5046_v19 = vsel %vm338_vm0, %v4962_v44, 0.0  ;;  %v4901_v39 = vsel %vm338_vm0, %v4817_v3, 0.0  ;;  %v4964_v28 = vmul.f32 %v4817_v3, %v4817_v3  ;;  %v17696_v59 = vld [vmem:[#allocation47_spill] sm:$0xff]  ;;  %v17699_v44 = vld [vmem:[#allocation48_spill] sm:$0xff] }
 0x4e7   :  { %v5047_v37 = vadd.f32 %v5046_v19, %v5045_v0  ;;  %v4993_v58 = vadd.f32 %v4992_v38, %v4963_v7  ;;  %v4902_v18 = vadd.f32 %v4901_v39, %v4900_v8 }
 0x4e8   :  { %v5048_v52 = vsel %vm338_vm0, %v4964_v28, 0.0  ;;  %v14925_v62 = vpop.f32.mrb[48].mxu0  ;;  %6208 = vmatpush1.bf16.msra.mxu1 %v11344_v41 }
 0x4e9   :  { %17695 = vst [vmem:[#allocation60_spill] sm:$0xff] %v14925_v62  ;;  %v5049_v22 = vadd.f32 %v5048_v52, %v5047_v37  ;;  %v4818_v60 = vmul.f32 %v14925_v62, %v17696_v59  ;;  %v14929_v0 = vpop.f32.mrb[49].mxu0  ;;  %6209 = vmatprep.subr.bf16.mxu1 %v11349_v40 }
 0x4ea   :  { %17697 = vst [vmem:[#allocation63_spill] sm:$0xff] %v14929_v0  ;;  %v4819_v39 = vmul.f32 %v14929_v0, %v17696_v59  ;;  %v14933_v19 = vpop.f32.mrb[50].mxu0  ;;  %v17702_v0 = vld [vmem:[#allocation53_spill] sm:$0xff] }
 0x4eb   :  { %17698 = vst [vmem:[#allocation64_spill] sm:$0xff] %v14933_v19  ;;  %v4847_v15 = vadd.f32 %v4846_v12, %v4818_v60  ;;  %v4965_v45 = vmul.f32 %v4818_v60, %v4818_v60  ;;  %v4820_v28 = vmul.f32 %v14933_v19, %v17699_v44  ;;  %v14937_v3 = vpop.f32.mrb[51].mxu0 }
 0x4ec   :  { %17700 = vst [vmem:[#allocation61_spill] sm:$0xff] %v14937_v3  ;;  %v4903_v37 = vsel %vm338_vm0, %v4819_v39, 0.0  ;;  %v4966_v33 = vmul.f32 %v4819_v39, %v4819_v39  ;;  %v4821_v38 = vmul.f32 %v14937_v3, %v17699_v44  ;;  %6210 = vmatpush1.bf16.msra.mxu1 %v11347_v49 }
 0x4ed   :  { %v4994_v8 = vadd.f32 %v4993_v58, %v4965_v45  ;;  %v4904_v7 = vadd.f32 %v4903_v37, %v4902_v18  ;;  %v4848_v12 = vadd.f32 %v4847_v15, %v4820_v28  ;;  %v4967_v52 = vmul.f32 %v4820_v28, %v4820_v28 }
 0x4ee   :  { %v5050_v60 = vsel %vm338_vm0, %v4966_v33, 0.0  ;;  %v4905_v59 = vsel %vm338_vm0, %v4821_v38, 0.0  ;;  %v4968_v23 = vmul.f32 %v4821_v38, %v4821_v38 }
 0x4ef   :  { %v5051_v19 = vadd.f32 %v5050_v60, %v5049_v22  ;;  %v4995_v39 = vadd.f32 %v4994_v8, %v4967_v52  ;;  %v4906_v62 = vadd.f32 %v4905_v59, %v4904_v7  ;;  %v11350_v52 = vld [vmem:[%s16983_s7 + $0x60] ss:$8 sps:$4 sm:$0xff]  }
 0x4f0   :  { %v5052_v44 = vsel %vm338_vm0, %v4968_v23, 0.0  ;;  %v14948_v41 = vpop.f32.mrb[52].mxu0 }
 0x4f1   :  { %17701 = vst [vmem:[#allocation65_spill] sm:$0xff] %v14948_v41  ;;  %v5053_v3 = vadd.f32 %v5052_v44, %v5051_v19  ;;  %v4822_v18 = vmul.f32 %v14948_v41, %v17702_v0  ;;  %v14952_v58 = vpop.f32.mrb[53].mxu0 }
 0x4f2   :  { %v4823_v40 = vmul.f32 %v14952_v58, %v17702_v0  ;;  %v4713_v15 = vpop.f32.mrb[54].mxu0 }
 0x4f3   :  { %v4849_v45 = vadd.f32 %v4848_v12, %v4822_v18  ;;  %v4969_v28 = vmul.f32 %v4822_v18, %v4822_v18  ;;  %v4714_v22 = vpop.f32.mrb[55].mxu0  ;;  %v11352_v12 = vld [vmem:[%s16983_s7 + $0x64] ss:$8 sps:$4 sm:$0xff]  }
 0x4f4   :  { %v4907_v59 = vsel %vm338_vm0, %v4823_v40, 0.0  ;;  %v4970_v37 = vmul.f32 %v4823_v40, %v4823_v40  ;;  %6211 = vmatprep.subr.bf16.mxu1 %v11352_v12 }
 0x4f5   :  { %v4850_v23 = vrot.slane %v4849_v45, 4  ;;  %v4996_v33 = vadd.f32 %v4995_v39, %v4969_v28  ;;  %v4908_v38 = vadd.f32 %v4907_v59, %v4906_v62  ;;  %6212 = vmatpush1.bf16.msra.mxu1 %v11350_v52 }
 0x4f6   :  { %v5054_v19 = vsel %vm338_vm0, %v4970_v37, 0.0 }
 0x4f7   :  { %v4851_v44 = vadd.f32 %v4850_v23, %v4849_v45  ;;  %v4997_v49 = vrot.slane %v4996_v33, 4  ;;  %v4909_v8 = vrot.slane %v4908_v38, 4  ;;  %v5055_v7 = vadd.f32 %v5054_v19, %v5053_v3 }
 0x4f9   :  { %v4852_v60 = vrot.slane %v4851_v44, 2  ;;  %v4998_v18 = vadd.f32 %v4997_v49, %v4996_v33  ;;  %v4910_v40 = vadd.f32 %v4909_v8, %v4908_v38  ;;  %v5056_v15 = vrot.slane %v5055_v7, 4  ;;  %v11353_v33 = vld [vmem:[%s16983_s7 + $0x70] ss:$8 sps:$4 sm:$0xff]   ;;  %v11355_v38 = vld [vmem:[%s16983_s7 + $0x74] ss:$8 sps:$4 sm:$0xff]  }
 0x4fa   :  { %6213 = vmatprep.subr.bf16.mxu1 %v11355_v38  ;;  %v5068_v38 = vld [vmem:[%s16984_s5] sm:$0x3] }
 0x4fb   :  { %v4853_v62 = vadd.f32 %v4852_v60, %v4851_v44  ;;  %v4999_v39 = vrot.slane %v4998_v18, 2  ;;  %v4911_v45 = vrot.slane %v4910_v40, 2  ;;  %v5057_v28 = vadd.f32 %v5056_v15, %v5055_v7  ;;  %6214 = vmatpush1.bf16.msra.mxu1 %v11353_v33 }
 0x4fd   :  { %v4854_v22 = vrot.slane %v4853_v62, 1  ;;  %v5000_v3 = vadd.f32 %v4999_v39, %v4998_v18  ;;  %v4912_v59 = vadd.f32 %v4911_v45, %v4910_v40  ;;  %v5058_v37 = vrot.slane %v5057_v28, 2 }
 0x4ff   :  { %v4855_v23 = vadd.f32 %v4854_v22, %v4853_v62  ;;  %v5001_v19 = vrot.slane %v5000_v3, 1  ;;  %v4913_v0 = vrot.slane %v4912_v59, 1  ;;  %v5059_v41 = vadd.f32 %v5058_v37, %v5057_v28  ;;  %v11356_v22 = vld [vmem:[%s16983_s7 + $0x80] ss:$8 sps:$4 sm:$0xff]   ;;  %v11359_v37 = vld [vmem:[%s16983_s7 + $0x90] ss:$8 sps:$4 sm:$0xff]  }
 0x501   :  { %v4915_v44 = vmul.f32 0.0069444445, %v4855_v23  ;;  %v5002_v49 = vadd.f32 %v5001_v19, %v5000_v3  ;;  %v4914_v8 = vadd.f32 %v4913_v0, %v4912_v59  ;;  %v5060_v7 = vrot.slane %v5059_v41, 1  ;;  %v11358_v0 = vld [vmem:[%s16983_s7 + $0x84] ss:$8 sps:$4 sm:$0xff]   ;;  %v17703_v19 = vld [vmem:[#allocation54_spill] sm:$0xff] }
 0x502   :  { %6215 = vmatprep.subr.bf16.mxu1 %v11358_v0  ;;  %v11361_v23 = vld [vmem:[%s16983_s7 + $0x94] ss:$8 sps:$4 sm:$0xff]  }
 0x503   :  { %v5062_v52 = vmul.f32 0.0069444445, %v5002_v49  ;;  %v5064_v12 = vmul.f32 %v4915_v44, %v4915_v44  ;;  %v4916_v60 = vmul.f32 0.0069444445, %v4914_v8  ;;  %v5061_v18 = vadd.f32 %v5060_v7, %v5059_v41  ;;  %6216 = vmatpush1.bf16.msra.mxu1 %v11356_v22  ;;  %v17704_v7 = vld [vmem:[#allocation55_spill] sm:$0xff] }
 0x504   :  { %6217 = vmatprep.subr.bf16.mxu1 %v11361_v23 }
 0x505   :  { %v5066_v40 = vsub.f32 %v5062_v52, %v5064_v12  ;;  %v5063_v15 = vmul.f32 0.0069444445, %v5061_v18  ;;  %v5065_v62 = vmul.f32 %v4916_v60, %v4916_v60  ;;  %v17705_v12 = vld [vmem:[#allocation56_spill] sm:$0xff] }
 0x507   :  { %v5069_v39 = vadd.f32 0.001, %v5066_v40  ;;  %v5067_v45 = vsub.f32 %v5063_v15, %v5065_v62  ;;  %6218 = vmatpush1.bf16.msra.mxu1 %v11359_v37  ;;  %v11364_v40 = vld [vmem:[%s16983_s7 + $0x144] ss:$8 sps:$4 sm:$0xff]  }
 0x508   :  { %6713 = vmatprep.subr.bf16.mxu1 %v11364_v40 }
 0x509   :  { %v5070_v28 = vadd.f32 0.001, %v5067_v45  ;;  %11516 = vrsqrt.f32 %v5069_v39 }
 0x50b   :  { %11518 = vrsqrt.f32 %v5070_v28  ;;  %v5092_v28 = vld [vmem:[%s16985_s6] sm:$0x3] }
 0x513   :  { %v11517_v3 = vpop.eup %11516 }
 0x515   :  { %v11519_v41 = vpop.eup %11518 }
 0x516   :  { %v5075_v59 = vcombine.low %v11517_v3, %v11519_v41 }
 0x518   :  { %v5082_v33 = vrot.slane %v5075_v59, %v17703_v19 }
 0x51a   :  { %v5089_v49 = vrot.slane %v5082_v33, %v17703_v19 }
 0x51c   :  { %v5091_v8 = vmul.f32 %v5089_v49, %v5068_v38 }
 0x51e   :  { %v14988_v52 = vrot.slane %v5091_v8, %v17704_v7  ;;  %v14991_v18 = vrot.slane %v5091_v8, %v17705_v12 }
 0x520   :  { %v5104_v15 = vmul.f32 %v14988_v52, %v4915_v44  ;;  %v5105_v62 = vmul.f32 %v14991_v18, %v4916_v60  ;;  %v5178_v22 = vmul.f32 %v14991_v18, %v14952_v58  ;;  %v5126_v0 = vmul.f32 %v14991_v18, %v14578_v4 }
 0x521   :  { %v5125_v3 = vmul.f32 %v14988_v52, %v14574_v6  ;;  %v5128_v60 = vmul.f32 %v14991_v18, %v14586_v55  ;;  %v5130_v41 = vmul.f32 %v14991_v18, %v14598_v35  ;;  %v5127_v59 = vmul.f32 %v14988_v52, %v14582_v57 }
 0x522   :  { %v5108_v39 = vcombine.low %v5104_v15, %v5105_v62  ;;  %v5129_v58 = vmul.f32 %v14988_v52, %v14594_v1  ;;  %v5132_v4 = vmul.f32 %v14991_v18, %v14606_v31  ;;  %v5134_v6 = vmul.f32 %v14991_v18, %v14618_v29 }
 0x523   :  { %v5131_v37 = vmul.f32 %v14988_v52, %v14602_v63  ;;  %v5133_v55 = vmul.f32 %v14988_v52, %v14614_v42  ;;  %v5136_v35 = vmul.f32 %v14991_v18, %v14626_v21  ;;  %v5138_v57 = vmul.f32 %v14991_v18, %v14638_v20 }
 0x524   :  { %v5115_v45 = vrot.slane %v5108_v39, %v17703_v19  ;;  %v5135_v1 = vmul.f32 %v14988_v52, %v14622_v26  ;;  %v5137_v31 = vmul.f32 %v14988_v52, %v14634_v9  ;;  %v5140_v29 = vmul.f32 %v14991_v18, %v14646_v34 }
 0x525   :  { %v5142_v63 = vmul.f32 %v14991_v18, %v14658_v17  ;;  %v5139_v20 = vmul.f32 %v14988_v52, %v14642_v43  ;;  %v5141_v26 = vmul.f32 %v14988_v52, %v14654_v30  ;;  %v5144_v9 = vmul.f32 %v14991_v18, %v14666_v56 }
 0x526   :  { %v5122_v44 = vrot.slane %v5115_v45, %v17703_v19  ;;  %v15051_v34 = vmul.f32 %v14991_v18, %v14678_v47  ;;  %v15055_v17 = vmul.f32 %v14988_v52, %v14662_v2  ;;  %v15059_v33 = vmul.f32 %v14988_v52, %v14674_v46 }
 0x528   :  { %v5124_v23 = vsub.f32 %v5092_v28, %v5122_v44 }
 0x52a   :  { %v15038_v42 = vrot.slane %v5124_v23, %v17704_v7  ;;  %v15041_v21 = vrot.slane %v5124_v23, %v17705_v12 }
 0x52c   :  { %v5243_v43 = vadd.f32 %v15041_v21, %v5178_v22  ;;  %v5191_v38 = vadd.f32 %v15041_v21, %v5126_v0  ;;  %v5190_v30 = vadd.f32 %v15038_v42, %v5125_v3  ;;  %v5193_v56 = vadd.f32 %v15041_v21, %v5128_v60 }
 0x52d   :  { %v5195_v49 = vadd.f32 %v15041_v21, %v5130_v41  ;;  %v5192_v47 = vadd.f32 %v15038_v42, %v5127_v59  ;;  %v5194_v8 = vadd.f32 %v15038_v42, %v5129_v58  ;;  %v5197_v2 = vadd.f32 %v15041_v21, %v5132_v4 }
 0x52e   :  { %v5297_v40 = vmax.f32 %v5243_v43, 0.0  ;;  %v5245_v15 = vmax.f32 %v5191_v38, 0.0  ;;  %v5244_v46 = vmax.f32 %v5190_v30, 0.0  ;;  %v5247_v62 = vmax.f32 %v5193_v56, 0.0 }
 0x52f   :  { %v5249_v39 = vmax.f32 %v5195_v49, 0.0  ;;  %v5246_v45 = vmax.f32 %v5192_v47, 0.0  ;;  %v5248_v28 = vmax.f32 %v5194_v8, 0.0  ;;  %v5199_v22 = vadd.f32 %v15041_v21, %v5134_v6  ;;  %v5447_v47 = vld [vmem:[#allocation3 + $0x68] sm:$0xff] }
 0x530   :  { %5433 = vst.msk [vmem:[#allocation3 + $0x218] sm:$0xff] %vm338_vm0, %v5297_v40  ;;  %5381 = vst.msk [vmem:[#allocation3 + $0x78] sm:$0xff] %vm338_vm0, %v5245_v15  ;;  %v15073_v0 = vpack.c.bf16 %v5244_v46, %v14817_v61  ;;  %v5251_v3 = vmax.f32 %v5197_v2, 0.0  ;;  %v5196_v44 = vadd.f32 %v15038_v42, %v5131_v37  ;;  %v5198_v60 = vadd.f32 %v15038_v42, %v5133_v55 }
 0x531   :  { %5380 = vst [vmem:[#allocation3 + $0x70] sm:$0xff] %v5244_v46  ;;  %5383 = vst.msk [vmem:[#allocation3 + $0x88] sm:$0xff] %vm338_vm0, %v5247_v62  ;;  %v15079_v41 = vpack.c.bf16 %v5248_v28, %v5246_v45  ;;  %v5253_v59 = vmax.f32 %v5199_v22, 0.0  ;;  %v5201_v58 = vadd.f32 %v15041_v21, %v5136_v35  ;;  %v5203_v4 = vadd.f32 %v15041_v21, %v5138_v57 }
 0x532   :  { %5385 = vst.msk [vmem:[#allocation3 + $0x98] sm:$0xff] %vm338_vm0, %v5249_v39  ;;  %5382 = vst [vmem:[#allocation3 + $0x80] sm:$0xff] %v5246_v45  ;;  %v5608_v61 = vrot.slane %v15073_v0, 2  ;;  %v5250_v6 = vmax.f32 %v5196_v44, 0.0  ;;  %v5252_v23 = vmax.f32 %v5198_v60, 0.0  ;;  %v5200_v37 = vadd.f32 %v15038_v42, %v5135_v1 }
 0x533   :  { %5384 = vst [vmem:[#allocation3 + $0x90] sm:$0xff] %v5248_v28  ;;  %5387 = vst.msk [vmem:[#allocation3 + $0xa8] sm:$0xff] %vm338_vm0, %v5251_v3  ;;  %v5612_v55 = vrot.slane %v15079_v41, 2  ;;  %v5255_v43 = vmax.f32 %v5201_v58, 0.0  ;;  %v5257_v38 = vmax.f32 %v5203_v4, 0.0  ;;  %v5202_v30 = vadd.f32 %v15038_v42, %v5137_v31 }
 0x534   :  { %5389 = vst.msk [vmem:[#allocation3 + $0xb8] sm:$0xff] %vm338_vm0, %v5253_v59  ;;  %5386 = vst [vmem:[#allocation3 + $0xa0] sm:$0xff] %v5250_v6  ;;  %v15089_v35 = vpack.c.bf16 %v5252_v23, %v5250_v6  ;;  %v5254_v57 = vmax.f32 %v5200_v37, 0.0  ;;  %v5205_v56 = vadd.f32 %v15041_v21, %v5140_v29  ;;  %v5148_v49 = vmul.f32 %v14991_v18, %v14692_v53 }
 0x535   :  { %5388 = vst [vmem:[#allocation3 + $0xb0] sm:$0xff] %v5252_v23  ;;  %v15099_v1 = vsel %vm5601_vm7, %v5608_v61, %v5612_v55  ;;  %5391 = vst.msk [vmem:[#allocation3 + $0xc8] sm:$0xff] %vm338_vm0, %v5255_v43  ;;  %v5256_v31 = vmax.f32 %v5202_v30, 0.0  ;;  %v5207_v8 = vadd.f32 %v15041_v21, %v5142_v63  ;;  %v5204_v29 = vadd.f32 %v15038_v42, %v5139_v20 }
 0x536   :  { %5393 = vst.msk [vmem:[#allocation3 + $0xd8] sm:$0xff] %vm338_vm0, %v5257_v38  ;;  %5390 = vst [vmem:[#allocation3 + $0xc0] sm:$0xff] %v5254_v57  ;;  %v5259_v2 = vmax.f32 %v5205_v56, 0.0  ;;  %v5206_v53 = vadd.f32 %v15038_v42, %v5141_v26  ;;  %v5209_v40 = vadd.f32 %v15041_v21, %v5144_v9  ;;  %v5150_v15 = vmul.f32 %v14991_v18, %v14716_v51 }
 0x537   :  { %v5449_v46 = vld [vmem:[#allocation3 + $0x78] sm:$0xff]  ;;  %5392 = vst [vmem:[#allocation3 + $0xd0] sm:$0xff] %v5256_v31  ;;  %v15109_v39 = vpack.c.bf16 %v5256_v31, %v5254_v57  ;;  %v5261_v45 = vmax.f32 %v5207_v8, 0.0  ;;  %v5258_v28 = vmax.f32 %v5204_v29, 0.0  ;;  %v5211_v63 = vadd.f32 %v15041_v21, %v15051_v34 }
 0x538   :  { %v5451_v62 = vld [vmem:[#allocation3 + $0x88] sm:$0xff]  ;;  %v15113_v20 = vpack.c.bf16 %v5449_v46, %v5447_v47  ;;  %5395 = vst.msk [vmem:[#allocation3 + $0xe8] sm:$0xff] %vm338_vm0, %v5259_v2  ;;  %v5260_v26 = vmax.f32 %v5206_v53, 0.0  ;;  %v5263_v9 = vmax.f32 %v5209_v40, 0.0  ;;  %v5147_v51 = vmul.f32 %v14988_v52, %v14685_v13 }
 0x539   :  { %v5453_v22 = vld [vmem:[#allocation3 + $0x98] sm:$0xff]  ;;  %5397 = vst.msk [vmem:[#allocation3 + $0xf8] sm:$0xff] %vm338_vm0, %v5261_v45  ;;  %5394 = vst [vmem:[#allocation3 + $0xe0] sm:$0xff] %v5258_v28  ;;  %v5265_v44 = vmax.f32 %v5211_v63, 0.0  ;;  %v5208_v60 = vadd.f32 %v15038_v42, %v15055_v17  ;;  %v5149_v34 = vmul.f32 %v14988_v52, %v14709_v50  ;;  %v5210_v13 = vadd.f32 %v15038_v42, %v15059_v33 }
 0x53a   :  { %v15118_v3 = vpack.c.bf16 %v5453_v22, %v5451_v62  ;;  %v5610_v59 = vrot.slane %v15113_v20, 2  ;;  %v5455_v58 = vld [vmem:[#allocation3 + $0xa8] sm:$0xff]  ;;  %5396 = vst [vmem:[#allocation3 + $0xf0] sm:$0xff] %v5260_v26  ;;  %v15126_v6 = vpack.c.bf16 %v5260_v26, %v5258_v28  ;;  %5399 = vst.msk [vmem:[#allocation3 + $0x108] sm:$0xff] %vm338_vm0, %v5263_v9  ;;  %v5213_v23 = vadd.f32 %v15041_v21, %v5148_v49 }
 0x53b   :  { %v5457_v4 = vld [vmem:[#allocation3 + $0xb8] sm:$0xff]  ;;  %5401 = vst.msk [vmem:[#allocation3 + $0x118] sm:$0xff] %vm338_vm0, %v5265_v44  ;;  %v5262_v17 = vmax.f32 %v5208_v60, 0.0  ;;  %v5152_v50 = vmul.f32 %v14991_v18, %v14727_v36  ;;  %v5154_v43 = vmul.f32 %v14991_v18, %v14750_v48  ;;  %v17706_v38 = vrot.slane %v14740_v14, 2 }
 0x53c   :  { %v5614_v37 = vrot.slane %v15118_v3, 2  ;;  %v5264_v57 = vmax.f32 %v5210_v13, 0.0  ;;  %v5215_v33 = vadd.f32 %v15041_v21, %v5150_v15  ;;  %v5151_v56 = vmul.f32 %v14988_v52, %v14723_v16  ;;  %v5459_v15 = vld [vmem:[#allocation3 + $0xc8] sm:$0xff] }
 0x53d   :  { %v5611_v30 = vsel %vm5601_vm7, %v17706_v38, %v5610_v59  ;;  %v17707_v49 = vrot.slane %v14821_v11, 2  ;;  %v15150_v47 = vpack.c.bf16 %v5457_v4, %v5455_v58  ;;  %5398 = vst [vmem:[#allocation3 + $0x100] sm:$0xff] %v5262_v17  ;;  %v5267_v48 = vmax.f32 %v5213_v23, 0.0  ;;  %v5461_v46 = vld [vmem:[#allocation3 + $0xd8] sm:$0xff]  ;;  %v17710_v13 = vld [vmem:[#allocation51_spill] sm:$0xff] }
 0x53e   :  { %10098 = vmatprep.mubr.msk.bf16.mxu1 %vm338_vm0, %v5611_v30  ;;  %v5153_v31 = vmul.f32 %v14988_v52, %v14743_v54  ;;  %v5615_v8 = vsel %vm5601_vm7, %v5610_v59, %v5614_v37  ;;  %5400 = vst [vmem:[#allocation3 + $0x110] sm:$0xff] %v5264_v57  ;;  %v15155_v16 = vpack.c.bf16 %v5264_v57, %v5262_v17  ;;  %v5269_v29 = vmax.f32 %v5215_v33, 0.0  ;;  %v17711_v33 = vld [vmem:[#allocation40_spill] sm:$0xff] }
 0x53f   :  { %v5609_v36 = vsel %vm5601_vm7, %v17707_v49, %v5608_v61  ;;  %v5212_v2 = vadd.f32 %v15038_v42, %v5147_v51  ;;  %5403 = vst.msk [vmem:[#allocation3 + $0x128] sm:$0xff] %vm338_vm0, %v5267_v48  ;;  %v5214_v61 = vadd.f32 %v15038_v42, %v5149_v34  ;;  %v5217_v53 = vadd.f32 %v15041_v21, %v5152_v50  ;;  %v17709_v34 = vld [vmem:[#allocation44_spill] sm:$0xff]  ;;  %v17712_v49 = vld [vmem:[#allocation43_spill] sm:$0xff] }
 0x540   :  { %5855 = vmatmul.mubr.bf16.gmra.mrb[4].mxu1 %v5609_v36  ;;  %v5156_v54 = vmul.f32 %v14991_v18, %v14765_v27  ;;  %v5158_v40 = vmul.f32 %v14991_v18, %v14790_v25  ;;  %5405 = vst.msk [vmem:[#allocation3 + $0x138] sm:$0xff] %vm338_vm0, %v5269_v29  ;;  %v5219_v45 = vadd.f32 %v15041_v21, %v5154_v43  ;;  %v5618_v22 = vrot.slane %v15150_v47, 2  ;;  %v17708_v27 = vld [vmem:[#allocation45_spill] sm:$0xff] }
 0x541   :  { %10099 = vmatprep.mubr.msk.bf16.mxu1 %vm338_vm0, %v5615_v8  ;;  %v5266_v62 = vmax.f32 %v5212_v2, 0.0  ;;  %v5216_v28 = vadd.f32 %v15038_v42, %v5151_v56  ;;  %v5155_v63 = vmul.f32 %v14988_v52, %v14758_v5  ;;  %v5268_v26 = vmax.f32 %v5214_v61, 0.0 }
 0x542   :  { %v5271_v9 = vmax.f32 %v5217_v53, 0.0  ;;  %v5157_v51 = vmul.f32 %v14988_v52, %v17708_v27  ;;  %v5273_v25 = vmax.f32 %v5219_v45, 0.0  ;;  %v5218_v44 = vadd.f32 %v15038_v42, %v5153_v31 }
 0x543   :  { %5402 = vst [vmem:[#allocation3 + $0x120] sm:$0xff] %v5266_v62  ;;  %v5270_v60 = vmax.f32 %v5216_v28, 0.0  ;;  %v5160_v59 = vmul.f32 %v14991_v18, %v17709_v34  ;;  %v15177_v58 = vpack.c.bf16 %v5461_v46, %v5459_v15  ;;  %5404 = vst [vmem:[#allocation3 + $0x130] sm:$0xff] %v5268_v26  ;;  %v15179_v4 = vpack.c.bf16 %v5268_v26, %v5266_v62  ;;  %v5463_v26 = vld [vmem:[#allocation3 + $0xe8] sm:$0xff] }
 0x544   :  { %5407 = vst.msk [vmem:[#allocation3 + $0x148] sm:$0xff] %vm338_vm0, %v5271_v9  ;;  %v5221_v5 = vadd.f32 %v15041_v21, %v5156_v54  ;;  %v5162_v23 = vmul.f32 %v14991_v18, %v17710_v13  ;;  %5409 = vst.msk [vmem:[#allocation3 + $0x158] sm:$0xff] %vm338_vm0, %v5273_v25  ;;  %v5272_v17 = vmax.f32 %v5218_v44, 0.0  ;;  %v5223_v50 = vadd.f32 %v15041_v21, %v5158_v40  ;;  %v5465_v9 = vld [vmem:[#allocation3 + $0xf8] sm:$0xff]  ;;  %v17713_v44 = vld [vmem:[#allocation46_spill] sm:$0xff] }
 0x545   :  { %5406 = vst [vmem:[#allocation3 + $0x140] sm:$0xff] %v5270_v60  ;;  %v5220_v43 = vadd.f32 %v15038_v42, %v5155_v63  ;;  %v5222_v38 = vadd.f32 %v15038_v42, %v5157_v51  ;;  %v5619_v30 = vsel %vm5601_vm7, %v5614_v37, %v5618_v22  ;;  %v5159_v56 = vmul.f32 %v14988_v52, %v17711_v33 }
 0x546   :  { %v5275_v57 = vmax.f32 %v5221_v5, 0.0  ;;  %v5161_v36 = vmul.f32 %v14988_v52, %v17712_v49  ;;  %5408 = vst [vmem:[#allocation3 + $0x150] sm:$0xff] %v5272_v17  ;;  %v15195_v48 = vpack.c.bf16 %v5272_v17, %v5270_v60  ;;  %v5277_v31 = vmax.f32 %v5223_v50, 0.0  ;;  %v17714_v5 = vld [vmem:[#allocation50_spill] sm:$0xff] }
 0x547   :  { %v5274_v8 = vmax.f32 %v5220_v43, 0.0  ;;  %v5276_v29 = vmax.f32 %v5222_v38, 0.0  ;;  %v5616_v2 = vrot.slane %v15089_v35, 2  ;;  %v5225_v37 = vadd.f32 %v15041_v21, %v5160_v59  ;;  %v17715_v38 = vld [vmem:[#allocation52_spill] sm:$0xff] }
 0x548   :  { %5865 = vmatmul.mubr.bf16.gmra.mrb[8].mxu1 %v15099_v1  ;;  %5411 = vst.msk [vmem:[#allocation3 + $0x168] sm:$0xff] %vm338_vm0, %v5275_v57  ;;  %v5227_v61 = vadd.f32 %v15041_v21, %v5162_v23  ;;  %v5164_v53 = vmul.f32 %v14991_v18, %v14840_v32  ;;  %v5622_v1 = vrot.slane %v15177_v58, 2  ;;  %v5636_v54 = vrot.slane %v15195_v48, 2  ;;  %5413 = vst.msk [vmem:[#allocation3 + $0x178] sm:$0xff] %vm338_vm0, %v5277_v31  ;;  %v17716_v57 = vld [vmem:[#allocation58_spill] sm:$0xff] }
 0x549   :  { %10100 = vmatprep.mubr.msk.bf16.mxu1 %vm338_vm0, %v5619_v30  ;;  %5410 = vst [vmem:[#allocation3 + $0x160] sm:$0xff] %v5274_v8  ;;  %5412 = vst [vmem:[#allocation3 + $0x170] sm:$0xff] %v5276_v29  ;;  %v15207_v40 = vpack.c.bf16 %v5276_v29, %v5274_v8  ;;  %v5224_v15 = vadd.f32 %v15038_v42, %v5159_v56  ;;  %v5279_v46 = vmax.f32 %v5225_v37, 0.0  ;;  %v17718_v8 = vld [vmem:[#allocation57_spill] sm:$0xff]  ;;  %v5620_v37 = vrot.slane %v15109_v39, 2 }
 0x54a   :  { %v5281_v62 = vmax.f32 %v5227_v61, 0.0  ;;  %v5226_v45 = vadd.f32 %v15038_v42, %v5161_v36  ;;  %v5166_v28 = vmul.f32 %v14991_v18, %v14865_v24  ;;  %v5229_v51 = vadd.f32 %v15041_v21, %v5164_v53  ;;  %v17717_v36 = vld [vmem:[#allocation49_spill] sm:$0xff] }
 0x54b   :  { %v5640_v32 = vrot.slane %v15207_v40, 2  ;;  %v5278_v63 = vmax.f32 %v5224_v15, 0.0  ;;  %5415 = vst.msk [vmem:[#allocation3 + $0x188] sm:$0xff] %vm338_vm0, %v5279_v46  ;;  %v5163_v60 = vmul.f32 %v14988_v52, %v17713_v44  ;;  %v5617_v24 = vsel %vm5601_vm7, %v5612_v55, %v5616_v2 }
 0x54c   :  { %5417 = vst.msk [vmem:[#allocation3 + $0x198] sm:$0xff] %vm338_vm0, %v5281_v62  ;;  %v5280_v27 = vmax.f32 %v5226_v45, 0.0  ;;  %v5231_v25 = vadd.f32 %v15041_v21, %v5166_v28  ;;  %v5623_v34 = vsel %vm5601_vm7, %v5618_v22, %v5622_v1  ;;  %v5165_v13 = vmul.f32 %v14988_v52, %v17714_v5 }
 0x54d   :  { %v15231_v59 = vsel %vm5601_vm7, %v5636_v54, %v5640_v32  ;;  %5414 = vst [vmem:[#allocation3 + $0x180] sm:$0xff] %v5278_v63  ;;  %v5283_v17 = vmax.f32 %v5229_v51, 0.0  ;;  %v5228_v55 = vadd.f32 %v15038_v42, %v5163_v60  ;;  %v15238_v43 = vpack.c.bf16 %v5465_v9, %v5463_v26  ;;  %v5469_v26 = vld [vmem:[#allocation3 + $0x118] sm:$0xff] }
 0x54e   :  { %5416 = vst [vmem:[#allocation3 + $0x190] sm:$0xff] %v5280_v27  ;;  %v15235_v23 = vpack.c.bf16 %v5280_v27, %v5278_v63  ;;  %v5285_v50 = vmax.f32 %v5231_v25, 0.0  ;;  %v5230_v22 = vadd.f32 %v15038_v42, %v5165_v13  ;;  %v5168_v30 = vmul.f32 %v14991_v18, %v17715_v38  ;;  %v5467_v63 = vld [vmem:[#allocation3 + $0x108] sm:$0xff] }
 0x54f   :  { %v5170_v33 = vmul.f32 %v14991_v18, %v17716_v57  ;;  %5419 = vst.msk [vmem:[#allocation3 + $0x1a8] sm:$0xff] %vm338_vm0, %v5283_v17  ;;  %v15249_v49 = vmax.f32 %v5228_v55, 0.0  ;;  %v5167_v31 = vmul.f32 %v14988_v52, %v17717_v36  ;;  %v5169_v29 = vmul.f32 %v14988_v52, %v17718_v8  ;;  %v5473_v57 = vld [vmem:[#allocation3 + $0x138] sm:$0xff] }
 0x550   :  { %5875 = vmatmul.mubr.bf16.gmra.mrb[12].mxu1 %v5617_v24  ;;  %v5644_v56 = vrot.slane %v15235_v23, 2  ;;  %5421 = vst.msk [vmem:[#allocation3 + $0x1b8] sm:$0xff] %vm338_vm0, %v5285_v50  ;;  %v5284_v61 = vmax.f32 %v5230_v22, 0.0  ;;  %v5233_v53 = vadd.f32 %v15041_v21, %v5168_v30  ;;  %v5626_v28 = vrot.slane %v15238_v43, 2  ;;  %v5471_v30 = vld [vmem:[#allocation3 + $0x128] sm:$0xff] }
 0x551   :  { %10101 = vmatprep.mubr.msk.bf16.mxu1 %vm338_vm0, %v5623_v34  ;;  %5418 = vst [vmem:[#allocation3 + $0x1a0] sm:$0xff] %v15249_v49  ;;  %v5235_v46 = vadd.f32 %v15041_v21, %v5170_v33  ;;  %v5232_v62 = vadd.f32 %v15038_v42, %v5167_v31  ;;  %v15264_v45 = vadd.f32 %v15038_v42, %v5169_v29  ;;  %v15274_v44 = vrot.slane %v14821_v11, 1 }
 0x552   :  { %v15258_v15 = vsel %vm5601_vm7, %v5640_v32, %v5644_v56  ;;  %5420 = vst [vmem:[#allocation3 + $0x1b0] sm:$0xff] %v5284_v61  ;;  %v15268_v9 = vpack.c.bf16 %v5284_v61, %v15249_v49  ;;  %v5287_v27 = vmax.f32 %v5233_v53, 0.0  ;;  %v5621_v24 = vsel %vm5601_vm7, %v5616_v2, %v5620_v37 }
 0x553   :  { %v5289_v32 = vmax.f32 %v5235_v46, 0.0  ;;  %v15270_v51 = vmax.f32 %v5232_v62, 0.0  ;;  %v5288_v25 = vmax.f32 %v15264_v45, 0.0  ;;  %v15281_v34 = vpack.c.bf16 %v5469_v26, %v5467_v63  ;;  %v5477_v62 = vld [vmem:[#allocation3 + $0x158] sm:$0xff] }
 0x554   :  { %v5648_v60 = vrot.slane %v15268_v9, 2  ;;  %5423 = vst.msk [vmem:[#allocation3 + $0x1c8] sm:$0xff] %vm338_vm0, %v5287_v27  ;;  %v17203_v11 = vrot.slane %v15113_v20, 1  ;;  %v5627_v5 = vsel %vm5601_vm7, %v5622_v1, %v5626_v28  ;;  %v5999_v2 = vrot.slane %v15073_v0, 1 }
 0x555   :  { %5425 = vst.msk [vmem:[#allocation3 + $0x1d8] sm:$0xff] %vm338_vm0, %v5289_v32  ;;  %5422 = vst [vmem:[#allocation3 + $0x1c0] sm:$0xff] %v15270_v51  ;;  %v17202_v17 = vrot.slane %v15118_v3, 1  ;;  %v17201_v1 = vrot.slane %v15079_v41, 1  ;;  %v5624_v22 = vrot.slane %v15126_v6, 2  ;;  %v5630_v0 = vrot.slane %v15281_v34, 2 }
 0x556   :  { %5424 = vst [vmem:[#allocation3 + $0x1d0] sm:$0xff] %v5288_v25  ;;  %v15292_v13 = vsel %vm5601_vm7, %v5644_v56, %v5648_v60  ;;  %v15299_v50 = vsel %vm3793_vm5, %v15274_v44, %v5999_v2  ;;  %v15319_v8 = vpack.c.bf16 %v5473_v57, %v5471_v30  ;;  %v5628_v61 = vrot.slane %v15155_v16, 2 }
 0x557   :  { %v15306_v55 = vsel %vm3793_vm5, %v17203_v11, %v17202_v17  ;;  %v15314_v38 = vsel %vm3793_vm5, %v5999_v2, %v17201_v1  ;;  %v5625_v56 = vsel %vm5601_vm7, %v5620_v37, %v5624_v22  ;;  %v5631_v31 = vsel %vm5601_vm7, %v5626_v28, %v5630_v0  ;;  %v5475_v37 = vld [vmem:[#allocation3 + $0x148] sm:$0xff]  ;;  %v17722_v1 = vld [vmem:[#allocation61_spill] sm:$0xff]  ;;  %v17723_v17 = vld [vmem:[#allocation64_spill] sm:$0xff] }
 0x558   :  { %5885 = vmatmul.mubr.bf16.gmra.mrb[16].mxu1 %v5621_v24  ;;  %v5634_v46 = vrot.slane %v15319_v8, 2  ;;  %v5629_v63 = vsel %vm5601_vm7, %v5624_v22, %v5628_v61  ;;  %v15332_v26 = vpack.c.bf16 %v5477_v62, %v5475_v37  ;;  %v5632_v27 = vrot.slane %v15179_v4, 2  ;;  %v5479_v24 = vld [vmem:[#allocation3 + $0x168] sm:$0xff]  ;;  %v5541_v62 = vld [vmem:[#allocation3 + $0x1b8] sm:$0xff] }
 0x559   :  { %10102 = vmatprep.mubr.msk.bf16.mxu1 %vm338_vm0, %v5627_v5  ;;  %v17200_v2 = vrot.slane %v15195_v48, 1  ;;  %v5487_v37 = vld [vmem:[#allocation3 + $0x1a8] sm:$0xff]  ;;  %v6009_v7 = vrot.slane %v15150_v47, 1 }
 0x55a   :  { %v5635_v28 = vsel %vm5601_vm7, %v5630_v0, %v5634_v46  ;;  %v5638_v32 = vrot.slane %v15332_v26, 2  ;;  %v5633_v5 = vsel %vm5601_vm7, %v5628_v61, %v5632_v27  ;;  %v6031_v0 = vrot.slane %v15207_v40, 1 }
 0x55c   :  { %v5639_v22 = vsel %vm5601_vm7, %v5634_v46, %v5638_v32  ;;  %v15347_v57 = vsel %vm3793_vm5, %v17200_v2, %v6031_v0 }
 0x55d   :  { %v5544_v33 = vld [vmem:[#allocation3 + $0x1d0] sm:$0xf] }
 0x55e   :  { %v5550_v36 = vpack.c.bf16 %v5544_v33, %v15270_v51 }
 0x560   :  { %5895 = vmatmul.mubr.bf16.gmra.mrb[20].mxu1 %v5625_v56  ;;  %v15322_v29 = vrot.slane %v5550_v36, 2  ;;  %v5483_v56 = vld [vmem:[#allocation3 + $0x188] sm:$0xff]  ;;  %v5485_v36 = vld [vmem:[#allocation3 + $0x198] sm:$0xff] }
 0x561   :  { %10103 = vmatprep.mubr.msk.bf16.mxu1 %vm338_vm0, %v5631_v31  ;;  %v5637_v31 = vsel %vm5601_vm7, %v5632_v27, %v5636_v54  ;;  %v15354_v46 = vpack.c.bf16 %v5485_v36, %v5483_v56  ;;  %v5488_v56 = vld [vmem:[#allocation3 + $0x1b0] sm:$0x3]  ;;  %v17719_v36 = vld [vmem:[#allocation63_spill] sm:$0xff] }
 0x562   :  { %v15327_v53 = vsel %vm5601_vm7, %v5648_v60, %v15322_v29  ;;  %v5481_v60 = vld [vmem:[#allocation3 + $0x178] sm:$0xff] }
 0x563   :  { %v15340_v30 = vpack.c.bf16 %v5481_v60, %v5479_v24  ;;  %v5646_v24 = vrot.slane %v15354_v46, 2  ;;  %v15362_v60 = vpack.c.bf16 %v5541_v62, %v5487_v37  ;;  %v17721_v62 = vld [vmem:[#allocation60_spill] sm:$0xff] }
 0x564   :  { %v5173_v2 = vmul.f32 %v14988_v52, %v17721_v62 }
 0x565   :  { %v5642_v33 = vrot.slane %v15340_v30, 2  ;;  %v5650_v27 = vrot.slane %v15362_v60, 2 }
 0x567   :  { %v5643_v61 = vsel %vm5601_vm7, %v5638_v32, %v5642_v33  ;;  %v5647_v54 = vsel %vm5601_vm7, %v5642_v33, %v5646_v24  ;;  %v5489_v32 = vld [vmem:[#allocation3 + $0x1b8] sm:$0x3]  ;;  %v5516_v33 = vpack.c.bf16 %v5488_v56, %v15249_v49  ;;  %v5238_v49 = vadd.f32 %v15038_v42, %v5173_v2 }
 0x568   :  { %5905 = vmatmul.mubr.bf16.gmra.mrb[24].mxu1 %v5629_v63  ;;  %v6035_v63 = vrot.slane %v15235_v23, 1 }
 0x569   :  { %10104 = vmatprep.mubr.msk.bf16.mxu1 %vm338_vm0, %v5635_v28 }
 0x56a   :  { %v15359_v28 = vsel %vm3793_vm5, %v6031_v0, %v6035_v63  ;;  %v5517_v0 = vpack.c.bf16 %v5489_v32, %v5487_v37 }
 0x56c   :  { %v15382_v11 = vrot.slane %v5517_v0, 1 }
 0x570   :  { %5915 = vmatmul.mubr.bf16.gmra.mrb[28].mxu1 %v5633_v5  ;;  %v5172_v5 = vmul.f32 %v14991_v18, %v14908_v10  ;;  %v5176_v10 = vmul.f32 %v14991_v18, %v17722_v1  ;;  %v5545_v1 = vld [vmem:[#allocation3 + $0x1d8] sm:$0xf] }
 0x571   :  { %10105 = vmatprep.mubr.msk.bf16.mxu1 %vm338_vm0, %v5639_v22  ;;  %v17206_v22 = vrot.slane %v15354_v46, 1 }
 0x572   :  { %v5237_v37 = vadd.f32 %v15041_v21, %v5172_v5  ;;  %v5241_v56 = vadd.f32 %v15041_v21, %v5176_v10  ;;  %v6450_v10 = vpack.c.bf16 %v5288_v25, %v15270_v51  ;;  %v17724_v51 = vld [vmem:[#allocation65_spill] sm:$0xff] }
 0x573   :  { %v5177_v25 = vmul.f32 %v14988_v52, %v17724_v51  ;;  %v5437_v51 = vld [vmem:[#allocation3 + $0x18] sm:$0xff] }
 0x574   :  { %v5291_v5 = vmax.f32 %v5237_v37, 0.0  ;;  %v17204_v37 = vrot.slane %v15195_v48, 3 }
 0x576   :  { %5427 = vst.msk [vmem:[#allocation3 + $0x1e8] sm:$0xff] %vm338_vm0, %v5291_v5 }
 0x578   :  { %5925 = vmatmul.mubr.bf16.gmra.mrb[32].mxu1 %v5637_v31  ;;  %v5174_v31 = vmul.f32 %v14991_v18, %v17719_v36  ;;  %v15392_v18 = vld [vmem:[#allocation3 + $0x1c8] sm:$0xff] }
 0x579   :  { %10106 = vmatprep.mubr.msk.bf16.mxu1 %vm338_vm0, %v5643_v61  ;;  %v17720_v61 = vld [vmem:[#allocation59_spill] sm:$0xff] }
 0x57a   :  { %v5239_v32 = vadd.f32 %v15041_v21, %v5174_v31  ;;  %v5292_v21 = vmax.f32 %v5238_v49, 0.0 }
 0x57c   :  { %v5293_v0 = vmax.f32 %v5239_v32, 0.0  ;;  %5428 = vst [vmem:[#allocation3 + $0x1f0] sm:$0xff] %v5292_v21  ;;  %v6541_v32 = vrot.slane %v15235_v23, 3  ;;  %v15445_v23 = vld [vmem:[#allocation3 + $0x70] sm:$0xff] }
 0x57e   :  { %5429 = vst.msk [vmem:[#allocation3 + $0x1f8] sm:$0xff] %vm338_vm0, %v5293_v0  ;;  %v15452_v0 = vld [vmem:[#allocation3 + $0x88] sm:$0xff] }
 0x580   :  { %5935 = vmatmul.mubr.bf16.gmra.mrb[36].mxu1 %v15231_v59  ;;  %v5171_v59 = vmul.f32 %v14988_v52, %v17720_v61  ;;  %v15387_v61 = vrot.slane %v5516_v33, 1 }
 0x581   :  { %10107 = vmatprep.mubr.msk.bf16.mxu1 %vm338_vm0, %v5647_v54  ;;  %v5175_v54 = vmul.f32 %v14988_v52, %v17723_v17  ;;  %v15398_v17 = vsel %vm3793_vm5, %v17206_v22, %v15382_v11 }
 0x582   :  { %v5236_v36 = vadd.f32 %v15038_v42, %v5171_v59  ;;  %v15404_v2 = vsel %vm3793_vm5, %v6035_v63, %v15387_v61  ;;  %v5295_v59 = vmax.f32 %v5241_v56, 0.0  ;;  %v5551_v63 = vpack.c.bf16 %v5545_v1, %v15392_v18 }
 0x583   :  { %v5240_v62 = vadd.f32 %v15038_v42, %v5175_v54  ;;  %v5651_v54 = vsel %vm5601_vm7, %v5646_v24, %v5650_v27  ;;  %v6537_v24 = vrot.slane %v15207_v40, 3  ;;  %v6549_v1 = vrot.slane %v6450_v10, 3  ;;  %v15443_v40 = vld [vmem:[#allocation3 + $0x78] sm:$0xff] }
 0x584   :  { %v15400_v31 = vmax.f32 %v5236_v36, 0.0  ;;  %5431 = vst.msk [vmem:[#allocation3 + $0x208] sm:$0xff] %vm338_vm0, %v5295_v59  ;;  %v6545_v36 = vrot.slane %v15268_v9, 3  ;;  %v5654_v49 = vrot.slane %v5551_v63, 2  ;;  %v5435_v63 = vld [vmem:[#allocation3 + $0x8] sm:$0xfc] }
 0x585   :  { %v15406_v33 = vmax.f32 %v5240_v62, 0.0  ;;  %v15433_v56 = vsel %vm1108_vm1, %v17204_v37, %v6537_v24  ;;  %v15436_v52 = vsel %vm1108_vm1, %v6537_v24, %v6541_v32  ;;  %v5491_v24 = vpack.c.bf16 %v5437_v51, %v5435_v63  ;;  %v5434_v63 = vld [vmem:[#allocation3] sm:$0xfc] }
 0x586   :  { %5426 = vst [vmem:[#allocation3 + $0x1e0] sm:$0xff] %v15400_v31  ;;  %v15439_v62 = vsel %vm1108_vm1, %v6541_v32, %v6545_v36  ;;  %v15448_v9 = vsel %vm1108_vm1, %v6545_v36, %v6549_v1  ;;  %v5655_v5 = vsel %vm5601_vm7, %v5650_v27, %v5654_v49  ;;  %v11581_v27 = vld [vmem:[#allocation3 + $0x38] sm:$0xff]  ;;  %v17205_v32 = vrot.slane %v15354_v46, 3 }
 0x587   :  { %5430 = vst [vmem:[#allocation3 + $0x200] sm:$0xff] %v15406_v33  ;;  %v15420_v45 = vpack.c.bf16 %v15406_v33, %v5292_v21  ;;  %v15454_v21 = vld [vmem:[#allocation3 + $0x80] sm:$0xff]  ;;  %v6547_v36 = vrot.slane %v15362_v60, 3  ;;  %v5992_v37 = vrot.slane %v5491_v24, 1  ;;  %v15481_v60 = vld [vmem:[#allocation3 + $0x1e8] sm:$0xff] }
 0x588   :  { %5945 = vmatmul.mubr.bf16.gmra.mrb[40].mxu1 %v15258_v15  ;;  %v5242_v15 = vadd.f32 %v15038_v42, %v5177_v25  ;;  %v6424_v25 = vld [vmem:[#allocation3 + $0x1f0] sm:$0x3f] }
 0x589   :  { %10108 = vmatprep.mubr.msk.bf16.mxu1 %vm338_vm0, %v5651_v54  ;;  %v5439_v54 = vld [vmem:[#allocation3 + $0x28] sm:$0xff]  ;;  %v6452_v59 = vpack.c.bf16 %v6424_v25, %v15400_v31  ;;  %v15471_v10 = vsel %vm1108_vm1, %v17205_v32, %v6547_v36  ;;  %v11382_v32 = vld [vmem:[%s16983_s7 + $0x1a4] ss:$8 sps:$4 sm:$0xff]  }
 0x58a   :  { %v15441_v42 = vmax.f32 %v5242_v15, 0.0  ;;  %v5493_v15 = vpack.c.bf16 %v11581_v27, %v5439_v54 }
 0x58b   :  { %v15475_v27 = vrot.slane %v6452_v59, 3 }
 0x58c   :  { %5432 = vst [vmem:[#allocation3 + $0x210] sm:$0xff] %v15441_v42  ;;  %v5993_v54 = vrot.slane %v5493_v15, 1 }
 0x58e   :  { %v5994_v15 = vsel %vm3793_vm5, %v5992_v37, %v5993_v54  ;;  %v11367_v37 = vld [vmem:[%s16983_s7 + $0x154] ss:$8 sps:$4 sm:$0xff]  }
 0x590   :  { %5955 = vmatmul.mubr.bf16.gmra.mrb[44].mxu1 %v15292_v13  ;;  %v6421_v13 = vld [vmem:[#allocation3 + $0x1d8] sm:$0xff] }
 0x591   :  { %10109 = vmatprep.mubr.msk.bf16.mxu1 %vm338_vm0, %v5655_v5  ;;  %v6451_v5 = vpack.c.bf16 %v6421_v13, %v15392_v18  ;;  %v15485_v18 = vsel %vm1108_vm1, %v6549_v1, %v15475_v27  ;;  %v15492_v24 = vpack.c.bf16 %v15481_v60, %v6421_v13  ;;  %v11362_v1 = vld [vmem:[%s16983_s7 + $0x140] ss:$8 sps:$4 sm:$0xff]  }
 0x592   :  { %v11368_v13 = vld [vmem:[%s16983_s7 + $0x160] ss:$8 sps:$4 sm:$0xff]  }
 0x593   :  { %v15473_v51 = vrot.slane %v6451_v5, 3 }
 0x598   :  { %5965 = vmatmul.mubr.bf16.gmra.mrb[48].mxu1 %v15327_v53  ;;  %v15479_v53 = vsel %vm1108_vm1, %v6547_v36, %v15473_v51  ;;  %v5997_v36 = vrot.slane %v14740_v14, 1  ;;  %v11365_v14 = vld [vmem:[%s16983_s7 + $0x150] ss:$8 sps:$4 sm:$0xff]  }
 0x599   :  { %10110 = vmatprep.mubr.msk.bf16.mxu1 %vm338_vm0, %v5654_v49  ;;  %v15487_v49 = vld [vmem:[#allocation2] sm:$0xff] }
 0x59a   :  { %v5490_v25 = vpack.c.bf16 %v15487_v49, %v5434_v63  ;;  %v5998_v63 = vsel %vm3793_vm5, %v5993_v54, %v5997_v36  ;;  %v11373_v54 = vld [vmem:[%s16983_s7 + $0x174] ss:$8 sps:$4 sm:$0xff]  }
 0x59c   :  { %v5989_v59 = vrot.slane %v5490_v25, 1  ;;  %v17725_v25 = vrot.slane %v15113_v20, 1  ;;  %v11374_v20 = vld [vmem:[%s16983_s7 + $0x180] ss:$8 sps:$4 sm:$0xff]  }
 0x59e   :  { %v5991_v5 = vsel %vm3793_vm5, %v5989_v59, %v15274_v44  ;;  %v11371_v59 = vld [vmem:[%s16983_s7 + $0x170] ss:$8 sps:$4 sm:$0xff]  }
 0x5a0   :  { %5975 = vmatmul.mubr.bf16.gmra.mrb[52].mxu1 %v15322_v29  ;;  %v11370_v29 = vld [vmem:[%s16983_s7 + $0x164] ss:$8 sps:$4 sm:$0xff]  }
 0x5a1   :  { %10131 = vmatprep.mubr.msk.bf16.mxu1 %vm338_vm0, %v5994_v15  ;;  %v6002_v15 = vsel %vm3793_vm5, %v5997_v36, %v17725_v25  ;;  %v8014_v36 = vld [vmem:[#allocation3 + $0x1e0] sm:$0xff]  ;;  %v8027_v25 = vld [vmem:[#allocation3 + $0x248] sm:$0xff] }
 0x5a8   :  { %6232 = vmatmul.mubr.bf16.vlgmr.msra.gmra.mrb[0].mxu1 %v5991_v5  ;;  %v15530_v5 = vld [vmem:[#allocation3 + $0x218] sm:$0xff] }
 0x5a9   :  { %6714 = vmatpush1.bf16.msra.mxu1 %v11362_v1  ;;  %10132 = vmatprep.mubr.msk.bf16.mxu1 %vm338_vm0, %v5998_v63  ;;  %v11376_v1 = vld [vmem:[%s16983_s7 + $0x184] ss:$8 sps:$4 sm:$0xff]   ;;  %v15532_v63 = vld [vmem:[#allocation3 + $0x228] sm:$0xff] }
 0x5aa   :  { %6715 = vmatprep.subr.bf16.mxu1 %v11367_v37  ;;  %v11379_v37 = vld [vmem:[%s16983_s7 + $0x194] ss:$8 sps:$4 sm:$0xff]  }
 0x5ad   :  { %6716 = vmatpush1.bf16.msra.mxu1 %v11365_v14  ;;  %v15544_v14 = vpack.c.bf16 %v15532_v63, %v15530_v5 }
 0x5ae   :  { %6717 = vmatprep.subr.bf16.mxu1 %v11370_v29  ;;  %v8016_v29 = vld [vmem:[#allocation3 + $0x1f0] sm:$0xff] }
 0x5b0   :  { %6242 = vmatmul.mubr.bf16.gmra.mrb[4].mxu1 %v15274_v44  ;;  %v15537_v44 = vld [vmem:[#allocation3 + $0x1d0] sm:$0xff] }
 0x5b1   :  { %10133 = vmatprep.mubr.msk.bf16.mxu1 %vm338_vm0, %v6002_v15  ;;  %6718 = vmatpush1.bf16.msra.mxu1 %v11368_v13  ;;  %v15548_v13 = vpack.c.bf16 %v15487_v49, %v15441_v42  ;;  %v8050_v15 = vpack.c.bf16 %v8014_v36, %v15537_v44 }
 0x5b2   :  { %6719 = vmatprep.subr.bf16.mxu1 %v11373_v54  ;;  %v15550_v54 = vld [vmem:[#allocation3 + $0x238] sm:$0xff] }
 0x5b3   :  { %v15563_v22 = vrot.slane %v8050_v15, 2  ;;  %v15567_v12 = vpack.c.bf16 %v8027_v25, %v15550_v54  ;;  %v11385_v15 = vld [vmem:[%s16983_s7 + $0x1b4] ss:$8 sps:$4 sm:$0xff]  }
 0x5b5   :  { %6720 = vmatpush1.bf16.msra.mxu1 %v11371_v59  ;;  %v11377_v59 = vld [vmem:[%s16983_s7 + $0x190] ss:$8 sps:$4 sm:$0xff]   ;;  %17726 = vst [vmem:[#allocation62_spill] sm:$0xff] %v15563_v22  ;;  %v17211_v19 = vrot.slane %v15567_v12, 2 }
 0x5b6   :  { %6721 = vmatprep.subr.bf16.mxu1 %v11376_v1  ;;  %v8052_v1 = vpack.c.bf16 %v15406_v33, %v8016_v29  ;;  %v11380_v33 = vld [vmem:[%s16983_s7 + $0x1a0] ss:$8 sps:$4 sm:$0xff]  }
 0x5b8   :  { %6252 = vmatmul.mubr.bf16.gmra.mrb[8].mxu1 %v15299_v50  ;;  %v17212_v50 = vrot.slane %v15544_v14, 2 }
 0x5b9   :  { %10134 = vmatprep.mubr.msk.bf16.mxu1 %vm338_vm0, %v15306_v55  ;;  %6722 = vmatpush1.bf16.msra.mxu1 %v11374_v20  ;;  %v8147_v55 = vrot.slane %v8052_v1, 2  ;;  %v17210_v20 = vrot.slane %v15548_v13, 2  ;;  %v17730_v1 = vrot.slane %v15118_v3, 1  ;;  %v11386_v3 = vld [vmem:[%s16983_s7 + $0x1c0] ss:$8 sps:$4 sm:$0xff]  }
 0x5ba   :  { %6723 = vmatprep.subr.bf16.mxu1 %v11379_v37 }
 0x5bb   :  { %v15577_v37 = vsel %vm5601_vm7, %v15563_v22, %v8147_v55  ;;  %v15582_v25 = vsel %vm5601_vm7, %v8147_v55, %v17210_v20  ;;  %v11388_v55 = vld [vmem:[%s16983_s7 + $0x1c4] ss:$8 sps:$4 sm:$0xff]   ;;  %v6007_v20 = vrot.slane %v15089_v35, 1 }
 0x5bc   :  { %17727 = vst [vmem:[#allocation24_spill] sm:$0xff] %v15577_v37  ;;  %17728 = vst [vmem:[#allocation25_spill] sm:$0xff] %v15582_v25  ;;  %v6010_v37 = vsel %vm3793_vm5, %v17730_v1, %v6009_v7 }
 0x5bd   :  { %6724 = vmatpush1.bf16.msra.mxu1 %v11377_v59  ;;  %v15592_v59 = vsel %vm5601_vm7, %v17212_v50, %v17211_v19  ;;  %v8576_v19 = vld [vmem:[#allocation3 + $0x1d0] sm:$0xff] }
 0x5be   :  { %6725 = vmatprep.subr.bf16.mxu1 %v11382_v32  ;;  %17729 = vst [vmem:[#allocation22_spill] sm:$0xff] %v15592_v59  ;;  %v11383_v32 = vld [vmem:[%s16983_s7 + $0x1b0] ss:$8 sps:$4 sm:$0xff]   ;;  %v8616_v50 = vpack.c.bf16 %v8014_v36, %v8576_v19 }
 0x5c0   :  { %6262 = vmatmul.mubr.bf16.gmra.mrb[12].mxu1 %v15314_v38  ;;  %v6013_v38 = vrot.slane %v15177_v58, 1  ;;  %v15621_v22 = vrot.slane %v8616_v50, 3  ;;  %v8721_v50 = vrot.slane %v15567_v12, 3 }
 0x5c1   :  { %10135 = vmatprep.mubr.msk.bf16.mxu1 %vm338_vm0, %v6010_v37  ;;  %6726 = vmatpush1.bf16.msra.mxu1 %v11380_v33  ;;  %v8582_v33 = vld [vmem:[#allocation3 + $0x200] sm:$0xff] }
 0x5c2   :  { %6727 = vmatprep.subr.bf16.mxu1 %v11385_v15  ;;  %v11391_v37 = vld [vmem:[%s16983_s7 + $0x1d4] ss:$8 sps:$4 sm:$0xff]   ;;  %v17731_v15 = vrot.slane %v15079_v41, 1  ;;  %v6014_v59 = vsel %vm3793_vm5, %v6009_v7, %v6013_v38  ;;  %v8618_v25 = vpack.c.bf16 %v8582_v33, %v8016_v29  ;;  %v11394_v41 = vld [vmem:[%s16983_s7 + $0x1e4] ss:$8 sps:$4 sm:$0xff]   ;;  %v6011_v7 = vrot.slane %v15109_v39, 1 }
 0x5c3   :  { %v6017_v29 = vrot.slane %v15238_v43, 1 }
 0x5c4   :  { %v6008_v1 = vsel %vm3793_vm5, %v17731_v15, %v6007_v20  ;;  %v15626_v19 = vrot.slane %v8618_v25, 3  ;;  %v6012_v25 = vsel %vm3793_vm5, %v6007_v20, %v6011_v7  ;;  %v6021_v15 = vrot.slane %v15281_v34, 1 }
 0x5c5   :  { %6728 = vmatpush1.bf16.msra.mxu1 %v11383_v32  ;;  %v8585_v32 = vld [vmem:[#allocation3 + $0x218] sm:$0xff]  ;;  %v6018_v33 = vsel %vm3793_vm5, %v6013_v38, %v6017_v29 }
 0x5c6   :  { %6729 = vmatprep.subr.bf16.mxu1 %v11388_v55  ;;  %v11389_v55 = vld [vmem:[%s16983_s7 + $0x1d0] ss:$8 sps:$4 sm:$0xff]   ;;  %v8621_v36 = vpack.c.bf16 %v15532_v63, %v8585_v32  ;;  %v6022_v20 = vsel %vm3793_vm5, %v6017_v29, %v6021_v15  ;;  %v6019_v32 = vrot.slane %v15155_v16, 1 }
 0x5c8   :  { %6272 = vmatmul.mubr.bf16.gmra.mrb[16].mxu1 %v6008_v1 }
 0x5c9   :  { %10136 = vmatprep.mubr.msk.bf16.mxu1 %vm338_vm0, %v6014_v59  ;;  %6730 = vmatpush1.bf16.msra.mxu1 %v11386_v3  ;;  %v15634_v59 = vsel %vm1108_vm1, %v15621_v22, %v15626_v19  ;;  %v15637_v3 = vrot.slane %v8621_v36, 3  ;;  %v6023_v36 = vrot.slane %v15179_v4, 1 }
 0x5ca   :  { %6731 = vmatprep.subr.bf16.mxu1 %v11391_v37  ;;  %v6015_v37 = vrot.slane %v15126_v6, 1 }
 0x5cb   :  { %v15644_v63 = vsel %vm1108_vm1, %v15637_v3, %v8721_v50 }
 0x5cc   :  { %v6016_v1 = vsel %vm3793_vm5, %v6011_v7, %v6015_v37  ;;  %v6029_v7 = vrot.slane %v15332_v26, 1 }
 0x5cd   :  { %6732 = vmatpush1.bf16.msra.mxu1 %v11389_v55  ;;  %v6025_v55 = vrot.slane %v15319_v8, 1 }
 0x5ce   :  { %7183 = vmatprep.subr.bf16.mxu1 %v11394_v41  ;;  %v6020_v41 = vsel %vm3793_vm5, %v6015_v37, %v6019_v32  ;;  %v17732_v37 = vrot.slane %v15195_v48, 1 }
 0x5cf   :  { %v6026_v38 = vsel %vm3793_vm5, %v6021_v15, %v6025_v55  ;;  %v6030_v29 = vsel %vm3793_vm5, %v6025_v55, %v6029_v7  ;;  %v6371_v55 = vld [vmem:[#allocation3 + $0x48] sm:$0xc0] }
 0x5d0   :  { %6282 = vmatmul.mubr.bf16.gmra.mrb[20].mxu1 %v6012_v25  ;;  %v6024_v25 = vsel %vm3793_vm5, %v6019_v32, %v6023_v36 }
 0x5d1   :  { %10137 = vmatprep.mubr.msk.bf16.mxu1 %vm338_vm0, %v6018_v33  ;;  %v6033_v33 = vrot.slane %v15340_v30, 1 }
 0x5d3   :  { %v6034_v15 = vsel %vm3793_vm5, %v6029_v7, %v6033_v33 }
 0x5d8   :  { %6292 = vmatmul.mubr.bf16.gmra.mrb[24].mxu1 %v6016_v1  ;;  %v6028_v1 = vsel %vm3793_vm5, %v6023_v36, %v17732_v37 }
 0x5d9   :  { %10138 = vmatprep.mubr.msk.bf16.mxu1 %vm338_vm0, %v6022_v20  ;;  %v17733_v20 = vrot.slane %v15354_v46, 1 }
 0x5db   :  { %v6038_v32 = vsel %vm3793_vm5, %v6033_v33, %v17733_v20  ;;  %v15681_v33 = vld [vmem:[#allocation3 + $0x98] sm:$0xff]  ;;  %v15691_v20 = vld [vmem:[#allocation3 + $0x90] sm:$0xff] }
 0x5dc   :  { %v6431_v37 = vpack.c.bf16 %v15681_v33, %v15452_v0 }
 0x5e0   :  { %6302 = vmatmul.mubr.bf16.gmra.mrb[28].mxu1 %v6020_v41  ;;  %v6373_v41 = vld [vmem:[#allocation3 + $0x58] sm:$0xff] }
 0x5e1   :  { %10139 = vmatprep.mubr.msk.bf16.mxu1 %vm338_vm0, %v6026_v38  ;;  %v6375_v38 = vld [vmem:[#allocation3 + $0x68] sm:$0xff]  ;;  %v6427_v36 = vpack.c.bf16 %v6373_v41, %v6371_v55  ;;  %v6430_v41 = vpack.c.bf16 %v15691_v20, %v15454_v21 }
 0x5e2   :  { %v6429_v7 = vpack.c.bf16 %v15443_v40, %v6375_v38 }
 0x5e8   :  { %6312 = vmatmul.mubr.bf16.gmra.mrb[32].mxu1 %v6024_v25  ;;  %v6507_v25 = vrot.slane %v6429_v7, 3  ;;  %v11400_v7 = vld [vmem:[%s16983_s7 + $0x204] ss:$8 sps:$4 sm:$0xff]  }
 0x5e9   :  { %10140 = vmatprep.mubr.msk.bf16.mxu1 %vm338_vm0, %v6030_v29  ;;  %v6370_v29 = vld [vmem:[#allocation3 + $0x40] sm:$0xc0] }
 0x5f0   :  { %6322 = vmatmul.mubr.bf16.gmra.mrb[36].mxu1 %v6028_v1 }
 0x5f1   :  { %10141 = vmatprep.mubr.msk.bf16.mxu1 %vm338_vm0, %v6034_v15  ;;  %v6511_v15 = vrot.slane %v6431_v37, 3  ;;  %v11406_v37 = vld [vmem:[%s16983_s7 + $0x224] ss:$8 sps:$4 sm:$0xff]  }
 0x5f3   :  { %v6512_v38 = vsel %vm1108_vm1, %v6507_v25, %v6511_v15 }
 0x5f8   :  { %6332 = vmatmul.mubr.bf16.gmra.mrb[40].mxu1 %v15347_v57  ;;  %v6506_v57 = vrot.slane %v6427_v36, 3  ;;  %v11395_v36 = vld [vmem:[%s16983_s7 + $0x1f0] ss:$8 sps:$4 sm:$0xff]  }
 0x5f9   :  { %10142 = vmatprep.mubr.msk.bf16.mxu1 %vm338_vm0, %v6038_v32  ;;  %v11392_v32 = vld [vmem:[%s16983_s7 + $0x1e0] ss:$8 sps:$4 sm:$0xff]  }
 0x600   :  { %6342 = vmatmul.mubr.bf16.gmra.mrb[44].mxu1 %v15359_v28  ;;  %v6426_v28 = vpack.c.bf16 %v15487_v49, %v6370_v29  ;;  %v6515_v29 = vrot.slane %v15150_v47, 3  ;;  %v11401_v47 = vld [vmem:[%s16983_s7 + $0x210] ss:$8 sps:$4 sm:$0xff]  }
 0x601   :  { %10143 = vmatprep.mubr.msk.bf16.mxu1 %vm338_vm0, %v15398_v17  ;;  %v6428_v17 = vpack.c.bf16 %v15445_v23, %v15487_v49 }
 0x603   :  { %v6504_v1 = vrot.slane %v6428_v17, 3 }
 0x608   :  { %6352 = vmatmul.mubr.bf16.gmra.mrb[48].mxu1 %v15404_v2  ;;  %v6508_v2 = vsel %vm1108_vm1, %v6506_v57, %v6507_v25  ;;  %v6509_v57 = vrot.slane %v6430_v41, 3  ;;  %v11398_v25 = vld [vmem:[%s16983_s7 + $0x200] ss:$8 sps:$4 sm:$0xff]   ;;  %v6517_v41 = vrot.slane %v15109_v39, 3  ;;  %v11413_v39 = vld [vmem:[%s16983_s7 + $0x250] ss:$8 sps:$4 sm:$0xff]  }
 0x609   :  { %10144 = vmatprep.mubr.msk.bf16.mxu1 %vm338_vm0, %v15382_v11  ;;  %v6503_v11 = vrot.slane %v6426_v28, 3  ;;  %v11403_v28 = vld [vmem:[%s16983_s7 + $0x214] ss:$8 sps:$4 sm:$0xff]  }
 0x60a   :  { %v6510_v17 = vsel %vm1108_vm1, %v6504_v1, %v6509_v57 }
 0x60b   :  { %v6505_v55 = vsel %vm1108_vm1, %v6503_v11, %v6504_v1  ;;  %v6519_v11 = vrot.slane %v15177_v58, 3  ;;  %v11404_v1 = vld [vmem:[%s16983_s7 + $0x220] ss:$8 sps:$4 sm:$0xff]   ;;  %v11412_v58 = vld [vmem:[%s16983_s7 + $0x244] ss:$8 sps:$4 sm:$0xff]  }
 0x610   :  { %6362 = vmatmul.mubr.bf16.gmra.mrb[52].mxu1 %v15387_v61  ;;  %v11397_v61 = vld [vmem:[%s16983_s7 + $0x1f4] ss:$8 sps:$4 sm:$0xff]  }
 0x611   :  { %10185 = vmatprep.mubr.msk.bf16.mxu1 %vm338_vm0, %v6508_v2  ;;  %v6516_v2 = vsel %vm1108_vm1, %v6511_v15, %v6515_v29  ;;  %v11409_v15 = vld [vmem:[%s16983_s7 + $0x234] ss:$8 sps:$4 sm:$0xff]  }
 0x618   :  { %6746 = vmatmul.mubr.bf16.vlgmr.msra.gmra.mrb[0].mxu1 %v6505_v55  ;;  %v6520_v55 = vsel %vm1108_vm1, %v6515_v29, %v6519_v11 }
 0x619   :  { %7184 = vmatpush1.bf16.msra.mxu1 %v11392_v32  ;;  %10186 = vmatprep.mubr.msk.bf16.mxu1 %vm338_vm0, %v6512_v38  ;;  %v6513_v32 = vrot.slane %v15089_v35, 3  ;;  %v11407_v35 = vld [vmem:[%s16983_s7 + $0x230] ss:$8 sps:$4 sm:$0xff]   ;;  %v6523_v38 = vrot.slane %v15238_v43, 3  ;;  %v11418_v43 = vld [vmem:[%s16983_s7 + $0x264] ss:$8 sps:$4 sm:$0xff]  }
 0x61a   :  { %7185 = vmatprep.subr.bf16.mxu1 %v11397_v61 }
 0x61b   :  { %v6514_v61 = vsel %vm1108_vm1, %v6509_v57, %v6513_v32  ;;  %v6518_v57 = vsel %vm1108_vm1, %v6513_v32, %v6517_v41  ;;  %v6524_v29 = vsel %vm1108_vm1, %v6519_v11, %v6523_v38  ;;  %v6525_v11 = vrot.slane %v15155_v16, 3 }
 0x61c   :  { %v6531_v32 = vrot.slane %v15319_v8, 3  ;;  %v6539_v8 = vrot.slane %v15340_v30, 3 }
 0x61d   :  { %7186 = vmatpush1.bf16.msra.mxu1 %v11395_v36  ;;  %v11410_v36 = vld [vmem:[%s16983_s7 + $0x240] ss:$8 sps:$4 sm:$0xff]  }
 0x61e   :  { %7187 = vmatprep.subr.bf16.mxu1 %v11400_v7  ;;  %v11415_v7 = vld [vmem:[%s16983_s7 + $0x254] ss:$8 sps:$4 sm:$0xff]  }
 0x620   :  { %6756 = vmatmul.mubr.bf16.gmra.mrb[4].mxu1 %v6510_v17  ;;  %v11416_v17 = vld [vmem:[%s16983_s7 + $0x260] ss:$8 sps:$4 sm:$0xff]  }
 0x621   :  { %10187 = vmatprep.mubr.msk.bf16.mxu1 %vm338_vm0, %v6516_v2  ;;  %7188 = vmatpush1.bf16.msra.mxu1 %v11398_v25  ;;  %v6521_v25 = vrot.slane %v15126_v6, 3  ;;  %v11421_v2 = vld [vmem:[%s16983_s7 + $0x274] ss:$8 sps:$4 sm:$0xff]   ;;  %v11419_v6 = vld [vmem:[%s16983_s7 + $0x270] ss:$8 sps:$4 sm:$0xff]  }
 0x622   :  { %7189 = vmatprep.subr.bf16.mxu1 %v11403_v28  ;;  %v6527_v28 = vrot.slane %v15281_v34, 3  ;;  %v11424_v34 = vld [vmem:[%s16983_s7 + $0x284] ss:$8 sps:$4 sm:$0xff]  }
 0x625   :  { %7190 = vmatpush1.bf16.msra.mxu1 %v11401_v47  ;;  %v6522_v47 = vsel %vm1108_vm1, %v6517_v41, %v6521_v25 }
 0x626   :  { %7191 = vmatprep.subr.bf16.mxu1 %v11406_v37  ;;  %v6528_v37 = vsel %vm1108_vm1, %v6523_v38, %v6527_v28 }
 0x628   :  { %6766 = vmatmul.mubr.bf16.gmra.mrb[8].mxu1 %v6514_v61  ;;  %v6529_v61 = vrot.slane %v15179_v4, 3  ;;  %v17735_v4 = vrot.slane %v15354_v46, 3 }
 0x629   :  { %10188 = vmatprep.mubr.msk.bf16.mxu1 %vm338_vm0, %v6520_v55  ;;  %7192 = vmatpush1.bf16.msra.mxu1 %v11404_v1  ;;  %v6526_v1 = vsel %vm1108_vm1, %v6521_v25, %v6525_v11  ;;  %v6535_v55 = vrot.slane %v15332_v26, 3  ;;  %v11434_v25 = vld [vmem:[%s16983_s7 + $0x2c0] ss:$8 sps:$4 sm:$0xff]  }
 0x62a   :  { %7193 = vmatprep.subr.bf16.mxu1 %v11409_v15  ;;  %v6532_v15 = vsel %vm1108_vm1, %v6527_v28, %v6531_v32  ;;  %v6544_v26 = vsel %vm1108_vm1, %v6539_v8, %v17735_v4  ;;  %v11446_v4 = vld [vmem:[%s16983_s7 + $0x300] ss:$8 sps:$4 sm:$0xff]  }
 0x62b   :  { %v6536_v16 = vsel %vm1108_vm1, %v6531_v32, %v6535_v55  ;;  %v6540_v38 = vsel %vm1108_vm1, %v6535_v55, %v6539_v8  ;;  %v6957_v32 = vld [vmem:[#allocation3 + $0x108] sm:$0xff]  ;;  %v6954_v8 = vld [vmem:[#allocation3 + $0xf0] sm:$0xff] }
 0x62d   :  { %7194 = vmatpush1.bf16.msra.mxu1 %v11407_v35  ;;  %v6530_v35 = vsel %vm1108_vm1, %v6525_v11, %v6529_v61  ;;  %v6955_v11 = vld [vmem:[#allocation3 + $0xf8] sm:$0xff] }
 0x62e   :  { %7195 = vmatprep.subr.bf16.mxu1 %v11412_v58  ;;  %v17734_v58 = vrot.slane %v15195_v48, 3  ;;  %v6425_v48 = vld [vmem:[#allocation3 + $0x1f8] sm:$0x3f]  ;;  %v15889_v55 = vpack.c.bf16 %v6957_v32, %v6955_v11 }
 0x62f   :  { %v6453_v30 = vpack.c.bf16 %v6425_v48, %v15481_v60  ;;  %v6947_v60 = vld [vmem:[#allocation3 + $0xb8] sm:$0xff]  ;;  %v11451_v48 = vld [vmem:[%s16983_s7 + $0x314] ss:$8 sps:$4 sm:$0xff]  }
 0x630   :  { %6776 = vmatmul.mubr.bf16.gmra.mrb[12].mxu1 %v6518_v57  ;;  %v6534_v41 = vsel %vm1108_vm1, %v6529_v61, %v17734_v58  ;;  %v6946_v57 = vld [vmem:[#allocation3 + $0xb0] sm:$0xff]  ;;  %v11445_v61 = vld [vmem:[%s16983_s7 + $0x2f4] ss:$8 sps:$4 sm:$0xff]  }
 0x631   :  { %10189 = vmatprep.mubr.msk.bf16.mxu1 %vm338_vm0, %v6524_v29  ;;  %7196 = vmatpush1.bf16.msra.mxu1 %v11410_v36  ;;  %v15859_v29 = vld [vmem:[#allocation3 + $0xc0] sm:$0xff] }
 0x632   :  { %7197 = vmatprep.subr.bf16.mxu1 %v11415_v7  ;;  %v11431_v7 = vld [vmem:[%s16983_s7 + $0x2b0] ss:$8 sps:$4 sm:$0xff]   ;;  %v15865_v28 = vpack.c.bf16 %v15859_v29, %v6946_v57 }
 0x633   :  { %v6956_v58 = vld [vmem:[#allocation3 + $0x100] sm:$0xff] }
 0x634   :  { %v6968_v57 = vld [vmem:[#allocation3 + $0x160] sm:$0xff] }
 0x635   :  { %7198 = vmatpush1.bf16.msra.mxu1 %v11413_v39  ;;  %v6951_v39 = vld [vmem:[#allocation3 + $0xd8] sm:$0xff] }
 0x636   :  { %7199 = vmatprep.subr.bf16.mxu1 %v11418_v43  ;;  %v6953_v43 = vld [vmem:[#allocation3 + $0xe8] sm:$0xff] }
 0x638   :  { %6786 = vmatmul.mubr.bf16.gmra.mrb[16].mxu1 %v6522_v47  ;;  %v11437_v47 = vld [vmem:[%s16983_s7 + $0x2d0] ss:$8 sps:$4 sm:$0xff]  }
 0x639   :  { %10190 = vmatprep.mubr.msk.bf16.mxu1 %vm338_vm0, %v6528_v37  ;;  %7200 = vmatpush1.bf16.msra.mxu1 %v11416_v17  ;;  %v11439_v17 = vld [vmem:[%s16983_s7 + $0x2d4] ss:$8 sps:$4 sm:$0xff]   ;;  %v11442_v37 = vld [vmem:[%s16983_s7 + $0x2e4] ss:$8 sps:$4 sm:$0xff]  }
 0x63a   :  { %7201 = vmatprep.subr.bf16.mxu1 %v11421_v2  ;;  %v15870_v2 = vpack.c.bf16 %v6953_v43, %v6951_v39  ;;  %v6971_v39 = vld [vmem:[#allocation3 + $0x178] sm:$0xff]  ;;  %v6973_v43 = vld [vmem:[#allocation3 + $0x188] sm:$0xff] }
 0x63d   :  { %7202 = vmatpush1.bf16.msra.mxu1 %v11419_v6  ;;  %v6950_v6 = vld [vmem:[#allocation3 + $0xd0] sm:$0xff] }
 0x63e   :  { %7751 = vmatprep.subr.bf16.mxu1 %v11424_v34  ;;  %v6952_v34 = vld [vmem:[#allocation3 + $0xe0] sm:$0xff] }
 0x640   :  { %6796 = vmatmul.mubr.bf16.gmra.mrb[20].mxu1 %v6526_v1  ;;  %v11440_v1 = vld [vmem:[%s16983_s7 + $0x2e0] ss:$8 sps:$4 sm:$0xff]  }
 0x641   :  { %10191 = vmatprep.mubr.msk.bf16.mxu1 %vm338_vm0, %v6532_v15  ;;  %v15884_v15 = vpack.c.bf16 %v6952_v34, %v6950_v6  ;;  %v6975_v6 = vld [vmem:[#allocation3 + $0x198] sm:$0xff]  ;;  %v6977_v34 = vld [vmem:[#allocation3 + $0x1a8] sm:$0xff] }
 0x642   :  { %v15942_v32 = vpack.c.bf16 %v6977_v34, %v6975_v6  ;;  %v11463_v6 = vld [vmem:[%s16983_s7 + $0x354] ss:$8 sps:$4 sm:$0xff]  }
 0x648   :  { %6806 = vmatmul.mubr.bf16.gmra.mrb[24].mxu1 %v6530_v35  ;;  %v11443_v35 = vld [vmem:[%s16983_s7 + $0x2f0] ss:$8 sps:$4 sm:$0xff]  }
 0x649   :  { %10192 = vmatprep.mubr.msk.bf16.mxu1 %vm338_vm0, %v6536_v16  ;;  %v11448_v16 = vld [vmem:[%s16983_s7 + $0x304] ss:$8 sps:$4 sm:$0xff]  }
 0x650   :  { %6816 = vmatmul.mubr.bf16.gmra.mrb[28].mxu1 %v6534_v41  ;;  %v6959_v41 = vld [vmem:[#allocation3 + $0x118] sm:$0xff] }
 0x651   :  { %10193 = vmatprep.mubr.msk.bf16.mxu1 %vm338_vm0, %v6540_v38  ;;  %v6961_v38 = vld [vmem:[#allocation3 + $0x128] sm:$0xff] }
 0x658   :  { %6826 = vmatmul.mubr.bf16.gmra.mrb[32].mxu1 %v15433_v56  ;;  %v6555_v56 = vrot.slane %v6453_v30, 3  ;;  %v15908_v30 = vpack.c.bf16 %v6961_v38, %v6959_v41  ;;  %v6978_v41 = vld [vmem:[#allocation3 + $0x1b0] sm:$0xff]  ;;  %v6980_v38 = vld [vmem:[#allocation3 + $0x1c0] sm:$0xff] }
 0x659   :  { %10194 = vmatprep.mubr.msk.bf16.mxu1 %vm338_vm0, %v6544_v26  ;;  %v15903_v26 = vpack.c.bf16 %v6956_v58, %v6954_v8 }
 0x65a   :  { %v6556_v46 = vsel %vm1108_vm1, %v15473_v51, %v6555_v56 }
 0x660   :  { %6836 = vmatmul.mubr.bf16.gmra.mrb[36].mxu1 %v15436_v52  ;;  %v17736_v52 = vpack.c.bf16 %v15452_v0, %v15443_v40  ;;  %v11425_v40 = vld [vmem:[%s16983_s7 + $0x290] ss:$8 sps:$4 sm:$0xff]   ;;  %v11430_v0 = vld [vmem:[%s16983_s7 + $0x2a4] ss:$8 sps:$4 sm:$0xff]  }
 0x661   :  { %10195 = vmatprep.mubr.msk.bf16.mxu1 %vm338_vm0, %v15471_v10  ;;  %v11427_v10 = vld [vmem:[%s16983_s7 + $0x294] ss:$8 sps:$4 sm:$0xff]  }
 0x668   :  { %6846 = vmatmul.mubr.bf16.gmra.mrb[40].mxu1 %v15439_v62  ;;  %v15816_v62 = vld [vmem:[#allocation3 + $0xa8] sm:$0xff] }
 0x669   :  { %10196 = vmatprep.mubr.msk.bf16.mxu1 %vm338_vm0, %v15479_v53  ;;  %v6995_v51 = vpack.c.bf16 %v15816_v62, %v15681_v33  ;;  %v15836_v53 = vld [vmem:[#allocation3 + $0xa0] sm:$0xff] }
 0x66a   :  { %v11433_v33 = vld [vmem:[%s16983_s7 + $0x2b4] ss:$8 sps:$4 sm:$0xff]  }
 0x670   :  { %6856 = vmatmul.mubr.bf16.gmra.mrb[44].mxu1 %v15448_v9  ;;  %v11422_v9 = vld [vmem:[%s16983_s7 + $0x280] ss:$8 sps:$4 sm:$0xff]  }
 0x671   :  { %10197 = vmatprep.mubr.msk.bf16.mxu1 %vm338_vm0, %v6556_v46  ;;  %v11454_v46 = vld [vmem:[%s16983_s7 + $0x324] ss:$8 sps:$4 sm:$0xff]  }
 0x678   :  { %6866 = vmatmul.mubr.bf16.gmra.mrb[48].mxu1 %v15485_v18  ;;  %v15838_v18 = vld [vmem:[#allocation3 + $0xc8] sm:$0xff] }
 0x679   :  { %10198 = vmatprep.mubr.msk.bf16.mxu1 %vm338_vm0, %v6555_v56  ;;  %v15849_v36 = vpack.c.bf16 %v15838_v18, %v6947_v60  ;;  %v11449_v56 = vld [vmem:[%s16983_s7 + $0x310] ss:$8 sps:$4 sm:$0xff]  }
 0x67a   :  { %v6964_v60 = vld [vmem:[#allocation3 + $0x140] sm:$0xff] }
 0x680   :  { %6876 = vmatmul.mubr.bf16.gmra.mrb[52].mxu1 %v15475_v27  ;;  %v17737_v27 = vpack.c.bf16 %v15454_v21, %v15445_v23  ;;  %v11428_v23 = vld [vmem:[%s16983_s7 + $0x2a0] ss:$8 sps:$4 sm:$0xff]   ;;  %v6994_v21 = vpack.c.bf16 %v15836_v53, %v15691_v20  ;;  %v11436_v20 = vld [vmem:[%s16983_s7 + $0x2c4] ss:$8 sps:$4 sm:$0xff]  }
 0x681   :  { %10239 = vmatprep.mubr.msk.bf16.mxu1 %vm338_vm0, %v17736_v52  ;;  %v6958_v52 = vld [vmem:[#allocation3 + $0x110] sm:$0xff] }
 0x688   :  { %7216 = vmatmul.mubr.bf16.vlgmr.msra.gmra.mrb[0].mxu1 %v17737_v27 }
 0x689   :  { %7752 = vmatpush1.bf16.msra.mxu1 %v11422_v9  ;;  %10240 = vmatprep.mubr.msk.bf16.mxu1 %vm338_vm0, %v6995_v51  ;;  %v6960_v9 = vld [vmem:[#allocation3 + $0x120] sm:$0xff]  ;;  %v6965_v51 = vld [vmem:[#allocation3 + $0x148] sm:$0xff] }
 0x68a   :  { %7753 = vmatprep.subr.bf16.mxu1 %v11427_v10  ;;  %v6963_v10 = vld [vmem:[#allocation3 + $0x138] sm:$0xff]  ;;  %v15919_v27 = vpack.c.bf16 %v6960_v9, %v6958_v52 }
 0x68b   :  { %v7409_v9 = vld [vmem:[#allocation3 + $0x98] sm:$0xfc] }
 0x68d   :  { %7754 = vmatpush1.bf16.msra.mxu1 %v11425_v40  ;;  %v15921_v40 = vpack.c.bf16 %v6965_v51, %v6963_v10  ;;  %v7019_v10 = vpack.c.bf16 %v15530_v5, %v15530_v5  ;;  %v7465_v51 = vpack.c.bf16 %v15816_v62, %v7409_v9  ;;  %v7549_v62 = vrot.slane %v15870_v2, 1 }
 0x68e   :  { %7755 = vmatprep.subr.bf16.mxu1 %v11430_v0  ;;  %v6962_v0 = vld [vmem:[#allocation3 + $0x130] sm:$0xff] }
 0x690   :  { %7226 = vmatmul.mubr.bf16.gmra.mrb[4].mxu1 %v6994_v21  ;;  %v6969_v21 = vld [vmem:[#allocation3 + $0x168] sm:$0xff] }
 0x691   :  { %10241 = vmatprep.mubr.msk.bf16.mxu1 %vm338_vm0, %v15849_v36  ;;  %7756 = vmatpush1.bf16.msra.mxu1 %v11428_v23  ;;  %v6967_v23 = vld [vmem:[#allocation3 + $0x158] sm:$0xff] }
 0x692   :  { %7757 = vmatprep.subr.bf16.mxu1 %v11433_v33  ;;  %v15926_v33 = vpack.c.bf16 %v6964_v60, %v6962_v0  ;;  %v7544_v0 = vrot.slane %v7465_v51, 1  ;;  %v7018_v60 = vpack.c.bf16 %v15441_v42, %v15441_v42  ;;  %v11457_v42 = vld [vmem:[%s16983_s7 + $0x334] ss:$8 sps:$4 sm:$0xff]   ;;  %v11472_v51 = vld [vmem:[%s16983_s7 + $0x384] ss:$8 sps:$4 sm:$0xff]  }
 0x695   :  { %7758 = vmatpush1.bf16.msra.mxu1 %v11431_v7  ;;  %v15928_v7 = vpack.c.bf16 %v6969_v21, %v6967_v23 }
 0x696   :  { %7759 = vmatprep.subr.bf16.mxu1 %v11436_v20  ;;  %v6966_v20 = vld [vmem:[#allocation3 + $0x150] sm:$0xff] }
 0x698   :  { %7236 = vmatmul.mubr.bf16.gmra.mrb[8].mxu1 %v15865_v28 }
 0x699   :  { %10242 = vmatprep.mubr.msk.bf16.mxu1 %vm338_vm0, %v15870_v2  ;;  %7760 = vmatpush1.bf16.msra.mxu1 %v11434_v25  ;;  %v15933_v25 = vpack.c.bf16 %v6968_v57, %v6966_v20  ;;  %v7542_v20 = vrot.slane %v15865_v28, 1  ;;  %v11455_v28 = vld [vmem:[%s16983_s7 + $0x330] ss:$8 sps:$4 sm:$0xff]  }
 0x69a   :  { %7761 = vmatprep.subr.bf16.mxu1 %v11439_v17  ;;  %v15935_v17 = vpack.c.bf16 %v6973_v43, %v6971_v39  ;;  %v11460_v39 = vld [vmem:[%s16983_s7 + $0x344] ss:$8 sps:$4 sm:$0xff]   ;;  %v7547_v43 = vrot.slane %v15884_v15, 1 }
 0x69c   :  { %v7548_v34 = vsel %vm3793_vm5, %v7542_v20, %v7547_v43 }
 0x69d   :  { %7762 = vmatpush1.bf16.msra.mxu1 %v11437_v47  ;;  %v6970_v47 = vld [vmem:[#allocation3 + $0x170] sm:$0xff] }
 0x69e   :  { %7763 = vmatprep.subr.bf16.mxu1 %v11442_v37  ;;  %v6972_v37 = vld [vmem:[#allocation3 + $0x180] sm:$0xff] }
 0x69f   :  { %v15940_v11 = vpack.c.bf16 %v6972_v37, %v6970_v47  ;;  %v7553_v47 = vrot.slane %v15889_v55, 1  ;;  %v11458_v37 = vld [vmem:[%s16983_s7 + $0x340] ss:$8 sps:$4 sm:$0xff]  }
 0x6a0   :  { %7246 = vmatmul.mubr.bf16.gmra.mrb[12].mxu1 %v15884_v15 }
 0x6a1   :  { %10243 = vmatprep.mubr.msk.bf16.mxu1 %vm338_vm0, %v15889_v55  ;;  %7764 = vmatpush1.bf16.msra.mxu1 %v11440_v1  ;;  %v6974_v1 = vld [vmem:[#allocation3 + $0x190] sm:$0xff] }
 0x6a2   :  { %7765 = vmatprep.subr.bf16.mxu1 %v11445_v61  ;;  %v6976_v61 = vld [vmem:[#allocation3 + $0x1a0] sm:$0xff] }
 0x6a3   :  { %v15947_v8 = vpack.c.bf16 %v6976_v61, %v6974_v1  ;;  %v7554_v1 = vsel %vm3793_vm5, %v7549_v62, %v7553_v47  ;;  %v11461_v61 = vld [vmem:[%s16983_s7 + $0x350] ss:$8 sps:$4 sm:$0xff]  }
 0x6a5   :  { %7766 = vmatpush1.bf16.msra.mxu1 %v11443_v35  ;;  %v6979_v35 = vld [vmem:[#allocation3 + $0x1b8] sm:$0xff] }
 0x6a6   :  { %7767 = vmatprep.subr.bf16.mxu1 %v11448_v16  ;;  %v6981_v16 = vld [vmem:[#allocation3 + $0x1c8] sm:$0xff] }
 0x6a7   :  { %v15949_v58 = vpack.c.bf16 %v6981_v16, %v6979_v35  ;;  %v11466_v35 = vld [vmem:[%s16983_s7 + $0x364] ss:$8 sps:$4 sm:$0xff]   ;;  %v7551_v16 = vrot.slane %v15903_v26, 1 }
 0x6a8   :  { %7256 = vmatmul.mubr.bf16.gmra.mrb[16].mxu1 %v15903_v26 }
 0x6a9   :  { %10244 = vmatprep.mubr.msk.bf16.mxu1 %vm338_vm0, %v15908_v30  ;;  %7768 = vmatpush1.bf16.msra.mxu1 %v11446_v4  ;;  %v15954_v4 = vpack.c.bf16 %v6980_v38, %v6978_v41  ;;  %v7557_v41 = vrot.slane %v15908_v30, 1  ;;  %v11464_v38 = vld [vmem:[%s16983_s7 + $0x360] ss:$8 sps:$4 sm:$0xff]  }
 0x6aa   :  { %7769 = vmatprep.subr.bf16.mxu1 %v11451_v48  ;;  %v6987_v48 = vld [vmem:[#allocation3 + $0x1f8] sm:$0xff] }
 0x6ab   :  { %v7558_v9 = vsel %vm3793_vm5, %v7553_v47, %v7557_v41  ;;  %v7563_v47 = vrot.slane %v15933_v25, 1 }
 0x6ad   :  { %7770 = vmatpush1.bf16.msra.mxu1 %v11449_v56  ;;  %v6989_v56 = vld [vmem:[#allocation3 + $0x208] sm:$0xff] }
 0x6ae   :  { %8319 = vmatprep.subr.bf16.mxu1 %v11454_v46  ;;  %v15961_v46 = vpack.c.bf16 %v15400_v31, %v15537_v44  ;;  %v15963_v52 = vpack.c.bf16 %v6989_v56, %v6987_v48  ;;  %v7545_v31 = vrot.slane %v15849_v36, 1  ;;  %v7408_v44 = vld [vmem:[#allocation3 + $0x90] sm:$0xfc]  ;;  %v11469_v48 = vld [vmem:[%s16983_s7 + $0x374] ss:$8 sps:$4 sm:$0xff]   ;;  %v7552_v56 = vsel %vm3793_vm5, %v7547_v43, %v7551_v16 }
 0x6af   :  { %v7464_v23 = vpack.c.bf16 %v15836_v53, %v7408_v44  ;;  %v11452_v36 = vld [vmem:[%s16983_s7 + $0x320] ss:$8 sps:$4 sm:$0xff]   ;;  %v11484_v43 = vld [vmem:[%s16983_s7 + $0x3c4] ss:$8 sps:$4 sm:$0xff]  }
 0x6b0   :  { %7266 = vmatmul.mubr.bf16.gmra.mrb[20].mxu1 %v15919_v27  ;;  %v7546_v21 = vsel %vm3793_vm5, %v7544_v0, %v7545_v31  ;;  %v7550_v57 = vsel %vm3793_vm5, %v7545_v31, %v7549_v62  ;;  %v7555_v0 = vrot.slane %v15919_v27, 1  ;;  %v7561_v31 = vrot.slane %v15921_v40, 1  ;;  %v11470_v44 = vld [vmem:[%s16983_s7 + $0x380] ss:$8 sps:$4 sm:$0xff]  }
 0x6b1   :  { %10245 = vmatprep.mubr.msk.bf16.mxu1 %vm338_vm0, %v15921_v40  ;;  %v7541_v5 = vrot.slane %v7464_v23, 1  ;;  %v7559_v62 = vrot.slane %v15926_v33, 1 }
 0x6b2   :  { %v7556_v23 = vsel %vm3793_vm5, %v7551_v16, %v7555_v0 }
 0x6b3   :  { %v7543_v53 = vsel %vm3793_vm5, %v7541_v5, %v7542_v20  ;;  %v11473_v5 = vld [vmem:[%s16983_s7 + $0x390] ss:$8 sps:$4 sm:$0xff]   ;;  %v11478_v20 = vld [vmem:[%s16983_s7 + $0x3a4] ss:$8 sps:$4 sm:$0xff]  }
 0x6b8   :  { %7276 = vmatmul.mubr.bf16.gmra.mrb[24].mxu1 %v15926_v33 }
 0x6b9   :  { %10246 = vmatprep.mubr.msk.bf16.mxu1 %vm338_vm0, %v15928_v7 }
 0x6c0   :  { %7286 = vmatmul.mubr.bf16.gmra.mrb[28].mxu1 %v15933_v25 }
 0x6c1   :  { %10247 = vmatprep.mubr.msk.bf16.mxu1 %vm338_vm0, %v15935_v17 }
 0x6c8   :  { %7296 = vmatmul.mubr.bf16.gmra.mrb[32].mxu1 %v15940_v11 }
 0x6c9   :  { %10248 = vmatprep.mubr.msk.bf16.mxu1 %vm338_vm0, %v15942_v32 }
 0x6d0   :  { %7306 = vmatmul.mubr.bf16.gmra.mrb[36].mxu1 %v15947_v8 }
 0x6d1   :  { %10249 = vmatprep.mubr.msk.bf16.mxu1 %vm338_vm0, %v15949_v58 }
 0x6d8   :  { %7316 = vmatmul.mubr.bf16.gmra.mrb[40].mxu1 %v15954_v4 }
 0x6d9   :  { %10250 = vmatprep.mubr.msk.bf16.mxu1 %vm338_vm0, %v15492_v24 }
 0x6e0   :  { %7326 = vmatmul.mubr.bf16.gmra.mrb[44].mxu1 %v15961_v46 }
 0x6e1   :  { %10251 = vmatprep.mubr.msk.bf16.mxu1 %vm338_vm0, %v15963_v52 }
 0x6e8   :  { %7336 = vmatmul.mubr.bf16.gmra.mrb[48].mxu1 %v15420_v45 }
 0x6e9   :  { %10252 = vmatprep.mubr.msk.bf16.mxu1 %vm338_vm0, %v7019_v10  ;;  %v11467_v10 = vld [vmem:[%s16983_s7 + $0x370] ss:$8 sps:$4 sm:$0xff]  }
 0x6f0   :  { %7346 = vmatmul.mubr.bf16.gmra.mrb[52].mxu1 %v7018_v60  ;;  %v11475_v60 = vld [vmem:[%s16983_s7 + $0x394] ss:$8 sps:$4 sm:$0xff]  }
 0x6f1   :  { %10293 = vmatprep.mubr.msk.bf16.mxu1 %vm338_vm0, %v7546_v21  ;;  %v7562_v21 = vsel %vm3793_vm5, %v7557_v41, %v7561_v31  ;;  %v7571_v41 = vrot.slane %v15947_v8, 1 }
 0x6f8   :  { %7784 = vmatmul.mubr.bf16.vlgmr.msra.gmra.mrb[0].mxu1 %v7543_v53  ;;  %v11481_v53 = vld [vmem:[%s16983_s7 + $0x3b4] ss:$8 sps:$4 sm:$0xff]  }
 0x6f9   :  { %8320 = vmatpush1.bf16.msra.mxu1 %v11452_v36  ;;  %10294 = vmatprep.mubr.msk.bf16.mxu1 %vm338_vm0, %v7550_v57  ;;  %v7565_v36 = vrot.slane %v15928_v7, 1  ;;  %v7560_v57 = vsel %vm3793_vm5, %v7555_v0, %v7559_v62 }
 0x6fa   :  { %8321 = vmatprep.subr.bf16.mxu1 %v11457_v42  ;;  %v11476_v42 = vld [vmem:[%s16983_s7 + $0x3a0] ss:$8 sps:$4 sm:$0xff]  }
 0x6fd   :  { %8322 = vmatpush1.bf16.msra.mxu1 %v11455_v28  ;;  %v7566_v28 = vsel %vm3793_vm5, %v7561_v31, %v7565_v36  ;;  %v7579_v31 = vrot.slane %v15961_v46, 1 }
 0x6fe   :  { %8323 = vmatprep.subr.bf16.mxu1 %v11460_v39  ;;  %v11479_v39 = vld [vmem:[%s16983_s7 + $0x3b0] ss:$8 sps:$4 sm:$0xff]  }
 0x700   :  { %7794 = vmatmul.mubr.bf16.gmra.mrb[4].mxu1 %v7548_v34 }
 0x701   :  { %10295 = vmatprep.mubr.msk.bf16.mxu1 %vm338_vm0, %v7554_v1  ;;  %8324 = vmatpush1.bf16.msra.mxu1 %v11458_v37  ;;  %v7569_v37 = vrot.slane %v15935_v17, 1  ;;  %v7567_v1 = vrot.slane %v15940_v11, 1 }
 0x702   :  { %8325 = vmatprep.subr.bf16.mxu1 %v11463_v6  ;;  %v7564_v6 = vsel %vm3793_vm5, %v7559_v62, %v7563_v47 }
 0x703   :  { %v7570_v34 = vsel %vm3793_vm5, %v7565_v36, %v7569_v37  ;;  %v7587_v36 = vrot.slane %v15548_v13, 1 }
 0x705   :  { %8326 = vmatpush1.bf16.msra.mxu1 %v11461_v61  ;;  %v7573_v61 = vrot.slane %v15942_v32, 1 }
 0x706   :  { %8327 = vmatprep.subr.bf16.mxu1 %v11466_v35  ;;  %v7568_v35 = vsel %vm3793_vm5, %v7563_v47, %v7567_v1 }
 0x707   :  { %v7574_v16 = vsel %vm3793_vm5, %v7569_v37, %v7573_v61 }
 0x708   :  { %7804 = vmatmul.mubr.bf16.gmra.mrb[8].mxu1 %v7552_v56 }
 0x709   :  { %10296 = vmatprep.mubr.msk.bf16.mxu1 %vm338_vm0, %v7558_v9  ;;  %8328 = vmatpush1.bf16.msra.mxu1 %v11464_v38  ;;  %v7577_v38 = vrot.slane %v15949_v58, 1  ;;  %v7575_v9 = vrot.slane %v15954_v4, 1 }
 0x70a   :  { %8329 = vmatprep.subr.bf16.mxu1 %v11469_v48  ;;  %v7572_v48 = vsel %vm3793_vm5, %v7567_v1, %v7571_v41 }
 0x70b   :  { %v7578_v56 = vsel %vm3793_vm5, %v7573_v61, %v7577_v38 }
 0x70d   :  { %8330 = vmatpush1.bf16.msra.mxu1 %v11467_v10  ;;  %v7581_v10 = vrot.slane %v15492_v24, 1  ;;  %v7589_v24 = vrot.slane %v15544_v14, 1 }
 0x70e   :  { %8331 = vmatprep.subr.bf16.mxu1 %v11472_v51  ;;  %v7576_v51 = vsel %vm3793_vm5, %v7571_v41, %v7575_v9 }
 0x70f   :  { %v7582_v0 = vsel %vm3793_vm5, %v7577_v38, %v7581_v10  ;;  %v8115_v38 = vrot.slane %v15903_v26, 2  ;;  %v11491_v26 = vld [vmem:[%s16983_s7 + $0x3f0] ss:$8 sps:$4 sm:$0xff]  }
 0x710   :  { %7814 = vmatmul.mubr.bf16.gmra.mrb[12].mxu1 %v7556_v23 }
 0x711   :  { %10297 = vmatprep.mubr.msk.bf16.mxu1 %vm338_vm0, %v7562_v21  ;;  %8332 = vmatpush1.bf16.msra.mxu1 %v11470_v44  ;;  %v7585_v44 = vrot.slane %v15963_v52, 1  ;;  %v7583_v21 = vrot.slane %v15420_v45, 1 }
 0x712   :  { %8333 = vmatprep.subr.bf16.mxu1 %v11475_v60  ;;  %v7580_v60 = vsel %vm3793_vm5, %v7575_v9, %v7579_v31  ;;  %v11493_v9 = vld [vmem:[%s16983_s7 + $0x3f4] ss:$8 sps:$4 sm:$0xff]  }
 0x713   :  { %v7586_v23 = vsel %vm3793_vm5, %v7581_v10, %v7585_v44  ;;  %v7590_v62 = vsel %vm3793_vm5, %v7585_v44, %v7589_v24  ;;  %v11494_v44 = vld [vmem:[%s16983_s7 + $0x400] ss:$8 sps:$4 sm:$0xff]  }
 0x715   :  { %8334 = vmatpush1.bf16.msra.mxu1 %v11473_v5  ;;  %v7463_v5 = vld [vmem:[#allocation3 + $0x248] sm:$0x3] }
 0x716   :  { %8335 = vmatprep.subr.bf16.mxu1 %v11478_v20  ;;  %v7584_v20 = vsel %vm3793_vm5, %v7579_v31, %v7583_v21  ;;  %v7491_v46 = vpack.c.bf16 %v7463_v5, %v15550_v54  ;;  %v8125_v31 = vrot.slane %v15921_v40, 2  ;;  %v11502_v40 = vld [vmem:[%s16983_s7 + $0x424] ss:$8 sps:$4 sm:$0xff]   ;;  %v8129_v5 = vrot.slane %v15928_v7, 2 }
 0x717   :  { %v11508_v7 = vld [vmem:[%s16983_s7 + $0x444] ss:$8 sps:$4 sm:$0xff]  }
 0x718   :  { %7824 = vmatmul.mubr.bf16.gmra.mrb[16].mxu1 %v7560_v57  ;;  %v7588_v57 = vsel %vm3793_vm5, %v7583_v21, %v7587_v36  ;;  %v8123_v21 = vrot.slane %v15926_v33, 2  ;;  %v11503_v33 = vld [vmem:[%s16983_s7 + $0x430] ss:$8 sps:$4 sm:$0xff]  }
 0x719   :  { %10298 = vmatprep.mubr.msk.bf16.mxu1 %vm338_vm0, %v7566_v28  ;;  %8336 = vmatpush1.bf16.msra.mxu1 %v11476_v42  ;;  %v7593_v42 = vrot.slane %v7491_v46, 1 }
 0x71a   :  { %8337 = vmatprep.subr.bf16.mxu1 %v11481_v53  ;;  %v7462_v53 = vld [vmem:[#allocation3 + $0x240] sm:$0x3] }
 0x71b   :  { %v7490_v28 = vpack.c.bf16 %v7462_v53, %v15487_v49  ;;  %v7594_v45 = vsel %vm3793_vm5, %v7589_v24, %v7593_v42  ;;  %v8133_v53 = vrot.slane %v15935_v17, 2  ;;  %v8131_v17 = vrot.slane %v15940_v11, 2 }
 0x71d   :  { %8338 = vmatpush1.bf16.msra.mxu1 %v11479_v39  ;;  %v7591_v39 = vrot.slane %v7490_v28, 1  ;;  %v11511_v28 = vld [vmem:[%s16983_s7 + $0x454] ss:$8 sps:$4 sm:$0xff]  }
 0x71e   :  { %8887 = vmatprep.subr.bf16.mxu1 %v11484_v43  ;;  %v7977_v43 = vld [vmem:[#allocation3 + $0xb8] sm:$0xf0] }
 0x71f   :  { %v7592_v47 = vsel %vm3793_vm5, %v7587_v36, %v7591_v39  ;;  %v8033_v54 = vpack.c.bf16 %v15838_v18, %v7977_v43  ;;  %v11482_v18 = vld [vmem:[%s16983_s7 + $0x3c0] ss:$8 sps:$4 sm:$0xff]   ;;  %v8130_v36 = vsel %vm5601_vm7, %v8125_v31, %v8129_v5  ;;  %v8137_v43 = vrot.slane %v15942_v32, 2 }
 0x720   :  { %7834 = vmatmul.mubr.bf16.gmra.mrb[20].mxu1 %v7564_v6  ;;  %v8113_v6 = vrot.slane %v15870_v2, 2  ;;  %v11487_v2 = vld [vmem:[%s16983_s7 + $0x3d4] ss:$8 sps:$4 sm:$0xff]  }
 0x721   :  { %10299 = vmatprep.mubr.msk.bf16.mxu1 %vm338_vm0, %v7570_v34  ;;  %v8112_v37 = vrot.slane %v8033_v54, 2  ;;  %v7976_v34 = vld [vmem:[#allocation3 + $0xb0] sm:$0xf0]  ;;  %v8138_v54 = vsel %vm5601_vm7, %v8133_v53, %v8137_v43 }
 0x722   :  { %v8032_v49 = vpack.c.bf16 %v15859_v29, %v7976_v34  ;;  %v8013_v34 = vld [vmem:[#allocation3 + $0x1d8] sm:$0xff] }
 0x723   :  { %v8114_v1 = vsel %vm5601_vm7, %v8112_v37, %v8113_v6  ;;  %v8135_v37 = vrot.slane %v15947_v8, 2 }
 0x724   :  { %v8109_v61 = vrot.slane %v8032_v49, 2  ;;  %v8015_v49 = vld [vmem:[#allocation3 + $0x1e8] sm:$0xff] }
 0x725   :  { %v16198_v32 = vpack.c.bf16 %v8015_v49, %v8013_v34  ;;  %v8559_v34 = vld [vmem:[#allocation3 + $0x148] sm:$0xff] }
 0x728   :  { %7844 = vmatmul.mubr.bf16.gmra.mrb[24].mxu1 %v7568_v35  ;;  %v8110_v35 = vrot.slane %v15884_v15, 2  ;;  %v11485_v15 = vld [vmem:[%s16983_s7 + $0x3d0] ss:$8 sps:$4 sm:$0xff]  }
 0x729   :  { %10300 = vmatprep.mubr.msk.bf16.mxu1 %vm338_vm0, %v7574_v16  ;;  %v8117_v16 = vrot.slane %v15889_v55, 2  ;;  %v11490_v55 = vld [vmem:[%s16983_s7 + $0x3e4] ss:$8 sps:$4 sm:$0xff]  }
 0x72a   :  { %v8111_v29 = vsel %vm5601_vm7, %v8109_v61, %v8110_v35  ;;  %v8116_v10 = vsel %vm5601_vm7, %v8110_v35, %v8115_v38  ;;  %v8139_v61 = vrot.slane %v15954_v4, 2  ;;  %v8145_v35 = vrot.slane %v16198_v32, 2  ;;  %v17739_v4 = vld [vmem:[#allocation24_spill] sm:$0xff] }
 0x72b   :  { %v8118_v41 = vsel %vm5601_vm7, %v8113_v6, %v8117_v16  ;;  %v8141_v6 = vrot.slane %v15949_v58, 2  ;;  %v8149_v58 = vrot.slane %v15963_v52, 2 }
 0x72d   :  { %v8142_v11 = vsel %vm5601_vm7, %v8137_v43, %v8141_v6  ;;  %v8146_v8 = vsel %vm5601_vm7, %v8141_v6, %v8145_v35  ;;  %v8557_v6 = vld [vmem:[#allocation3 + $0x138] sm:$0xff] }
 0x730   :  { %7854 = vmatmul.mubr.bf16.gmra.mrb[28].mxu1 %v7572_v48  ;;  %v8121_v48 = vrot.slane %v15908_v30, 2  ;;  %v11496_v30 = vld [vmem:[%s16983_s7 + $0x404] ss:$8 sps:$4 sm:$0xff]  }
 0x731   :  { %10301 = vmatprep.mubr.msk.bf16.mxu1 %vm338_vm0, %v7578_v56  ;;  %v11488_v56 = vld [vmem:[%s16983_s7 + $0x3e0] ss:$8 sps:$4 sm:$0xff]  }
 0x732   :  { %v8126_v24 = vsel %vm5601_vm7, %v8121_v48, %v8125_v31 }
 0x738   :  { %7864 = vmatmul.mubr.bf16.gmra.mrb[32].mxu1 %v7576_v51  ;;  %v8122_v51 = vsel %vm5601_vm7, %v8117_v16, %v8121_v48  ;;  %v8140_v16 = vsel %vm5601_vm7, %v8135_v37, %v8139_v61  ;;  %v16219_v48 = vld [vmem:[#allocation2] sm:$0xff] }
 0x739   :  { %10302 = vmatprep.mubr.msk.bf16.mxu1 %vm338_vm0, %v7582_v0  ;;  %v8119_v0 = vrot.slane %v15919_v27, 2  ;;  %v11497_v27 = vld [vmem:[%s16983_s7 + $0x410] ss:$8 sps:$4 sm:$0xff]  }
 0x73b   :  { %v8124_v46 = vsel %vm5601_vm7, %v8119_v0, %v8123_v21 }
 0x740   :  { %7874 = vmatmul.mubr.bf16.gmra.mrb[36].mxu1 %v7580_v60  ;;  %v11499_v60 = vld [vmem:[%s16983_s7 + $0x414] ss:$8 sps:$4 sm:$0xff]  }
 0x741   :  { %10303 = vmatprep.mubr.msk.bf16.mxu1 %vm338_vm0, %v7586_v23  ;;  %v8120_v23 = vsel %vm5601_vm7, %v8115_v38, %v8119_v0  ;;  %v8031_v38 = vld [vmem:[#allocation3 + $0x268] sm:$0xf]  ;;  %v17743_v0 = vrot.slane %v15567_v12, 2 }
 0x748   :  { %7884 = vmatmul.mubr.bf16.gmra.mrb[40].mxu1 %v7584_v20  ;;  %v11500_v20 = vld [vmem:[%s16983_s7 + $0x420] ss:$8 sps:$4 sm:$0xff]  }
 0x749   :  { %10304 = vmatprep.mubr.msk.bf16.mxu1 %vm338_vm0, %v7590_v62  ;;  %v11505_v62 = vld [vmem:[%s16983_s7 + $0x434] ss:$8 sps:$4 sm:$0xff]  }
 0x750   :  { %7894 = vmatmul.mubr.bf16.gmra.mrb[44].mxu1 %v7588_v57  ;;  %v11506_v57 = vld [vmem:[%s16983_s7 + $0x440] ss:$8 sps:$4 sm:$0xff]  }
 0x751   :  { %10305 = vmatprep.mubr.msk.bf16.mxu1 %vm338_vm0, %v7594_v45 }
 0x758   :  { %7904 = vmatmul.mubr.bf16.gmra.mrb[48].mxu1 %v7592_v47 }
 0x759   :  { %10306 = vmatprep.mubr.msk.bf16.mxu1 %vm338_vm0, %v7593_v42  ;;  %v8127_v42 = vrot.slane %v15933_v25, 2  ;;  %v11509_v25 = vld [vmem:[%s16983_s7 + $0x450] ss:$8 sps:$4 sm:$0xff]  }
 0x75b   :  { %v8128_v45 = vsel %vm5601_vm7, %v8123_v21, %v8127_v42  ;;  %v8132_v47 = vsel %vm5601_vm7, %v8127_v42, %v8131_v17  ;;  %v8549_v21 = vld [vmem:[#allocation3 + $0xf8] sm:$0xff]  ;;  %v8550_v42 = vld [vmem:[#allocation3 + $0x100] sm:$0xff] }
 0x760   :  { %7914 = vmatmul.mubr.bf16.gmra.mrb[52].mxu1 %v7591_v39  ;;  %v8134_v39 = vsel %vm5601_vm7, %v8129_v5, %v8133_v53  ;;  %v8551_v5 = vld [vmem:[#allocation3 + $0x108] sm:$0xff]  ;;  %v8553_v53 = vld [vmem:[#allocation3 + $0x118] sm:$0xff] }
 0x761   :  { %10347 = vmatprep.mubr.msk.bf16.mxu1 %vm338_vm0, %v8114_v1  ;;  %v8136_v1 = vsel %vm5601_vm7, %v8131_v17, %v8135_v37  ;;  %v8554_v37 = vld [vmem:[#allocation3 + $0x120] sm:$0xff] }
 0x768   :  { %8352 = vmatmul.mubr.bf16.vlgmr.msra.gmra.mrb[0].mxu1 %v8111_v29  ;;  %v8150_v29 = vsel %vm5601_vm7, %v8145_v35, %v8149_v58 }
 0x769   :  { %8888 = vmatpush1.bf16.msra.mxu1 %v11482_v18  ;;  %10348 = vmatprep.mubr.msk.bf16.mxu1 %vm338_vm0, %v8118_v41  ;;  %v17738_v18 = vld [vmem:[#allocation62_spill] sm:$0xff]  ;;  %v17740_v41 = vrot.slane %v15544_v14, 2 }
 0x76a   :  { %8889 = vmatprep.subr.bf16.mxu1 %v11487_v2  ;;  %v8144_v2 = vsel %vm5601_vm7, %v8139_v61, %v17738_v18  ;;  %v8607_v61 = vpack.c.bf16 %v8559_v34, %v8557_v6  ;;  %v8561_v18 = vld [vmem:[#allocation3 + $0x158] sm:$0xff]  ;;  %v8709_v34 = vrot.slane %v16198_v32, 3  ;;  %v8584_v32 = vld [vmem:[#allocation3 + $0x210] sm:$0xff] }
 0x76d   :  { %8890 = vmatpush1.bf16.msra.mxu1 %v11485_v15  ;;  %v8154_v15 = vsel %vm5601_vm7, %v8149_v58, %v17740_v41  ;;  %v8558_v58 = vld [vmem:[#allocation3 + $0x140] sm:$0xff] }
 0x76e   :  { %8891 = vmatprep.subr.bf16.mxu1 %v11490_v55  ;;  %v16216_v55 = vld [vmem:[#allocation3 + $0x258] sm:$0xff] }
 0x76f   :  { %v8059_v52 = vpack.c.bf16 %v8031_v38, %v16216_v55 }
 0x770   :  { %8362 = vmatmul.mubr.bf16.gmra.mrb[4].mxu1 %v8116_v10  ;;  %v17742_v10 = vld [vmem:[#allocation22_spill] sm:$0xff] }
 0x771   :  { %10349 = vmatprep.mubr.msk.bf16.mxu1 %vm338_vm0, %v8122_v51  ;;  %8892 = vmatpush1.bf16.msra.mxu1 %v11488_v56  ;;  %v16223_v56 = vpack.c.bf16 %v16219_v48, %v16219_v48  ;;  %v8161_v14 = vrot.slane %v8059_v52, 2  ;;  %v8030_v51 = vld [vmem:[#allocation3 + $0x260] sm:$0xf] }
 0x772   :  { %8893 = vmatprep.subr.bf16.mxu1 %v11493_v9  ;;  %v17741_v9 = vld [vmem:[#allocation25_spill] sm:$0xff] }
 0x773   :  { %v8162_v31 = vsel %vm5601_vm7, %v17743_v0, %v8161_v14 }
 0x775   :  { %8894 = vmatpush1.bf16.msra.mxu1 %v11491_v26  ;;  %v8155_v26 = vrot.slane %v16223_v56, 2 }
 0x776   :  { %8895 = vmatprep.subr.bf16.mxu1 %v11496_v30  ;;  %v8058_v30 = vpack.c.bf16 %v8030_v51, %v16219_v48  ;;  %v8567_v51 = vld [vmem:[#allocation3 + $0x188] sm:$0xff] }
 0x778   :  { %8372 = vmatmul.mubr.bf16.gmra.mrb[8].mxu1 %v8120_v23  ;;  %v8159_v23 = vrot.slane %v8058_v30, 2 }
 0x779   :  { %10350 = vmatprep.mubr.msk.bf16.mxu1 %vm338_vm0, %v8126_v24  ;;  %8896 = vmatpush1.bf16.msra.mxu1 %v11494_v44  ;;  %v17744_v44 = vrot.slane %v15548_v13, 2  ;;  %v8545_v24 = vld [vmem:[#allocation3 + $0xd8] sm:$0xc0] }
 0x77a   :  { %8897 = vmatprep.subr.bf16.mxu1 %v11499_v60 }
 0x77b   :  { %v8156_v60 = vsel %vm5601_vm7, %v17744_v44, %v8155_v26 }
 0x77d   :  { %8898 = vmatpush1.bf16.msra.mxu1 %v11497_v27  ;;  %v8160_v27 = vsel %vm5601_vm7, %v8155_v26, %v8159_v23 }
 0x77e   :  { %8899 = vmatprep.subr.bf16.mxu1 %v11502_v40  ;;  %v8547_v40 = vld [vmem:[#allocation3 + $0xe8] sm:$0xff] }
 0x780   :  { %8382 = vmatmul.mubr.bf16.gmra.mrb[12].mxu1 %v8124_v46  ;;  %v8544_v46 = vld [vmem:[#allocation3 + $0xd0] sm:$0xc0] }
 0x781   :  { %10351 = vmatprep.mubr.msk.bf16.mxu1 %vm338_vm0, %v8130_v36  ;;  %8900 = vmatpush1.bf16.msra.mxu1 %v11500_v20  ;;  %v8601_v20 = vpack.c.bf16 %v8547_v40, %v8545_v24  ;;  %v8566_v24 = vld [vmem:[#allocation3 + $0x180] sm:$0xff]  ;;  %v8571_v40 = vld [vmem:[#allocation3 + $0x1a8] sm:$0xff] }
 0x782   :  { %8901 = vmatprep.subr.bf16.mxu1 %v11505_v62  ;;  %v8603_v62 = vpack.c.bf16 %v8551_v5, %v8549_v21 }
 0x783   :  { %v8680_v36 = vrot.slane %v8601_v20, 3 }
 0x784   :  { %v8681_v13 = vrot.slane %v8603_v62, 3 }
 0x785   :  { %8902 = vmatpush1.bf16.msra.mxu1 %v11503_v33  ;;  %v8546_v33 = vld [vmem:[#allocation3 + $0xe0] sm:$0xff] }
 0x786   :  { %8903 = vmatprep.subr.bf16.mxu1 %v11508_v7  ;;  %v8548_v7 = vld [vmem:[#allocation3 + $0xf0] sm:$0xff] }
 0x788   :  { %8392 = vmatmul.mubr.bf16.gmra.mrb[16].mxu1 %v8128_v45  ;;  %v8602_v45 = vpack.c.bf16 %v8550_v42, %v8548_v7  ;;  %v8573_v7 = vld [vmem:[#allocation3 + $0x1b8] sm:$0xff]  ;;  %v8575_v42 = vld [vmem:[#allocation3 + $0x1c8] sm:$0xff] }
 0x789   :  { %10352 = vmatprep.mubr.msk.bf16.mxu1 %vm338_vm0, %v8134_v39  ;;  %8904 = vmatpush1.bf16.msra.mxu1 %v11506_v57  ;;  %v8555_v57 = vld [vmem:[#allocation3 + $0x128] sm:$0xff]  ;;  %v8682_v39 = vsel %vm1108_vm1, %v8680_v36, %v8681_v13 }
 0x78a   :  { %8905 = vmatprep.subr.bf16.mxu1 %v11511_v28  ;;  %v8600_v28 = vpack.c.bf16 %v8546_v33, %v8544_v46  ;;  %v8678_v43 = vrot.slane %v8602_v45, 3  ;;  %v8570_v33 = vld [vmem:[#allocation3 + $0x1a0] sm:$0xff]  ;;  %v8615_v45 = vpack.c.bf16 %v8575_v42, %v8573_v7 }
 0x78c   :  { %v8677_v17 = vrot.slane %v8600_v28, 3 }
 0x78d   :  { %8906 = vmatpush1.bf16.msra.mxu1 %v11509_v25  ;;  %v8605_v25 = vpack.c.bf16 %v8555_v57, %v8553_v53 }
 0x78e   :  { %v8679_v49 = vsel %vm1108_vm1, %v8677_v17, %v8678_v43  ;;  %v8572_v17 = vld [vmem:[#allocation3 + $0x1b0] sm:$0xff] }
 0x790   :  { %8402 = vmatmul.mubr.bf16.gmra.mrb[20].mxu1 %v8132_v47  ;;  %v8685_v47 = vrot.slane %v8605_v25, 3  ;;  %v8705_v25 = vrot.slane %v8615_v45, 3 }
 0x791   :  { %10353 = vmatprep.mubr.msk.bf16.mxu1 %vm338_vm0, %v8138_v54  ;;  %v8552_v54 = vld [vmem:[#allocation3 + $0x110] sm:$0xff] }
 0x798   :  { %8412 = vmatmul.mubr.bf16.gmra.mrb[24].mxu1 %v8136_v1  ;;  %v8604_v1 = vpack.c.bf16 %v8554_v37, %v8552_v54 }
 0x799   :  { %10354 = vmatprep.mubr.msk.bf16.mxu1 %vm338_vm0, %v8142_v11  ;;  %v8686_v11 = vsel %vm1108_vm1, %v8681_v13, %v8685_v47  ;;  %v8568_v13 = vld [vmem:[#allocation3 + $0x190] sm:$0xff] }
 0x79a   :  { %v8683_v35 = vrot.slane %v8604_v1, 3  ;;  %v8612_v57 = vpack.c.bf16 %v8570_v33, %v8568_v13  ;;  %v8583_v1 = vld [vmem:[#allocation3 + $0x208] sm:$0xff] }
 0x7a0   :  { %8422 = vmatmul.mubr.bf16.gmra.mrb[28].mxu1 %v8140_v16  ;;  %v8689_v16 = vrot.slane %v8607_v61, 3  ;;  %v8710_v61 = vsel %vm1108_vm1, %v8705_v25, %v8709_v34 }
 0x7a1   :  { %10355 = vmatprep.mubr.msk.bf16.mxu1 %vm338_vm0, %v8146_v8  ;;  %v8556_v8 = vld [vmem:[#allocation3 + $0x130] sm:$0xff] }
 0x7a2   :  { %v8690_v41 = vsel %vm1108_vm1, %v8685_v47, %v8689_v16 }
 0x7a8   :  { %8432 = vmatmul.mubr.bf16.gmra.mrb[32].mxu1 %v8144_v2  ;;  %v8563_v2 = vld [vmem:[#allocation3 + $0x168] sm:$0xff] }
 0x7a9   :  { %10356 = vmatprep.mubr.msk.bf16.mxu1 %vm338_vm0, %v8150_v29  ;;  %v8684_v29 = vsel %vm1108_vm1, %v8678_v43, %v8683_v35  ;;  %v8574_v43 = vld [vmem:[#allocation3 + $0x1c0] sm:$0xff] }
 0x7aa   :  { %v8614_v54 = vpack.c.bf16 %v8574_v43, %v8572_v17 }
 0x7ac   :  { %v8703_v6 = vrot.slane %v8614_v54, 3 }
 0x7b0   :  { %8442 = vmatmul.mubr.bf16.gmra.mrb[36].mxu1 %v17739_v4  ;;  %v8606_v4 = vpack.c.bf16 %v8558_v58, %v8556_v8  ;;  %v8708_v8 = vsel %vm1108_vm1, %v8703_v6, %v15621_v22 }
 0x7b1   :  { %10357 = vmatprep.mubr.msk.bf16.mxu1 %vm338_vm0, %v8154_v15  ;;  %v8609_v15 = vpack.c.bf16 %v8563_v2, %v8561_v18  ;;  %v8620_v18 = vpack.c.bf16 %v16219_v48, %v8584_v32 }
 0x7b2   :  { %v8687_v38 = vrot.slane %v8606_v4, 3  ;;  %v8595_v4 = vld [vmem:[#allocation3 + $0x268] sm:$0xff] }
 0x7b3   :  { %v8693_v52 = vrot.slane %v8609_v15, 3 }
 0x7b4   :  { %v8688_v26 = vsel %vm1108_vm1, %v8683_v35, %v8687_v38 }
 0x7b5   :  { %v8694_v0 = vsel %vm1108_vm1, %v8689_v16, %v8693_v52 }
 0x7b8   :  { %8452 = vmatmul.mubr.bf16.gmra.mrb[40].mxu1 %v17741_v9  ;;  %v8560_v9 = vld [vmem:[#allocation3 + $0x150] sm:$0xff] }
 0x7b9   :  { %10358 = vmatprep.mubr.msk.bf16.mxu1 %vm338_vm0, %v17742_v10  ;;  %v8562_v10 = vld [vmem:[#allocation3 + $0x160] sm:$0xff] }
 0x7ba   :  { %v8608_v30 = vpack.c.bf16 %v8562_v10, %v8560_v9 }
 0x7bc   :  { %v8691_v44 = vrot.slane %v8608_v30, 3 }
 0x7be   :  { %v8692_v21 = vsel %vm1108_vm1, %v8687_v38, %v8691_v44  ;;  %v8719_v38 = vrot.slane %v16223_v56, 3 }
 0x7c0   :  { %8462 = vmatmul.mubr.bf16.gmra.mrb[44].mxu1 %v8156_v60 }
 0x7c1   :  { %10359 = vmatprep.mubr.msk.bf16.mxu1 %vm338_vm0, %v8162_v31 }
 0x7c8   :  { %8472 = vmatmul.mubr.bf16.gmra.mrb[48].mxu1 %v8160_v27  ;;  %v8569_v27 = vld [vmem:[#allocation3 + $0x198] sm:$0xff] }
 0x7c9   :  { %10360 = vmatprep.mubr.msk.bf16.mxu1 %vm338_vm0, %v8161_v14  ;;  %v8565_v14 = vld [vmem:[#allocation3 + $0x178] sm:$0xff]  ;;  %v8613_v62 = vpack.c.bf16 %v8571_v40, %v8569_v27 }
 0x7ca   :  { %v8611_v31 = vpack.c.bf16 %v8567_v51, %v8565_v14  ;;  %v8724_v14 = vsel %vm1108_vm1, %v8719_v38, %v8719_v38 }
 0x7cb   :  { %v8701_v36 = vrot.slane %v8613_v62, 3 }
 0x7cc   :  { %v8697_v60 = vrot.slane %v8611_v31, 3 }
 0x7cd   :  { %v8706_v37 = vsel %vm1108_vm1, %v8701_v36, %v8705_v25 }
 0x7ce   :  { %v8698_v20 = vsel %vm1108_vm1, %v8693_v52, %v8697_v60  ;;  %v8702_v28 = vsel %vm1108_vm1, %v8697_v60, %v8701_v36  ;;  %v8599_v52 = vld [vmem:[#allocation3 + $0x288] sm:$0x3f] }
 0x7d0   :  { %8482 = vmatmul.mubr.bf16.gmra.mrb[52].mxu1 %v8159_v23  ;;  %v8564_v23 = vld [vmem:[#allocation3 + $0x170] sm:$0xff] }
 0x7d1   :  { %10401 = vmatprep.mubr.msk.bf16.mxu1 %vm338_vm0, %v8682_v39  ;;  %v8610_v5 = vpack.c.bf16 %v8566_v24, %v8564_v23  ;;  %v8699_v39 = vrot.slane %v8612_v57, 3  ;;  %v17747_v57 = vld [vmem:[#allocation4_spill] sm:$0xff] }
 0x7d3   :  { %v8695_v46 = vrot.slane %v8610_v5, 3 }
 0x7d5   :  { %v8696_v53 = vsel %vm1108_vm1, %v8691_v44, %v8695_v46  ;;  %v8700_v47 = vsel %vm1108_vm1, %v8695_v46, %v8699_v39  ;;  %v17746_v44 = vld [vmem:[#allocation7_spill] sm:$0xff] }
 0x7d8   :  { %8920 = vmatmul.mubr.bf16.vlgmr.msra.gmra.mrb[0].mxu1 %v8679_v49  ;;  %v8581_v49 = vld [vmem:[#allocation3 + $0x1f8] sm:$0xff] }
 0x7d9   :  { %10402 = vmatprep.mubr.msk.bf16.mxu1 %vm338_vm0, %v8686_v11  ;;  %v8704_v11 = vsel %vm1108_vm1, %v8699_v39, %v8703_v6  ;;  %v8619_v35 = vpack.c.bf16 %v8583_v1, %v8581_v49 }
 0x7db   :  { %v8713_v16 = vrot.slane %v8619_v35, 3 }
 0x7dd   :  { %v8714_v58 = vsel %vm1108_vm1, %v8709_v34, %v8713_v16  ;;  %v8718_v2 = vsel %vm1108_vm1, %v8713_v16, %v15637_v3 }
 0x7e0   :  { %8930 = vmatmul.mubr.bf16.gmra.mrb[4].mxu1 %v8684_v29  ;;  %v8715_v29 = vrot.slane %v8620_v18, 3 }
 0x7e1   :  { %10403 = vmatprep.mubr.msk.bf16.mxu1 %vm338_vm0, %v8690_v41  ;;  %v8625_v41 = vpack.c.bf16 %v8595_v4, %v16216_v55  ;;  %v8598_v55 = vld [vmem:[#allocation3 + $0x280] sm:$0x3f] }
 0x7e2   :  { %v8716_v22 = vsel %vm1108_vm1, %v15626_v19, %v8715_v29  ;;  %v8720_v10 = vsel %vm1108_vm1, %v8715_v29, %v8719_v38 }
 0x7e3   :  { %v8725_v15 = vrot.slane %v8625_v41, 3 }
 0x7e5   :  { %v8726_v3 = vsel %vm1108_vm1, %v8721_v50, %v8725_v15 }
 0x7e8   :  { %8940 = vmatmul.mubr.bf16.gmra.mrb[8].mxu1 %v8688_v26  ;;  %v17745_v26 = vld [vmem:[#allocation5_spill] sm:$0xff] }
 0x7e9   :  { %10404 = vmatprep.mubr.msk.bf16.mxu1 %vm338_vm0, %v8694_v0 }
 0x7f0   :  { %8950 = vmatmul.mubr.bf16.gmra.mrb[12].mxu1 %v8692_v21 }
 0x7f1   :  { %10405 = vmatprep.mubr.msk.bf16.mxu1 %vm338_vm0, %v8698_v20 }
 0x7f8   :  { %8960 = vmatmul.mubr.bf16.gmra.mrb[16].mxu1 %v8696_v53 }
 0x7f9   :  { %10406 = vmatprep.mubr.msk.bf16.mxu1 %vm338_vm0, %v8702_v28 }
 0x800   :  { %8970 = vmatmul.mubr.bf16.gmra.mrb[20].mxu1 %v8700_v47  ;;  %v17748_v47 = vld [vmem:[#allocation6_spill] sm:$0xff] }
 0x801   :  { %10407 = vmatprep.mubr.msk.bf16.mxu1 %vm338_vm0, %v8706_v37 }
 0x808   :  { %8980 = vmatmul.mubr.bf16.gmra.mrb[24].mxu1 %v8704_v11 }
 0x809   :  { %10408 = vmatprep.mubr.msk.bf16.mxu1 %vm338_vm0, %v8710_v61 }
 0x810   :  { %8990 = vmatmul.mubr.bf16.gmra.mrb[28].mxu1 %v8708_v8 }
 0x811   :  { %10409 = vmatprep.mubr.msk.bf16.mxu1 %vm338_vm0, %v8714_v58 }
 0x818   :  { %9000 = vmatmul.mubr.bf16.gmra.mrb[32].mxu1 %v15634_v59  ;;  %v8597_v59 = vld [vmem:[#allocation3 + $0x278] sm:$0xff] }
 0x819   :  { %10410 = vmatprep.mubr.msk.bf16.mxu1 %vm338_vm0, %v8718_v2  ;;  %v8627_v9 = vpack.c.bf16 %v8599_v52, %v8597_v59 }
 0x81b   :  { %v8729_v19 = vrot.slane %v8627_v9, 3 }
 0x81d   :  { %v8730_v56 = vsel %vm1108_vm1, %v8725_v15, %v8729_v19 }
 0x820   :  { %9010 = vmatmul.mubr.bf16.gmra.mrb[36].mxu1 %v8716_v22  ;;  %v17749_v22 = vld [vmem:[#allocation9_spill] sm:$0xff] }
 0x821   :  { %10411 = vmatprep.mubr.msk.bf16.mxu1 %vm338_vm0, %v15644_v63  ;;  %v8626_v63 = vpack.c.bf16 %v8598_v55, %v16219_v48 }
 0x823   :  { %v8727_v12 = vrot.slane %v8626_v63, 3 }
 0x825   :  { %v8728_v50 = vsel %vm1108_vm1, %v8719_v38, %v8727_v12 }
 0x828   :  { %9020 = vmatmul.mubr.bf16.gmra.mrb[40].mxu1 %v8720_v10  ;;  %v17750_v10 = vld [vmem:[#allocation8_spill] sm:$0xff] }
 0x829   :  { %10412 = vmatprep.mubr.msk.bf16.mxu1 %vm338_vm0, %v8726_v3 }
 0x830   :  { %9030 = vmatmul.mubr.bf16.gmra.mrb[44].mxu1 %v8724_v14 }
 0x831   :  { %10413 = vmatprep.mubr.msk.bf16.mxu1 %vm338_vm0, %v8730_v56 }
 0x838   :  { %9040 = vmatmul.mubr.bf16.gmra.mrb[48].mxu1 %v8728_v50 }
 0x839   :  { %10414 = vmatprep.mubr.msk.bf16.mxu1 %vm338_vm0, %v8729_v19 }
 0x840   :  { %9050 = vmatmul.mubr.bf16.gmra.mrb[52].mxu1 %v8727_v12 }
 0x8ab   :  { %v16289_v51 = vpop.f32.mrb[0].mxu1 }
 0x8ac   :  { %v9112_v30 = vmul.f32 %v16289_v51, %v17745_v26  ;;  %v16293_v0 = vpop.f32.mrb[1].mxu1 }
 0x8ad   :  { %v9113_v48 = vmul.f32 %v16293_v0, %v17745_v26  ;;  %v16297_v31 = vpop.f32.mrb[2].mxu1 }
 0x8ae   :  { %v9114_v60 = vmul.f32 %v16297_v31, %v17746_v44  ;;  %v16301_v23 = vpop.f32.mrb[3].mxu1  ;;  %v9260_v40 = vmul.f32 %v9112_v30, %v9112_v30 }
 0x8af   :  { %v9261_v24 = vmul.f32 %v9113_v48, %v9113_v48  ;;  %v9115_v27 = vmul.f32 %v16301_v23, %v17746_v44  ;;  %v9199_v20 = vsel %vm9198_vm8, %v9113_v48, 0.0 }
 0x8b0   :  { %v9166_v21 = vadd.f32 %v9114_v60, %v9112_v30  ;;  %v9262_v5 = vmul.f32 %v9114_v60, %v9114_v60 }
 0x8b1   :  { %v9200_v62 = vsel %vm9198_vm8, %v9115_v27, 0.0  ;;  %v9263_v46 = vmul.f32 %v9115_v27, %v9115_v27  ;;  %v9346_v33 = vsel %vm9198_vm8, %v9261_v24, 0.0 }
 0x8b2   :  { %v9314_v36 = vadd.f32 %v9262_v5, %v9260_v40  ;;  %v9201_v13 = vadd.f32 %v9200_v62, %v9199_v20  ;;  %v17751_v62 = vld [vmem:[#allocation11_spill] sm:$0xff] }
 0x8b3   :  { %v9347_v7 = vsel %vm9198_vm8, %v9263_v46, 0.0  ;;  %v16309_v42 = vpop.f32.mrb[4].mxu1 }
 0x8b4   :  { %v9348_v53 = vadd.f32 %v9347_v7, %v9346_v33  ;;  %v9116_v28 = vmul.f32 %v16309_v42, %v17747_v57  ;;  %v16313_v45 = vpop.f32.mrb[5].mxu1 }
 0x8b5   :  { %v9117_v39 = vmul.f32 %v16313_v45, %v17747_v57  ;;  %v16317_v25 = vpop.f32.mrb[6].mxu1  ;;  %v17752_v57 = vld [vmem:[#allocation10_spill] sm:$0xff] }
 0x8b6   :  { %v9167_v17 = vadd.f32 %v9166_v21, %v9116_v28  ;;  %v9264_v43 = vmul.f32 %v9116_v28, %v9116_v28  ;;  %v9118_v54 = vmul.f32 %v16317_v25, %v17748_v47  ;;  %v16321_v37 = vpop.f32.mrb[7].mxu1 }
 0x8b7   :  { %v9202_v6 = vsel %vm9198_vm8, %v9117_v39, 0.0  ;;  %v9265_v34 = vmul.f32 %v9117_v39, %v9117_v39  ;;  %v9119_v49 = vmul.f32 %v16321_v37, %v17748_v47 }
 0x8b8   :  { %v9315_v1 = vadd.f32 %v9314_v36, %v9264_v43  ;;  %v9203_v11 = vadd.f32 %v9202_v6, %v9201_v13  ;;  %v9168_v61 = vadd.f32 %v9167_v17, %v9118_v54  ;;  %v9266_v35 = vmul.f32 %v9118_v54, %v9118_v54 }
 0x8b9   :  { %v9349_v16 = vsel %vm9198_vm8, %v9265_v34, 0.0  ;;  %v9204_v8 = vsel %vm9198_vm8, %v9119_v49, 0.0  ;;  %v9267_v58 = vmul.f32 %v9119_v49, %v9119_v49 }
 0x8ba   :  { %v9350_v32 = vadd.f32 %v9349_v16, %v9348_v53  ;;  %v9316_v18 = vadd.f32 %v9315_v1, %v9266_v35  ;;  %v9205_v2 = vadd.f32 %v9204_v8, %v9203_v11 }
 0x8bb   :  { %v9351_v29 = vsel %vm9198_vm8, %v9267_v58, 0.0  ;;  %v16329_v4 = vpop.f32.mrb[8].mxu1 }
 0x8bc   :  { %v9352_v41 = vadd.f32 %v9351_v29, %v9350_v32  ;;  %v9120_v15 = vmul.f32 %v16329_v4, %v17749_v22  ;;  %v16333_v38 = vpop.f32.mrb[9].mxu1 }
 0x8bd   :  { %v9121_v59 = vmul.f32 %v16333_v38, %v17749_v22  ;;  %v16337_v52 = vpop.f32.mrb[10].mxu1 }
 0x8be   :  { %v9169_v3 = vadd.f32 %v9168_v61, %v9120_v15  ;;  %v9268_v9 = vmul.f32 %v9120_v15, %v9120_v15  ;;  %v9122_v19 = vmul.f32 %v16337_v52, %v17750_v10  ;;  %v16341_v55 = vpop.f32.mrb[11].mxu1 }
 0x8bf   :  { %v9206_v14 = vsel %vm9198_vm8, %v9121_v59, 0.0  ;;  %v9269_v63 = vmul.f32 %v9121_v59, %v9121_v59  ;;  %v9123_v56 = vmul.f32 %v16341_v55, %v17750_v10 }
 0x8c0   :  { %v9317_v12 = vadd.f32 %v9316_v18, %v9268_v9  ;;  %v9207_v50 = vadd.f32 %v9206_v14, %v9205_v2  ;;  %v9170_v26 = vadd.f32 %v9169_v3, %v9122_v19  ;;  %v9270_v30 = vmul.f32 %v9122_v19, %v9122_v19  ;;  %v17753_v2 = vld [vmem:[#allocation13_spill] sm:$0xff]  ;;  %v17754_v9 = vld [vmem:[#allocation12_spill] sm:$0xff] }
 0x8c1   :  { %v9353_v48 = vsel %vm9198_vm8, %v9269_v63, 0.0  ;;  %v9208_v44 = vsel %vm9198_vm8, %v9123_v56, 0.0  ;;  %v9271_v60 = vmul.f32 %v9123_v56, %v9123_v56 }
 0x8c2   :  { %v9354_v24 = vadd.f32 %v9353_v48, %v9352_v41  ;;  %v9318_v27 = vadd.f32 %v9317_v12, %v9270_v30  ;;  %v9209_v40 = vadd.f32 %v9208_v44, %v9207_v50 }
 0x8c3   :  { %v9355_v21 = vsel %vm9198_vm8, %v9271_v60, 0.0  ;;  %v16349_v5 = vpop.f32.mrb[12].mxu1 }
 0x8c4   :  { %v9356_v20 = vadd.f32 %v9355_v21, %v9354_v24  ;;  %v9124_v46 = vmul.f32 %v16349_v5, %v17751_v62  ;;  %v16353_v36 = vpop.f32.mrb[13].mxu1 }
 0x8c5   :  { %v9125_v13 = vmul.f32 %v16353_v36, %v17751_v62  ;;  %v16357_v33 = vpop.f32.mrb[14].mxu1 }
 0x8c6   :  { %v9171_v7 = vadd.f32 %v9170_v26, %v9124_v46  ;;  %v9272_v53 = vmul.f32 %v9124_v46, %v9124_v46  ;;  %v9126_v28 = vmul.f32 %v16357_v33, %v17752_v57  ;;  %v16361_v39 = vpop.f32.mrb[15].mxu1  ;;  %v17755_v46 = vld [vmem:[#allocation15_spill] sm:$0xff] }
 0x8c7   :  { %v9210_v17 = vsel %vm9198_vm8, %v9125_v13, 0.0  ;;  %v9273_v43 = vmul.f32 %v9125_v13, %v9125_v13  ;;  %v9127_v47 = vmul.f32 %v16361_v39, %v17752_v57 }
 0x8c8   :  { %v9319_v54 = vadd.f32 %v9318_v27, %v9272_v53  ;;  %v9211_v6 = vadd.f32 %v9210_v17, %v9209_v40  ;;  %v9172_v34 = vadd.f32 %v9171_v7, %v9126_v28  ;;  %v9274_v49 = vmul.f32 %v9126_v28, %v9126_v28 }
 0x8c9   :  { %v9357_v1 = vsel %vm9198_vm8, %v9273_v43, 0.0  ;;  %v9212_v11 = vsel %vm9198_vm8, %v9127_v47, 0.0  ;;  %v9275_v61 = vmul.f32 %v9127_v47, %v9127_v47  ;;  %v17756_v43 = vld [vmem:[#allocation14_spill] sm:$0xff] }
 0x8ca   :  { %v9358_v35 = vadd.f32 %v9357_v1, %v9356_v20  ;;  %v9320_v16 = vadd.f32 %v9319_v54, %v9274_v49  ;;  %v9213_v8 = vadd.f32 %v9212_v11, %v9211_v6 }
 0x8cb   :  { %v9359_v58 = vsel %vm9198_vm8, %v9275_v61, 0.0  ;;  %v16369_v32 = vpop.f32.mrb[16].mxu1 }
 0x8cc   :  { %v9360_v18 = vadd.f32 %v9359_v58, %v9358_v35  ;;  %v9128_v29 = vmul.f32 %v16369_v32, %v17753_v2  ;;  %v16373_v41 = vpop.f32.mrb[17].mxu1 }
 0x8cd   :  { %v9129_v22 = vmul.f32 %v16373_v41, %v17753_v2  ;;  %v16377_v15 = vpop.f32.mrb[18].mxu1 }
 0x8ce   :  { %v9173_v59 = vadd.f32 %v9172_v34, %v9128_v29  ;;  %v9276_v3 = vmul.f32 %v9128_v29, %v9128_v29  ;;  %v9130_v10 = vmul.f32 %v16377_v15, %v17754_v9  ;;  %v16381_v19 = vpop.f32.mrb[19].mxu1 }
 0x8cf   :  { %v9214_v14 = vsel %vm9198_vm8, %v9129_v22, 0.0  ;;  %v9277_v63 = vmul.f32 %v9129_v22, %v9129_v22  ;;  %v9131_v56 = vmul.f32 %v16381_v19, %v17754_v9  ;;  %v17757_v9 = vld [vmem:[#allocation17_spill] sm:$0xff] }
 0x8d0   :  { %v9321_v12 = vadd.f32 %v9320_v16, %v9276_v3  ;;  %v9215_v50 = vadd.f32 %v9214_v14, %v9213_v8  ;;  %v9174_v26 = vadd.f32 %v9173_v59, %v9130_v10  ;;  %v9278_v30 = vmul.f32 %v9130_v10, %v9130_v10 }
 0x8d1   :  { %v9361_v48 = vsel %vm9198_vm8, %v9277_v63, 0.0  ;;  %v9216_v44 = vsel %vm9198_vm8, %v9131_v56, 0.0  ;;  %v9279_v60 = vmul.f32 %v9131_v56, %v9131_v56 }
 0x8d2   :  { %v9362_v24 = vadd.f32 %v9361_v48, %v9360_v18  ;;  %v9322_v27 = vadd.f32 %v9321_v12, %v9278_v30  ;;  %v9217_v40 = vadd.f32 %v9216_v44, %v9215_v50 }
 0x8d3   :  { %v9363_v21 = vsel %vm9198_vm8, %v9279_v60, 0.0  ;;  %v16389_v20 = vpop.f32.mrb[20].mxu1 }
 0x8d4   :  { %v9364_v62 = vadd.f32 %v9363_v21, %v9362_v24  ;;  %v9132_v13 = vmul.f32 %v16389_v20, %v17755_v46  ;;  %v16393_v7 = vpop.f32.mrb[21].mxu1 }
 0x8d5   :  { %v9133_v53 = vmul.f32 %v16393_v7, %v17755_v46  ;;  %v16397_v57 = vpop.f32.mrb[22].mxu1 }
 0x8d6   :  { %v9175_v28 = vadd.f32 %v9174_v26, %v9132_v13  ;;  %v9280_v17 = vmul.f32 %v9132_v13, %v9132_v13  ;;  %v9134_v47 = vmul.f32 %v16397_v57, %v17756_v43  ;;  %v16401_v54 = vpop.f32.mrb[23].mxu1  ;;  %v17758_v26 = vld [vmem:[#allocation16_spill] sm:$0xff] }
 0x8d7   :  { %v9218_v6 = vsel %vm9198_vm8, %v9133_v53, 0.0  ;;  %v9281_v34 = vmul.f32 %v9133_v53, %v9133_v53  ;;  %v9135_v49 = vmul.f32 %v16401_v54, %v17756_v43 }
 0x8d8   :  { %v9323_v1 = vadd.f32 %v9322_v27, %v9280_v17  ;;  %v9219_v11 = vadd.f32 %v9218_v6, %v9217_v40  ;;  %v9176_v61 = vadd.f32 %v9175_v28, %v9134_v47  ;;  %v9282_v35 = vmul.f32 %v9134_v47, %v9134_v47 }
 0x8d9   :  { %v9365_v16 = vsel %vm9198_vm8, %v9281_v34, 0.0  ;;  %v9220_v8 = vsel %vm9198_vm8, %v9135_v49, 0.0  ;;  %v9283_v58 = vmul.f32 %v9135_v49, %v9135_v49  ;;  %v17759_v49 = vld [vmem:[#allocation19_spill] sm:$0xff] }
 0x8da   :  { %v9366_v18 = vadd.f32 %v9365_v16, %v9364_v62  ;;  %v9324_v2 = vadd.f32 %v9323_v1, %v9282_v35  ;;  %v9221_v29 = vadd.f32 %v9220_v8, %v9219_v11 }
 0x8db   :  { %v9367_v22 = vsel %vm9198_vm8, %v9283_v58, 0.0  ;;  %v16409_v59 = vpop.f32.mrb[24].mxu1  ;;  %v17760_v58 = vld [vmem:[#allocation18_spill] sm:$0xff] }
 0x8dc   :  { %v9368_v3 = vadd.f32 %v9367_v22, %v9366_v18  ;;  %v9136_v10 = vmul.f32 %v16409_v59, %v17757_v9  ;;  %v16413_v14 = vpop.f32.mrb[25].mxu1 }
 0x8dd   :  { %v9137_v63 = vmul.f32 %v16413_v14, %v17757_v9  ;;  %v16417_v56 = vpop.f32.mrb[26].mxu1 }
 0x8de   :  { %v9177_v12 = vadd.f32 %v9176_v61, %v9136_v10  ;;  %v9284_v50 = vmul.f32 %v9136_v10, %v9136_v10  ;;  %v9138_v30 = vmul.f32 %v16417_v56, %v17758_v26  ;;  %v16421_v48 = vpop.f32.mrb[27].mxu1 }
 0x8df   :  { %v9222_v44 = vsel %vm9198_vm8, %v9137_v63, 0.0  ;;  %v9285_v60 = vmul.f32 %v9137_v63, %v9137_v63  ;;  %v9139_v24 = vmul.f32 %v16421_v48, %v17758_v26 }
 0x8e0   :  { %v9325_v27 = vadd.f32 %v9324_v2, %v9284_v50  ;;  %v9223_v40 = vadd.f32 %v9222_v44, %v9221_v29  ;;  %v9178_v21 = vadd.f32 %v9177_v12, %v9138_v30  ;;  %v9286_v62 = vmul.f32 %v9138_v30, %v9138_v30 }
 0x8e1   :  { %v9369_v46 = vsel %vm9198_vm8, %v9285_v60, 0.0  ;;  %v9224_v13 = vsel %vm9198_vm8, %v9139_v24, 0.0  ;;  %v9287_v53 = vmul.f32 %v9139_v24, %v9139_v24 }
 0x8e2   :  { %v9370_v28 = vadd.f32 %v9369_v46, %v9368_v3  ;;  %v9326_v17 = vadd.f32 %v9325_v27, %v9286_v62  ;;  %v9225_v43 = vadd.f32 %v9224_v13, %v9223_v40  ;;  %v17761_v62 = vld [vmem:[#allocation21_spill] sm:$0xff] }
 0x8e3   :  { %v9371_v47 = vsel %vm9198_vm8, %v9287_v53, 0.0  ;;  %v16429_v6 = vpop.f32.mrb[28].mxu1 }
 0x8e4   :  { %v9372_v34 = vadd.f32 %v9371_v47, %v9370_v28  ;;  %v9140_v1 = vmul.f32 %v16429_v6, %v17759_v49  ;;  %v16433_v11 = vpop.f32.mrb[29].mxu1  ;;  %v17762_v47 = vld [vmem:[#allocation23_spill] sm:$0xff] }
 0x8e5   :  { %v9141_v61 = vmul.f32 %v16433_v11, %v17759_v49  ;;  %v16437_v35 = vpop.f32.mrb[30].mxu1 }
 0x8e6   :  { %v9179_v16 = vadd.f32 %v9178_v21, %v9140_v1  ;;  %v9288_v8 = vmul.f32 %v9140_v1, %v9140_v1  ;;  %v9142_v18 = vmul.f32 %v16437_v35, %v17760_v58  ;;  %v16441_v2 = vpop.f32.mrb[31].mxu1 }
 0x8e7   :  { %v9226_v29 = vsel %vm9198_vm8, %v9141_v61, 0.0  ;;  %v9289_v22 = vmul.f32 %v9141_v61, %v9141_v61  ;;  %v9143_v3 = vmul.f32 %v16441_v2, %v17760_v58 }
 0x8e8   :  { %v9327_v9 = vadd.f32 %v9326_v17, %v9288_v8  ;;  %v9227_v10 = vadd.f32 %v9226_v29, %v9225_v43  ;;  %v9180_v63 = vadd.f32 %v9179_v16, %v9142_v18  ;;  %v9290_v12 = vmul.f32 %v9142_v18, %v9142_v18 }
 0x8e9   :  { %v9373_v50 = vsel %vm9198_vm8, %v9289_v22, 0.0  ;;  %v9228_v26 = vsel %vm9198_vm8, %v9143_v3, 0.0  ;;  %v9291_v30 = vmul.f32 %v9143_v3, %v9143_v3 }
 0x8ea   :  { %v9374_v44 = vadd.f32 %v9373_v50, %v9372_v34  ;;  %v9328_v60 = vadd.f32 %v9327_v9, %v9290_v12  ;;  %v9229_v24 = vadd.f32 %v9228_v26, %v9227_v10 }
 0x8eb   :  { %v9375_v27 = vsel %vm9198_vm8, %v9291_v30, 0.0  ;;  %v16449_v40 = vpop.f32.mrb[32].mxu1 }
 0x8ec   :  { %v9376_v21 = vadd.f32 %v9375_v27, %v9374_v44  ;;  %v9144_v46 = vmul.f32 %v16449_v40, %v17761_v62  ;;  %v16453_v13 = vpop.f32.mrb[33].mxu1  ;;  %v17763_v44 = vld [vmem:[#allocation26_spill] sm:$0xff] }
 0x8ed   :  { %v9145_v53 = vmul.f32 %v16453_v13, %v17761_v62  ;;  %v16457_v28 = vpop.f32.mrb[34].mxu1 }
 0x8ee   :  { %v9181_v17 = vadd.f32 %v9180_v63, %v9144_v46  ;;  %v9292_v43 = vmul.f32 %v9144_v46, %v9144_v46  ;;  %v9146_v34 = vmul.f32 %v16457_v28, %v17762_v47  ;;  %v16461_v49 = vpop.f32.mrb[35].mxu1 }
 0x8ef   :  { %v9230_v1 = vsel %vm9198_vm8, %v9145_v53, 0.0  ;;  %v9293_v61 = vmul.f32 %v9145_v53, %v9145_v53  ;;  %v9147_v16 = vmul.f32 %v16461_v49, %v17762_v47 }
 0x8f0   :  { %v9329_v8 = vadd.f32 %v9328_v60, %v9292_v43  ;;  %v9231_v58 = vadd.f32 %v9230_v1, %v9229_v24  ;;  %v9182_v18 = vadd.f32 %v9181_v17, %v9146_v34  ;;  %v9294_v29 = vmul.f32 %v9146_v34, %v9146_v34 }
 0x8f1   :  { %v9377_v22 = vsel %vm9198_vm8, %v9293_v61, 0.0  ;;  %v9232_v3 = vsel %vm9198_vm8, %v9147_v16, 0.0  ;;  %v9295_v9 = vmul.f32 %v9147_v16, %v9147_v16 }
 0x8f2   :  { %v9378_v10 = vadd.f32 %v9377_v22, %v9376_v21  ;;  %v9330_v63 = vadd.f32 %v9329_v8, %v9294_v29  ;;  %v9233_v12 = vadd.f32 %v9232_v3, %v9231_v58  ;;  %v17766_v21 = vld [vmem:[#allocation30_spill] sm:$0xff] }
 0x8f3   :  { %v9379_v50 = vsel %vm9198_vm8, %v9295_v9, 0.0  ;;  %v16469_v26 = vpop.f32.mrb[36].mxu1 }
 0x8f4   :  { %v9380_v30 = vadd.f32 %v9379_v50, %v9378_v10  ;;  %v9148_v27 = vmul.f32 %v16469_v26, %v17763_v44  ;;  %v16473_v60 = vpop.f32.mrb[37].mxu1 }
 0x8f5   :  { %17764 = vst [vmem:[#allocation66_spill] sm:$0xff] %v16473_v60  ;;  %v9149_v24 = vmul.f32 %v16473_v60, %v17763_v44  ;;  %v16477_v62 = vpop.f32.mrb[38].mxu1 }
 0x8f6   :  { %17765 = vst [vmem:[#allocation20_spill] sm:$0xff] %v16477_v62  ;;  %v9183_v46 = vadd.f32 %v9182_v18, %v9148_v27  ;;  %v9296_v53 = vmul.f32 %v9148_v27, %v9148_v27  ;;  %v9150_v17 = vmul.f32 %v16477_v62, %v17766_v21  ;;  %v16481_v43 = vpop.f32.mrb[39].mxu1 }
 0x8f7   :  { %17767 = vst [vmem:[#allocation27_spill] sm:$0xff] %v16481_v43  ;;  %v9234_v47 = vsel %vm9198_vm8, %v9149_v24, 0.0  ;;  %v9297_v34 = vmul.f32 %v9149_v24, %v9149_v24  ;;  %v9151_v1 = vmul.f32 %v16481_v43, %v17766_v21  ;;  %v17769_v24 = vld [vmem:[#allocation34_spill] sm:$0xff]  ;;  %v17775_v43 = vld [vmem:[#allocation41_spill] sm:$0xff] }
 0x8f8   :  { %v9331_v61 = vadd.f32 %v9330_v63, %v9296_v53  ;;  %v9235_v16 = vadd.f32 %v9234_v47, %v9233_v12  ;;  %v9184_v8 = vadd.f32 %v9183_v46, %v9150_v17  ;;  %v9298_v58 = vmul.f32 %v9150_v17, %v9150_v17 }
 0x8f9   :  { %v9381_v29 = vsel %vm9198_vm8, %v9297_v34, 0.0  ;;  %v9236_v18 = vsel %vm9198_vm8, %v9151_v1, 0.0  ;;  %v9299_v22 = vmul.f32 %v9151_v1, %v9151_v1 }
 0x8fa   :  { %v9382_v3 = vadd.f32 %v9381_v29, %v9380_v30  ;;  %v9332_v9 = vadd.f32 %v9331_v61, %v9298_v58  ;;  %v9237_v10 = vadd.f32 %v9236_v18, %v9235_v16  ;;  %v17772_v30 = vld [vmem:[#allocation36_spill] sm:$0xff] }
 0x8fb   :  { %v9383_v50 = vsel %vm9198_vm8, %v9299_v22, 0.0  ;;  %v16489_v44 = vpop.f32.mrb[40].mxu1 }
 0x8fc   :  { %17768 = vst [vmem:[#allocation68_spill] sm:$0xff] %v16489_v44  ;;  %v9384_v27 = vadd.f32 %v9383_v50, %v9382_v3  ;;  %v9152_v21 = vmul.f32 %v16489_v44, %v17769_v24  ;;  %v16493_v63 = vpop.f32.mrb[41].mxu1 }
 0x8fd   :  { %17770 = vst [vmem:[#allocation28_spill] sm:$0xff] %v16493_v63  ;;  %v9153_v12 = vmul.f32 %v16493_v63, %v17769_v24  ;;  %v16497_v46 = vpop.f32.mrb[42].mxu1 }
 0x8fe   :  { %17771 = vst [vmem:[#allocation67_spill] sm:$0xff] %v16497_v46  ;;  %v9185_v53 = vadd.f32 %v9184_v8, %v9152_v21  ;;  %v9300_v17 = vmul.f32 %v9152_v21, %v9152_v21  ;;  %v9154_v47 = vmul.f32 %v16497_v46, %v17772_v30  ;;  %v16501_v34 = vpop.f32.mrb[43].mxu1 }
 0x8ff   :  { %17773 = vst [vmem:[#allocation69_spill] sm:$0xff] %v16501_v34  ;;  %v9238_v1 = vsel %vm9198_vm8, %v9153_v12, 0.0  ;;  %v9301_v61 = vmul.f32 %v9153_v12, %v9153_v12  ;;  %v9155_v16 = vmul.f32 %v16501_v34, %v17772_v30  ;;  %v17781_v34 = vld [vmem:[#allocation47_spill] sm:$0xff] }
 0x900   :  { %v9333_v58 = vadd.f32 %v9332_v9, %v9300_v17  ;;  %v9239_v29 = vadd.f32 %v9238_v1, %v9237_v10  ;;  %v9186_v18 = vadd.f32 %v9185_v53, %v9154_v47  ;;  %v9302_v22 = vmul.f32 %v9154_v47, %v9154_v47 }
 0x901   :  { %v9385_v3 = vsel %vm9198_vm8, %v9301_v61, 0.0  ;;  %v9240_v8 = vsel %vm9198_vm8, %v9155_v16, 0.0  ;;  %v9303_v50 = vmul.f32 %v9155_v16, %v9155_v16 }
 0x902   :  { %v9386_v24 = vadd.f32 %v9385_v3, %v9384_v27  ;;  %v9334_v21 = vadd.f32 %v9333_v58, %v9302_v22  ;;  %v9241_v46 = vadd.f32 %v9240_v8, %v9239_v29  ;;  %v17778_v27 = vld [vmem:[#allocation42_spill] sm:$0xff] }
 0x903   :  { %v9387_v63 = vsel %vm9198_vm8, %v9303_v50, 0.0  ;;  %v16509_v44 = vpop.f32.mrb[44].mxu1 }
 0x904   :  { %17774 = vst [vmem:[#allocation71_spill] sm:$0xff] %v16509_v44  ;;  %v9388_v12 = vadd.f32 %v9387_v63, %v9386_v24  ;;  %v9156_v30 = vmul.f32 %v16509_v44, %v17775_v43  ;;  %v16513_v9 = vpop.f32.mrb[45].mxu1 }
 0x905   :  { %17776 = vst [vmem:[#allocation33_spill] sm:$0xff] %v16513_v9  ;;  %v9157_v10 = vmul.f32 %v16513_v9, %v17775_v43  ;;  %v16517_v53 = vpop.f32.mrb[46].mxu1 }
 0x906   :  { %17777 = vst [vmem:[#allocation29_spill] sm:$0xff] %v16517_v53  ;;  %v9187_v17 = vadd.f32 %v9186_v18, %v9156_v30  ;;  %v9304_v47 = vmul.f32 %v9156_v30, %v9156_v30  ;;  %v9158_v1 = vmul.f32 %v16517_v53, %v17778_v27  ;;  %v16521_v61 = vpop.f32.mrb[47].mxu1 }
 0x907   :  { %17779 = vst [vmem:[#allocation70_spill] sm:$0xff] %v16521_v61  ;;  %v9242_v16 = vsel %vm9198_vm8, %v9157_v10, 0.0  ;;  %v9305_v63 = vmul.f32 %v9157_v10, %v9157_v10  ;;  %v9159_v58 = vmul.f32 %v16521_v61, %v17778_v27  ;;  %v17787_v61 = vld [vmem:[#allocation53_spill] sm:$0xff] }
 0x908   :  { %v9335_v29 = vadd.f32 %v9334_v21, %v9304_v47  ;;  %v9243_v22 = vadd.f32 %v9242_v16, %v9241_v46  ;;  %v9188_v3 = vadd.f32 %v9187_v17, %v9158_v1  ;;  %v9306_v8 = vmul.f32 %v9158_v1, %v9158_v1 }
 0x909   :  { %v9389_v43 = vsel %vm9198_vm8, %v9305_v63, 0.0  ;;  %v9244_v18 = vsel %vm9198_vm8, %v9159_v58, 0.0  ;;  %v9307_v50 = vmul.f32 %v9159_v58, %v9159_v58 }
 0x90a   :  { %v9390_v24 = vadd.f32 %v9389_v43, %v9388_v12  ;;  %v9336_v30 = vadd.f32 %v9335_v29, %v9306_v8  ;;  %v9245_v53 = vadd.f32 %v9244_v18, %v9243_v22  ;;  %v17784_v12 = vld [vmem:[#allocation48_spill] sm:$0xff] }
 0x90b   :  { %v9391_v9 = vsel %vm9198_vm8, %v9307_v50, 0.0  ;;  %v16529_v44 = vpop.f32.mrb[48].mxu1 }
 0x90c   :  { %17780 = vst [vmem:[#allocation72_spill] sm:$0xff] %v16529_v44  ;;  %v9392_v10 = vadd.f32 %v9391_v9, %v9390_v24  ;;  %v9160_v27 = vmul.f32 %v16529_v44, %v17781_v34  ;;  %v16533_v21 = vpop.f32.mrb[49].mxu1 }
 0x90d   :  { %17782 = vst [vmem:[#allocation73_spill] sm:$0xff] %v16533_v21  ;;  %v9161_v46 = vmul.f32 %v16533_v21, %v17781_v34  ;;  %v16537_v17 = vpop.f32.mrb[50].mxu1 }
 0x90e   :  { %17783 = vst [vmem:[#allocation74_spill] sm:$0xff] %v16537_v17  ;;  %v9189_v47 = vadd.f32 %v9188_v3, %v9160_v27  ;;  %v9308_v1 = vmul.f32 %v9160_v27, %v9160_v27  ;;  %v9162_v16 = vmul.f32 %v16537_v17, %v17784_v12  ;;  %v16541_v63 = vpop.f32.mrb[51].mxu1 }
 0x90f   :  { %17785 = vst [vmem:[#allocation75_spill] sm:$0xff] %v16541_v63  ;;  %v9246_v58 = vsel %vm9198_vm8, %v9161_v46, 0.0  ;;  %v9309_v9 = vmul.f32 %v9161_v46, %v9161_v46  ;;  %v9163_v29 = vmul.f32 %v16541_v63, %v17784_v12 }
 0x910   :  { %v9337_v22 = vadd.f32 %v9336_v30, %v9308_v1  ;;  %v9247_v8 = vadd.f32 %v9246_v58, %v9245_v53  ;;  %v9190_v43 = vadd.f32 %v9189_v47, %v9162_v16  ;;  %v9310_v18 = vmul.f32 %v9162_v16, %v9162_v16 }
 0x911   :  { %v9393_v34 = vsel %vm9198_vm8, %v9309_v9, 0.0  ;;  %v9248_v3 = vsel %vm9198_vm8, %v9163_v29, 0.0  ;;  %v9311_v50 = vmul.f32 %v9163_v29, %v9163_v29 }
 0x912   :  { %v9394_v24 = vadd.f32 %v9393_v34, %v9392_v10  ;;  %v9338_v27 = vadd.f32 %v9337_v22, %v9310_v18  ;;  %v9249_v17 = vadd.f32 %v9248_v3, %v9247_v8 }
 0x913   :  { %v9395_v21 = vsel %vm9198_vm8, %v9311_v50, 0.0  ;;  %v16549_v44 = vpop.f32.mrb[52].mxu1 }
 0x914   :  { %17786 = vst [vmem:[#allocation76_spill] sm:$0xff] %v16549_v44  ;;  %v9396_v46 = vadd.f32 %v9395_v21, %v9394_v24  ;;  %v9164_v12 = vmul.f32 %v16549_v44, %v17787_v61  ;;  %v16553_v30 = vpop.f32.mrb[53].mxu1 }
 0x915   :  { %17788 = vst [vmem:[#allocation77_spill] sm:$0xff] %v16553_v30  ;;  %v9165_v53 = vmul.f32 %v16553_v30, %v17787_v61  ;;  %v9055_v47 = vpop.f32.mrb[54].mxu1 }
 0x916   :  { %v9191_v1 = vadd.f32 %v9190_v43, %v9164_v12  ;;  %v9312_v16 = vmul.f32 %v9164_v12, %v9164_v12  ;;  %v9056_v58 = vpop.f32.mrb[55].mxu1 }
 0x917   :  { %v9250_v10 = vsel %vm9198_vm8, %v9165_v53, 0.0  ;;  %v9313_v9 = vmul.f32 %v9165_v53, %v9165_v53 }
 0x918   :  { %v9192_v29 = vrot.slane %v9191_v1, 4  ;;  %v9339_v22 = vadd.f32 %v9338_v27, %v9312_v16  ;;  %v9251_v8 = vadd.f32 %v9250_v10, %v9249_v17 }
 0x919   :  { %v9397_v21 = vsel %vm9198_vm8, %v9313_v9, 0.0 }
 0x91a   :  { %v9193_v18 = vadd.f32 %v9192_v29, %v9191_v1  ;;  %v9340_v34 = vrot.slane %v9339_v22, 4  ;;  %v9252_v3 = vrot.slane %v9251_v8, 4  ;;  %v9398_v50 = vadd.f32 %v9397_v21, %v9396_v46 }
 0x91c   :  { %v9194_v24 = vrot.slane %v9193_v18, 2  ;;  %v9341_v44 = vadd.f32 %v9340_v34, %v9339_v22  ;;  %v9253_v63 = vadd.f32 %v9252_v3, %v9251_v8  ;;  %v9399_v61 = vrot.slane %v9398_v50, 4 }
 0x91e   :  { %v9195_v47 = vadd.f32 %v9194_v24, %v9193_v18  ;;  %v9342_v43 = vrot.slane %v9341_v44, 2  ;;  %v9254_v12 = vrot.slane %v9253_v63, 2  ;;  %v9400_v58 = vadd.f32 %v9399_v61, %v9398_v50 }
 0x920   :  { %v9196_v30 = vrot.slane %v9195_v47, 1  ;;  %v9343_v62 = vadd.f32 %v9342_v43, %v9341_v44  ;;  %v9255_v53 = vadd.f32 %v9254_v12, %v9253_v63  ;;  %v9401_v60 = vrot.slane %v9400_v58, 2 }
 0x922   :  { %v9197_v27 = vadd.f32 %v9196_v30, %v9195_v47  ;;  %v9344_v17 = vrot.slane %v9343_v62, 1  ;;  %v9256_v16 = vrot.slane %v9255_v53, 1  ;;  %v9402_v10 = vadd.f32 %v9401_v60, %v9400_v58  ;;  %v17789_v60 = vld [vmem:[#allocation54_spill] sm:$0xff] }
 0x924   :  { %v9258_v1 = vmul.f32 0.0069444445, %v9197_v27  ;;  %v9345_v9 = vadd.f32 %v9344_v17, %v9343_v62  ;;  %v9257_v29 = vadd.f32 %v9256_v16, %v9255_v53  ;;  %v9403_v46 = vrot.slane %v9402_v10, 1  ;;  %v9411_v62 = vld [vmem:[%s16986_s8] sm:$0x3]  ;;  %v17790_v53 = vld [vmem:[#allocation55_spill] sm:$0xff] }
 0x925   :  { %v17791_v17 = vld [vmem:[#allocation56_spill] sm:$0xff] }
 0x926   :  { %v9405_v21 = vmul.f32 0.0069444445, %v9345_v9  ;;  %v9407_v22 = vmul.f32 %v9258_v1, %v9258_v1  ;;  %v9259_v8 = vmul.f32 0.0069444445, %v9257_v29  ;;  %v9404_v34 = vadd.f32 %v9403_v46, %v9402_v10 }
 0x928   :  { %v9409_v18 = vsub.f32 %v9405_v21, %v9407_v22  ;;  %v9406_v3 = vmul.f32 0.0069444445, %v9404_v34  ;;  %v9408_v24 = vmul.f32 %v9259_v8, %v9259_v8 }
 0x92a   :  { %v9412_v50 = vadd.f32 0.001, %v9409_v18  ;;  %v9410_v61 = vsub.f32 %v9406_v3, %v9408_v24 }
 0x92c   :  { %v9413_v44 = vadd.f32 0.001, %v9410_v61  ;;  %11520 = vrsqrt.f32 %v9412_v50 }
 0x92e   :  { %11522 = vrsqrt.f32 %v9413_v44 }
 0x936   :  { %v11521_v63 = vpop.eup %11520 }
 0x938   :  { %v11523_v30 = vpop.eup %11522 }
 0x939   :  { %v9418_v47 = vcombine.low %v11521_v63, %v11523_v30 }
 0x93b   :  { %v9425_v43 = vrot.slane %v9418_v47, %v17789_v60  ;;  %v17792_v47 = vld [vmem:[#allocation66_spill] sm:$0xff] }
 0x93d   :  { %v9432_v12 = vrot.slane %v9425_v43, %v17789_v60  ;;  %v17794_v43 = vld [vmem:[#allocation27_spill] sm:$0xff] }
 0x93f   :  { %v9434_v58 = vmul.f32 %v9432_v12, %v9411_v62  ;;  %v17795_v62 = vld [vmem:[#allocation68_spill] sm:$0xff] }
 0x940   :  { %v17796_v12 = vld [vmem:[#allocation28_spill] sm:$0xff] }
 0x941   :  { %v9440_v27 = vrot.slane %v9434_v58, %v17790_v53  ;;  %v9444_v16 = vrot.slane %v9434_v58, %v17791_v17  ;;  %v17797_v58 = vld [vmem:[#allocation67_spill] sm:$0xff]  ;;  %v17804_v17 = vld [vmem:[#allocation73_spill] sm:$0xff]  ;;  %v17805_v53 = vld [vmem:[#allocation74_spill] sm:$0xff] }
 0x943   :  { %v9447_v10 = vmul.f32 %v9440_v27, %v9258_v1  ;;  %v9448_v9 = vmul.f32 %v9444_v16, %v9259_v8  ;;  %v9468_v29 = vmul.f32 %v9440_v27, %v16289_v51  ;;  %v9469_v46 = vmul.f32 %v9444_v16, %v16293_v0 }
 0x944   :  { %v9470_v21 = vmul.f32 %v9440_v27, %v16297_v31  ;;  %v9471_v22 = vmul.f32 %v9444_v16, %v16301_v23  ;;  %v9472_v34 = vmul.f32 %v9440_v27, %v16309_v42  ;;  %v9473_v18 = vmul.f32 %v9444_v16, %v16313_v45 }
 0x945   :  { %v9451_v3 = vcombine.low %v9447_v10, %v9448_v9  ;;  %v9474_v24 = vmul.f32 %v9440_v27, %v16317_v25  ;;  %v9475_v50 = vmul.f32 %v9444_v16, %v16321_v37  ;;  %v9476_v1 = vmul.f32 %v9440_v27, %v16329_v4  ;;  %v9435_v37 = vld [vmem:[%s16987_s9] sm:$0x3]  ;;  %v17798_v10 = vld [vmem:[#allocation69_spill] sm:$0xff]  ;;  %v17799_v9 = vld [vmem:[#allocation71_spill] sm:$0xff] }
 0x946   :  { %v9477_v8 = vmul.f32 %v9444_v16, %v16333_v38  ;;  %v9478_v51 = vmul.f32 %v9440_v27, %v16337_v52  ;;  %v9479_v0 = vmul.f32 %v9444_v16, %v16341_v55  ;;  %v9480_v31 = vmul.f32 %v9440_v27, %v16349_v5 }
 0x947   :  { %v9458_v23 = vrot.slane %v9451_v3, %v17789_v60  ;;  %v9481_v42 = vmul.f32 %v9444_v16, %v16353_v36  ;;  %v9482_v45 = vmul.f32 %v9440_v27, %v16357_v33  ;;  %v9483_v25 = vmul.f32 %v9444_v16, %v16361_v39  ;;  %v17800_v3 = vld [vmem:[#allocation33_spill] sm:$0xff] }
 0x948   :  { %v9484_v4 = vmul.f32 %v9440_v27, %v16369_v32  ;;  %v9485_v38 = vmul.f32 %v9444_v16, %v16373_v41  ;;  %v9486_v52 = vmul.f32 %v9440_v27, %v16377_v15  ;;  %v9487_v55 = vmul.f32 %v9444_v16, %v16381_v19 }
 0x949   :  { %v9465_v5 = vrot.slane %v9458_v23, %v17789_v60  ;;  %v9488_v36 = vmul.f32 %v9440_v27, %v16389_v20  ;;  %v9489_v33 = vmul.f32 %v9444_v16, %v16393_v7  ;;  %v9490_v39 = vmul.f32 %v9440_v27, %v16397_v57  ;;  %v17793_v60 = vld [vmem:[#allocation20_spill] sm:$0xff]  ;;  %v17801_v23 = vld [vmem:[#allocation29_spill] sm:$0xff] }
 0x94a   :  { %v9491_v61 = vmul.f32 %v9444_v16, %v16401_v54  ;;  %v9492_v44 = vmul.f32 %v9440_v27, %v16409_v59  ;;  %v9493_v32 = vmul.f32 %v9444_v16, %v16413_v14  ;;  %v9494_v41 = vmul.f32 %v9440_v27, %v16417_v56 }
 0x94b   :  { %v9467_v63 = vsub.f32 %v9435_v37, %v9465_v5  ;;  %v9495_v15 = vmul.f32 %v9444_v16, %v16421_v48  ;;  %v9496_v19 = vmul.f32 %v9440_v27, %v16429_v6  ;;  %v9497_v30 = vmul.f32 %v9444_v16, %v16433_v11  ;;  %v17802_v37 = vld [vmem:[#allocation70_spill] sm:$0xff] }
 0x94c   :  { %v9498_v20 = vmul.f32 %v9440_v27, %v16437_v35  ;;  %v9499_v7 = vmul.f32 %v9444_v16, %v16441_v2  ;;  %v9500_v57 = vmul.f32 %v9440_v27, %v16449_v40  ;;  %v9501_v54 = vmul.f32 %v9444_v16, %v16453_v13 }
 0x94d   :  { %v9502_v59 = vmul.f32 %v9440_v27, %v16457_v28  ;;  %v9503_v14 = vmul.f32 %v9444_v16, %v16461_v49  ;;  %v9504_v56 = vmul.f32 %v9440_v27, %v16469_v26  ;;  %v9505_v48 = vmul.f32 %v9444_v16, %v17792_v47  ;;  %v17803_v47 = vld [vmem:[#allocation72_spill] sm:$0xff] }
 0x94e   :  { %v9506_v6 = vmul.f32 %v9440_v27, %v17793_v60  ;;  %v9507_v11 = vmul.f32 %v9444_v16, %v17794_v43  ;;  %v9508_v35 = vmul.f32 %v9440_v27, %v17795_v62  ;;  %v9509_v2 = vmul.f32 %v9444_v16, %v17796_v12  ;;  %v17806_v12 = vld [vmem:[#allocation75_spill] sm:$0xff] }
 0x94f   :  { %v9510_v40 = vmul.f32 %v9440_v27, %v17797_v58  ;;  %v9511_v13 = vmul.f32 %v9444_v16, %v17798_v10  ;;  %v9512_v28 = vmul.f32 %v9440_v27, %v17799_v9  ;;  %v9513_v49 = vmul.f32 %v9444_v16, %v17800_v3  ;;  %v17807_v10 = vld [vmem:[#allocation76_spill] sm:$0xff]  ;;  %v17808_v3 = vld [vmem:[#allocation77_spill] sm:$0xff] }
 0x950   :  { %v9514_v26 = vmul.f32 %v9440_v27, %v17801_v23  ;;  %v9515_v5 = vmul.f32 %v9444_v16, %v17802_v37  ;;  %v9516_v60 = vmul.f32 %v9440_v27, %v17803_v47  ;;  %v9517_v43 = vmul.f32 %v9444_v16, %v17804_v17  ;;  %v17809_v37 = vld [vmem:[#allocation55_spill] sm:$0xff]  ;;  %v17810_v17 = vld [vmem:[#allocation56_spill] sm:$0xff] }
 0x951   :  { %v9518_v62 = vmul.f32 %v9440_v27, %v17805_v53  ;;  %v9519_v58 = vmul.f32 %v9444_v16, %v17806_v12  ;;  %v9520_v9 = vmul.f32 %v9440_v27, %v17807_v10  ;;  %v9521_v23 = vmul.f32 %v9444_v16, %v17808_v3 }
 0x952   :  { %v9526_v47 = vrot.slane %v9467_v63, %v17809_v37  ;;  %v9530_v53 = vrot.slane %v9467_v63, %v17810_v17 }
 0x954   :  { %v16627_v12 = vadd.f32 %v9526_v47, %v9468_v29  ;;  %v16629_v10 = vadd.f32 %v9530_v53, %v9469_v46  ;;  %v16631_v27 = vadd.f32 %v9526_v47, %v9470_v21  ;;  %v16633_v3 = vadd.f32 %v9530_v53, %v9471_v22 }
 0x955   :  { %v16635_v16 = vadd.f32 %v9526_v47, %v9472_v34  ;;  %v16637_v37 = vadd.f32 %v9530_v53, %v9473_v18  ;;  %v16639_v17 = vadd.f32 %v9526_v47, %v9474_v24  ;;  %v16641_v63 = vadd.f32 %v9530_v53, %v9475_v50 }
 0x956   :  { %17811 = vst [vmem:[#allocation78_spill] sm:$0xff] %v16627_v12  ;;  %17812 = vst [vmem:[#allocation79_spill] sm:$0xff] %v16629_v10  ;;  %v16643_v29 = vadd.f32 %v9526_v47, %v9476_v1  ;;  %v16645_v12 = vadd.f32 %v9530_v53, %v9477_v8  ;;  %v16647_v46 = vadd.f32 %v9526_v47, %v9478_v51 }
 0x957   :  { %v16649_v10 = vadd.f32 %v9530_v53, %v9479_v0  ;;  %v16651_v21 = vadd.f32 %v9526_v47, %v9480_v31  ;;  %v16653_v22 = vadd.f32 %v9530_v53, %v9481_v42  ;;  %v16655_v34 = vadd.f32 %v9526_v47, %v9482_v45 }
 0x958   :  { %v16657_v18 = vadd.f32 %v9530_v53, %v9483_v25  ;;  %v16659_v24 = vadd.f32 %v9526_v47, %v9484_v4  ;;  %v16661_v50 = vadd.f32 %v9530_v53, %v9485_v38  ;;  %v16663_v1 = vadd.f32 %v9526_v47, %v9486_v52 }
 0x959   :  { %v16665_v8 = vadd.f32 %v9530_v53, %v9487_v55  ;;  %v16667_v51 = vadd.f32 %v9526_v47, %v9488_v36  ;;  %v16669_v0 = vadd.f32 %v9530_v53, %v9489_v33  ;;  %v16671_v31 = vadd.f32 %v9526_v47, %v9490_v39 }
 0x95a   :  { %v16673_v42 = vadd.f32 %v9530_v53, %v9491_v61  ;;  %v16675_v45 = vadd.f32 %v9526_v47, %v9492_v44  ;;  %v16677_v25 = vadd.f32 %v9530_v53, %v9493_v32  ;;  %v16679_v4 = vadd.f32 %v9526_v47, %v9494_v41 }
 0x95b   :  { %v16681_v38 = vadd.f32 %v9530_v53, %v9495_v15  ;;  %v16683_v52 = vadd.f32 %v9526_v47, %v9496_v19  ;;  %v16685_v55 = vadd.f32 %v9530_v53, %v9497_v30  ;;  %v16687_v36 = vadd.f32 %v9526_v47, %v9498_v20 }
 0x95c   :  { %v16689_v33 = vadd.f32 %v9530_v53, %v9499_v7  ;;  %v16691_v39 = vadd.f32 %v9526_v47, %v9500_v57  ;;  %v16693_v61 = vadd.f32 %v9530_v53, %v9501_v54  ;;  %v16695_v44 = vadd.f32 %v9526_v47, %v9502_v59 }
 0x95d   :  { %v16697_v32 = vadd.f32 %v9530_v53, %v9503_v14  ;;  %v16699_v41 = vadd.f32 %v9526_v47, %v9504_v56  ;;  %v16701_v15 = vadd.f32 %v9530_v53, %v9505_v48  ;;  %v16703_v19 = vadd.f32 %v9526_v47, %v9506_v6 }
 0x95e   :  { %v16705_v30 = vadd.f32 %v9530_v53, %v9507_v11  ;;  %v16707_v20 = vadd.f32 %v9526_v47, %v9508_v35  ;;  %v16709_v7 = vadd.f32 %v9530_v53, %v9509_v2  ;;  %v16711_v57 = vadd.f32 %v9526_v47, %v9510_v40 }
 0x95f   :  { %v16713_v54 = vadd.f32 %v9530_v53, %v9511_v13  ;;  %v16715_v59 = vadd.f32 %v9526_v47, %v9512_v28  ;;  %v16717_v14 = vadd.f32 %v9530_v53, %v9513_v49  ;;  %v16719_v56 = vadd.f32 %v9526_v47, %v9514_v26  ;;  %v17815_v28 = vld [vmem:[#allocation78_spill] sm:$0xff]  ;;  %v17816_v49 = vld [vmem:[#allocation79_spill] sm:$0xff] }
 0x960   :  { %v16721_v48 = vadd.f32 %v9530_v53, %v9515_v5  ;;  %v16723_v6 = vadd.f32 %v9526_v47, %v9516_v60  ;;  %v16725_v11 = vadd.f32 %v9530_v53, %v9517_v43  ;;  %v16727_v35 = vadd.f32 %v9526_v47, %v9518_v62 }
 0x961   :  { %17813 = vst [vmem:[#allocation80_spill] sm:$0xff] %v16715_v59  ;;  %17814 = vst [vmem:[#allocation81_spill] sm:$0xff] %v16717_v14  ;;  %v16729_v2 = vadd.f32 %v9530_v53, %v9519_v58  ;;  %v16731_v40 = vadd.f32 %v9526_v47, %v9520_v9  ;;  %v16733_v13 = vadd.f32 %v9530_v53, %v9521_v23  ;;  %v9587_v59 = vmax.f32 %v17815_v28, 0.0 }
 0x962   :  { %v9588_v14 = vmax.f32 %v17816_v49, 0.0  ;;  %v9589_v26 = vmax.f32 %v16631_v27, 0.0  ;;  %v9590_v5 = vmax.f32 %v16633_v3, 0.0  ;;  %v9591_v60 = vmax.f32 %v16635_v16, 0.0 }
 0x963   :  { %v9592_v43 = vmax.f32 %v16637_v37, 0.0  ;;  %v9593_v62 = vmax.f32 %v16639_v17, 0.0  ;;  %v9594_v58 = vmax.f32 %v16641_v63, 0.0  ;;  %v9595_v9 = vmax.f32 %v16643_v29, 0.0  ;;  %9641 = vst [vmem:[%s16988_s10] sm:$0xff] %v9587_v59 }
 0x964   :  { %v9596_v23 = vmax.f32 %v16645_v12, 0.0  ;;  %9642 = vst.msk [vmem:[%s16988_s10 + $0x8] sm:$0xff] %vm9198_vm8, %v9588_v14  ;;  %v9597_v47 = vmax.f32 %v16647_v46, 0.0  ;;  %v9598_v53 = vmax.f32 %v16649_v10, 0.0  ;;  %v9599_v27 = vmax.f32 %v16651_v21, 0.0  ;;  %9643 = vst [vmem:[%s16988_s10 + $0x10] sm:$0xff] %v9589_v26 }
 0x965   :  { %v9600_v3 = vmax.f32 %v16653_v22, 0.0  ;;  %9644 = vst.msk [vmem:[%s16988_s10 + $0x18] sm:$0xff] %vm9198_vm8, %v9590_v5  ;;  %9645 = vst [vmem:[%s16988_s10 + $0x20] sm:$0xff] %v9591_v60  ;;  %v9601_v12 = vmax.f32 %v16655_v34, 0.0  ;;  %v9602_v10 = vmax.f32 %v16657_v18, 0.0  ;;  %v9603_v16 = vmax.f32 %v16659_v24, 0.0 }
 0x966   :  { %9646 = vst.msk [vmem:[%s16988_s10 + $0x28] sm:$0xff] %vm9198_vm8, %v9592_v43  ;;  %v9604_v37 = vmax.f32 %v16661_v50, 0.0  ;;  %9647 = vst [vmem:[%s16988_s10 + $0x30] sm:$0xff] %v9593_v62  ;;  %v9605_v17 = vmax.f32 %v16663_v1, 0.0  ;;  %v9606_v63 = vmax.f32 %v16665_v8, 0.0  ;;  %v9607_v29 = vmax.f32 %v16667_v51, 0.0 }
 0x967   :  { %9648 = vst.msk [vmem:[%s16988_s10 + $0x38] sm:$0xff] %vm9198_vm8, %v9594_v58  ;;  %9649 = vst [vmem:[%s16988_s10 + $0x40] sm:$0xff] %v9595_v9  ;;  %v9608_v46 = vmax.f32 %v16669_v0, 0.0  ;;  %v9609_v21 = vmax.f32 %v16671_v31, 0.0  ;;  %v9610_v22 = vmax.f32 %v16673_v42, 0.0  ;;  %v9611_v34 = vmax.f32 %v16675_v45, 0.0 }
 0x968   :  { %9650 = vst.msk [vmem:[%s16988_s10 + $0x48] sm:$0xff] %vm9198_vm8, %v9596_v23  ;;  %9651 = vst [vmem:[%s16988_s10 + $0x50] sm:$0xff] %v9597_v47  ;;  %v9612_v18 = vmax.f32 %v16677_v25, 0.0  ;;  %v9613_v24 = vmax.f32 %v16679_v4, 0.0  ;;  %v9614_v50 = vmax.f32 %v16681_v38, 0.0  ;;  %v9615_v1 = vmax.f32 %v16683_v52, 0.0 }
 0x969   :  { %9652 = vst.msk [vmem:[%s16988_s10 + $0x58] sm:$0xff] %vm9198_vm8, %v9598_v53  ;;  %9653 = vst [vmem:[%s16988_s10 + $0x60] sm:$0xff] %v9599_v27  ;;  %v9616_v8 = vmax.f32 %v16685_v55, 0.0  ;;  %v9617_v51 = vmax.f32 %v16687_v36, 0.0  ;;  %v9618_v0 = vmax.f32 %v16689_v33, 0.0  ;;  %v9619_v31 = vmax.f32 %v16691_v39, 0.0 }
 0x96a   :  { %9654 = vst.msk [vmem:[%s16988_s10 + $0x68] sm:$0xff] %vm9198_vm8, %v9600_v3  ;;  %9655 = vst [vmem:[%s16988_s10 + $0x70] sm:$0xff] %v9601_v12  ;;  %v9620_v42 = vmax.f32 %v16693_v61, 0.0  ;;  %v9621_v45 = vmax.f32 %v16695_v44, 0.0  ;;  %v9622_v25 = vmax.f32 %v16697_v32, 0.0  ;;  %v9623_v4 = vmax.f32 %v16699_v41, 0.0 }
 0x96b   :  { %9656 = vst.msk [vmem:[%s16988_s10 + $0x78] sm:$0xff] %vm9198_vm8, %v9602_v10  ;;  %9657 = vst [vmem:[%s16988_s10 + $0x80] sm:$0xff] %v9603_v16  ;;  %v9624_v38 = vmax.f32 %v16701_v15, 0.0  ;;  %v9625_v52 = vmax.f32 %v16703_v19, 0.0  ;;  %v9626_v55 = vmax.f32 %v16705_v30, 0.0  ;;  %v9627_v36 = vmax.f32 %v16707_v20, 0.0 }
 0x96c   :  { %9658 = vst.msk [vmem:[%s16988_s10 + $0x88] sm:$0xff] %vm9198_vm8, %v9604_v37  ;;  %9659 = vst [vmem:[%s16988_s10 + $0x90] sm:$0xff] %v9605_v17  ;;  %v9628_v33 = vmax.f32 %v16709_v7, 0.0  ;;  %v9629_v39 = vmax.f32 %v16711_v57, 0.0  ;;  %v9630_v61 = vmax.f32 %v16713_v54, 0.0  ;;  %v17817_v44 = vld [vmem:[#allocation80_spill] sm:$0xff] }
 0x96d   :  { %9660 = vst.msk [vmem:[%s16988_s10 + $0x98] sm:$0xff] %vm9198_vm8, %v9606_v63  ;;  %9661 = vst [vmem:[%s16988_s10 + $0xa0] sm:$0xff] %v9607_v29  ;;  %v9631_v32 = vmax.f32 %v17817_v44, 0.0  ;;  %v17818_v41 = vld [vmem:[#allocation81_spill] sm:$0xff]  ;;  %v9633_v19 = vmax.f32 %v16719_v56, 0.0  ;;  %v9634_v30 = vmax.f32 %v16721_v48, 0.0 }
 0x96e   :  { %9662 = vst.msk [vmem:[%s16988_s10 + $0xa8] sm:$0xff] %vm9198_vm8, %v9608_v46  ;;  %9663 = vst [vmem:[%s16988_s10 + $0xb0] sm:$0xff] %v9609_v21  ;;  %v9632_v15 = vmax.f32 %v17818_v41, 0.0  ;;  %v9635_v20 = vmax.f32 %v16723_v6, 0.0  ;;  %v9636_v7 = vmax.f32 %v16725_v11, 0.0  ;;  %v9637_v57 = vmax.f32 %v16727_v35, 0.0 }
 0x96f   :  { %9664 = vst.msk [vmem:[%s16988_s10 + $0xb8] sm:$0xff] %vm9198_vm8, %v9610_v22  ;;  %9665 = vst [vmem:[%s16988_s10 + $0xc0] sm:$0xff] %v9611_v34  ;;  %v9638_v54 = vmax.f32 %v16729_v2, 0.0  ;;  %v9639_v59 = vmax.f32 %v16731_v40, 0.0  ;;  %v9640_v14 = vmax.f32 %v16733_v13, 0.0 }
 0x970   :  { %9666 = vst.msk [vmem:[%s16988_s10 + $0xc8] sm:$0xff] %vm9198_vm8, %v9612_v18  ;;  %9667 = vst [vmem:[%s16988_s10 + $0xd0] sm:$0xff] %v9613_v24 }
 0x971   :  { %9668 = vst.msk [vmem:[%s16988_s10 + $0xd8] sm:$0xff] %vm9198_vm8, %v9614_v50  ;;  %9669 = vst [vmem:[%s16988_s10 + $0xe0] sm:$0xff] %v9615_v1 }
 0x972   :  { %9670 = vst.msk [vmem:[%s16988_s10 + $0xe8] sm:$0xff] %vm9198_vm8, %v9616_v8  ;;  %9671 = vst [vmem:[%s16988_s10 + $0xf0] sm:$0xff] %v9617_v51 }
 0x973   :  { %9672 = vst.msk [vmem:[%s16988_s10 + $0xf8] sm:$0xff] %vm9198_vm8, %v9618_v0  ;;  %9673 = vst [vmem:[%s16988_s10 + $0x100] sm:$0xff] %v9619_v31 }
 0x974   :  { %9674 = vst.msk [vmem:[%s16988_s10 + $0x108] sm:$0xff] %vm9198_vm8, %v9620_v42  ;;  %9675 = vst [vmem:[%s16988_s10 + $0x110] sm:$0xff] %v9621_v45 }
 0x975   :  { %9676 = vst.msk [vmem:[%s16988_s10 + $0x118] sm:$0xff] %vm9198_vm8, %v9622_v25  ;;  %9677 = vst [vmem:[%s16988_s10 + $0x120] sm:$0xff] %v9623_v4 }
 0x976   :  { %9678 = vst.msk [vmem:[%s16988_s10 + $0x128] sm:$0xff] %vm9198_vm8, %v9624_v38  ;;  %9679 = vst [vmem:[%s16988_s10 + $0x130] sm:$0xff] %v9625_v52 }
 0x977   :  { %9680 = vst.msk [vmem:[%s16988_s10 + $0x138] sm:$0xff] %vm9198_vm8, %v9626_v55  ;;  %9681 = vst [vmem:[%s16988_s10 + $0x140] sm:$0xff] %v9627_v36 }
 0x978   :  { %9682 = vst.msk [vmem:[%s16988_s10 + $0x148] sm:$0xff] %vm9198_vm8, %v9628_v33  ;;  %9683 = vst [vmem:[%s16988_s10 + $0x150] sm:$0xff] %v9629_v39 }
 0x979   :  { %9684 = vst.msk [vmem:[%s16988_s10 + $0x158] sm:$0xff] %vm9198_vm8, %v9630_v61  ;;  %9685 = vst [vmem:[%s16988_s10 + $0x160] sm:$0xff] %v9631_v32 }
 0x97a   :  { %9686 = vst.msk [vmem:[%s16988_s10 + $0x168] sm:$0xff] %vm9198_vm8, %v9632_v15  ;;  %9687 = vst [vmem:[%s16988_s10 + $0x170] sm:$0xff] %v9633_v19 }
 0x97b   :  { %9688 = vst.msk [vmem:[%s16988_s10 + $0x178] sm:$0xff] %vm9198_vm8, %v9634_v30  ;;  %9689 = vst [vmem:[%s16988_s10 + $0x180] sm:$0xff] %v9635_v20 }
 0x97c   :  { %9690 = vst.msk [vmem:[%s16988_s10 + $0x188] sm:$0xff] %vm9198_vm8, %v9636_v7  ;;  %9691 = vst [vmem:[%s16988_s10 + $0x190] sm:$0xff] %v9637_v57 }
 0x97d   :  { %9692 = vst.msk [vmem:[%s16988_s10 + $0x198] sm:$0xff] %vm9198_vm8, %v9638_v54  ;;  %9693 = vst [vmem:[%s16988_s10 + $0x1a0] sm:$0xff] %v9639_v59 }
 0x97e   :  { %9694 = vst.msk [vmem:[%s16988_s10 + $0x1a8] sm:$0xff] %vm9198_vm8, %v9640_v14 }

</bundles_post_ra>
